<compile_context>
chip_gen: v6e
topology: v6e:2x2x1
jax: 0.10.0
libtpu: 0.0.40
codegen_flags: <defaults>
</compile_context>

<pallas_src>
import functools
import math

import jax
import jax.numpy as jnp
import numpy as np
from jax.experimental import pallas as pl
from jax.experimental.pallas import tpu as pltpu


def clip_layer_kernel(x_ref,
                      ln1_w_ref, ln1_b_ref,
                      wq_ref, bq_ref, wkv_ref, bkv_ref,
                      wo_ref, bo_ref,
                      ln2_w_ref, ln2_b_ref,
                      w1_ref, b1_ref, w2_ref, b2_ref,
                      out_ref,
                      kh_scr, vh_scr, qh_scr, ctx_scr,
                      *, heads, head_group, batched_heads, act="quick_gelu", eps=1e-5):
    f32 = jnp.float32
    cdt = wq_ref.dtype                  # MXU operand dtype (bf16 model -> bf16 matmuls, f32 acc)

    S = x_ref.shape[1]                  # full sequence length (K/V)
    TS = out_ref.shape[1]               # query tile handled by this grid step
    D = x_ref.shape[2]
    dh = D // heads
    scale = 1.0 / math.sqrt(dh)
    s_idx = pl.program_id(1)

    def layer_norm(v, w_ref, b_ref):    # v: (rows, D) in f32
        mu = jnp.mean(v, axis=-1, keepdims=True)
        var = jnp.mean(jnp.square(v - mu), axis=-1, keepdims=True)
        return (v - mu) * jax.lax.rsqrt(var + eps) * w_ref[0].astype(f32) + b_ref[0].astype(f32)

    # ---- once per batch element: full-sequence LN1 + fused K/V projection into VMEM scratch ----
    @pl.when(s_idx == 0)
    def _():
        h1_full_c = layer_norm(x_ref[0].astype(f32), ln1_w_ref, ln1_b_ref).astype(cdt)
        kv = (jnp.dot(h1_full_c, wkv_ref[...], preferred_element_type=f32)
              + bkv_ref[0].astype(f32))                         # (S, 2D) f32
        if batched_heads:
            kh_scr[...] = pltpu.einshape("shd->hsd", kv[:, :D].reshape(S, heads, dh)).astype(cdt)
            vh_scr[...] = pltpu.einshape("shd->hsd", kv[:, D:].reshape(S, heads, dh)).astype(cdt)
        else:
            for h in range(heads):                              # portability fallback layout
                kh_scr[h] = kv[:, h * dh:(h + 1) * dh].astype(cdt)
                vh_scr[h] = kv[:, D + h * dh:D + (h + 1) * dh].astype(cdt)

    # ---- per sequence-tile ----
    if TS == S:
        x_tile = x_ref[0].astype(f32)
    else:
        row0 = pl.multiple_of(s_idx * TS, TS)
        x_tile = x_ref[0, pl.ds(row0, TS), :].astype(f32)       # (TS, D)
    h1_tile_c = layer_norm(x_tile, ln1_w_ref, ln1_b_ref).astype(cdt)

    # query projection only for this tile; fold 1/sqrt(dh) into q once
    q = (jnp.dot(h1_tile_c, wq_ref[...], preferred_element_type=f32)
         + bq_ref[0].astype(f32)) * scale                       # (TS, D) f32

    if batched_heads:
        qh = pltpu.einshape("shd->hsd", q.reshape(TS, heads, dh)).astype(cdt)   # (heads, TS, dh)
        if head_group >= heads:
            # single-shot batched-head attention
            sc = jnp.einsum("hqd,hkd->hqk", qh, kh_scr[...], preferred_element_type=f32)
            m = jnp.max(sc, axis=-1, keepdims=True)
            p = jnp.exp(sc - m)
            p = p * pl.reciprocal(jnp.sum(p, axis=-1, keepdims=True), approx=True)
            ctx = jnp.einsum("hqk,hkd->hqd", p.astype(cdt), vh_scr[...],
                             preferred_element_type=f32)
            attn = pltpu.einshape("hsd->shd", ctx).reshape(TS, D)
        else:
            # head-group blocked attention: bounds live f32 scores to (hg, TS, S)
            hg = head_group
            qh_scr[...] = qh

            def attend_group(g, carry):
                g0 = pl.multiple_of(g * hg, hg)
                qg = qh_scr[pl.ds(g0, hg)]
                kg = kh_scr[pl.ds(g0, hg)]
                vg = vh_scr[pl.ds(g0, hg)]
                sc = jnp.einsum("hqd,hkd->hqk", qg, kg, preferred_element_type=f32)
                m = jnp.max(sc, axis=-1, keepdims=True)
                p = jnp.exp(sc - m)
                p = p * pl.reciprocal(jnp.sum(p, axis=-1, keepdims=True), approx=True)
                ctx_scr[pl.ds(g0, hg)] = jnp.einsum("hqk,hkd->hqd", p.astype(cdt), vg,
                                                    preferred_element_type=f32)
                return carry

            jax.lax.fori_loop(0, heads // hg, attend_group, 0)
            attn = pltpu.einshape("hsd->shd", ctx_scr[...]).reshape(TS, D)
    else:
        # Portability fallback (per-head loop) for lowerings without batched einsum / einshape.
        outs = []
        for h in range(heads):
            qh_ = q[:, h * dh:(h + 1) * dh].astype(cdt)
            kh_ = kh_scr[h]
            vh_ = vh_scr[h]
            sc = jnp.dot(qh_, kh_.T, preferred_element_type=f32)
            m = jnp.max(sc, axis=-1, keepdims=True)
            p = jnp.exp(sc - m)
            p = p * pl.reciprocal(jnp.sum(p, axis=-1, keepdims=True), approx=True)
            outs.append(jnp.dot(p.astype(cdt), vh_, preferred_element_type=f32))
        attn = jnp.concatenate(outs, axis=-1)

    attn = (jnp.dot(attn.astype(cdt), wo_ref[...], preferred_element_type=f32)
            + bo_ref[0].astype(f32))
    x1 = x_tile + attn                                          # first residual

    # ---- MLP branch (pre-LN) ----
    h2 = layer_norm(x1, ln2_w_ref, ln2_b_ref).astype(cdt)
    a = jnp.dot(h2, w1_ref[...], preferred_element_type=f32) + b1_ref[0].astype(f32)
    if act == "quick_gelu":
        a = a * jax.nn.sigmoid(1.702 * a)                       # quick_gelu (sigmoid -> EUP)
    else:
        a = jax.nn.gelu(a, approximate=False)                   # torch F.gelu (erf)
    mlp = jnp.dot(a.astype(cdt), w2_ref[...], preferred_element_type=f32) + b2_ref[0].astype(f32)

    out_ref[0] = (x1 + mlp).astype(out_ref.dtype)               # second residual


_PARAM_ORDER = ("ln1_w", "ln1_b",
                "wq", "bq", "wkv", "bkv", "wo", "bo",
                "ln2_w", "ln2_b",
                "w1", "b1", "w2", "b2")


def _vmem_capacity_bytes():
    try:
        cap = getattr(pltpu.get_tpu_info(), "vmem_capacity_bytes", None)
        if cap:
            return int(cap)
    except Exception:
        pass
    return 64 << 20            # conservative fallback (v7x per-TC VMEM)


def _build_call(x, params, heads, seq_tile, head_group, batched_heads, single_buffer, act, eps):
    B, S, D = x.shape
    I = params["w1"].shape[1]
    dh = D // heads
    n_s = S // seq_tile
    cdt = params["wq"].dtype

    kparams = {
        "ln1_w": params["ln1_w"], "ln1_b": params["ln1_b"],
        "wq": params["wq"], "bq": params["bq"],
        "wkv": jnp.concatenate([params["wk"], params["wv"]], axis=1),   # (D, 2D) fused K/V
        "bkv": jnp.concatenate([params["bk"], params["bv"]], axis=1),   # (1, 2D)
        "wo": params["wo"], "bo": params["bo"],
        "ln2_w": params["ln2_w"], "ln2_b": params["ln2_b"],
        "w1": params["w1"], "b1": params["b1"],
        "w2": params["w2"], "b2": params["b2"],
    }

    in_specs = [pl.BlockSpec((1, S, D), lambda b, s: (b, 0, 0))]   # full sequence (for K/V)
    args = [x]
    for name in _PARAM_ORDER:
        p = kparams[name]
        idx_map = (lambda b, s, _nd=p.ndim: (0,) * _nd)
        if single_buffer:
            # grid-invariant parameters: a second pipeline buffer is never used
            spec = pl.BlockSpec(p.shape, idx_map, pipeline_mode=pl.Buffered(1))
        else:
            spec = pl.BlockSpec(p.shape, idx_map)
        in_specs.append(spec)
        args.append(p)
    out_specs = pl.BlockSpec((1, seq_tile, D), lambda b, s: (b, s, 0))

    scratch_shapes = [
        pltpu.VMEM((heads, S, dh), cdt),                 # K, head-batched, compute dtype
        pltpu.VMEM((heads, S, dh), cdt),                 # V
        pltpu.VMEM((heads, seq_tile, dh), cdt),          # Q (head-group path)
        pltpu.VMEM((heads, seq_tile, dh), jnp.float32),  # ctx accumulator (head-group path)
    ]

    # ---- VMEM budget clamped to the chip ----
    itemsize = x.dtype.itemsize
    c_item = jnp.dtype(cdt).itemsize
    weight_bytes = sum(int(np.prod(kparams[n].shape)) * jnp.dtype(kparams[n].dtype).itemsize
                       for n in _PARAM_ORDER)
    wbuf = weight_bytes * (1 if single_buffer else 2)
    io_bytes = 2 * (S * D + seq_tile * D) * itemsize
    scr_bytes = 2 * heads * S * dh * c_item + heads * seq_tile * dh * (4 + c_item)
    act_bytes = 4 * (4 * S * D + 3 * head_group * seq_tile * S
                     + 2 * seq_tile * I + 8 * seq_tile * D)
    cap = _vmem_capacity_bytes() - (8 << 20)                      # headroom
    vmem_limit = int(min(cap, max(32 << 20,
                                  wbuf + io_bytes + scr_bytes + act_bytes + (4 << 20))))

    cost = pl.CostEstimate(
        flops=int(2 * B * S * D * (4 * D + 2 * I) + 4 * B * S * S * D),
        transcendentals=int(B * (heads * S * S + S * I + heads * S + 2 * S)),
        bytes_accessed=int(2 * B * S * D * itemsize + weight_bytes),
    )

    kernel = functools.partial(clip_layer_kernel, heads=heads, head_group=head_group,
                               batched_heads=batched_heads, act=act, eps=eps)
    call = pl.pallas_call(
        kernel,
        out_shape=jax.ShapeDtypeStruct((B, S, D), x.dtype),
        grid=(B, n_s),
        in_specs=in_specs,
        out_specs=out_specs,
        scratch_shapes=scratch_shapes,
        compiler_params=pltpu.CompilerParams(
            # batch parallel (megacore), seq-tile arbitrary (scratch K/V carry across s)
            dimension_semantics=("parallel", "arbitrary"),
            vmem_limit_bytes=vmem_limit),
        cost_estimate=cost,
    )
    return call, args


def clip_layer(x, params, heads, *, seq_tile=None, head_group=None, batched_heads=None,
               act="quick_gelu", eps=1e-5):
    B, S, D = x.shape
    assert D % heads == 0

    if seq_tile is None:
        seq_tile = S
        if S > 128:                                   # prefer lane/MXU-friendly 128-multiples
            for t in (512, 384, 256, 128):
                if S % t == 0:
                    seq_tile = t
                    break
    assert S % seq_tile == 0 and (seq_tile == S or seq_tile % 8 == 0)

    if head_group is None:
        head_group = heads
        budget = 12 << 20                             # bound live f32 score intermediates
        while (head_group > 1 and 3 * head_group * seq_tile * S * 4 > budget
               and heads % max(head_group // 2, 1) == 0):
            head_group //= 2
    assert heads % head_group == 0

    bh_opts = (True, False) if batched_heads is None else (bool(batched_heads),)
    errs = []
    for bh in bh_opts:
        for sb in (True, False):
            try:
                call, args = _build_call(x, params, heads, seq_tile, head_group, bh, sb, act, eps)
                return call(*args)
            except Exception as e:                    # fall back; genuine errors fail every config
                errs.append(e)
    raise errs[0]


def make_params(key, D, I, dtype=jnp.float32):
    ks = jax.random.split(key, 6)
    std = 0.02

    def lin(k, fan_in, fan_out):
        kw, kb = jax.random.split(k)
        w = jax.random.normal(kw, (fan_in, fan_out), dtype) * std   # already (in, out)
        b = jax.random.normal(kb, (1, fan_out), dtype) * std
        return w, b

    wq, bq = lin(ks[0], D, D)
    wk, bk = lin(ks[1], D, D)
    wv, bv = lin(ks[2], D, D)
    wo, bo = lin(ks[3], D, D)
    w1, b1 = lin(ks[4], D, I)
    w2, b2 = lin(ks[5], I, D)
    return {
        "ln1_w": jnp.ones((1, D), dtype), "ln1_b": jnp.zeros((1, D), dtype),
        "wq": wq, "bq": bq, "wk": wk, "bk": bk, "wv": wv, "bv": bv,
        "wo": wo, "bo": bo,
        "ln2_w": jnp.ones((1, D), dtype), "ln2_b": jnp.zeros((1, D), dtype),
        "w1": w1, "b1": b1, "w2": w2, "b2": b2,
    }


def clip_layer_ref(x, p, heads, eps=1e-5):
    def ln(v, w, b):
        mu = v.mean(-1, keepdims=True)
        var = ((v - mu) ** 2).mean(-1, keepdims=True)
        return (v - mu) / jnp.sqrt(var + eps) * w[0] + b[0]

    B, S, D = x.shape
    dh = D // heads
    h1 = ln(x, p["ln1_w"], p["ln1_b"])
    q = h1 @ p["wq"] + p["bq"][0]
    k = h1 @ p["wk"] + p["bk"][0]
    v = h1 @ p["wv"] + p["bv"][0]
    qh = q.reshape(B, S, heads, dh).transpose(0, 2, 1, 3)
    kh = k.reshape(B, S, heads, dh).transpose(0, 2, 1, 3)
    vh = v.reshape(B, S, heads, dh).transpose(0, 2, 1, 3)
    s = jnp.einsum("bhqd,bhkd->bhqk", qh, kh) / math.sqrt(dh)
    a = jax.nn.softmax(s, axis=-1)
    o = jnp.einsum("bhqk,bhkd->bhqd", a, vh).transpose(0, 2, 1, 3).reshape(B, S, D)
    x1 = x + (o @ p["wo"] + p["bo"][0])
    h2 = ln(x1, p["ln2_w"], p["ln2_b"])
    m = h2 @ p["w1"] + p["b1"][0]
    m = m * jax.nn.sigmoid(1.702 * m)
    return x1 + (m @ p["w2"] + p["b2"][0])


if __name__ == "__main__":
    B, S, D, H, I = 2, 16, 64, 4, 128   # batch, seq, embed_dim, heads, intermediate_size
    key = jax.random.PRNGKey(0)
    kx, kp = jax.random.split(key)
    x = jax.random.normal(kx, (B, S, D), jnp.float32)
    params = make_params(kp, D, I, jnp.float32)
    ref = clip_layer_ref(x, params, heads=H)

    # f32, single sequence tile per batch element (grid = (B, 1))
    out = jax.block_until_ready(clip_layer(x, params, heads=H))
    np.testing.assert_allclose(np.asarray(out), np.asarray(ref), rtol=2e-3, atol=2e-3)

    # f32, two sequence tiles (grid = (B, 2)) -> exercises the scratch K/V carry across s
    out_t = jax.block_until_ready(clip_layer(x, params, heads=H, seq_tile=8))
    np.testing.assert_allclose(np.asarray(out_t), np.asarray(ref), rtol=2e-3, atol=2e-3)

    # f32, head-group-blocked attention (2 heads per group) -> exercises the fori_loop path
    out_g = jax.block_until_ready(clip_layer(x, params, heads=H, seq_tile=8, head_group=2))
    np.testing.assert_allclose(np.asarray(out_g), np.asarray(ref), rtol=2e-3, atol=2e-3)

    # bf16 weights/activations: bf16 MXU operands with f32 accumulation inside the kernel
    xb = x.astype(jnp.bfloat16)
    pb = {name: val.astype(jnp.bfloat16) for name, val in params.items()}
    out_b = jax.block_until_ready(clip_layer(xb, pb, heads=H, seq_tile=8))
    ref_b = clip_layer_ref(xb.astype(jnp.float32),
                           {name: val.astype(jnp.float32) for name, val in pb.items()},
                           heads=H)
    np.testing.assert_allclose(np.asarray(out_b.astype(jnp.float32)), np.asarray(ref_b),
                               rtol=5e-2, atol=5e-2)

    print("KERNEL_OK")
</pallas_src>

<mosaic_0001>
module attributes {stable_mosaic.version = 11 : i64} {
  func.func @clip_layer_kernel(%arg0: i32, %arg1: i32, %arg2: memref<1x16x64xf32, #tpu.memory_space<vmem>>, %arg3: memref<1x64xf32, #tpu.memory_space<vmem>>, %arg4: memref<1x64xf32, #tpu.memory_space<vmem>>, %arg5: memref<64x64xf32, #tpu.memory_space<vmem>>, %arg6: memref<1x64xf32, #tpu.memory_space<vmem>>, %arg7: memref<64x128xf32, #tpu.memory_space<vmem>>, %arg8: memref<1x128xf32, #tpu.memory_space<vmem>>, %arg9: memref<64x64xf32, #tpu.memory_space<vmem>>, %arg10: memref<1x64xf32, #tpu.memory_space<vmem>>, %arg11: memref<1x64xf32, #tpu.memory_space<vmem>>, %arg12: memref<1x64xf32, #tpu.memory_space<vmem>>, %arg13: memref<64x128xf32, #tpu.memory_space<vmem>>, %arg14: memref<1x128xf32, #tpu.memory_space<vmem>>, %arg15: memref<128x64xf32, #tpu.memory_space<vmem>>, %arg16: memref<1x64xf32, #tpu.memory_space<vmem>>, %arg17: memref<1x16x64xf32, #tpu.memory_space<vmem>>, %arg18: memref<4x16x16xf32, #tpu.memory_space<vmem>>, %arg19: memref<4x16x16xf32, #tpu.memory_space<vmem>>, %arg20: memref<4x16x16xf32, #tpu.memory_space<vmem>>, %arg21: memref<4x16x16xf32, #tpu.memory_space<vmem>>) attributes {dimension_semantics = [#tpu.dimension_semantics<parallel>, #tpu.dimension_semantics<arbitrary>], iteration_bounds = array<i64: 2, 1>, scalar_prefetch = 0 : i64, scratch_operands = 4 : i64, tpu.core_type = #tpu.core_type<tc>, window_params = [{transform_indices = @transform_0, window_bounds = array<i64: 1, 16, 64>}, {pipeline_mode = #tpu.pipeline_mode<synchronous>, transform_indices = @transform_1, window_bounds = array<i64: 1, 64>}, {pipeline_mode = #tpu.pipeline_mode<synchronous>, transform_indices = @transform_2, window_bounds = array<i64: 1, 64>}, {pipeline_mode = #tpu.pipeline_mode<synchronous>, transform_indices = @transform_3, window_bounds = array<i64: 64, 64>}, {pipeline_mode = #tpu.pipeline_mode<synchronous>, transform_indices = @transform_4, window_bounds = array<i64: 1, 64>}, {pipeline_mode = #tpu.pipeline_mode<synchronous>, transform_indices = @transform_5, window_bounds = array<i64: 64, 128>}, {pipeline_mode = #tpu.pipeline_mode<synchronous>, transform_indices = @transform_6, window_bounds = array<i64: 1, 128>}, {pipeline_mode = #tpu.pipeline_mode<synchronous>, transform_indices = @transform_7, window_bounds = array<i64: 64, 64>}, {pipeline_mode = #tpu.pipeline_mode<synchronous>, transform_indices = @transform_8, window_bounds = array<i64: 1, 64>}, {pipeline_mode = #tpu.pipeline_mode<synchronous>, transform_indices = @transform_9, window_bounds = array<i64: 1, 64>}, {pipeline_mode = #tpu.pipeline_mode<synchronous>, transform_indices = @transform_10, window_bounds = array<i64: 1, 64>}, {pipeline_mode = #tpu.pipeline_mode<synchronous>, transform_indices = @transform_11, window_bounds = array<i64: 64, 128>}, {pipeline_mode = #tpu.pipeline_mode<synchronous>, transform_indices = @transform_12, window_bounds = array<i64: 1, 128>}, {pipeline_mode = #tpu.pipeline_mode<synchronous>, transform_indices = @transform_13, window_bounds = array<i64: 128, 64>}, {pipeline_mode = #tpu.pipeline_mode<synchronous>, transform_indices = @transform_14, window_bounds = array<i64: 1, 64>}, {transform_indices = @transform_15, window_bounds = array<i64: 1, 16, 64>}]} {
    %c0_i32 = arith.constant 0 : i32
    %0 = arith.cmpi eq, %arg1, %c0_i32 : i32
    %1 = arith.extui %0 : i1 to i32
    %c0_i32_0 = arith.constant 0 : i32
    %2 = arith.cmpi ne, %1, %c0_i32_0 : i32
    scf.if %2 {
      %c0_56 = arith.constant 0 : index
      %c0_57 = arith.constant 0 : index
      %c0_58 = arith.constant 0 : index
      %122 = vector.load %arg2[%c0_56, %c0_57, %c0_58] : memref<1x16x64xf32, #tpu.memory_space<vmem>>, vector<1x16x64xf32>
      %123 = vector.shape_cast %122 : vector<1x16x64xf32> to vector<16x64xf32>
      %cst_59 = arith.constant dense<0.000000e+00> : vector<16xf32>
      %124 = vector.multi_reduction <add>, %123, %cst_59 [1] : vector<16x64xf32> to vector<16xf32>
      %125 = vector.shape_cast %124 : vector<16xf32> to vector<16x1xf32>
      %cst_60 = arith.constant 6.400000e+01 : f32
      %126 = vector.broadcast %cst_60 : f32 to vector<16x1xf32>
      %127 = arith.divf %125, %126 : vector<16x1xf32>
      %128 = vector.broadcast %127 : vector<16x1xf32> to vector<16x64xf32>
      %129 = arith.subf %123, %128 : vector<16x64xf32>
      %130 = arith.mulf %129, %129 : vector<16x64xf32>
      %cst_61 = arith.constant dense<0.000000e+00> : vector<16xf32>
      %131 = vector.multi_reduction <add>, %130, %cst_61 [1] : vector<16x64xf32> to vector<16xf32>
      %132 = vector.shape_cast %131 : vector<16xf32> to vector<16x1xf32>
      %cst_62 = arith.constant 6.400000e+01 : f32
      %133 = vector.broadcast %cst_62 : f32 to vector<16x1xf32>
      %134 = arith.divf %132, %133 : vector<16x1xf32>
      %135 = vector.broadcast %127 : vector<16x1xf32> to vector<16x64xf32>
      %136 = arith.subf %123, %135 : vector<16x64xf32>
      %cst_63 = arith.constant 9.99999974E-6 : f32
      %137 = vector.broadcast %cst_63 : f32 to vector<16x1xf32>
      %138 = arith.addf %134, %137 : vector<16x1xf32>
      %139 = math.rsqrt %138 : vector<16x1xf32>
      %140 = vector.broadcast %139 : vector<16x1xf32> to vector<16x64xf32>
      %141 = arith.mulf %136, %140 : vector<16x64xf32>
      %c0_64 = arith.constant 0 : index
      %c0_65 = arith.constant 0 : index
      %142 = vector.load %arg3[%c0_64, %c0_65] : memref<1x64xf32, #tpu.memory_space<vmem>>, vector<1x64xf32>
      %143 = vector.shape_cast %142 : vector<1x64xf32> to vector<64xf32>
      %144 = vector.shape_cast %143 : vector<64xf32> to vector<1x64xf32>
      %145 = vector.broadcast %144 : vector<1x64xf32> to vector<16x64xf32>
      %146 = arith.mulf %141, %145 : vector<16x64xf32>
      %c0_66 = arith.constant 0 : index
      %c0_67 = arith.constant 0 : index
      %147 = vector.load %arg4[%c0_66, %c0_67] : memref<1x64xf32, #tpu.memory_space<vmem>>, vector<1x64xf32>
      %148 = vector.shape_cast %147 : vector<1x64xf32> to vector<64xf32>
      %149 = vector.shape_cast %148 : vector<64xf32> to vector<1x64xf32>
      %150 = vector.broadcast %149 : vector<1x64xf32> to vector<16x64xf32>
      %151 = arith.addf %146, %150 : vector<16x64xf32>
      %c0_68 = arith.constant 0 : index
      %c0_69 = arith.constant 0 : index
      %152 = vector.load %arg7[%c0_68, %c0_69] : memref<64x128xf32, #tpu.memory_space<vmem>>, vector<64x128xf32>
      %cst_70 = arith.constant dense<0.000000e+00> : vector<16x128xf32>
      %153 = tpu.matmul %151, %152, %cst_70 {dimension_numbers = #tpu.dot_dimension_numbers<[1], [0], [0], [1], [0, 0, 1, 1], [], []>} : vector<16x64xf32>, vector<64x128xf32>, vector<16x128xf32> -> vector<16x128xf32>
      %c0_71 = arith.constant 0 : index
      %c0_72 = arith.constant 0 : index
      %154 = vector.load %arg8[%c0_71, %c0_72] : memref<1x128xf32, #tpu.memory_space<vmem>>, vector<1x128xf32>
      %155 = vector.shape_cast %154 : vector<1x128xf32> to vector<128xf32>
      %156 = vector.shape_cast %155 : vector<128xf32> to vector<1x128xf32>
      %157 = vector.broadcast %156 : vector<1x128xf32> to vector<16x128xf32>
      %158 = arith.addf %153, %157 : vector<16x128xf32>
      %159 = vector.extract_strided_slice %158 {offsets = [0, 0], sizes = [16, 64], strides = [1, 1]} : vector<16x128xf32> to vector<16x64xf32>
      %160 = vector.shape_cast %159 : vector<16x64xf32> to vector<16x4x16xf32>
      %161 = tpu.transpose %160, [1, 0, 2] : vector<16x4x16xf32> -> vector<4x16x16xf32>
      %c0_73 = arith.constant 0 : index
      %c0_74 = arith.constant 0 : index
      %c0_75 = arith.constant 0 : index
      %162 = vector.load %arg18[%c0_73, %c0_74, %c0_75] : memref<4x16x16xf32, #tpu.memory_space<vmem>>, vector<4x16x16xf32>
      tpu.vector_store %arg18[%c0_73, %c0_74, %c0_75], %161 {strides = array<i32>} : memref<4x16x16xf32, #tpu.memory_space<vmem>>, vector<4x16x16xf32>,
      %163 = vector.extract_strided_slice %158 {offsets = [0, 64], sizes = [16, 64], strides = [1, 1]} : vector<16x128xf32> to vector<16x64xf32>
      %164 = vector.shape_cast %163 : vector<16x64xf32> to vector<16x4x16xf32>
      %165 = tpu.transpose %164, [1, 0, 2] : vector<16x4x16xf32> -> vector<4x16x16xf32>
      %c0_76 = arith.constant 0 : index
      %c0_77 = arith.constant 0 : index
      %c0_78 = arith.constant 0 : index
      %166 = vector.load %arg19[%c0_76, %c0_77, %c0_78] : memref<4x16x16xf32, #tpu.memory_space<vmem>>, vector<4x16x16xf32>
      tpu.vector_store %arg19[%c0_76, %c0_77, %c0_78], %165 {strides = array<i32>} : memref<4x16x16xf32, #tpu.memory_space<vmem>>, vector<4x16x16xf32>,
    } else {
    }
    %c0 = arith.constant 0 : index
    %c0_1 = arith.constant 0 : index
    %c0_2 = arith.constant 0 : index
    %3 = vector.load %arg2[%c0, %c0_1, %c0_2] : memref<1x16x64xf32, #tpu.memory_space<vmem>>, vector<1x16x64xf32>
    %4 = vector.shape_cast %3 : vector<1x16x64xf32> to vector<16x64xf32>
    %cst = arith.constant dense<0.000000e+00> : vector<16xf32>
    %5 = vector.multi_reduction <add>, %4, %cst [1] : vector<16x64xf32> to vector<16xf32>
    %6 = vector.shape_cast %5 : vector<16xf32> to vector<16x1xf32>
    %cst_3 = arith.constant 6.400000e+01 : f32
    %7 = vector.broadcast %cst_3 : f32 to vector<16x1xf32>
    %8 = arith.divf %6, %7 : vector<16x1xf32>
    %9 = vector.broadcast %8 : vector<16x1xf32> to vector<16x64xf32>
    %10 = arith.subf %4, %9 : vector<16x64xf32>
    %11 = arith.mulf %10, %10 : vector<16x64xf32>
    %cst_4 = arith.constant dense<0.000000e+00> : vector<16xf32>
    %12 = vector.multi_reduction <add>, %11, %cst_4 [1] : vector<16x64xf32> to vector<16xf32>
    %13 = vector.shape_cast %12 : vector<16xf32> to vector<16x1xf32>
    %cst_5 = arith.constant 6.400000e+01 : f32
    %14 = vector.broadcast %cst_5 : f32 to vector<16x1xf32>
    %15 = arith.divf %13, %14 : vector<16x1xf32>
    %16 = vector.broadcast %8 : vector<16x1xf32> to vector<16x64xf32>
    %17 = arith.subf %4, %16 : vector<16x64xf32>
    %cst_6 = arith.constant 9.99999974E-6 : f32
    %18 = vector.broadcast %cst_6 : f32 to vector<16x1xf32>
    %19 = arith.addf %15, %18 : vector<16x1xf32>
    %20 = math.rsqrt %19 : vector<16x1xf32>
    %21 = vector.broadcast %20 : vector<16x1xf32> to vector<16x64xf32>
    %22 = arith.mulf %17, %21 : vector<16x64xf32>
    %c0_7 = arith.constant 0 : index
    %c0_8 = arith.constant 0 : index
    %23 = vector.load %arg3[%c0_7, %c0_8] : memref<1x64xf32, #tpu.memory_space<vmem>>, vector<1x64xf32>
    %24 = vector.shape_cast %23 : vector<1x64xf32> to vector<64xf32>
    %25 = vector.shape_cast %24 : vector<64xf32> to vector<1x64xf32>
    %26 = vector.broadcast %25 : vector<1x64xf32> to vector<16x64xf32>
    %27 = arith.mulf %22, %26 : vector<16x64xf32>
    %c0_9 = arith.constant 0 : index
    %c0_10 = arith.constant 0 : index
    %28 = vector.load %arg4[%c0_9, %c0_10] : memref<1x64xf32, #tpu.memory_space<vmem>>, vector<1x64xf32>
    %29 = vector.shape_cast %28 : vector<1x64xf32> to vector<64xf32>
    %30 = vector.shape_cast %29 : vector<64xf32> to vector<1x64xf32>
    %31 = vector.broadcast %30 : vector<1x64xf32> to vector<16x64xf32>
    %32 = arith.addf %27, %31 : vector<16x64xf32>
    %c0_11 = arith.constant 0 : index
    %c0_12 = arith.constant 0 : index
    %33 = vector.load %arg5[%c0_11, %c0_12] : memref<64x64xf32, #tpu.memory_space<vmem>>, vector<64x64xf32>
    %cst_13 = arith.constant dense<0.000000e+00> : vector<16x64xf32>
    %34 = tpu.matmul %32, %33, %cst_13 {dimension_numbers = #tpu.dot_dimension_numbers<[1], [0], [0], [1], [0, 0, 1, 1], [], []>} : vector<16x64xf32>, vector<64x64xf32>, vector<16x64xf32> -> vector<16x64xf32>
    %c0_14 = arith.constant 0 : index
    %c0_15 = arith.constant 0 : index
    %35 = vector.load %arg6[%c0_14, %c0_15] : memref<1x64xf32, #tpu.memory_space<vmem>>, vector<1x64xf32>
    %36 = vector.shape_cast %35 : vector<1x64xf32> to vector<64xf32>
    %37 = vector.shape_cast %36 : vector<64xf32> to vector<1x64xf32>
    %38 = vector.broadcast %37 : vector<1x64xf32> to vector<16x64xf32>
    %39 = arith.addf %34, %38 : vector<16x64xf32>
    %cst_16 = arith.constant 2.500000e-01 : f32
    %40 = vector.broadcast %cst_16 : f32 to vector<16x64xf32>
    %41 = arith.mulf %39, %40 : vector<16x64xf32>
    %42 = vector.shape_cast %41 : vector<16x64xf32> to vector<16x4x16xf32>
    %43 = tpu.transpose %42, [1, 0, 2] : vector<16x4x16xf32> -> vector<4x16x16xf32>
    %c0_17 = arith.constant 0 : index
    %c0_18 = arith.constant 0 : index
    %c0_19 = arith.constant 0 : index
    %44 = vector.load %arg18[%c0_17, %c0_18, %c0_19] : memref<4x16x16xf32, #tpu.memory_space<vmem>>, vector<4x16x16xf32>
    "tpu.trace_start"() <{level = 10 : i32, message = "hqd,hkd->hqk"}> : () -> ()
    %cst_20 = arith.constant dense<0.000000e+00> : vector<4x16x16xf32>
    %45 = tpu.matmul %43, %44, %cst_20 {dimension_numbers = #tpu.dot_dimension_numbers<[2], [2], [1], [1], [0, 0, 0, 1, 1, 1], [0], [0]>} : vector<4x16x16xf32>, vector<4x16x16xf32>, vector<4x16x16xf32> -> vector<4x16x16xf32>
    "tpu.trace_stop"() : () -> ()
    %cst_21 = arith.constant dense<0xFF800000> : vector<4x16xf32>
    %46 = vector.multi_reduction <maximumf>, %45, %cst_21 [2] : vector<4x16x16xf32> to vector<4x16xf32>
    %47 = vector.shape_cast %46 : vector<4x16xf32> to vector<4x16x1xf32>
    %48 = vector.broadcast %47 : vector<4x16x1xf32> to vector<4x16x16xf32>
    %49 = arith.subf %45, %48 : vector<4x16x16xf32>
    %50 = math.exp %49 : vector<4x16x16xf32>
    %cst_22 = arith.constant dense<0.000000e+00> : vector<4x16xf32>
    %51 = vector.multi_reduction <add>, %50, %cst_22 [2] : vector<4x16x16xf32> to vector<4x16xf32>
    %52 = vector.shape_cast %51 : vector<4x16xf32> to vector<4x16x1xf32>
    %53 = tpu.reciprocal %52 {approx = true} : vector<4x16x1xf32> -> vector<4x16x1xf32>
    %54 = vector.broadcast %53 : vector<4x16x1xf32> to vector<4x16x16xf32>
    %55 = arith.mulf %50, %54 : vector<4x16x16xf32>
    %c0_23 = arith.constant 0 : index
    %c0_24 = arith.constant 0 : index
    %c0_25 = arith.constant 0 : index
    %56 = vector.load %arg19[%c0_23, %c0_24, %c0_25] : memref<4x16x16xf32, #tpu.memory_space<vmem>>, vector<4x16x16xf32>
    "tpu.trace_start"() <{level = 10 : i32, message = "hqk,hkd->hqd"}> : () -> ()
    %cst_26 = arith.constant dense<0.000000e+00> : vector<4x16x16xf32>
    %57 = tpu.matmul %55, %56, %cst_26 {dimension_numbers = #tpu.dot_dimension_numbers<[2], [1], [1], [2], [0, 0, 0, 1, 1, 2], [0], [0]>} : vector<4x16x16xf32>, vector<4x16x16xf32>, vector<4x16x16xf32> -> vector<4x16x16xf32>
    "tpu.trace_stop"() : () -> ()
    %58 = tpu.transpose %57, [1, 0, 2] : vector<4x16x16xf32> -> vector<16x4x16xf32>
    %59 = vector.shape_cast %58 : vector<16x4x16xf32> to vector<16x64xf32>
    %c0_27 = arith.constant 0 : index
    %c0_28 = arith.constant 0 : index
    %60 = vector.load %arg9[%c0_27, %c0_28] : memref<64x64xf32, #tpu.memory_space<vmem>>, vector<64x64xf32>
    %cst_29 = arith.constant dense<0.000000e+00> : vector<16x64xf32>
    %61 = tpu.matmul %59, %60, %cst_29 {dimension_numbers = #tpu.dot_dimension_numbers<[1], [0], [0], [1], [0, 0, 1, 1], [], []>} : vector<16x64xf32>, vector<64x64xf32>, vector<16x64xf32> -> vector<16x64xf32>
    %c0_30 = arith.constant 0 : index
    %c0_31 = arith.constant 0 : index
    %62 = vector.load %arg10[%c0_30, %c0_31] : memref<1x64xf32, #tpu.memory_space<vmem>>, vector<1x64xf32>
    %63 = vector.shape_cast %62 : vector<1x64xf32> to vector<64xf32>
    %64 = vector.shape_cast %63 : vector<64xf32> to vector<1x64xf32>
    %65 = vector.broadcast %64 : vector<1x64xf32> to vector<16x64xf32>
    %66 = arith.addf %61, %65 : vector<16x64xf32>
    %67 = arith.addf %4, %66 : vector<16x64xf32>
    %cst_32 = arith.constant dense<0.000000e+00> : vector<16xf32>
    %68 = vector.multi_reduction <add>, %67, %cst_32 [1] : vector<16x64xf32> to vector<16xf32>
    %69 = vector.shape_cast %68 : vector<16xf32> to vector<16x1xf32>
    %cst_33 = arith.constant 6.400000e+01 : f32
    %70 = vector.broadcast %cst_33 : f32 to vector<16x1xf32>
    %71 = arith.divf %69, %70 : vector<16x1xf32>
    %72 = vector.broadcast %71 : vector<16x1xf32> to vector<16x64xf32>
    %73 = arith.subf %67, %72 : vector<16x64xf32>
    %74 = arith.mulf %73, %73 : vector<16x64xf32>
    %cst_34 = arith.constant dense<0.000000e+00> : vector<16xf32>
    %75 = vector.multi_reduction <add>, %74, %cst_34 [1] : vector<16x64xf32> to vector<16xf32>
    %76 = vector.shape_cast %75 : vector<16xf32> to vector<16x1xf32>
    %cst_35 = arith.constant 6.400000e+01 : f32
    %77 = vector.broadcast %cst_35 : f32 to vector<16x1xf32>
    %78 = arith.divf %76, %77 : vector<16x1xf32>
    %79 = vector.broadcast %71 : vector<16x1xf32> to vector<16x64xf32>
    %80 = arith.subf %67, %79 : vector<16x64xf32>
    %cst_36 = arith.constant 9.99999974E-6 : f32
    %81 = vector.broadcast %cst_36 : f32 to vector<16x1xf32>
    %82 = arith.addf %78, %81 : vector<16x1xf32>
    %83 = math.rsqrt %82 : vector<16x1xf32>
    %84 = vector.broadcast %83 : vector<16x1xf32> to vector<16x64xf32>
    %85 = arith.mulf %80, %84 : vector<16x64xf32>
    %c0_37 = arith.constant 0 : index
    %c0_38 = arith.constant 0 : index
    %86 = vector.load %arg11[%c0_37, %c0_38] : memref<1x64xf32, #tpu.memory_space<vmem>>, vector<1x64xf32>
    %87 = vector.shape_cast %86 : vector<1x64xf32> to vector<64xf32>
    %88 = vector.shape_cast %87 : vector<64xf32> to vector<1x64xf32>
    %89 = vector.broadcast %88 : vector<1x64xf32> to vector<16x64xf32>
    %90 = arith.mulf %85, %89 : vector<16x64xf32>
    %c0_39 = arith.constant 0 : index
    %c0_40 = arith.constant 0 : index
    %91 = vector.load %arg12[%c0_39, %c0_40] : memref<1x64xf32, #tpu.memory_space<vmem>>, vector<1x64xf32>
    %92 = vector.shape_cast %91 : vector<1x64xf32> to vector<64xf32>
    %93 = vector.shape_cast %92 : vector<64xf32> to vector<1x64xf32>
    %94 = vector.broadcast %93 : vector<1x64xf32> to vector<16x64xf32>
    %95 = arith.addf %90, %94 : vector<16x64xf32>
    %c0_41 = arith.constant 0 : index
    %c0_42 = arith.constant 0 : index
    %96 = vector.load %arg13[%c0_41, %c0_42] : memref<64x128xf32, #tpu.memory_space<vmem>>, vector<64x128xf32>
    %cst_43 = arith.constant dense<0.000000e+00> : vector<16x128xf32>
    %97 = tpu.matmul %95, %96, %cst_43 {dimension_numbers = #tpu.dot_dimension_numbers<[1], [0], [0], [1], [0, 0, 1, 1], [], []>} : vector<16x64xf32>, vector<64x128xf32>, vector<16x128xf32> -> vector<16x128xf32>
    %c0_44 = arith.constant 0 : index
    %c0_45 = arith.constant 0 : index
    %98 = vector.load %arg14[%c0_44, %c0_45] : memref<1x128xf32, #tpu.memory_space<vmem>>, vector<1x128xf32>
    %99 = vector.shape_cast %98 : vector<1x128xf32> to vector<128xf32>
    %100 = vector.shape_cast %99 : vector<128xf32> to vector<1x128xf32>
    %101 = vector.broadcast %100 : vector<1x128xf32> to vector<16x128xf32>
    %102 = arith.addf %97, %101 : vector<16x128xf32>
    %cst_46 = arith.constant 1.702000e+00 : f32
    %103 = vector.broadcast %cst_46 : f32 to vector<16x128xf32>
    %104 = arith.mulf %103, %102 : vector<16x128xf32>
    %105 = arith.negf %104 : vector<16x128xf32>
    %106 = math.exp %105 : vector<16x128xf32>
    %cst_47 = arith.constant 1.000000e+00 : f32
    %107 = vector.broadcast %cst_47 : f32 to vector<16x128xf32>
    %108 = arith.addf %107, %106 : vector<16x128xf32>
    %109 = arith.divf %107, %108 : vector<16x128xf32>
    %110 = arith.mulf %102, %109 : vector<16x128xf32>
    %c0_48 = arith.constant 0 : index
    %c0_49 = arith.constant 0 : index
    %111 = vector.load %arg15[%c0_48, %c0_49] : memref<128x64xf32, #tpu.memory_space<vmem>>, vector<128x64xf32>
    %cst_50 = arith.constant dense<0.000000e+00> : vector<16x64xf32>
    %112 = tpu.matmul %110, %111, %cst_50 {dimension_numbers = #tpu.dot_dimension_numbers<[1], [0], [0], [1], [0, 0, 1, 1], [], []>} : vector<16x128xf32>, vector<128x64xf32>, vector<16x64xf32> -> vector<16x64xf32>
    %c0_51 = arith.constant 0 : index
    %c0_52 = arith.constant 0 : index
    %113 = vector.load %arg16[%c0_51, %c0_52] : memref<1x64xf32, #tpu.memory_space<vmem>>, vector<1x64xf32>
    %114 = vector.shape_cast %113 : vector<1x64xf32> to vector<64xf32>
    %115 = vector.shape_cast %114 : vector<64xf32> to vector<1x64xf32>
    %116 = vector.broadcast %115 : vector<1x64xf32> to vector<16x64xf32>
    %117 = arith.addf %112, %116 : vector<16x64xf32>
    %118 = arith.addf %67, %117 : vector<16x64xf32>
    %c0_53 = arith.constant 0 : index
    %c0_54 = arith.constant 0 : index
    %c0_55 = arith.constant 0 : index
    %119 = vector.load %arg17[%c0_53, %c0_54, %c0_55] : memref<1x16x64xf32, #tpu.memory_space<vmem>>, vector<1x16x64xf32>
    %120 = vector.shape_cast %119 : vector<1x16x64xf32> to vector<16x64xf32>
    %121 = vector.shape_cast %118 : vector<16x64xf32> to vector<1x16x64xf32>
    tpu.vector_store %arg17[%c0_53, %c0_54, %c0_55], %121 {strides = array<i32>} : memref<1x16x64xf32, #tpu.memory_space<vmem>>, vector<1x16x64xf32>,
    return
  }
  func.func @transform_0(%arg0: i32, %arg1: i32) -> (i32, i32, i32) {
    %c0_i32 = arith.constant 0 : i32
    %c0_i32_0 = arith.constant 0 : i32
    %c0_i32_1 = arith.constant 0 : i32
    return %arg0, %c0_i32, %c0_i32_0 : i32, i32, i32
  }
  func.func @transform_1(%arg0: i32, %arg1: i32) -> (i32, i32) {
    %c0_i32 = arith.constant 0 : i32
    %c0_i32_0 = arith.constant 0 : i32
    %c0_i32_1 = arith.constant 0 : i32
    return %c0_i32, %c0_i32_0 : i32, i32
  }
  func.func @transform_2(%arg0: i32, %arg1: i32) -> (i32, i32) {
    %c0_i32 = arith.constant 0 : i32
    %c0_i32_0 = arith.constant 0 : i32
    %c0_i32_1 = arith.constant 0 : i32
    return %c0_i32, %c0_i32_0 : i32, i32
  }
  func.func @transform_3(%arg0: i32, %arg1: i32) -> (i32, i32) {
    %c0_i32 = arith.constant 0 : i32
    %c0_i32_0 = arith.constant 0 : i32
    %c0_i32_1 = arith.constant 0 : i32
    return %c0_i32, %c0_i32_0 : i32, i32
  }
  func.func @transform_4(%arg0: i32, %arg1: i32) -> (i32, i32) {
    %c0_i32 = arith.constant 0 : i32
    %c0_i32_0 = arith.constant 0 : i32
    %c0_i32_1 = arith.constant 0 : i32
    return %c0_i32, %c0_i32_0 : i32, i32
  }
  func.func @transform_5(%arg0: i32, %arg1: i32) -> (i32, i32) {
    %c0_i32 = arith.constant 0 : i32
    %c0_i32_0 = arith.constant 0 : i32
    %c0_i32_1 = arith.constant 0 : i32
    return %c0_i32, %c0_i32_0 : i32, i32
  }
  func.func @transform_6(%arg0: i32, %arg1: i32) -> (i32, i32) {
    %c0_i32 = arith.constant 0 : i32
    %c0_i32_0 = arith.constant 0 : i32
    %c0_i32_1 = arith.constant 0 : i32
    return %c0_i32, %c0_i32_0 : i32, i32
  }
  func.func @transform_7(%arg0: i32, %arg1: i32) -> (i32, i32) {
    %c0_i32 = arith.constant 0 : i32
    %c0_i32_0 = arith.constant 0 : i32
    %c0_i32_1 = arith.constant 0 : i32
    return %c0_i32, %c0_i32_0 : i32, i32
  }
  func.func @transform_8(%arg0: i32, %arg1: i32) -> (i32, i32) {
    %c0_i32 = arith.constant 0 : i32
    %c0_i32_0 = arith.constant 0 : i32
    %c0_i32_1 = arith.constant 0 : i32
    return %c0_i32, %c0_i32_0 : i32, i32
  }
  func.func @transform_9(%arg0: i32, %arg1: i32) -> (i32, i32) {
    %c0_i32 = arith.constant 0 : i32
    %c0_i32_0 = arith.constant 0 : i32
    %c0_i32_1 = arith.constant 0 : i32
    return %c0_i32, %c0_i32_0 : i32, i32
  }
  func.func @transform_10(%arg0: i32, %arg1: i32) -> (i32, i32) {
    %c0_i32 = arith.constant 0 : i32
    %c0_i32_0 = arith.constant 0 : i32
    %c0_i32_1 = arith.constant 0 : i32
    return %c0_i32, %c0_i32_0 : i32, i32
  }
  func.func @transform_11(%arg0: i32, %arg1: i32) -> (i32, i32) {
    %c0_i32 = arith.constant 0 : i32
    %c0_i32_0 = arith.constant 0 : i32
    %c0_i32_1 = arith.constant 0 : i32
    return %c0_i32, %c0_i32_0 : i32, i32
  }
  func.func @transform_12(%arg0: i32, %arg1: i32) -> (i32, i32) {
    %c0_i32 = arith.constant 0 : i32
    %c0_i32_0 = arith.constant 0 : i32
    %c0_i32_1 = arith.constant 0 : i32
    return %c0_i32, %c0_i32_0 : i32, i32
  }
  func.func @transform_13(%arg0: i32, %arg1: i32) -> (i32, i32) {
    %c0_i32 = arith.constant 0 : i32
    %c0_i32_0 = arith.constant 0 : i32
    %c0_i32_1 = arith.constant 0 : i32
    return %c0_i32, %c0_i32_0 : i32, i32
  }
  func.func @transform_14(%arg0: i32, %arg1: i32) -> (i32, i32) {
    %c0_i32 = arith.constant 0 : i32
    %c0_i32_0 = arith.constant 0 : i32
    %c0_i32_1 = arith.constant 0 : i32
    return %c0_i32, %c0_i32_0 : i32, i32
  }
  func.func @transform_15(%arg0: i32, %arg1: i32) -> (i32, i32, i32) {
    %c0_i32 = arith.constant 0 : i32
    %c0_i32_0 = arith.constant 0 : i32
    return %arg0, %arg1, %c0_i32 : i32, i32, i32
  }
}

module attributes {stable_mosaic.version = 11 : i64} {
  func.func @clip_layer_kernel(%arg0: i32, %arg1: i32, %arg2: memref<1x16x64xf32, #tpu.memory_space<vmem>>, %arg3: memref<1x64xf32, #tpu.memory_space<vmem>>, %arg4: memref<1x64xf32, #tpu.memory_space<vmem>>, %arg5: memref<64x64xf32, #tpu.memory_space<vmem>>, %arg6: memref<1x64xf32, #tpu.memory_space<vmem>>, %arg7: memref<64x128xf32, #tpu.memory_space<vmem>>, %arg8: memref<1x128xf32, #tpu.memory_space<vmem>>, %arg9: memref<64x64xf32, #tpu.memory_space<vmem>>, %arg10: memref<1x64xf32, #tpu.memory_space<vmem>>, %arg11: memref<1x64xf32, #tpu.memory_space<vmem>>, %arg12: memref<1x64xf32, #tpu.memory_space<vmem>>, %arg13: memref<64x128xf32, #tpu.memory_space<vmem>>, %arg14: memref<1x128xf32, #tpu.memory_space<vmem>>, %arg15: memref<128x64xf32, #tpu.memory_space<vmem>>, %arg16: memref<1x64xf32, #tpu.memory_space<vmem>>, %arg17: memref<1x16x64xf32, #tpu.memory_space<vmem>>, %arg18: memref<4x16x16xf32, #tpu.memory_space<vmem>>, %arg19: memref<4x16x16xf32, #tpu.memory_space<vmem>>, %arg20: memref<4x16x16xf32, #tpu.memory_space<vmem>>, %arg21: memref<4x16x16xf32, #tpu.memory_space<vmem>>) attributes {dimension_semantics = [#tpu.dimension_semantics<parallel>, #tpu.dimension_semantics<arbitrary>], iteration_bounds = array<i64: 2, 1>, scalar_prefetch = 0 : i64, scratch_operands = 4 : i64, tpu.core_type = #tpu.core_type<tc>, window_params = [{transform_indices = @transform_0, window_bounds = array<i64: 1, 16, 64>}, {pipeline_mode = #tpu.pipeline_mode<synchronous>, transform_indices = @transform_1, window_bounds = array<i64: 1, 64>}, {pipeline_mode = #tpu.pipeline_mode<synchronous>, transform_indices = @transform_2, window_bounds = array<i64: 1, 64>}, {pipeline_mode = #tpu.pipeline_mode<synchronous>, transform_indices = @transform_3, window_bounds = array<i64: 64, 64>}, {pipeline_mode = #tpu.pipeline_mode<synchronous>, transform_indices = @transform_4, window_bounds = array<i64: 1, 64>}, {pipeline_mode = #tpu.pipeline_mode<synchronous>, transform_indices = @transform_5, window_bounds = array<i64: 64, 128>}, {pipeline_mode = #tpu.pipeline_mode<synchronous>, transform_indices = @transform_6, window_bounds = array<i64: 1, 128>}, {pipeline_mode = #tpu.pipeline_mode<synchronous>, transform_indices = @transform_7, window_bounds = array<i64: 64, 64>}, {pipeline_mode = #tpu.pipeline_mode<synchronous>, transform_indices = @transform_8, window_bounds = array<i64: 1, 64>}, {pipeline_mode = #tpu.pipeline_mode<synchronous>, transform_indices = @transform_9, window_bounds = array<i64: 1, 64>}, {pipeline_mode = #tpu.pipeline_mode<synchronous>, transform_indices = @transform_10, window_bounds = array<i64: 1, 64>}, {pipeline_mode = #tpu.pipeline_mode<synchronous>, transform_indices = @transform_11, window_bounds = array<i64: 64, 128>}, {pipeline_mode = #tpu.pipeline_mode<synchronous>, transform_indices = @transform_12, window_bounds = array<i64: 1, 128>}, {pipeline_mode = #tpu.pipeline_mode<synchronous>, transform_indices = @transform_13, window_bounds = array<i64: 128, 64>}, {pipeline_mode = #tpu.pipeline_mode<synchronous>, transform_indices = @transform_14, window_bounds = array<i64: 1, 64>}, {transform_indices = @transform_15, window_bounds = array<i64: 1, 16, 64>}]} {
    %c0_i32 = arith.constant 0 : i32
    %0 = arith.cmpi eq, %arg1, %c0_i32 : i32
    %1 = arith.extui %0 : i1 to i32
    %c0_i32_0 = arith.constant 0 : i32
    %2 = arith.cmpi ne, %1, %c0_i32_0 : i32
    scf.if %2 {
      %c0_56 = arith.constant 0 : index
      %c0_57 = arith.constant 0 : index
      %c0_58 = arith.constant 0 : index
      %122 = vector.load %arg2[%c0_56, %c0_57, %c0_58] : memref<1x16x64xf32, #tpu.memory_space<vmem>>, vector<1x16x64xf32>
      %123 = vector.shape_cast %122 : vector<1x16x64xf32> to vector<16x64xf32>
      %cst_59 = arith.constant dense<0.000000e+00> : vector<16xf32>
      %124 = vector.multi_reduction <add>, %123, %cst_59 [1] : vector<16x64xf32> to vector<16xf32>
      %125 = vector.shape_cast %124 : vector<16xf32> to vector<16x1xf32>
      %cst_60 = arith.constant 6.400000e+01 : f32
      %126 = vector.broadcast %cst_60 : f32 to vector<16x1xf32>
      %127 = arith.divf %125, %126 : vector<16x1xf32>
      %128 = vector.broadcast %127 : vector<16x1xf32> to vector<16x64xf32>
      %129 = arith.subf %123, %128 : vector<16x64xf32>
      %130 = arith.mulf %129, %129 : vector<16x64xf32>
      %cst_61 = arith.constant dense<0.000000e+00> : vector<16xf32>
      %131 = vector.multi_reduction <add>, %130, %cst_61 [1] : vector<16x64xf32> to vector<16xf32>
      %132 = vector.shape_cast %131 : vector<16xf32> to vector<16x1xf32>
      %cst_62 = arith.constant 6.400000e+01 : f32
      %133 = vector.broadcast %cst_62 : f32 to vector<16x1xf32>
      %134 = arith.divf %132, %133 : vector<16x1xf32>
      %135 = vector.broadcast %127 : vector<16x1xf32> to vector<16x64xf32>
      %136 = arith.subf %123, %135 : vector<16x64xf32>
      %cst_63 = arith.constant 9.99999974E-6 : f32
      %137 = vector.broadcast %cst_63 : f32 to vector<16x1xf32>
      %138 = arith.addf %134, %137 : vector<16x1xf32>
      %139 = math.rsqrt %138 : vector<16x1xf32>
      %140 = vector.broadcast %139 : vector<16x1xf32> to vector<16x64xf32>
      %141 = arith.mulf %136, %140 : vector<16x64xf32>
      %c0_64 = arith.constant 0 : index
      %c0_65 = arith.constant 0 : index
      %142 = vector.load %arg3[%c0_64, %c0_65] : memref<1x64xf32, #tpu.memory_space<vmem>>, vector<1x64xf32>
      %143 = vector.shape_cast %142 : vector<1x64xf32> to vector<64xf32>
      %144 = vector.shape_cast %143 : vector<64xf32> to vector<1x64xf32>
      %145 = vector.broadcast %144 : vector<1x64xf32> to vector<16x64xf32>
      %146 = arith.mulf %141, %145 : vector<16x64xf32>
      %c0_66 = arith.constant 0 : index
      %c0_67 = arith.constant 0 : index
      %147 = vector.load %arg4[%c0_66, %c0_67] : memref<1x64xf32, #tpu.memory_space<vmem>>, vector<1x64xf32>
      %148 = vector.shape_cast %147 : vector<1x64xf32> to vector<64xf32>
      %149 = vector.shape_cast %148 : vector<64xf32> to vector<1x64xf32>
      %150 = vector.broadcast %149 : vector<1x64xf32> to vector<16x64xf32>
      %151 = arith.addf %146, %150 : vector<16x64xf32>
      %c0_68 = arith.constant 0 : index
      %c0_69 = arith.constant 0 : index
      %152 = vector.load %arg7[%c0_68, %c0_69] : memref<64x128xf32, #tpu.memory_space<vmem>>, vector<64x128xf32>
      %cst_70 = arith.constant dense<0.000000e+00> : vector<16x128xf32>
      %153 = tpu.matmul %151, %152, %cst_70 {dimension_numbers = #tpu.dot_dimension_numbers<[1], [0], [0], [1], [0, 0, 1, 1], [], []>} : vector<16x64xf32>, vector<64x128xf32>, vector<16x128xf32> -> vector<16x128xf32>
      %c0_71 = arith.constant 0 : index
      %c0_72 = arith.constant 0 : index
      %154 = vector.load %arg8[%c0_71, %c0_72] : memref<1x128xf32, #tpu.memory_space<vmem>>, vector<1x128xf32>
      %155 = vector.shape_cast %154 : vector<1x128xf32> to vector<128xf32>
      %156 = vector.shape_cast %155 : vector<128xf32> to vector<1x128xf32>
      %157 = vector.broadcast %156 : vector<1x128xf32> to vector<16x128xf32>
      %158 = arith.addf %153, %157 : vector<16x128xf32>
      %159 = vector.extract_strided_slice %158 {offsets = [0, 0], sizes = [16, 64], strides = [1, 1]} : vector<16x128xf32> to vector<16x64xf32>
      %160 = vector.shape_cast %159 : vector<16x64xf32> to vector<16x4x16xf32>
      %161 = tpu.transpose %160, [1, 0, 2] : vector<16x4x16xf32> -> vector<4x16x16xf32>
      %c0_73 = arith.constant 0 : index
      %c0_74 = arith.constant 0 : index
      %c0_75 = arith.constant 0 : index
      %162 = vector.load %arg18[%c0_73, %c0_74, %c0_75] : memref<4x16x16xf32, #tpu.memory_space<vmem>>, vector<4x16x16xf32>
      tpu.vector_store %arg18[%c0_73, %c0_74, %c0_75], %161 {strides = array<i32>} : memref<4x16x16xf32, #tpu.memory_space<vmem>>, vector<4x16x16xf32>,
      %163 = vector.extract_strided_slice %158 {offsets = [0, 64], sizes = [16, 64], strides = [1, 1]} : vector<16x128xf32> to vector<16x64xf32>
      %164 = vector.shape_cast %163 : vector<16x64xf32> to vector<16x4x16xf32>
      %165 = tpu.transpose %164, [1, 0, 2] : vector<16x4x16xf32> -> vector<4x16x16xf32>
      %c0_76 = arith.constant 0 : index
      %c0_77 = arith.constant 0 : index
      %c0_78 = arith.constant 0 : index
      %166 = vector.load %arg19[%c0_76, %c0_77, %c0_78] : memref<4x16x16xf32, #tpu.memory_space<vmem>>, vector<4x16x16xf32>
      tpu.vector_store %arg19[%c0_76, %c0_77, %c0_78], %165 {strides = array<i32>} : memref<4x16x16xf32, #tpu.memory_space<vmem>>, vector<4x16x16xf32>,
    } else {
    }
    %c0 = arith.constant 0 : index
    %c0_1 = arith.constant 0 : index
    %c0_2 = arith.constant 0 : index
    %3 = vector.load %arg2[%c0, %c0_1, %c0_2] : memref<1x16x64xf32, #tpu.memory_space<vmem>>, vector<1x16x64xf32>
    %4 = vector.shape_cast %3 : vector<1x16x64xf32> to vector<16x64xf32>
    %cst = arith.constant dense<0.000000e+00> : vector<16xf32>
    %5 = vector.multi_reduction <add>, %4, %cst [1] : vector<16x64xf32> to vector<16xf32>
    %6 = vector.shape_cast %5 : vector<16xf32> to vector<16x1xf32>
    %cst_3 = arith.constant 6.400000e+01 : f32
    %7 = vector.broadcast %cst_3 : f32 to vector<16x1xf32>
    %8 = arith.divf %6, %7 : vector<16x1xf32>
    %9 = vector.broadcast %8 : vector<16x1xf32> to vector<16x64xf32>
    %10 = arith.subf %4, %9 : vector<16x64xf32>
    %11 = arith.mulf %10, %10 : vector<16x64xf32>
    %cst_4 = arith.constant dense<0.000000e+00> : vector<16xf32>
    %12 = vector.multi_reduction <add>, %11, %cst_4 [1] : vector<16x64xf32> to vector<16xf32>
    %13 = vector.shape_cast %12 : vector<16xf32> to vector<16x1xf32>
    %cst_5 = arith.constant 6.400000e+01 : f32
    %14 = vector.broadcast %cst_5 : f32 to vector<16x1xf32>
    %15 = arith.divf %13, %14 : vector<16x1xf32>
    %16 = vector.broadcast %8 : vector<16x1xf32> to vector<16x64xf32>
    %17 = arith.subf %4, %16 : vector<16x64xf32>
    %cst_6 = arith.constant 9.99999974E-6 : f32
    %18 = vector.broadcast %cst_6 : f32 to vector<16x1xf32>
    %19 = arith.addf %15, %18 : vector<16x1xf32>
    %20 = math.rsqrt %19 : vector<16x1xf32>
    %21 = vector.broadcast %20 : vector<16x1xf32> to vector<16x64xf32>
    %22 = arith.mulf %17, %21 : vector<16x64xf32>
    %c0_7 = arith.constant 0 : index
    %c0_8 = arith.constant 0 : index
    %23 = vector.load %arg3[%c0_7, %c0_8] : memref<1x64xf32, #tpu.memory_space<vmem>>, vector<1x64xf32>
    %24 = vector.shape_cast %23 : vector<1x64xf32> to vector<64xf32>
    %25 = vector.shape_cast %24 : vector<64xf32> to vector<1x64xf32>
    %26 = vector.broadcast %25 : vector<1x64xf32> to vector<16x64xf32>
    %27 = arith.mulf %22, %26 : vector<16x64xf32>
    %c0_9 = arith.constant 0 : index
    %c0_10 = arith.constant 0 : index
    %28 = vector.load %arg4[%c0_9, %c0_10] : memref<1x64xf32, #tpu.memory_space<vmem>>, vector<1x64xf32>
    %29 = vector.shape_cast %28 : vector<1x64xf32> to vector<64xf32>
    %30 = vector.shape_cast %29 : vector<64xf32> to vector<1x64xf32>
    %31 = vector.broadcast %30 : vector<1x64xf32> to vector<16x64xf32>
    %32 = arith.addf %27, %31 : vector<16x64xf32>
    %c0_11 = arith.constant 0 : index
    %c0_12 = arith.constant 0 : index
    %33 = vector.load %arg5[%c0_11, %c0_12] : memref<64x64xf32, #tpu.memory_space<vmem>>, vector<64x64xf32>
    %cst_13 = arith.constant dense<0.000000e+00> : vector<16x64xf32>
    %34 = tpu.matmul %32, %33, %cst_13 {dimension_numbers = #tpu.dot_dimension_numbers<[1], [0], [0], [1], [0, 0, 1, 1], [], []>} : vector<16x64xf32>, vector<64x64xf32>, vector<16x64xf32> -> vector<16x64xf32>
    %c0_14 = arith.constant 0 : index
    %c0_15 = arith.constant 0 : index
    %35 = vector.load %arg6[%c0_14, %c0_15] : memref<1x64xf32, #tpu.memory_space<vmem>>, vector<1x64xf32>
    %36 = vector.shape_cast %35 : vector<1x64xf32> to vector<64xf32>
    %37 = vector.shape_cast %36 : vector<64xf32> to vector<1x64xf32>
    %38 = vector.broadcast %37 : vector<1x64xf32> to vector<16x64xf32>
    %39 = arith.addf %34, %38 : vector<16x64xf32>
    %cst_16 = arith.constant 2.500000e-01 : f32
    %40 = vector.broadcast %cst_16 : f32 to vector<16x64xf32>
    %41 = arith.mulf %39, %40 : vector<16x64xf32>
    %42 = vector.shape_cast %41 : vector<16x64xf32> to vector<16x4x16xf32>
    %43 = tpu.transpose %42, [1, 0, 2] : vector<16x4x16xf32> -> vector<4x16x16xf32>
    %c0_17 = arith.constant 0 : index
    %c0_18 = arith.constant 0 : index
    %c0_19 = arith.constant 0 : index
    %44 = vector.load %arg18[%c0_17, %c0_18, %c0_19] : memref<4x16x16xf32, #tpu.memory_space<vmem>>, vector<4x16x16xf32>
    "tpu.trace_start"() <{level = 10 : i32, message = "hqd,hkd->hqk"}> : () -> ()
    %cst_20 = arith.constant dense<0.000000e+00> : vector<4x16x16xf32>
    %45 = tpu.matmul %43, %44, %cst_20 {dimension_numbers = #tpu.dot_dimension_numbers<[2], [2], [1], [1], [0, 0, 0, 1, 1, 1], [0], [0]>} : vector<4x16x16xf32>, vector<4x16x16xf32>, vector<4x16x16xf32> -> vector<4x16x16xf32>
    "tpu.trace_stop"() : () -> ()
    %cst_21 = arith.constant dense<0xFF800000> : vector<4x16xf32>
    %46 = vector.multi_reduction <maximumf>, %45, %cst_21 [2] : vector<4x16x16xf32> to vector<4x16xf32>
    %47 = vector.shape_cast %46 : vector<4x16xf32> to vector<4x16x1xf32>
    %48 = vector.broadcast %47 : vector<4x16x1xf32> to vector<4x16x16xf32>
    %49 = arith.subf %45, %48 : vector<4x16x16xf32>
    %50 = math.exp %49 : vector<4x16x16xf32>
    %cst_22 = arith.constant dense<0.000000e+00> : vector<4x16xf32>
    %51 = vector.multi_reduction <add>, %50, %cst_22 [2] : vector<4x16x16xf32> to vector<4x16xf32>
    %52 = vector.shape_cast %51 : vector<4x16xf32> to vector<4x16x1xf32>
    %53 = tpu.reciprocal %52 {approx = true} : vector<4x16x1xf32> -> vector<4x16x1xf32>
    %54 = vector.broadcast %53 : vector<4x16x1xf32> to vector<4x16x16xf32>
    %55 = arith.mulf %50, %54 : vector<4x16x16xf32>
    %c0_23 = arith.constant 0 : index
    %c0_24 = arith.constant 0 : index
    %c0_25 = arith.constant 0 : index
    %56 = vector.load %arg19[%c0_23, %c0_24, %c0_25] : memref<4x16x16xf32, #tpu.memory_space<vmem>>, vector<4x16x16xf32>
    "tpu.trace_start"() <{level = 10 : i32, message = "hqk,hkd->hqd"}> : () -> ()
    %cst_26 = arith.constant dense<0.000000e+00> : vector<4x16x16xf32>
    %57 = tpu.matmul %55, %56, %cst_26 {dimension_numbers = #tpu.dot_dimension_numbers<[2], [1], [1], [2], [0, 0, 0, 1, 1, 2], [0], [0]>} : vector<4x16x16xf32>, vector<4x16x16xf32>, vector<4x16x16xf32> -> vector<4x16x16xf32>
    "tpu.trace_stop"() : () -> ()
    %58 = tpu.transpose %57, [1, 0, 2] : vector<4x16x16xf32> -> vector<16x4x16xf32>
    %59 = vector.shape_cast %58 : vector<16x4x16xf32> to vector<16x64xf32>
    %c0_27 = arith.constant 0 : index
    %c0_28 = arith.constant 0 : index
    %60 = vector.load %arg9[%c0_27, %c0_28] : memref<64x64xf32, #tpu.memory_space<vmem>>, vector<64x64xf32>
    %cst_29 = arith.constant dense<0.000000e+00> : vector<16x64xf32>
    %61 = tpu.matmul %59, %60, %cst_29 {dimension_numbers = #tpu.dot_dimension_numbers<[1], [0], [0], [1], [0, 0, 1, 1], [], []>} : vector<16x64xf32>, vector<64x64xf32>, vector<16x64xf32> -> vector<16x64xf32>
    %c0_30 = arith.constant 0 : index
    %c0_31 = arith.constant 0 : index
    %62 = vector.load %arg10[%c0_30, %c0_31] : memref<1x64xf32, #tpu.memory_space<vmem>>, vector<1x64xf32>
    %63 = vector.shape_cast %62 : vector<1x64xf32> to vector<64xf32>
    %64 = vector.shape_cast %63 : vector<64xf32> to vector<1x64xf32>
    %65 = vector.broadcast %64 : vector<1x64xf32> to vector<16x64xf32>
    %66 = arith.addf %61, %65 : vector<16x64xf32>
    %67 = arith.addf %4, %66 : vector<16x64xf32>
    %cst_32 = arith.constant dense<0.000000e+00> : vector<16xf32>
    %68 = vector.multi_reduction <add>, %67, %cst_32 [1] : vector<16x64xf32> to vector<16xf32>
    %69 = vector.shape_cast %68 : vector<16xf32> to vector<16x1xf32>
    %cst_33 = arith.constant 6.400000e+01 : f32
    %70 = vector.broadcast %cst_33 : f32 to vector<16x1xf32>
    %71 = arith.divf %69, %70 : vector<16x1xf32>
    %72 = vector.broadcast %71 : vector<16x1xf32> to vector<16x64xf32>
    %73 = arith.subf %67, %72 : vector<16x64xf32>
    %74 = arith.mulf %73, %73 : vector<16x64xf32>
    %cst_34 = arith.constant dense<0.000000e+00> : vector<16xf32>
    %75 = vector.multi_reduction <add>, %74, %cst_34 [1] : vector<16x64xf32> to vector<16xf32>
    %76 = vector.shape_cast %75 : vector<16xf32> to vector<16x1xf32>
    %cst_35 = arith.constant 6.400000e+01 : f32
    %77 = vector.broadcast %cst_35 : f32 to vector<16x1xf32>
    %78 = arith.divf %76, %77 : vector<16x1xf32>
    %79 = vector.broadcast %71 : vector<16x1xf32> to vector<16x64xf32>
    %80 = arith.subf %67, %79 : vector<16x64xf32>
    %cst_36 = arith.constant 9.99999974E-6 : f32
    %81 = vector.broadcast %cst_36 : f32 to vector<16x1xf32>
    %82 = arith.addf %78, %81 : vector<16x1xf32>
    %83 = math.rsqrt %82 : vector<16x1xf32>
    %84 = vector.broadcast %83 : vector<16x1xf32> to vector<16x64xf32>
    %85 = arith.mulf %80, %84 : vector<16x64xf32>
    %c0_37 = arith.constant 0 : index
    %c0_38 = arith.constant 0 : index
    %86 = vector.load %arg11[%c0_37, %c0_38] : memref<1x64xf32, #tpu.memory_space<vmem>>, vector<1x64xf32>
    %87 = vector.shape_cast %86 : vector<1x64xf32> to vector<64xf32>
    %88 = vector.shape_cast %87 : vector<64xf32> to vector<1x64xf32>
    %89 = vector.broadcast %88 : vector<1x64xf32> to vector<16x64xf32>
    %90 = arith.mulf %85, %89 : vector<16x64xf32>
    %c0_39 = arith.constant 0 : index
    %c0_40 = arith.constant 0 : index
    %91 = vector.load %arg12[%c0_39, %c0_40] : memref<1x64xf32, #tpu.memory_space<vmem>>, vector<1x64xf32>
    %92 = vector.shape_cast %91 : vector<1x64xf32> to vector<64xf32>
    %93 = vector.shape_cast %92 : vector<64xf32> to vector<1x64xf32>
    %94 = vector.broadcast %93 : vector<1x64xf32> to vector<16x64xf32>
    %95 = arith.addf %90, %94 : vector<16x64xf32>
    %c0_41 = arith.constant 0 : index
    %c0_42 = arith.constant 0 : index
    %96 = vector.load %arg13[%c0_41, %c0_42] : memref<64x128xf32, #tpu.memory_space<vmem>>, vector<64x128xf32>
    %cst_43 = arith.constant dense<0.000000e+00> : vector<16x128xf32>
    %97 = tpu.matmul %95, %96, %cst_43 {dimension_numbers = #tpu.dot_dimension_numbers<[1], [0], [0], [1], [0, 0, 1, 1], [], []>} : vector<16x64xf32>, vector<64x128xf32>, vector<16x128xf32> -> vector<16x128xf32>
    %c0_44 = arith.constant 0 : index
    %c0_45 = arith.constant 0 : index
    %98 = vector.load %arg14[%c0_44, %c0_45] : memref<1x128xf32, #tpu.memory_space<vmem>>, vector<1x128xf32>
    %99 = vector.shape_cast %98 : vector<1x128xf32> to vector<128xf32>
    %100 = vector.shape_cast %99 : vector<128xf32> to vector<1x128xf32>
    %101 = vector.broadcast %100 : vector<1x128xf32> to vector<16x128xf32>
    %102 = arith.addf %97, %101 : vector<16x128xf32>
    %cst_46 = arith.constant 1.702000e+00 : f32
    %103 = vector.broadcast %cst_46 : f32 to vector<16x128xf32>
    %104 = arith.mulf %103, %102 : vector<16x128xf32>
    %105 = arith.negf %104 : vector<16x128xf32>
    %106 = math.exp %105 : vector<16x128xf32>
    %cst_47 = arith.constant 1.000000e+00 : f32
    %107 = vector.broadcast %cst_47 : f32 to vector<16x128xf32>
    %108 = arith.addf %107, %106 : vector<16x128xf32>
    %109 = arith.divf %107, %108 : vector<16x128xf32>
    %110 = arith.mulf %102, %109 : vector<16x128xf32>
    %c0_48 = arith.constant 0 : index
    %c0_49 = arith.constant 0 : index
    %111 = vector.load %arg15[%c0_48, %c0_49] : memref<128x64xf32, #tpu.memory_space<vmem>>, vector<128x64xf32>
    %cst_50 = arith.constant dense<0.000000e+00> : vector<16x64xf32>
    %112 = tpu.matmul %110, %111, %cst_50 {dimension_numbers = #tpu.dot_dimension_numbers<[1], [0], [0], [1], [0, 0, 1, 1], [], []>} : vector<16x128xf32>, vector<128x64xf32>, vector<16x64xf32> -> vector<16x64xf32>
    %c0_51 = arith.constant 0 : index
    %c0_52 = arith.constant 0 : index
    %113 = vector.load %arg16[%c0_51, %c0_52] : memref<1x64xf32, #tpu.memory_space<vmem>>, vector<1x64xf32>
    %114 = vector.shape_cast %113 : vector<1x64xf32> to vector<64xf32>
    %115 = vector.shape_cast %114 : vector<64xf32> to vector<1x64xf32>
    %116 = vector.broadcast %115 : vector<1x64xf32> to vector<16x64xf32>
    %117 = arith.addf %112, %116 : vector<16x64xf32>
    %118 = arith.addf %67, %117 : vector<16x64xf32>
    %c0_53 = arith.constant 0 : index
    %c0_54 = arith.constant 0 : index
    %c0_55 = arith.constant 0 : index
    %119 = vector.load %arg17[%c0_53, %c0_54, %c0_55] : memref<1x16x64xf32, #tpu.memory_space<vmem>>, vector<1x16x64xf32>
    %120 = vector.shape_cast %119 : vector<1x16x64xf32> to vector<16x64xf32>
    %121 = vector.shape_cast %118 : vector<16x64xf32> to vector<1x16x64xf32>
    tpu.vector_store %arg17[%c0_53, %c0_54, %c0_55], %121 {strides = array<i32>} : memref<1x16x64xf32, #tpu.memory_space<vmem>>, vector<1x16x64xf32>,
    return
  }
  func.func @transform_0(%arg0: i32, %arg1: i32) -> (i32, i32, i32) {
    %c0_i32 = arith.constant 0 : i32
    %c0_i32_0 = arith.constant 0 : i32
    %c0_i32_1 = arith.constant 0 : i32
    return %arg0, %c0_i32, %c0_i32_0 : i32, i32, i32
  }
  func.func @transform_1(%arg0: i32, %arg1: i32) -> (i32, i32) {
    %c0_i32 = arith.constant 0 : i32
    %c0_i32_0 = arith.constant 0 : i32
    %c0_i32_1 = arith.constant 0 : i32
    return %c0_i32, %c0_i32_0 : i32, i32
  }
  func.func @transform_2(%arg0: i32, %arg1: i32) -> (i32, i32) {
    %c0_i32 = arith.constant 0 : i32
    %c0_i32_0 = arith.constant 0 : i32
    %c0_i32_1 = arith.constant 0 : i32
    return %c0_i32, %c0_i32_0 : i32, i32
  }
  func.func @transform_3(%arg0: i32, %arg1: i32) -> (i32, i32) {
    %c0_i32 = arith.constant 0 : i32
    %c0_i32_0 = arith.constant 0 : i32
    %c0_i32_1 = arith.constant 0 : i32
    return %c0_i32, %c0_i32_0 : i32, i32
  }
  func.func @transform_4(%arg0: i32, %arg1: i32) -> (i32, i32) {
    %c0_i32 = arith.constant 0 : i32
    %c0_i32_0 = arith.constant 0 : i32
    %c0_i32_1 = arith.constant 0 : i32
    return %c0_i32, %c0_i32_0 : i32, i32
  }
  func.func @transform_5(%arg0: i32, %arg1: i32) -> (i32, i32) {
    %c0_i32 = arith.constant 0 : i32
    %c0_i32_0 = arith.constant 0 : i32
    %c0_i32_1 = arith.constant 0 : i32
    return %c0_i32, %c0_i32_0 : i32, i32
  }
  func.func @transform_6(%arg0: i32, %arg1: i32) -> (i32, i32) {
    %c0_i32 = arith.constant 0 : i32
    %c0_i32_0 = arith.constant 0 : i32
    %c0_i32_1 = arith.constant 0 : i32
    return %c0_i32, %c0_i32_0 : i32, i32
  }
  func.func @transform_7(%arg0: i32, %arg1: i32) -> (i32, i32) {
    %c0_i32 = arith.constant 0 : i32
    %c0_i32_0 = arith.constant 0 : i32
    %c0_i32_1 = arith.constant 0 : i32
    return %c0_i32, %c0_i32_0 : i32, i32
  }
  func.func @transform_8(%arg0: i32, %arg1: i32) -> (i32, i32) {
    %c0_i32 = arith.constant 0 : i32
    %c0_i32_0 = arith.constant 0 : i32
    %c0_i32_1 = arith.constant 0 : i32
    return %c0_i32, %c0_i32_0 : i32, i32
  }
  func.func @transform_9(%arg0: i32, %arg1: i32) -> (i32, i32) {
    %c0_i32 = arith.constant 0 : i32
    %c0_i32_0 = arith.constant 0 : i32
    %c0_i32_1 = arith.constant 0 : i32
    return %c0_i32, %c0_i32_0 : i32, i32
  }
  func.func @transform_10(%arg0: i32, %arg1: i32) -> (i32, i32) {
    %c0_i32 = arith.constant 0 : i32
    %c0_i32_0 = arith.constant 0 : i32
    %c0_i32_1 = arith.constant 0 : i32
    return %c0_i32, %c0_i32_0 : i32, i32
  }
  func.func @transform_11(%arg0: i32, %arg1: i32) -> (i32, i32) {
    %c0_i32 = arith.constant 0 : i32
    %c0_i32_0 = arith.constant 0 : i32
    %c0_i32_1 = arith.constant 0 : i32
    return %c0_i32, %c0_i32_0 : i32, i32
  }
  func.func @transform_12(%arg0: i32, %arg1: i32) -> (i32, i32) {
    %c0_i32 = arith.constant 0 : i32
    %c0_i32_0 = arith.constant 0 : i32
    %c0_i32_1 = arith.constant 0 : i32
    return %c0_i32, %c0_i32_0 : i32, i32
  }
  func.func @transform_13(%arg0: i32, %arg1: i32) -> (i32, i32) {
    %c0_i32 = arith.constant 0 : i32
    %c0_i32_0 = arith.constant 0 : i32
    %c0_i32_1 = arith.constant 0 : i32
    return %c0_i32, %c0_i32_0 : i32, i32
  }
  func.func @transform_14(%arg0: i32, %arg1: i32) -> (i32, i32) {
    %c0_i32 = arith.constant 0 : i32
    %c0_i32_0 = arith.constant 0 : i32
    %c0_i32_1 = arith.constant 0 : i32
    return %c0_i32, %c0_i32_0 : i32, i32
  }
  func.func @transform_15(%arg0: i32, %arg1: i32) -> (i32, i32, i32) {
    %c0_i32 = arith.constant 0 : i32
    %c0_i32_0 = arith.constant 0 : i32
    return %arg0, %arg1, %c0_i32 : i32, i32, i32
  }
}

module attributes {stable_mosaic.version = 11 : i64} {
  func.func @clip_layer_kernel(%arg0: i32, %arg1: i32, %arg2: memref<1x16x64xf32, #tpu.memory_space<vmem>>, %arg3: memref<1x64xf32, #tpu.memory_space<vmem>>, %arg4: memref<1x64xf32, #tpu.memory_space<vmem>>, %arg5: memref<64x64xf32, #tpu.memory_space<vmem>>, %arg6: memref<1x64xf32, #tpu.memory_space<vmem>>, %arg7: memref<64x128xf32, #tpu.memory_space<vmem>>, %arg8: memref<1x128xf32, #tpu.memory_space<vmem>>, %arg9: memref<64x64xf32, #tpu.memory_space<vmem>>, %arg10: memref<1x64xf32, #tpu.memory_space<vmem>>, %arg11: memref<1x64xf32, #tpu.memory_space<vmem>>, %arg12: memref<1x64xf32, #tpu.memory_space<vmem>>, %arg13: memref<64x128xf32, #tpu.memory_space<vmem>>, %arg14: memref<1x128xf32, #tpu.memory_space<vmem>>, %arg15: memref<128x64xf32, #tpu.memory_space<vmem>>, %arg16: memref<1x64xf32, #tpu.memory_space<vmem>>, %arg17: memref<1x16x64xf32, #tpu.memory_space<vmem>>, %arg18: memref<4x16x16xf32, #tpu.memory_space<vmem>>, %arg19: memref<4x16x16xf32, #tpu.memory_space<vmem>>, %arg20: memref<4x16x16xf32, #tpu.memory_space<vmem>>, %arg21: memref<4x16x16xf32, #tpu.memory_space<vmem>>) attributes {dimension_semantics = [#tpu.dimension_semantics<parallel>, #tpu.dimension_semantics<arbitrary>], iteration_bounds = array<i64: 2, 1>, scalar_prefetch = 0 : i64, scratch_operands = 4 : i64, tpu.core_type = #tpu.core_type<tc>, window_params = [{transform_indices = @transform_0, window_bounds = array<i64: 1, 16, 64>}, {pipeline_mode = #tpu.pipeline_mode<synchronous>, transform_indices = @transform_1, window_bounds = array<i64: 1, 64>}, {pipeline_mode = #tpu.pipeline_mode<synchronous>, transform_indices = @transform_2, window_bounds = array<i64: 1, 64>}, {pipeline_mode = #tpu.pipeline_mode<synchronous>, transform_indices = @transform_3, window_bounds = array<i64: 64, 64>}, {pipeline_mode = #tpu.pipeline_mode<synchronous>, transform_indices = @transform_4, window_bounds = array<i64: 1, 64>}, {pipeline_mode = #tpu.pipeline_mode<synchronous>, transform_indices = @transform_5, window_bounds = array<i64: 64, 128>}, {pipeline_mode = #tpu.pipeline_mode<synchronous>, transform_indices = @transform_6, window_bounds = array<i64: 1, 128>}, {pipeline_mode = #tpu.pipeline_mode<synchronous>, transform_indices = @transform_7, window_bounds = array<i64: 64, 64>}, {pipeline_mode = #tpu.pipeline_mode<synchronous>, transform_indices = @transform_8, window_bounds = array<i64: 1, 64>}, {pipeline_mode = #tpu.pipeline_mode<synchronous>, transform_indices = @transform_9, window_bounds = array<i64: 1, 64>}, {pipeline_mode = #tpu.pipeline_mode<synchronous>, transform_indices = @transform_10, window_bounds = array<i64: 1, 64>}, {pipeline_mode = #tpu.pipeline_mode<synchronous>, transform_indices = @transform_11, window_bounds = array<i64: 64, 128>}, {pipeline_mode = #tpu.pipeline_mode<synchronous>, transform_indices = @transform_12, window_bounds = array<i64: 1, 128>}, {pipeline_mode = #tpu.pipeline_mode<synchronous>, transform_indices = @transform_13, window_bounds = array<i64: 128, 64>}, {pipeline_mode = #tpu.pipeline_mode<synchronous>, transform_indices = @transform_14, window_bounds = array<i64: 1, 64>}, {transform_indices = @transform_15, window_bounds = array<i64: 1, 16, 64>}]} {
    %c0_i32 = arith.constant 0 : i32
    %0 = arith.cmpi eq, %arg1, %c0_i32 : i32
    %1 = arith.extui %0 : i1 to i32
    %c0_i32_0 = arith.constant 0 : i32
    %2 = arith.cmpi ne, %1, %c0_i32_0 : i32
    scf.if %2 {
      %c0_83 = arith.constant 0 : index
      %c0_84 = arith.constant 0 : index
      %c0_85 = arith.constant 0 : index
      %177 = vector.load %arg2[%c0_83, %c0_84, %c0_85] : memref<1x16x64xf32, #tpu.memory_space<vmem>>, vector<1x16x64xf32>
      %178 = vector.shape_cast %177 : vector<1x16x64xf32> to vector<16x64xf32>
      %cst_86 = arith.constant dense<0.000000e+00> : vector<16xf32>
      %179 = vector.multi_reduction <add>, %178, %cst_86 [1] : vector<16x64xf32> to vector<16xf32>
      %180 = vector.shape_cast %179 : vector<16xf32> to vector<16x1xf32>
      %cst_87 = arith.constant 6.400000e+01 : f32
      %181 = vector.broadcast %cst_87 : f32 to vector<16x1xf32>
      %182 = arith.divf %180, %181 : vector<16x1xf32>
      %183 = vector.broadcast %182 : vector<16x1xf32> to vector<16x64xf32>
      %184 = arith.subf %178, %183 : vector<16x64xf32>
      %185 = arith.mulf %184, %184 : vector<16x64xf32>
      %cst_88 = arith.constant dense<0.000000e+00> : vector<16xf32>
      %186 = vector.multi_reduction <add>, %185, %cst_88 [1] : vector<16x64xf32> to vector<16xf32>
      %187 = vector.shape_cast %186 : vector<16xf32> to vector<16x1xf32>
      %cst_89 = arith.constant 6.400000e+01 : f32
      %188 = vector.broadcast %cst_89 : f32 to vector<16x1xf32>
      %189 = arith.divf %187, %188 : vector<16x1xf32>
      %190 = vector.broadcast %182 : vector<16x1xf32> to vector<16x64xf32>
      %191 = arith.subf %178, %190 : vector<16x64xf32>
      %cst_90 = arith.constant 9.99999974E-6 : f32
      %192 = vector.broadcast %cst_90 : f32 to vector<16x1xf32>
      %193 = arith.addf %189, %192 : vector<16x1xf32>
      %194 = math.rsqrt %193 : vector<16x1xf32>
      %195 = vector.broadcast %194 : vector<16x1xf32> to vector<16x64xf32>
      %196 = arith.mulf %191, %195 : vector<16x64xf32>
      %c0_91 = arith.constant 0 : index
      %c0_92 = arith.constant 0 : index
      %197 = vector.load %arg3[%c0_91, %c0_92] : memref<1x64xf32, #tpu.memory_space<vmem>>, vector<1x64xf32>
      %198 = vector.shape_cast %197 : vector<1x64xf32> to vector<64xf32>
      %199 = vector.shape_cast %198 : vector<64xf32> to vector<1x64xf32>
      %200 = vector.broadcast %199 : vector<1x64xf32> to vector<16x64xf32>
      %201 = arith.mulf %196, %200 : vector<16x64xf32>
      %c0_93 = arith.constant 0 : index
      %c0_94 = arith.constant 0 : index
      %202 = vector.load %arg4[%c0_93, %c0_94] : memref<1x64xf32, #tpu.memory_space<vmem>>, vector<1x64xf32>
      %203 = vector.shape_cast %202 : vector<1x64xf32> to vector<64xf32>
      %204 = vector.shape_cast %203 : vector<64xf32> to vector<1x64xf32>
      %205 = vector.broadcast %204 : vector<1x64xf32> to vector<16x64xf32>
      %206 = arith.addf %201, %205 : vector<16x64xf32>
      %c0_95 = arith.constant 0 : index
      %c0_96 = arith.constant 0 : index
      %207 = vector.load %arg7[%c0_95, %c0_96] : memref<64x128xf32, #tpu.memory_space<vmem>>, vector<64x128xf32>
      %cst_97 = arith.constant dense<0.000000e+00> : vector<16x128xf32>
      %208 = tpu.matmul %206, %207, %cst_97 {dimension_numbers = #tpu.dot_dimension_numbers<[1], [0], [0], [1], [0, 0, 1, 1], [], []>} : vector<16x64xf32>, vector<64x128xf32>, vector<16x128xf32> -> vector<16x128xf32>
      %c0_98 = arith.constant 0 : index
      %c0_99 = arith.constant 0 : index
      %209 = vector.load %arg8[%c0_98, %c0_99] : memref<1x128xf32, #tpu.memory_space<vmem>>, vector<1x128xf32>
      %210 = vector.shape_cast %209 : vector<1x128xf32> to vector<128xf32>
      %211 = vector.shape_cast %210 : vector<128xf32> to vector<1x128xf32>
      %212 = vector.broadcast %211 : vector<1x128xf32> to vector<16x128xf32>
      %213 = arith.addf %208, %212 : vector<16x128xf32>
      %214 = vector.extract_strided_slice %213 {offsets = [0, 0], sizes = [16, 16], strides = [1, 1]} : vector<16x128xf32> to vector<16x16xf32>
      %c0_100 = arith.constant 0 : index
      %c0_101 = arith.constant 0 : index
      %c0_102 = arith.constant 0 : index
      %215 = vector.load %arg18[%c0_100, %c0_101, %c0_102] : memref<4x16x16xf32, #tpu.memory_space<vmem>>, vector<1x16x16xf32>
      %216 = vector.shape_cast %215 : vector<1x16x16xf32> to vector<16x16xf32>
      %217 = vector.shape_cast %214 : vector<16x16xf32> to vector<1x16x16xf32>
      tpu.vector_store %arg18[%c0_100, %c0_101, %c0_102], %217 {strides = array<i32>} : memref<4x16x16xf32, #tpu.memory_space<vmem>>, vector<1x16x16xf32>,
      %218 = vector.extract_strided_slice %213 {offsets = [0, 64], sizes = [16, 16], strides = [1, 1]} : vector<16x128xf32> to vector<16x16xf32>
      %c0_103 = arith.constant 0 : index
      %c0_104 = arith.constant 0 : index
      %c0_105 = arith.constant 0 : index
      %219 = vector.load %arg19[%c0_103, %c0_104, %c0_105] : memref<4x16x16xf32, #tpu.memory_space<vmem>>, vector<1x16x16xf32>
      %220 = vector.shape_cast %219 : vector<1x16x16xf32> to vector<16x16xf32>
      %221 = vector.shape_cast %218 : vector<16x16xf32> to vector<1x16x16xf32>
      tpu.vector_store %arg19[%c0_103, %c0_104, %c0_105], %221 {strides = array<i32>} : memref<4x16x16xf32, #tpu.memory_space<vmem>>, vector<1x16x16xf32>,
      %222 = vector.extract_strided_slice %213 {offsets = [0, 16], sizes = [16, 16], strides = [1, 1]} : vector<16x128xf32> to vector<16x16xf32>
      %c1_106 = arith.constant 1 : index
      %c0_107 = arith.constant 0 : index
      %c0_108 = arith.constant 0 : index
      %223 = vector.load %arg18[%c1_106, %c0_107, %c0_108] : memref<4x16x16xf32, #tpu.memory_space<vmem>>, vector<1x16x16xf32>
      %224 = vector.shape_cast %223 : vector<1x16x16xf32> to vector<16x16xf32>
      %225 = vector.shape_cast %222 : vector<16x16xf32> to vector<1x16x16xf32>
      tpu.vector_store %arg18[%c1_106, %c0_107, %c0_108], %225 {strides = array<i32>} : memref<4x16x16xf32, #tpu.memory_space<vmem>>, vector<1x16x16xf32>,
      %226 = vector.extract_strided_slice %213 {offsets = [0, 80], sizes = [16, 16], strides = [1, 1]} : vector<16x128xf32> to vector<16x16xf32>
      %c1_109 = arith.constant 1 : index
      %c0_110 = arith.constant 0 : index
      %c0_111 = arith.constant 0 : index
      %227 = vector.load %arg19[%c1_109, %c0_110, %c0_111] : memref<4x16x16xf32, #tpu.memory_space<vmem>>, vector<1x16x16xf32>
      %228 = vector.shape_cast %227 : vector<1x16x16xf32> to vector<16x16xf32>
      %229 = vector.shape_cast %226 : vector<16x16xf32> to vector<1x16x16xf32>
      tpu.vector_store %arg19[%c1_109, %c0_110, %c0_111], %229 {strides = array<i32>} : memref<4x16x16xf32, #tpu.memory_space<vmem>>, vector<1x16x16xf32>,
      %230 = vector.extract_strided_slice %213 {offsets = [0, 32], sizes = [16, 16], strides = [1, 1]} : vector<16x128xf32> to vector<16x16xf32>
      %c2_112 = arith.constant 2 : index
      %c0_113 = arith.constant 0 : index
      %c0_114 = arith.constant 0 : index
      %231 = vector.load %arg18[%c2_112, %c0_113, %c0_114] : memref<4x16x16xf32, #tpu.memory_space<vmem>>, vector<1x16x16xf32>
      %232 = vector.shape_cast %231 : vector<1x16x16xf32> to vector<16x16xf32>
      %233 = vector.shape_cast %230 : vector<16x16xf32> to vector<1x16x16xf32>
      tpu.vector_store %arg18[%c2_112, %c0_113, %c0_114], %233 {strides = array<i32>} : memref<4x16x16xf32, #tpu.memory_space<vmem>>, vector<1x16x16xf32>,
      %234 = vector.extract_strided_slice %213 {offsets = [0, 96], sizes = [16, 16], strides = [1, 1]} : vector<16x128xf32> to vector<16x16xf32>
      %c2_115 = arith.constant 2 : index
      %c0_116 = arith.constant 0 : index
      %c0_117 = arith.constant 0 : index
      %235 = vector.load %arg19[%c2_115, %c0_116, %c0_117] : memref<4x16x16xf32, #tpu.memory_space<vmem>>, vector<1x16x16xf32>
      %236 = vector.shape_cast %235 : vector<1x16x16xf32> to vector<16x16xf32>
      %237 = vector.shape_cast %234 : vector<16x16xf32> to vector<1x16x16xf32>
      tpu.vector_store %arg19[%c2_115, %c0_116, %c0_117], %237 {strides = array<i32>} : memref<4x16x16xf32, #tpu.memory_space<vmem>>, vector<1x16x16xf32>,
      %238 = vector.extract_strided_slice %213 {offsets = [0, 48], sizes = [16, 16], strides = [1, 1]} : vector<16x128xf32> to vector<16x16xf32>
      %c3_118 = arith.constant 3 : index
      %c0_119 = arith.constant 0 : index
      %c0_120 = arith.constant 0 : index
      %239 = vector.load %arg18[%c3_118, %c0_119, %c0_120] : memref<4x16x16xf32, #tpu.memory_space<vmem>>, vector<1x16x16xf32>
      %240 = vector.shape_cast %239 : vector<1x16x16xf32> to vector<16x16xf32>
      %241 = vector.shape_cast %238 : vector<16x16xf32> to vector<1x16x16xf32>
      tpu.vector_store %arg18[%c3_118, %c0_119, %c0_120], %241 {strides = array<i32>} : memref<4x16x16xf32, #tpu.memory_space<vmem>>, vector<1x16x16xf32>,
      %242 = vector.extract_strided_slice %213 {offsets = [0, 112], sizes = [16, 16], strides = [1, 1]} : vector<16x128xf32> to vector<16x16xf32>
      %c3_121 = arith.constant 3 : index
      %c0_122 = arith.constant 0 : index
      %c0_123 = arith.constant 0 : index
      %243 = vector.load %arg19[%c3_121, %c0_122, %c0_123] : memref<4x16x16xf32, #tpu.memory_space<vmem>>, vector<1x16x16xf32>
      %244 = vector.shape_cast %243 : vector<1x16x16xf32> to vector<16x16xf32>
      %245 = vector.shape_cast %242 : vector<16x16xf32> to vector<1x16x16xf32>
      tpu.vector_store %arg19[%c3_121, %c0_122, %c0_123], %245 {strides = array<i32>} : memref<4x16x16xf32, #tpu.memory_space<vmem>>, vector<1x16x16xf32>,
    } else {
    }
    %c0 = arith.constant 0 : index
    %c0_1 = arith.constant 0 : index
    %c0_2 = arith.constant 0 : index
    %3 = vector.load %arg2[%c0, %c0_1, %c0_2] : memref<1x16x64xf32, #tpu.memory_space<vmem>>, vector<1x16x64xf32>
    %4 = vector.shape_cast %3 : vector<1x16x64xf32> to vector<16x64xf32>
    %cst = arith.constant dense<0.000000e+00> : vector<16xf32>
    %5 = vector.multi_reduction <add>, %4, %cst [1] : vector<16x64xf32> to vector<16xf32>
    %6 = vector.shape_cast %5 : vector<16xf32> to vector<16x1xf32>
    %cst_3 = arith.constant 6.400000e+01 : f32
    %7 = vector.broadcast %cst_3 : f32 to vector<16x1xf32>
    %8 = arith.divf %6, %7 : vector<16x1xf32>
    %9 = vector.broadcast %8 : vector<16x1xf32> to vector<16x64xf32>
    %10 = arith.subf %4, %9 : vector<16x64xf32>
    %11 = arith.mulf %10, %10 : vector<16x64xf32>
    %cst_4 = arith.constant dense<0.000000e+00> : vector<16xf32>
    %12 = vector.multi_reduction <add>, %11, %cst_4 [1] : vector<16x64xf32> to vector<16xf32>
    %13 = vector.shape_cast %12 : vector<16xf32> to vector<16x1xf32>
    %cst_5 = arith.constant 6.400000e+01 : f32
    %14 = vector.broadcast %cst_5 : f32 to vector<16x1xf32>
    %15 = arith.divf %13, %14 : vector<16x1xf32>
    %16 = vector.broadcast %8 : vector<16x1xf32> to vector<16x64xf32>
    %17 = arith.subf %4, %16 : vector<16x64xf32>
    %cst_6 = arith.constant 9.99999974E-6 : f32
    %18 = vector.broadcast %cst_6 : f32 to vector<16x1xf32>
    %19 = arith.addf %15, %18 : vector<16x1xf32>
    %20 = math.rsqrt %19 : vector<16x1xf32>
    %21 = vector.broadcast %20 : vector<16x1xf32> to vector<16x64xf32>
    %22 = arith.mulf %17, %21 : vector<16x64xf32>
    %c0_7 = arith.constant 0 : index
    %c0_8 = arith.constant 0 : index
    %23 = vector.load %arg3[%c0_7, %c0_8] : memref<1x64xf32, #tpu.memory_space<vmem>>, vector<1x64xf32>
    %24 = vector.shape_cast %23 : vector<1x64xf32> to vector<64xf32>
    %25 = vector.shape_cast %24 : vector<64xf32> to vector<1x64xf32>
    %26 = vector.broadcast %25 : vector<1x64xf32> to vector<16x64xf32>
    %27 = arith.mulf %22, %26 : vector<16x64xf32>
    %c0_9 = arith.constant 0 : index
    %c0_10 = arith.constant 0 : index
    %28 = vector.load %arg4[%c0_9, %c0_10] : memref<1x64xf32, #tpu.memory_space<vmem>>, vector<1x64xf32>
    %29 = vector.shape_cast %28 : vector<1x64xf32> to vector<64xf32>
    %30 = vector.shape_cast %29 : vector<64xf32> to vector<1x64xf32>
    %31 = vector.broadcast %30 : vector<1x64xf32> to vector<16x64xf32>
    %32 = arith.addf %27, %31 : vector<16x64xf32>
    %c0_11 = arith.constant 0 : index
    %c0_12 = arith.constant 0 : index
    %33 = vector.load %arg5[%c0_11, %c0_12] : memref<64x64xf32, #tpu.memory_space<vmem>>, vector<64x64xf32>
    %cst_13 = arith.constant dense<0.000000e+00> : vector<16x64xf32>
    %34 = tpu.matmul %32, %33, %cst_13 {dimension_numbers = #tpu.dot_dimension_numbers<[1], [0], [0], [1], [0, 0, 1, 1], [], []>} : vector<16x64xf32>, vector<64x64xf32>, vector<16x64xf32> -> vector<16x64xf32>
    %c0_14 = arith.constant 0 : index
    %c0_15 = arith.constant 0 : index
    %35 = vector.load %arg6[%c0_14, %c0_15] : memref<1x64xf32, #tpu.memory_space<vmem>>, vector<1x64xf32>
    %36 = vector.shape_cast %35 : vector<1x64xf32> to vector<64xf32>
    %37 = vector.shape_cast %36 : vector<64xf32> to vector<1x64xf32>
    %38 = vector.broadcast %37 : vector<1x64xf32> to vector<16x64xf32>
    %39 = arith.addf %34, %38 : vector<16x64xf32>
    %cst_16 = arith.constant 2.500000e-01 : f32
    %40 = vector.broadcast %cst_16 : f32 to vector<16x64xf32>
    %41 = arith.mulf %39, %40 : vector<16x64xf32>
    %42 = vector.extract_strided_slice %41 {offsets = [0, 0], sizes = [16, 16], strides = [1, 1]} : vector<16x64xf32> to vector<16x16xf32>
    %c0_17 = arith.constant 0 : index
    %c0_18 = arith.constant 0 : index
    %c0_19 = arith.constant 0 : index
    %43 = vector.load %arg18[%c0_17, %c0_18, %c0_19] : memref<4x16x16xf32, #tpu.memory_space<vmem>>, vector<1x16x16xf32>
    %44 = vector.shape_cast %43 : vector<1x16x16xf32> to vector<16x16xf32>
    %c0_20 = arith.constant 0 : index
    %c0_21 = arith.constant 0 : index
    %c0_22 = arith.constant 0 : index
    %45 = vector.load %arg19[%c0_20, %c0_21, %c0_22] : memref<4x16x16xf32, #tpu.memory_space<vmem>>, vector<1x16x16xf32>
    %46 = vector.shape_cast %45 : vector<1x16x16xf32> to vector<16x16xf32>
    %47 = tpu.transpose %44, [1, 0] : vector<16x16xf32> -> vector<16x16xf32>
    %cst_23 = arith.constant dense<0.000000e+00> : vector<16x16xf32>
    %48 = tpu.matmul %42, %47, %cst_23 {dimension_numbers = #tpu.dot_dimension_numbers<[1], [0], [0], [1], [0, 0, 1, 1], [], []>} : vector<16x16xf32>, vector<16x16xf32>, vector<16x16xf32> -> vector<16x16xf32>
    %cst_24 = arith.constant dense<0xFF800000> : vector<16xf32>
    %49 = vector.multi_reduction <maximumf>, %48, %cst_24 [1] : vector<16x16xf32> to vector<16xf32>
    %50 = vector.shape_cast %49 : vector<16xf32> to vector<16x1xf32>
    %51 = vector.broadcast %50 : vector<16x1xf32> to vector<16x16xf32>
    %52 = arith.subf %48, %51 : vector<16x16xf32>
    %53 = math.exp %52 : vector<16x16xf32>
    %cst_25 = arith.constant dense<0.000000e+00> : vector<16xf32>
    %54 = vector.multi_reduction <add>, %53, %cst_25 [1] : vector<16x16xf32> to vector<16xf32>
    %55 = vector.shape_cast %54 : vector<16xf32> to vector<16x1xf32>
    %56 = tpu.reciprocal %55 {approx = true} : vector<16x1xf32> -> vector<16x1xf32>
    %57 = vector.broadcast %56 : vector<16x1xf32> to vector<16x16xf32>
    %58 = arith.mulf %53, %57 : vector<16x16xf32>
    %cst_26 = arith.constant dense<0.000000e+00> : vector<16x16xf32>
    %59 = tpu.matmul %58, %46, %cst_26 {dimension_numbers = #tpu.dot_dimension_numbers<[1], [0], [0], [1], [0, 0, 1, 1], [], []>} : vector<16x16xf32>, vector<16x16xf32>, vector<16x16xf32> -> vector<16x16xf32>
    %60 = vector.extract_strided_slice %41 {offsets = [0, 16], sizes = [16, 16], strides = [1, 1]} : vector<16x64xf32> to vector<16x16xf32>
    %c1 = arith.constant 1 : index
    %c0_27 = arith.constant 0 : index
    %c0_28 = arith.constant 0 : index
    %61 = vector.load %arg18[%c1, %c0_27, %c0_28] : memref<4x16x16xf32, #tpu.memory_space<vmem>>, vector<1x16x16xf32>
    %62 = vector.shape_cast %61 : vector<1x16x16xf32> to vector<16x16xf32>
    %c1_29 = arith.constant 1 : index
    %c0_30 = arith.constant 0 : index
    %c0_31 = arith.constant 0 : index
    %63 = vector.load %arg19[%c1_29, %c0_30, %c0_31] : memref<4x16x16xf32, #tpu.memory_space<vmem>>, vector<1x16x16xf32>
    %64 = vector.shape_cast %63 : vector<1x16x16xf32> to vector<16x16xf32>
    %65 = tpu.transpose %62, [1, 0] : vector<16x16xf32> -> vector<16x16xf32>
    %cst_32 = arith.constant dense<0.000000e+00> : vector<16x16xf32>
    %66 = tpu.matmul %60, %65, %cst_32 {dimension_numbers = #tpu.dot_dimension_numbers<[1], [0], [0], [1], [0, 0, 1, 1], [], []>} : vector<16x16xf32>, vector<16x16xf32>, vector<16x16xf32> -> vector<16x16xf32>
    %cst_33 = arith.constant dense<0xFF800000> : vector<16xf32>
    %67 = vector.multi_reduction <maximumf>, %66, %cst_33 [1] : vector<16x16xf32> to vector<16xf32>
    %68 = vector.shape_cast %67 : vector<16xf32> to vector<16x1xf32>
    %69 = vector.broadcast %68 : vector<16x1xf32> to vector<16x16xf32>
    %70 = arith.subf %66, %69 : vector<16x16xf32>
    %71 = math.exp %70 : vector<16x16xf32>
    %cst_34 = arith.constant dense<0.000000e+00> : vector<16xf32>
    %72 = vector.multi_reduction <add>, %71, %cst_34 [1] : vector<16x16xf32> to vector<16xf32>
    %73 = vector.shape_cast %72 : vector<16xf32> to vector<16x1xf32>
    %74 = tpu.reciprocal %73 {approx = true} : vector<16x1xf32> -> vector<16x1xf32>
    %75 = vector.broadcast %74 : vector<16x1xf32> to vector<16x16xf32>
    %76 = arith.mulf %71, %75 : vector<16x16xf32>
    %cst_35 = arith.constant dense<0.000000e+00> : vector<16x16xf32>
    %77 = tpu.matmul %76, %64, %cst_35 {dimension_numbers = #tpu.dot_dimension_numbers<[1], [0], [0], [1], [0, 0, 1, 1], [], []>} : vector<16x16xf32>, vector<16x16xf32>, vector<16x16xf32> -> vector<16x16xf32>
    %78 = vector.extract_strided_slice %41 {offsets = [0, 32], sizes = [16, 16], strides = [1, 1]} : vector<16x64xf32> to vector<16x16xf32>
    %c2 = arith.constant 2 : index
    %c0_36 = arith.constant 0 : index
    %c0_37 = arith.constant 0 : index
    %79 = vector.load %arg18[%c2, %c0_36, %c0_37] : memref<4x16x16xf32, #tpu.memory_space<vmem>>, vector<1x16x16xf32>
    %80 = vector.shape_cast %79 : vector<1x16x16xf32> to vector<16x16xf32>
    %c2_38 = arith.constant 2 : index
    %c0_39 = arith.constant 0 : index
    %c0_40 = arith.constant 0 : index
    %81 = vector.load %arg19[%c2_38, %c0_39, %c0_40] : memref<4x16x16xf32, #tpu.memory_space<vmem>>, vector<1x16x16xf32>
    %82 = vector.shape_cast %81 : vector<1x16x16xf32> to vector<16x16xf32>
    %83 = tpu.transpose %80, [1, 0] : vector<16x16xf32> -> vector<16x16xf32>
    %cst_41 = arith.constant dense<0.000000e+00> : vector<16x16xf32>
    %84 = tpu.matmul %78, %83, %cst_41 {dimension_numbers = #tpu.dot_dimension_numbers<[1], [0], [0], [1], [0, 0, 1, 1], [], []>} : vector<16x16xf32>, vector<16x16xf32>, vector<16x16xf32> -> vector<16x16xf32>
    %cst_42 = arith.constant dense<0xFF800000> : vector<16xf32>
    %85 = vector.multi_reduction <maximumf>, %84, %cst_42 [1] : vector<16x16xf32> to vector<16xf32>
    %86 = vector.shape_cast %85 : vector<16xf32> to vector<16x1xf32>
    %87 = vector.broadcast %86 : vector<16x1xf32> to vector<16x16xf32>
    %88 = arith.subf %84, %87 : vector<16x16xf32>
    %89 = math.exp %88 : vector<16x16xf32>
    %cst_43 = arith.constant dense<0.000000e+00> : vector<16xf32>
    %90 = vector.multi_reduction <add>, %89, %cst_43 [1] : vector<16x16xf32> to vector<16xf32>
    %91 = vector.shape_cast %90 : vector<16xf32> to vector<16x1xf32>
    %92 = tpu.reciprocal %91 {approx = true} : vector<16x1xf32> -> vector<16x1xf32>
    %93 = vector.broadcast %92 : vector<16x1xf32> to vector<16x16xf32>
    %94 = arith.mulf %89, %93 : vector<16x16xf32>
    %cst_44 = arith.constant dense<0.000000e+00> : vector<16x16xf32>
    %95 = tpu.matmul %94, %82, %cst_44 {dimension_numbers = #tpu.dot_dimension_numbers<[1], [0], [0], [1], [0, 0, 1, 1], [], []>} : vector<16x16xf32>, vector<16x16xf32>, vector<16x16xf32> -> vector<16x16xf32>
    %96 = vector.extract_strided_slice %41 {offsets = [0, 48], sizes = [16, 16], strides = [1, 1]} : vector<16x64xf32> to vector<16x16xf32>
    %c3 = arith.constant 3 : index
    %c0_45 = arith.constant 0 : index
    %c0_46 = arith.constant 0 : index
    %97 = vector.load %arg18[%c3, %c0_45, %c0_46] : memref<4x16x16xf32, #tpu.memory_space<vmem>>, vector<1x16x16xf32>
    %98 = vector.shape_cast %97 : vector<1x16x16xf32> to vector<16x16xf32>
    %c3_47 = arith.constant 3 : index
    %c0_48 = arith.constant 0 : index
    %c0_49 = arith.constant 0 : index
    %99 = vector.load %arg19[%c3_47, %c0_48, %c0_49] : memref<4x16x16xf32, #tpu.memory_space<vmem>>, vector<1x16x16xf32>
    %100 = vector.shape_cast %99 : vector<1x16x16xf32> to vector<16x16xf32>
    %101 = tpu.transpose %98, [1, 0] : vector<16x16xf32> -> vector<16x16xf32>
    %cst_50 = arith.constant dense<0.000000e+00> : vector<16x16xf32>
    %102 = tpu.matmul %96, %101, %cst_50 {dimension_numbers = #tpu.dot_dimension_numbers<[1], [0], [0], [1], [0, 0, 1, 1], [], []>} : vector<16x16xf32>, vector<16x16xf32>, vector<16x16xf32> -> vector<16x16xf32>
    %cst_51 = arith.constant dense<0xFF800000> : vector<16xf32>
    %103 = vector.multi_reduction <maximumf>, %102, %cst_51 [1] : vector<16x16xf32> to vector<16xf32>
    %104 = vector.shape_cast %103 : vector<16xf32> to vector<16x1xf32>
    %105 = vector.broadcast %104 : vector<16x1xf32> to vector<16x16xf32>
    %106 = arith.subf %102, %105 : vector<16x16xf32>
    %107 = math.exp %106 : vector<16x16xf32>
    %cst_52 = arith.constant dense<0.000000e+00> : vector<16xf32>
    %108 = vector.multi_reduction <add>, %107, %cst_52 [1] : vector<16x16xf32> to vector<16xf32>
    %109 = vector.shape_cast %108 : vector<16xf32> to vector<16x1xf32>
    %110 = tpu.reciprocal %109 {approx = true} : vector<16x1xf32> -> vector<16x1xf32>
    %111 = vector.broadcast %110 : vector<16x1xf32> to vector<16x16xf32>
    %112 = arith.mulf %107, %111 : vector<16x16xf32>
    %cst_53 = arith.constant dense<0.000000e+00> : vector<16x16xf32>
    %113 = tpu.matmul %112, %100, %cst_53 {dimension_numbers = #tpu.dot_dimension_numbers<[1], [0], [0], [1], [0, 0, 1, 1], [], []>} : vector<16x16xf32>, vector<16x16xf32>, vector<16x16xf32> -> vector<16x16xf32>
    %114 = tpu.concatenate %59, %77, %95, %113 in 1 : vector<16x16xf32>, vector<16x16xf32>, vector<16x16xf32>, vector<16x16xf32> -> vector<16x64xf32>
    %c0_54 = arith.constant 0 : index
    %c0_55 = arith.constant 0 : index
    %115 = vector.load %arg9[%c0_54, %c0_55] : memref<64x64xf32, #tpu.memory_space<vmem>>, vector<64x64xf32>
    %cst_56 = arith.constant dense<0.000000e+00> : vector<16x64xf32>
    %116 = tpu.matmul %114, %115, %cst_56 {dimension_numbers = #tpu.dot_dimension_numbers<[1], [0], [0], [1], [0, 0, 1, 1], [], []>} : vector<16x64xf32>, vector<64x64xf32>, vector<16x64xf32> -> vector<16x64xf32>
    %c0_57 = arith.constant 0 : index
    %c0_58 = arith.constant 0 : index
    %117 = vector.load %arg10[%c0_57, %c0_58] : memref<1x64xf32, #tpu.memory_space<vmem>>, vector<1x64xf32>
    %118 = vector.shape_cast %117 : vector<1x64xf32> to vector<64xf32>
    %119 = vector.shape_cast %118 : vector<64xf32> to vector<1x64xf32>
    %120 = vector.broadcast %119 : vector<1x64xf32> to vector<16x64xf32>
    %121 = arith.addf %116, %120 : vector<16x64xf32>
    %122 = arith.addf %4, %121 : vector<16x64xf32>
    %cst_59 = arith.constant dense<0.000000e+00> : vector<16xf32>
    %123 = vector.multi_reduction <add>, %122, %cst_59 [1] : vector<16x64xf32> to vector<16xf32>
    %124 = vector.shape_cast %123 : vector<16xf32> to vector<16x1xf32>
    %cst_60 = arith.constant 6.400000e+01 : f32
    %125 = vector.broadcast %cst_60 : f32 to vector<16x1xf32>
    %126 = arith.divf %124, %125 : vector<16x1xf32>
    %127 = vector.broadcast %126 : vector<16x1xf32> to vector<16x64xf32>
    %128 = arith.subf %122, %127 : vector<16x64xf32>
    %129 = arith.mulf %128, %128 : vector<16x64xf32>
    %cst_61 = arith.constant dense<0.000000e+00> : vector<16xf32>
    %130 = vector.multi_reduction <add>, %129, %cst_61 [1] : vector<16x64xf32> to vector<16xf32>
    %131 = vector.shape_cast %130 : vector<16xf32> to vector<16x1xf32>
    %cst_62 = arith.constant 6.400000e+01 : f32
    %132 = vector.broadcast %cst_62 : f32 to vector<16x1xf32>
    %133 = arith.divf %131, %132 : vector<16x1xf32>
    %134 = vector.broadcast %126 : vector<16x1xf32> to vector<16x64xf32>
    %135 = arith.subf %122, %134 : vector<16x64xf32>
    %cst_63 = arith.constant 9.99999974E-6 : f32
    %136 = vector.broadcast %cst_63 : f32 to vector<16x1xf32>
    %137 = arith.addf %133, %136 : vector<16x1xf32>
    %138 = math.rsqrt %137 : vector<16x1xf32>
    %139 = vector.broadcast %138 : vector<16x1xf32> to vector<16x64xf32>
    %140 = arith.mulf %135, %139 : vector<16x64xf32>
    %c0_64 = arith.constant 0 : index
    %c0_65 = arith.constant 0 : index
    %141 = vector.load %arg11[%c0_64, %c0_65] : memref<1x64xf32, #tpu.memory_space<vmem>>, vector<1x64xf32>
    %142 = vector.shape_cast %141 : vector<1x64xf32> to vector<64xf32>
    %143 = vector.shape_cast %142 : vector<64xf32> to vector<1x64xf32>
    %144 = vector.broadcast %143 : vector<1x64xf32> to vector<16x64xf32>
    %145 = arith.mulf %140, %144 : vector<16x64xf32>
    %c0_66 = arith.constant 0 : index
    %c0_67 = arith.constant 0 : index
    %146 = vector.load %arg12[%c0_66, %c0_67] : memref<1x64xf32, #tpu.memory_space<vmem>>, vector<1x64xf32>
    %147 = vector.shape_cast %146 : vector<1x64xf32> to vector<64xf32>
    %148 = vector.shape_cast %147 : vector<64xf32> to vector<1x64xf32>
    %149 = vector.broadcast %148 : vector<1x64xf32> to vector<16x64xf32>
    %150 = arith.addf %145, %149 : vector<16x64xf32>
    %c0_68 = arith.constant 0 : index
    %c0_69 = arith.constant 0 : index
    %151 = vector.load %arg13[%c0_68, %c0_69] : memref<64x128xf32, #tpu.memory_space<vmem>>, vector<64x128xf32>
    %cst_70 = arith.constant dense<0.000000e+00> : vector<16x128xf32>
    %152 = tpu.matmul %150, %151, %cst_70 {dimension_numbers = #tpu.dot_dimension_numbers<[1], [0], [0], [1], [0, 0, 1, 1], [], []>} : vector<16x64xf32>, vector<64x128xf32>, vector<16x128xf32> -> vector<16x128xf32>
    %c0_71 = arith.constant 0 : index
    %c0_72 = arith.constant 0 : index
    %153 = vector.load %arg14[%c0_71, %c0_72] : memref<1x128xf32, #tpu.memory_space<vmem>>, vector<1x128xf32>
    %154 = vector.shape_cast %153 : vector<1x128xf32> to vector<128xf32>
    %155 = vector.shape_cast %154 : vector<128xf32> to vector<1x128xf32>
    %156 = vector.broadcast %155 : vector<1x128xf32> to vector<16x128xf32>
    %157 = arith.addf %152, %156 : vector<16x128xf32>
    %cst_73 = arith.constant 1.702000e+00 : f32
    %158 = vector.broadcast %cst_73 : f32 to vector<16x128xf32>
    %159 = arith.mulf %158, %157 : vector<16x128xf32>
    %160 = arith.negf %159 : vector<16x128xf32>
    %161 = math.exp %160 : vector<16x128xf32>
    %cst_74 = arith.constant 1.000000e+00 : f32
    %162 = vector.broadcast %cst_74 : f32 to vector<16x128xf32>
    %163 = arith.addf %162, %161 : vector<16x128xf32>
    %164 = arith.divf %162, %163 : vector<16x128xf32>
    %165 = arith.mulf %157, %164 : vector<16x128xf32>
    %c0_75 = arith.constant 0 : index
    %c0_76 = arith.constant 0 : index
    %166 = vector.load %arg15[%c0_75, %c0_76] : memref<128x64xf32, #tpu.memory_space<vmem>>, vector<128x64xf32>
    %cst_77 = arith.constant dense<0.000000e+00> : vector<16x64xf32>
    %167 = tpu.matmul %165, %166, %cst_77 {dimension_numbers = #tpu.dot_dimension_numbers<[1], [0], [0], [1], [0, 0, 1, 1], [], []>} : vector<16x128xf32>, vector<128x64xf32>, vector<16x64xf32> -> vector<16x64xf32>
    %c0_78 = arith.constant 0 : index
    %c0_79 = arith.constant 0 : index
    %168 = vector.load %arg16[%c0_78, %c0_79] : memref<1x64xf32, #tpu.memory_space<vmem>>, vector<1x64xf32>
    %169 = vector.shape_cast %168 : vector<1x64xf32> to vector<64xf32>
    %170 = vector.shape_cast %169 : vector<64xf32> to vector<1x64xf32>
    %171 = vector.broadcast %170 : vector<1x64xf32> to vector<16x64xf32>
    %172 = arith.addf %167, %171 : vector<16x64xf32>
    %173 = arith.addf %122, %172 : vector<16x64xf32>
    %c0_80 = arith.constant 0 : index
    %c0_81 = arith.constant 0 : index
    %c0_82 = arith.constant 0 : index
    %174 = vector.load %arg17[%c0_80, %c0_81, %c0_82] : memref<1x16x64xf32, #tpu.memory_space<vmem>>, vector<1x16x64xf32>
    %175 = vector.shape_cast %174 : vector<1x16x64xf32> to vector<16x64xf32>
    %176 = vector.shape_cast %173 : vector<16x64xf32> to vector<1x16x64xf32>
    tpu.vector_store %arg17[%c0_80, %c0_81, %c0_82], %176 {strides = array<i32>} : memref<1x16x64xf32, #tpu.memory_space<vmem>>, vector<1x16x64xf32>,
    return
  }
  func.func @transform_0(%arg0: i32, %arg1: i32) -> (i32, i32, i32) {
    %c0_i32 = arith.constant 0 : i32
    %c0_i32_0 = arith.constant 0 : i32
    %c0_i32_1 = arith.constant 0 : i32
    return %arg0, %c0_i32, %c0_i32_0 : i32, i32, i32
  }
  func.func @transform_1(%arg0: i32, %arg1: i32) -> (i32, i32) {
    %c0_i32 = arith.constant 0 : i32
    %c0_i32_0 = arith.constant 0 : i32
    %c0_i32_1 = arith.constant 0 : i32
    return %c0_i32, %c0_i32_0 : i32, i32
  }
  func.func @transform_2(%arg0: i32, %arg1: i32) -> (i32, i32) {
    %c0_i32 = arith.constant 0 : i32
    %c0_i32_0 = arith.constant 0 : i32
    %c0_i32_1 = arith.constant 0 : i32
    return %c0_i32, %c0_i32_0 : i32, i32
  }
  func.func @transform_3(%arg0: i32, %arg1: i32) -> (i32, i32) {
    %c0_i32 = arith.constant 0 : i32
    %c0_i32_0 = arith.constant 0 : i32
    %c0_i32_1 = arith.constant 0 : i32
    return %c0_i32, %c0_i32_0 : i32, i32
  }
  func.func @transform_4(%arg0: i32, %arg1: i32) -> (i32, i32) {
    %c0_i32 = arith.constant 0 : i32
    %c0_i32_0 = arith.constant 0 : i32
    %c0_i32_1 = arith.constant 0 : i32
    return %c0_i32, %c0_i32_0 : i32, i32
  }
  func.func @transform_5(%arg0: i32, %arg1: i32) -> (i32, i32) {
    %c0_i32 = arith.constant 0 : i32
    %c0_i32_0 = arith.constant 0 : i32
    %c0_i32_1 = arith.constant 0 : i32
    return %c0_i32, %c0_i32_0 : i32, i32
  }
  func.func @transform_6(%arg0: i32, %arg1: i32) -> (i32, i32) {
    %c0_i32 = arith.constant 0 : i32
    %c0_i32_0 = arith.constant 0 : i32
    %c0_i32_1 = arith.constant 0 : i32
    return %c0_i32, %c0_i32_0 : i32, i32
  }
  func.func @transform_7(%arg0: i32, %arg1: i32) -> (i32, i32) {
    %c0_i32 = arith.constant 0 : i32
    %c0_i32_0 = arith.constant 0 : i32
    %c0_i32_1 = arith.constant 0 : i32
    return %c0_i32, %c0_i32_0 : i32, i32
  }
  func.func @transform_8(%arg0: i32, %arg1: i32) -> (i32, i32) {
    %c0_i32 = arith.constant 0 : i32
    %c0_i32_0 = arith.constant 0 : i32
    %c0_i32_1 = arith.constant 0 : i32
    return %c0_i32, %c0_i32_0 : i32, i32
  }
  func.func @transform_9(%arg0: i32, %arg1: i32) -> (i32, i32) {
    %c0_i32 = arith.constant 0 : i32
    %c0_i32_0 = arith.constant 0 : i32
    %c0_i32_1 = arith.constant 0 : i32
    return %c0_i32, %c0_i32_0 : i32, i32
  }
  func.func @transform_10(%arg0: i32, %arg1: i32) -> (i32, i32) {
    %c0_i32 = arith.constant 0 : i32
    %c0_i32_0 = arith.constant 0 : i32
    %c0_i32_1 = arith.constant 0 : i32
    return %c0_i32, %c0_i32_0 : i32, i32
  }
  func.func @transform_11(%arg0: i32, %arg1: i32) -> (i32, i32) {
    %c0_i32 = arith.constant 0 : i32
    %c0_i32_0 = arith.constant 0 : i32
    %c0_i32_1 = arith.constant 0 : i32
    return %c0_i32, %c0_i32_0 : i32, i32
  }
  func.func @transform_12(%arg0: i32, %arg1: i32) -> (i32, i32) {
    %c0_i32 = arith.constant 0 : i32
    %c0_i32_0 = arith.constant 0 : i32
    %c0_i32_1 = arith.constant 0 : i32
    return %c0_i32, %c0_i32_0 : i32, i32
  }
  func.func @transform_13(%arg0: i32, %arg1: i32) -> (i32, i32) {
    %c0_i32 = arith.constant 0 : i32
    %c0_i32_0 = arith.constant 0 : i32
    %c0_i32_1 = arith.constant 0 : i32
    return %c0_i32, %c0_i32_0 : i32, i32
  }
  func.func @transform_14(%arg0: i32, %arg1: i32) -> (i32, i32) {
    %c0_i32 = arith.constant 0 : i32
    %c0_i32_0 = arith.constant 0 : i32
    %c0_i32_1 = arith.constant 0 : i32
    return %c0_i32, %c0_i32_0 : i32, i32
  }
  func.func @transform_15(%arg0: i32, %arg1: i32) -> (i32, i32, i32) {
    %c0_i32 = arith.constant 0 : i32
    %c0_i32_0 = arith.constant 0 : i32
    return %arg0, %arg1, %c0_i32 : i32, i32, i32
  }
}

module attributes {stable_mosaic.version = 11 : i64} {
  func.func @clip_layer_kernel(%arg0: i32, %arg1: i32, %arg2: memref<1x16x64xf32, #tpu.memory_space<vmem>>, %arg3: memref<1x64xf32, #tpu.memory_space<vmem>>, %arg4: memref<1x64xf32, #tpu.memory_space<vmem>>, %arg5: memref<64x64xf32, #tpu.memory_space<vmem>>, %arg6: memref<1x64xf32, #tpu.memory_space<vmem>>, %arg7: memref<64x128xf32, #tpu.memory_space<vmem>>, %arg8: memref<1x128xf32, #tpu.memory_space<vmem>>, %arg9: memref<64x64xf32, #tpu.memory_space<vmem>>, %arg10: memref<1x64xf32, #tpu.memory_space<vmem>>, %arg11: memref<1x64xf32, #tpu.memory_space<vmem>>, %arg12: memref<1x64xf32, #tpu.memory_space<vmem>>, %arg13: memref<64x128xf32, #tpu.memory_space<vmem>>, %arg14: memref<1x128xf32, #tpu.memory_space<vmem>>, %arg15: memref<128x64xf32, #tpu.memory_space<vmem>>, %arg16: memref<1x64xf32, #tpu.memory_space<vmem>>, %arg17: memref<1x16x64xf32, #tpu.memory_space<vmem>>, %arg18: memref<4x16x16xf32, #tpu.memory_space<vmem>>, %arg19: memref<4x16x16xf32, #tpu.memory_space<vmem>>, %arg20: memref<4x16x16xf32, #tpu.memory_space<vmem>>, %arg21: memref<4x16x16xf32, #tpu.memory_space<vmem>>) attributes {dimension_semantics = [#tpu.dimension_semantics<parallel>, #tpu.dimension_semantics<arbitrary>], iteration_bounds = array<i64: 2, 1>, scalar_prefetch = 0 : i64, scratch_operands = 4 : i64, tpu.core_type = #tpu.core_type<tc>, window_params = [{transform_indices = @transform_0, window_bounds = array<i64: 1, 16, 64>}, {pipeline_mode = #tpu.pipeline_mode<synchronous>, transform_indices = @transform_1, window_bounds = array<i64: 1, 64>}, {pipeline_mode = #tpu.pipeline_mode<synchronous>, transform_indices = @transform_2, window_bounds = array<i64: 1, 64>}, {pipeline_mode = #tpu.pipeline_mode<synchronous>, transform_indices = @transform_3, window_bounds = array<i64: 64, 64>}, {pipeline_mode = #tpu.pipeline_mode<synchronous>, transform_indices = @transform_4, window_bounds = array<i64: 1, 64>}, {pipeline_mode = #tpu.pipeline_mode<synchronous>, transform_indices = @transform_5, window_bounds = array<i64: 64, 128>}, {pipeline_mode = #tpu.pipeline_mode<synchronous>, transform_indices = @transform_6, window_bounds = array<i64: 1, 128>}, {pipeline_mode = #tpu.pipeline_mode<synchronous>, transform_indices = @transform_7, window_bounds = array<i64: 64, 64>}, {pipeline_mode = #tpu.pipeline_mode<synchronous>, transform_indices = @transform_8, window_bounds = array<i64: 1, 64>}, {pipeline_mode = #tpu.pipeline_mode<synchronous>, transform_indices = @transform_9, window_bounds = array<i64: 1, 64>}, {pipeline_mode = #tpu.pipeline_mode<synchronous>, transform_indices = @transform_10, window_bounds = array<i64: 1, 64>}, {pipeline_mode = #tpu.pipeline_mode<synchronous>, transform_indices = @transform_11, window_bounds = array<i64: 64, 128>}, {pipeline_mode = #tpu.pipeline_mode<synchronous>, transform_indices = @transform_12, window_bounds = array<i64: 1, 128>}, {pipeline_mode = #tpu.pipeline_mode<synchronous>, transform_indices = @transform_13, window_bounds = array<i64: 128, 64>}, {pipeline_mode = #tpu.pipeline_mode<synchronous>, transform_indices = @transform_14, window_bounds = array<i64: 1, 64>}, {transform_indices = @transform_15, window_bounds = array<i64: 1, 16, 64>}]} {
    %c0_i32 = arith.constant 0 : i32
    %0 = arith.cmpi eq, %arg1, %c0_i32 : i32
    %1 = arith.extui %0 : i1 to i32
    %c0_i32_0 = arith.constant 0 : i32
    %2 = arith.cmpi ne, %1, %c0_i32_0 : i32
    scf.if %2 {
      %c0_83 = arith.constant 0 : index
      %c0_84 = arith.constant 0 : index
      %c0_85 = arith.constant 0 : index
      %177 = vector.load %arg2[%c0_83, %c0_84, %c0_85] : memref<1x16x64xf32, #tpu.memory_space<vmem>>, vector<1x16x64xf32>
      %178 = vector.shape_cast %177 : vector<1x16x64xf32> to vector<16x64xf32>
      %cst_86 = arith.constant dense<0.000000e+00> : vector<16xf32>
      %179 = vector.multi_reduction <add>, %178, %cst_86 [1] : vector<16x64xf32> to vector<16xf32>
      %180 = vector.shape_cast %179 : vector<16xf32> to vector<16x1xf32>
      %cst_87 = arith.constant 6.400000e+01 : f32
      %181 = vector.broadcast %cst_87 : f32 to vector<16x1xf32>
      %182 = arith.divf %180, %181 : vector<16x1xf32>
      %183 = vector.broadcast %182 : vector<16x1xf32> to vector<16x64xf32>
      %184 = arith.subf %178, %183 : vector<16x64xf32>
      %185 = arith.mulf %184, %184 : vector<16x64xf32>
      %cst_88 = arith.constant dense<0.000000e+00> : vector<16xf32>
      %186 = vector.multi_reduction <add>, %185, %cst_88 [1] : vector<16x64xf32> to vector<16xf32>
      %187 = vector.shape_cast %186 : vector<16xf32> to vector<16x1xf32>
      %cst_89 = arith.constant 6.400000e+01 : f32
      %188 = vector.broadcast %cst_89 : f32 to vector<16x1xf32>
      %189 = arith.divf %187, %188 : vector<16x1xf32>
      %190 = vector.broadcast %182 : vector<16x1xf32> to vector<16x64xf32>
      %191 = arith.subf %178, %190 : vector<16x64xf32>
      %cst_90 = arith.constant 9.99999974E-6 : f32
      %192 = vector.broadcast %cst_90 : f32 to vector<16x1xf32>
      %193 = arith.addf %189, %192 : vector<16x1xf32>
      %194 = math.rsqrt %193 : vector<16x1xf32>
      %195 = vector.broadcast %194 : vector<16x1xf32> to vector<16x64xf32>
      %196 = arith.mulf %191, %195 : vector<16x64xf32>
      %c0_91 = arith.constant 0 : index
      %c0_92 = arith.constant 0 : index
      %197 = vector.load %arg3[%c0_91, %c0_92] : memref<1x64xf32, #tpu.memory_space<vmem>>, vector<1x64xf32>
      %198 = vector.shape_cast %197 : vector<1x64xf32> to vector<64xf32>
      %199 = vector.shape_cast %198 : vector<64xf32> to vector<1x64xf32>
      %200 = vector.broadcast %199 : vector<1x64xf32> to vector<16x64xf32>
      %201 = arith.mulf %196, %200 : vector<16x64xf32>
      %c0_93 = arith.constant 0 : index
      %c0_94 = arith.constant 0 : index
      %202 = vector.load %arg4[%c0_93, %c0_94] : memref<1x64xf32, #tpu.memory_space<vmem>>, vector<1x64xf32>
      %203 = vector.shape_cast %202 : vector<1x64xf32> to vector<64xf32>
      %204 = vector.shape_cast %203 : vector<64xf32> to vector<1x64xf32>
      %205 = vector.broadcast %204 : vector<1x64xf32> to vector<16x64xf32>
      %206 = arith.addf %201, %205 : vector<16x64xf32>
      %c0_95 = arith.constant 0 : index
      %c0_96 = arith.constant 0 : index
      %207 = vector.load %arg7[%c0_95, %c0_96] : memref<64x128xf32, #tpu.memory_space<vmem>>, vector<64x128xf32>
      %cst_97 = arith.constant dense<0.000000e+00> : vector<16x128xf32>
      %208 = tpu.matmul %206, %207, %cst_97 {dimension_numbers = #tpu.dot_dimension_numbers<[1], [0], [0], [1], [0, 0, 1, 1], [], []>} : vector<16x64xf32>, vector<64x128xf32>, vector<16x128xf32> -> vector<16x128xf32>
      %c0_98 = arith.constant 0 : index
      %c0_99 = arith.constant 0 : index
      %209 = vector.load %arg8[%c0_98, %c0_99] : memref<1x128xf32, #tpu.memory_space<vmem>>, vector<1x128xf32>
      %210 = vector.shape_cast %209 : vector<1x128xf32> to vector<128xf32>
      %211 = vector.shape_cast %210 : vector<128xf32> to vector<1x128xf32>
      %212 = vector.broadcast %211 : vector<1x128xf32> to vector<16x128xf32>
      %213 = arith.addf %208, %212 : vector<16x128xf32>
      %214 = vector.extract_strided_slice %213 {offsets = [0, 0], sizes = [16, 16], strides = [1, 1]} : vector<16x128xf32> to vector<16x16xf32>
      %c0_100 = arith.constant 0 : index
      %c0_101 = arith.constant 0 : index
      %c0_102 = arith.constant 0 : index
      %215 = vector.load %arg18[%c0_100, %c0_101, %c0_102] : memref<4x16x16xf32, #tpu.memory_space<vmem>>, vector<1x16x16xf32>
      %216 = vector.shape_cast %215 : vector<1x16x16xf32> to vector<16x16xf32>
      %217 = vector.shape_cast %214 : vector<16x16xf32> to vector<1x16x16xf32>
      tpu.vector_store %arg18[%c0_100, %c0_101, %c0_102], %217 {strides = array<i32>} : memref<4x16x16xf32, #tpu.memory_space<vmem>>, vector<1x16x16xf32>,
      %218 = vector.extract_strided_slice %213 {offsets = [0, 64], sizes = [16, 16], strides = [1, 1]} : vector<16x128xf32> to vector<16x16xf32>
      %c0_103 = arith.constant 0 : index
      %c0_104 = arith.constant 0 : index
      %c0_105 = arith.constant 0 : index
      %219 = vector.load %arg19[%c0_103, %c0_104, %c0_105] : memref<4x16x16xf32, #tpu.memory_space<vmem>>, vector<1x16x16xf32>
      %220 = vector.shape_cast %219 : vector<1x16x16xf32> to vector<16x16xf32>
      %221 = vector.shape_cast %218 : vector<16x16xf32> to vector<1x16x16xf32>
      tpu.vector_store %arg19[%c0_103, %c0_104, %c0_105], %221 {strides = array<i32>} : memref<4x16x16xf32, #tpu.memory_space<vmem>>, vector<1x16x16xf32>,
      %222 = vector.extract_strided_slice %213 {offsets = [0, 16], sizes = [16, 16], strides = [1, 1]} : vector<16x128xf32> to vector<16x16xf32>
      %c1_106 = arith.constant 1 : index
      %c0_107 = arith.constant 0 : index
      %c0_108 = arith.constant 0 : index
      %223 = vector.load %arg18[%c1_106, %c0_107, %c0_108] : memref<4x16x16xf32, #tpu.memory_space<vmem>>, vector<1x16x16xf32>
      %224 = vector.shape_cast %223 : vector<1x16x16xf32> to vector<16x16xf32>
      %225 = vector.shape_cast %222 : vector<16x16xf32> to vector<1x16x16xf32>
      tpu.vector_store %arg18[%c1_106, %c0_107, %c0_108], %225 {strides = array<i32>} : memref<4x16x16xf32, #tpu.memory_space<vmem>>, vector<1x16x16xf32>,
      %226 = vector.extract_strided_slice %213 {offsets = [0, 80], sizes = [16, 16], strides = [1, 1]} : vector<16x128xf32> to vector<16x16xf32>
      %c1_109 = arith.constant 1 : index
      %c0_110 = arith.constant 0 : index
      %c0_111 = arith.constant 0 : index
      %227 = vector.load %arg19[%c1_109, %c0_110, %c0_111] : memref<4x16x16xf32, #tpu.memory_space<vmem>>, vector<1x16x16xf32>
      %228 = vector.shape_cast %227 : vector<1x16x16xf32> to vector<16x16xf32>
      %229 = vector.shape_cast %226 : vector<16x16xf32> to vector<1x16x16xf32>
      tpu.vector_store %arg19[%c1_109, %c0_110, %c0_111], %229 {strides = array<i32>} : memref<4x16x16xf32, #tpu.memory_space<vmem>>, vector<1x16x16xf32>,
      %230 = vector.extract_strided_slice %213 {offsets = [0, 32], sizes = [16, 16], strides = [1, 1]} : vector<16x128xf32> to vector<16x16xf32>
      %c2_112 = arith.constant 2 : index
      %c0_113 = arith.constant 0 : index
      %c0_114 = arith.constant 0 : index
      %231 = vector.load %arg18[%c2_112, %c0_113, %c0_114] : memref<4x16x16xf32, #tpu.memory_space<vmem>>, vector<1x16x16xf32>
      %232 = vector.shape_cast %231 : vector<1x16x16xf32> to vector<16x16xf32>
      %233 = vector.shape_cast %230 : vector<16x16xf32> to vector<1x16x16xf32>
      tpu.vector_store %arg18[%c2_112, %c0_113, %c0_114], %233 {strides = array<i32>} : memref<4x16x16xf32, #tpu.memory_space<vmem>>, vector<1x16x16xf32>,
      %234 = vector.extract_strided_slice %213 {offsets = [0, 96], sizes = [16, 16], strides = [1, 1]} : vector<16x128xf32> to vector<16x16xf32>
      %c2_115 = arith.constant 2 : index
      %c0_116 = arith.constant 0 : index
      %c0_117 = arith.constant 0 : index
      %235 = vector.load %arg19[%c2_115, %c0_116, %c0_117] : memref<4x16x16xf32, #tpu.memory_space<vmem>>, vector<1x16x16xf32>
      %236 = vector.shape_cast %235 : vector<1x16x16xf32> to vector<16x16xf32>
      %237 = vector.shape_cast %234 : vector<16x16xf32> to vector<1x16x16xf32>
      tpu.vector_store %arg19[%c2_115, %c0_116, %c0_117], %237 {strides = array<i32>} : memref<4x16x16xf32, #tpu.memory_space<vmem>>, vector<1x16x16xf32>,
      %238 = vector.extract_strided_slice %213 {offsets = [0, 48], sizes = [16, 16], strides = [1, 1]} : vector<16x128xf32> to vector<16x16xf32>
      %c3_118 = arith.constant 3 : index
      %c0_119 = arith.constant 0 : index
      %c0_120 = arith.constant 0 : index
      %239 = vector.load %arg18[%c3_118, %c0_119, %c0_120] : memref<4x16x16xf32, #tpu.memory_space<vmem>>, vector<1x16x16xf32>
      %240 = vector.shape_cast %239 : vector<1x16x16xf32> to vector<16x16xf32>
      %241 = vector.shape_cast %238 : vector<16x16xf32> to vector<1x16x16xf32>
      tpu.vector_store %arg18[%c3_118, %c0_119, %c0_120], %241 {strides = array<i32>} : memref<4x16x16xf32, #tpu.memory_space<vmem>>, vector<1x16x16xf32>,
      %242 = vector.extract_strided_slice %213 {offsets = [0, 112], sizes = [16, 16], strides = [1, 1]} : vector<16x128xf32> to vector<16x16xf32>
      %c3_121 = arith.constant 3 : index
      %c0_122 = arith.constant 0 : index
      %c0_123 = arith.constant 0 : index
      %243 = vector.load %arg19[%c3_121, %c0_122, %c0_123] : memref<4x16x16xf32, #tpu.memory_space<vmem>>, vector<1x16x16xf32>
      %244 = vector.shape_cast %243 : vector<1x16x16xf32> to vector<16x16xf32>
      %245 = vector.shape_cast %242 : vector<16x16xf32> to vector<1x16x16xf32>
      tpu.vector_store %arg19[%c3_121, %c0_122, %c0_123], %245 {strides = array<i32>} : memref<4x16x16xf32, #tpu.memory_space<vmem>>, vector<1x16x16xf32>,
    } else {
    }
    %c0 = arith.constant 0 : index
    %c0_1 = arith.constant 0 : index
    %c0_2 = arith.constant 0 : index
    %3 = vector.load %arg2[%c0, %c0_1, %c0_2] : memref<1x16x64xf32, #tpu.memory_space<vmem>>, vector<1x16x64xf32>
    %4 = vector.shape_cast %3 : vector<1x16x64xf32> to vector<16x64xf32>
    %cst = arith.constant dense<0.000000e+00> : vector<16xf32>
    %5 = vector.multi_reduction <add>, %4, %cst [1] : vector<16x64xf32> to vector<16xf32>
    %6 = vector.shape_cast %5 : vector<16xf32> to vector<16x1xf32>
    %cst_3 = arith.constant 6.400000e+01 : f32
    %7 = vector.broadcast %cst_3 : f32 to vector<16x1xf32>
    %8 = arith.divf %6, %7 : vector<16x1xf32>
    %9 = vector.broadcast %8 : vector<16x1xf32> to vector<16x64xf32>
    %10 = arith.subf %4, %9 : vector<16x64xf32>
    %11 = arith.mulf %10, %10 : vector<16x64xf32>
    %cst_4 = arith.constant dense<0.000000e+00> : vector<16xf32>
    %12 = vector.multi_reduction <add>, %11, %cst_4 [1] : vector<16x64xf32> to vector<16xf32>
    %13 = vector.shape_cast %12 : vector<16xf32> to vector<16x1xf32>
    %cst_5 = arith.constant 6.400000e+01 : f32
    %14 = vector.broadcast %cst_5 : f32 to vector<16x1xf32>
    %15 = arith.divf %13, %14 : vector<16x1xf32>
    %16 = vector.broadcast %8 : vector<16x1xf32> to vector<16x64xf32>
    %17 = arith.subf %4, %16 : vector<16x64xf32>
    %cst_6 = arith.constant 9.99999974E-6 : f32
    %18 = vector.broadcast %cst_6 : f32 to vector<16x1xf32>
    %19 = arith.addf %15, %18 : vector<16x1xf32>
    %20 = math.rsqrt %19 : vector<16x1xf32>
    %21 = vector.broadcast %20 : vector<16x1xf32> to vector<16x64xf32>
    %22 = arith.mulf %17, %21 : vector<16x64xf32>
    %c0_7 = arith.constant 0 : index
    %c0_8 = arith.constant 0 : index
    %23 = vector.load %arg3[%c0_7, %c0_8] : memref<1x64xf32, #tpu.memory_space<vmem>>, vector<1x64xf32>
    %24 = vector.shape_cast %23 : vector<1x64xf32> to vector<64xf32>
    %25 = vector.shape_cast %24 : vector<64xf32> to vector<1x64xf32>
    %26 = vector.broadcast %25 : vector<1x64xf32> to vector<16x64xf32>
    %27 = arith.mulf %22, %26 : vector<16x64xf32>
    %c0_9 = arith.constant 0 : index
    %c0_10 = arith.constant 0 : index
    %28 = vector.load %arg4[%c0_9, %c0_10] : memref<1x64xf32, #tpu.memory_space<vmem>>, vector<1x64xf32>
    %29 = vector.shape_cast %28 : vector<1x64xf32> to vector<64xf32>
    %30 = vector.shape_cast %29 : vector<64xf32> to vector<1x64xf32>
    %31 = vector.broadcast %30 : vector<1x64xf32> to vector<16x64xf32>
    %32 = arith.addf %27, %31 : vector<16x64xf32>
    %c0_11 = arith.constant 0 : index
    %c0_12 = arith.constant 0 : index
    %33 = vector.load %arg5[%c0_11, %c0_12] : memref<64x64xf32, #tpu.memory_space<vmem>>, vector<64x64xf32>
    %cst_13 = arith.constant dense<0.000000e+00> : vector<16x64xf32>
    %34 = tpu.matmul %32, %33, %cst_13 {dimension_numbers = #tpu.dot_dimension_numbers<[1], [0], [0], [1], [0, 0, 1, 1], [], []>} : vector<16x64xf32>, vector<64x64xf32>, vector<16x64xf32> -> vector<16x64xf32>
    %c0_14 = arith.constant 0 : index
    %c0_15 = arith.constant 0 : index
    %35 = vector.load %arg6[%c0_14, %c0_15] : memref<1x64xf32, #tpu.memory_space<vmem>>, vector<1x64xf32>
    %36 = vector.shape_cast %35 : vector<1x64xf32> to vector<64xf32>
    %37 = vector.shape_cast %36 : vector<64xf32> to vector<1x64xf32>
    %38 = vector.broadcast %37 : vector<1x64xf32> to vector<16x64xf32>
    %39 = arith.addf %34, %38 : vector<16x64xf32>
    %cst_16 = arith.constant 2.500000e-01 : f32
    %40 = vector.broadcast %cst_16 : f32 to vector<16x64xf32>
    %41 = arith.mulf %39, %40 : vector<16x64xf32>
    %42 = vector.extract_strided_slice %41 {offsets = [0, 0], sizes = [16, 16], strides = [1, 1]} : vector<16x64xf32> to vector<16x16xf32>
    %c0_17 = arith.constant 0 : index
    %c0_18 = arith.constant 0 : index
    %c0_19 = arith.constant 0 : index
    %43 = vector.load %arg18[%c0_17, %c0_18, %c0_19] : memref<4x16x16xf32, #tpu.memory_space<vmem>>, vector<1x16x16xf32>
    %44 = vector.shape_cast %43 : vector<1x16x16xf32> to vector<16x16xf32>
    %c0_20 = arith.constant 0 : index
    %c0_21 = arith.constant 0 : index
    %c0_22 = arith.constant 0 : index
    %45 = vector.load %arg19[%c0_20, %c0_21, %c0_22] : memref<4x16x16xf32, #tpu.memory_space<vmem>>, vector<1x16x16xf32>
    %46 = vector.shape_cast %45 : vector<1x16x16xf32> to vector<16x16xf32>
    %47 = tpu.transpose %44, [1, 0] : vector<16x16xf32> -> vector<16x16xf32>
    %cst_23 = arith.constant dense<0.000000e+00> : vector<16x16xf32>
    %48 = tpu.matmul %42, %47, %cst_23 {dimension_numbers = #tpu.dot_dimension_numbers<[1], [0], [0], [1], [0, 0, 1, 1], [], []>} : vector<16x16xf32>, vector<16x16xf32>, vector<16x16xf32> -> vector<16x16xf32>
    %cst_24 = arith.constant dense<0xFF800000> : vector<16xf32>
    %49 = vector.multi_reduction <maximumf>, %48, %cst_24 [1] : vector<16x16xf32> to vector<16xf32>
    %50 = vector.shape_cast %49 : vector<16xf32> to vector<16x1xf32>
    %51 = vector.broadcast %50 : vector<16x1xf32> to vector<16x16xf32>
    %52 = arith.subf %48, %51 : vector<16x16xf32>
    %53 = math.exp %52 : vector<16x16xf32>
    %cst_25 = arith.constant dense<0.000000e+00> : vector<16xf32>
    %54 = vector.multi_reduction <add>, %53, %cst_25 [1] : vector<16x16xf32> to vector<16xf32>
    %55 = vector.shape_cast %54 : vector<16xf32> to vector<16x1xf32>
    %56 = tpu.reciprocal %55 {approx = true} : vector<16x1xf32> -> vector<16x1xf32>
    %57 = vector.broadcast %56 : vector<16x1xf32> to vector<16x16xf32>
    %58 = arith.mulf %53, %57 : vector<16x16xf32>
    %cst_26 = arith.constant dense<0.000000e+00> : vector<16x16xf32>
    %59 = tpu.matmul %58, %46, %cst_26 {dimension_numbers = #tpu.dot_dimension_numbers<[1], [0], [0], [1], [0, 0, 1, 1], [], []>} : vector<16x16xf32>, vector<16x16xf32>, vector<16x16xf32> -> vector<16x16xf32>
    %60 = vector.extract_strided_slice %41 {offsets = [0, 16], sizes = [16, 16], strides = [1, 1]} : vector<16x64xf32> to vector<16x16xf32>
    %c1 = arith.constant 1 : index
    %c0_27 = arith.constant 0 : index
    %c0_28 = arith.constant 0 : index
    %61 = vector.load %arg18[%c1, %c0_27, %c0_28] : memref<4x16x16xf32, #tpu.memory_space<vmem>>, vector<1x16x16xf32>
    %62 = vector.shape_cast %61 : vector<1x16x16xf32> to vector<16x16xf32>
    %c1_29 = arith.constant 1 : index
    %c0_30 = arith.constant 0 : index
    %c0_31 = arith.constant 0 : index
    %63 = vector.load %arg19[%c1_29, %c0_30, %c0_31] : memref<4x16x16xf32, #tpu.memory_space<vmem>>, vector<1x16x16xf32>
    %64 = vector.shape_cast %63 : vector<1x16x16xf32> to vector<16x16xf32>
    %65 = tpu.transpose %62, [1, 0] : vector<16x16xf32> -> vector<16x16xf32>
    %cst_32 = arith.constant dense<0.000000e+00> : vector<16x16xf32>
    %66 = tpu.matmul %60, %65, %cst_32 {dimension_numbers = #tpu.dot_dimension_numbers<[1], [0], [0], [1], [0, 0, 1, 1], [], []>} : vector<16x16xf32>, vector<16x16xf32>, vector<16x16xf32> -> vector<16x16xf32>
    %cst_33 = arith.constant dense<0xFF800000> : vector<16xf32>
    %67 = vector.multi_reduction <maximumf>, %66, %cst_33 [1] : vector<16x16xf32> to vector<16xf32>
    %68 = vector.shape_cast %67 : vector<16xf32> to vector<16x1xf32>
    %69 = vector.broadcast %68 : vector<16x1xf32> to vector<16x16xf32>
    %70 = arith.subf %66, %69 : vector<16x16xf32>
    %71 = math.exp %70 : vector<16x16xf32>
    %cst_34 = arith.constant dense<0.000000e+00> : vector<16xf32>
    %72 = vector.multi_reduction <add>, %71, %cst_34 [1] : vector<16x16xf32> to vector<16xf32>
    %73 = vector.shape_cast %72 : vector<16xf32> to vector<16x1xf32>
    %74 = tpu.reciprocal %73 {approx = true} : vector<16x1xf32> -> vector<16x1xf32>
    %75 = vector.broadcast %74 : vector<16x1xf32> to vector<16x16xf32>
    %76 = arith.mulf %71, %75 : vector<16x16xf32>
    %cst_35 = arith.constant dense<0.000000e+00> : vector<16x16xf32>
    %77 = tpu.matmul %76, %64, %cst_35 {dimension_numbers = #tpu.dot_dimension_numbers<[1], [0], [0], [1], [0, 0, 1, 1], [], []>} : vector<16x16xf32>, vector<16x16xf32>, vector<16x16xf32> -> vector<16x16xf32>
    %78 = vector.extract_strided_slice %41 {offsets = [0, 32], sizes = [16, 16], strides = [1, 1]} : vector<16x64xf32> to vector<16x16xf32>
    %c2 = arith.constant 2 : index
    %c0_36 = arith.constant 0 : index
    %c0_37 = arith.constant 0 : index
    %79 = vector.load %arg18[%c2, %c0_36, %c0_37] : memref<4x16x16xf32, #tpu.memory_space<vmem>>, vector<1x16x16xf32>
    %80 = vector.shape_cast %79 : vector<1x16x16xf32> to vector<16x16xf32>
    %c2_38 = arith.constant 2 : index
    %c0_39 = arith.constant 0 : index
    %c0_40 = arith.constant 0 : index
    %81 = vector.load %arg19[%c2_38, %c0_39, %c0_40] : memref<4x16x16xf32, #tpu.memory_space<vmem>>, vector<1x16x16xf32>
    %82 = vector.shape_cast %81 : vector<1x16x16xf32> to vector<16x16xf32>
    %83 = tpu.transpose %80, [1, 0] : vector<16x16xf32> -> vector<16x16xf32>
    %cst_41 = arith.constant dense<0.000000e+00> : vector<16x16xf32>
    %84 = tpu.matmul %78, %83, %cst_41 {dimension_numbers = #tpu.dot_dimension_numbers<[1], [0], [0], [1], [0, 0, 1, 1], [], []>} : vector<16x16xf32>, vector<16x16xf32>, vector<16x16xf32> -> vector<16x16xf32>
    %cst_42 = arith.constant dense<0xFF800000> : vector<16xf32>
    %85 = vector.multi_reduction <maximumf>, %84, %cst_42 [1] : vector<16x16xf32> to vector<16xf32>
    %86 = vector.shape_cast %85 : vector<16xf32> to vector<16x1xf32>
    %87 = vector.broadcast %86 : vector<16x1xf32> to vector<16x16xf32>
    %88 = arith.subf %84, %87 : vector<16x16xf32>
    %89 = math.exp %88 : vector<16x16xf32>
    %cst_43 = arith.constant dense<0.000000e+00> : vector<16xf32>
    %90 = vector.multi_reduction <add>, %89, %cst_43 [1] : vector<16x16xf32> to vector<16xf32>
    %91 = vector.shape_cast %90 : vector<16xf32> to vector<16x1xf32>
    %92 = tpu.reciprocal %91 {approx = true} : vector<16x1xf32> -> vector<16x1xf32>
    %93 = vector.broadcast %92 : vector<16x1xf32> to vector<16x16xf32>
    %94 = arith.mulf %89, %93 : vector<16x16xf32>
    %cst_44 = arith.constant dense<0.000000e+00> : vector<16x16xf32>
    %95 = tpu.matmul %94, %82, %cst_44 {dimension_numbers = #tpu.dot_dimension_numbers<[1], [0], [0], [1], [0, 0, 1, 1], [], []>} : vector<16x16xf32>, vector<16x16xf32>, vector<16x16xf32> -> vector<16x16xf32>
    %96 = vector.extract_strided_slice %41 {offsets = [0, 48], sizes = [16, 16], strides = [1, 1]} : vector<16x64xf32> to vector<16x16xf32>
    %c3 = arith.constant 3 : index
    %c0_45 = arith.constant 0 : index
    %c0_46 = arith.constant 0 : index
    %97 = vector.load %arg18[%c3, %c0_45, %c0_46] : memref<4x16x16xf32, #tpu.memory_space<vmem>>, vector<1x16x16xf32>
    %98 = vector.shape_cast %97 : vector<1x16x16xf32> to vector<16x16xf32>
    %c3_47 = arith.constant 3 : index
    %c0_48 = arith.constant 0 : index
    %c0_49 = arith.constant 0 : index
    %99 = vector.load %arg19[%c3_47, %c0_48, %c0_49] : memref<4x16x16xf32, #tpu.memory_space<vmem>>, vector<1x16x16xf32>
    %100 = vector.shape_cast %99 : vector<1x16x16xf32> to vector<16x16xf32>
    %101 = tpu.transpose %98, [1, 0] : vector<16x16xf32> -> vector<16x16xf32>
    %cst_50 = arith.constant dense<0.000000e+00> : vector<16x16xf32>
    %102 = tpu.matmul %96, %101, %cst_50 {dimension_numbers = #tpu.dot_dimension_numbers<[1], [0], [0], [1], [0, 0, 1, 1], [], []>} : vector<16x16xf32>, vector<16x16xf32>, vector<16x16xf32> -> vector<16x16xf32>
    %cst_51 = arith.constant dense<0xFF800000> : vector<16xf32>
    %103 = vector.multi_reduction <maximumf>, %102, %cst_51 [1] : vector<16x16xf32> to vector<16xf32>
    %104 = vector.shape_cast %103 : vector<16xf32> to vector<16x1xf32>
    %105 = vector.broadcast %104 : vector<16x1xf32> to vector<16x16xf32>
    %106 = arith.subf %102, %105 : vector<16x16xf32>
    %107 = math.exp %106 : vector<16x16xf32>
    %cst_52 = arith.constant dense<0.000000e+00> : vector<16xf32>
    %108 = vector.multi_reduction <add>, %107, %cst_52 [1] : vector<16x16xf32> to vector<16xf32>
    %109 = vector.shape_cast %108 : vector<16xf32> to vector<16x1xf32>
    %110 = tpu.reciprocal %109 {approx = true} : vector<16x1xf32> -> vector<16x1xf32>
    %111 = vector.broadcast %110 : vector<16x1xf32> to vector<16x16xf32>
    %112 = arith.mulf %107, %111 : vector<16x16xf32>
    %cst_53 = arith.constant dense<0.000000e+00> : vector<16x16xf32>
    %113 = tpu.matmul %112, %100, %cst_53 {dimension_numbers = #tpu.dot_dimension_numbers<[1], [0], [0], [1], [0, 0, 1, 1], [], []>} : vector<16x16xf32>, vector<16x16xf32>, vector<16x16xf32> -> vector<16x16xf32>
    %114 = tpu.concatenate %59, %77, %95, %113 in 1 : vector<16x16xf32>, vector<16x16xf32>, vector<16x16xf32>, vector<16x16xf32> -> vector<16x64xf32>
    %c0_54 = arith.constant 0 : index
    %c0_55 = arith.constant 0 : index
    %115 = vector.load %arg9[%c0_54, %c0_55] : memref<64x64xf32, #tpu.memory_space<vmem>>, vector<64x64xf32>
    %cst_56 = arith.constant dense<0.000000e+00> : vector<16x64xf32>
    %116 = tpu.matmul %114, %115, %cst_56 {dimension_numbers = #tpu.dot_dimension_numbers<[1], [0], [0], [1], [0, 0, 1, 1], [], []>} : vector<16x64xf32>, vector<64x64xf32>, vector<16x64xf32> -> vector<16x64xf32>
    %c0_57 = arith.constant 0 : index
    %c0_58 = arith.constant 0 : index
    %117 = vector.load %arg10[%c0_57, %c0_58] : memref<1x64xf32, #tpu.memory_space<vmem>>, vector<1x64xf32>
    %118 = vector.shape_cast %117 : vector<1x64xf32> to vector<64xf32>
    %119 = vector.shape_cast %118 : vector<64xf32> to vector<1x64xf32>
    %120 = vector.broadcast %119 : vector<1x64xf32> to vector<16x64xf32>
    %121 = arith.addf %116, %120 : vector<16x64xf32>
    %122 = arith.addf %4, %121 : vector<16x64xf32>
    %cst_59 = arith.constant dense<0.000000e+00> : vector<16xf32>
    %123 = vector.multi_reduction <add>, %122, %cst_59 [1] : vector<16x64xf32> to vector<16xf32>
    %124 = vector.shape_cast %123 : vector<16xf32> to vector<16x1xf32>
    %cst_60 = arith.constant 6.400000e+01 : f32
    %125 = vector.broadcast %cst_60 : f32 to vector<16x1xf32>
    %126 = arith.divf %124, %125 : vector<16x1xf32>
    %127 = vector.broadcast %126 : vector<16x1xf32> to vector<16x64xf32>
    %128 = arith.subf %122, %127 : vector<16x64xf32>
    %129 = arith.mulf %128, %128 : vector<16x64xf32>
    %cst_61 = arith.constant dense<0.000000e+00> : vector<16xf32>
    %130 = vector.multi_reduction <add>, %129, %cst_61 [1] : vector<16x64xf32> to vector<16xf32>
    %131 = vector.shape_cast %130 : vector<16xf32> to vector<16x1xf32>
    %cst_62 = arith.constant 6.400000e+01 : f32
    %132 = vector.broadcast %cst_62 : f32 to vector<16x1xf32>
    %133 = arith.divf %131, %132 : vector<16x1xf32>
    %134 = vector.broadcast %126 : vector<16x1xf32> to vector<16x64xf32>
    %135 = arith.subf %122, %134 : vector<16x64xf32>
    %cst_63 = arith.constant 9.99999974E-6 : f32
    %136 = vector.broadcast %cst_63 : f32 to vector<16x1xf32>
    %137 = arith.addf %133, %136 : vector<16x1xf32>
    %138 = math.rsqrt %137 : vector<16x1xf32>
    %139 = vector.broadcast %138 : vector<16x1xf32> to vector<16x64xf32>
    %140 = arith.mulf %135, %139 : vector<16x64xf32>
    %c0_64 = arith.constant 0 : index
    %c0_65 = arith.constant 0 : index
    %141 = vector.load %arg11[%c0_64, %c0_65] : memref<1x64xf32, #tpu.memory_space<vmem>>, vector<1x64xf32>
    %142 = vector.shape_cast %141 : vector<1x64xf32> to vector<64xf32>
    %143 = vector.shape_cast %142 : vector<64xf32> to vector<1x64xf32>
    %144 = vector.broadcast %143 : vector<1x64xf32> to vector<16x64xf32>
    %145 = arith.mulf %140, %144 : vector<16x64xf32>
    %c0_66 = arith.constant 0 : index
    %c0_67 = arith.constant 0 : index
    %146 = vector.load %arg12[%c0_66, %c0_67] : memref<1x64xf32, #tpu.memory_space<vmem>>, vector<1x64xf32>
    %147 = vector.shape_cast %146 : vector<1x64xf32> to vector<64xf32>
    %148 = vector.shape_cast %147 : vector<64xf32> to vector<1x64xf32>
    %149 = vector.broadcast %148 : vector<1x64xf32> to vector<16x64xf32>
    %150 = arith.addf %145, %149 : vector<16x64xf32>
    %c0_68 = arith.constant 0 : index
    %c0_69 = arith.constant 0 : index
    %151 = vector.load %arg13[%c0_68, %c0_69] : memref<64x128xf32, #tpu.memory_space<vmem>>, vector<64x128xf32>
    %cst_70 = arith.constant dense<0.000000e+00> : vector<16x128xf32>
    %152 = tpu.matmul %150, %151, %cst_70 {dimension_numbers = #tpu.dot_dimension_numbers<[1], [0], [0], [1], [0, 0, 1, 1], [], []>} : vector<16x64xf32>, vector<64x128xf32>, vector<16x128xf32> -> vector<16x128xf32>
    %c0_71 = arith.constant 0 : index
    %c0_72 = arith.constant 0 : index
    %153 = vector.load %arg14[%c0_71, %c0_72] : memref<1x128xf32, #tpu.memory_space<vmem>>, vector<1x128xf32>
    %154 = vector.shape_cast %153 : vector<1x128xf32> to vector<128xf32>
    %155 = vector.shape_cast %154 : vector<128xf32> to vector<1x128xf32>
    %156 = vector.broadcast %155 : vector<1x128xf32> to vector<16x128xf32>
    %157 = arith.addf %152, %156 : vector<16x128xf32>
    %cst_73 = arith.constant 1.702000e+00 : f32
    %158 = vector.broadcast %cst_73 : f32 to vector<16x128xf32>
    %159 = arith.mulf %158, %157 : vector<16x128xf32>
    %160 = arith.negf %159 : vector<16x128xf32>
    %161 = math.exp %160 : vector<16x128xf32>
    %cst_74 = arith.constant 1.000000e+00 : f32
    %162 = vector.broadcast %cst_74 : f32 to vector<16x128xf32>
    %163 = arith.addf %162, %161 : vector<16x128xf32>
    %164 = arith.divf %162, %163 : vector<16x128xf32>
    %165 = arith.mulf %157, %164 : vector<16x128xf32>
    %c0_75 = arith.constant 0 : index
    %c0_76 = arith.constant 0 : index
    %166 = vector.load %arg15[%c0_75, %c0_76] : memref<128x64xf32, #tpu.memory_space<vmem>>, vector<128x64xf32>
    %cst_77 = arith.constant dense<0.000000e+00> : vector<16x64xf32>
    %167 = tpu.matmul %165, %166, %cst_77 {dimension_numbers = #tpu.dot_dimension_numbers<[1], [0], [0], [1], [0, 0, 1, 1], [], []>} : vector<16x128xf32>, vector<128x64xf32>, vector<16x64xf32> -> vector<16x64xf32>
    %c0_78 = arith.constant 0 : index
    %c0_79 = arith.constant 0 : index
    %168 = vector.load %arg16[%c0_78, %c0_79] : memref<1x64xf32, #tpu.memory_space<vmem>>, vector<1x64xf32>
    %169 = vector.shape_cast %168 : vector<1x64xf32> to vector<64xf32>
    %170 = vector.shape_cast %169 : vector<64xf32> to vector<1x64xf32>
    %171 = vector.broadcast %170 : vector<1x64xf32> to vector<16x64xf32>
    %172 = arith.addf %167, %171 : vector<16x64xf32>
    %173 = arith.addf %122, %172 : vector<16x64xf32>
    %c0_80 = arith.constant 0 : index
    %c0_81 = arith.constant 0 : index
    %c0_82 = arith.constant 0 : index
    %174 = vector.load %arg17[%c0_80, %c0_81, %c0_82] : memref<1x16x64xf32, #tpu.memory_space<vmem>>, vector<1x16x64xf32>
    %175 = vector.shape_cast %174 : vector<1x16x64xf32> to vector<16x64xf32>
    %176 = vector.shape_cast %173 : vector<16x64xf32> to vector<1x16x64xf32>
    tpu.vector_store %arg17[%c0_80, %c0_81, %c0_82], %176 {strides = array<i32>} : memref<1x16x64xf32, #tpu.memory_space<vmem>>, vector<1x16x64xf32>,
    return
  }
  func.func @transform_0(%arg0: i32, %arg1: i32) -> (i32, i32, i32) {
    %c0_i32 = arith.constant 0 : i32
    %c0_i32_0 = arith.constant 0 : i32
    %c0_i32_1 = arith.constant 0 : i32
    return %arg0, %c0_i32, %c0_i32_0 : i32, i32, i32
  }
  func.func @transform_1(%arg0: i32, %arg1: i32) -> (i32, i32) {
    %c0_i32 = arith.constant 0 : i32
    %c0_i32_0 = arith.constant 0 : i32
    %c0_i32_1 = arith.constant 0 : i32
    return %c0_i32, %c0_i32_0 : i32, i32
  }
  func.func @transform_2(%arg0: i32, %arg1: i32) -> (i32, i32) {
    %c0_i32 = arith.constant 0 : i32
    %c0_i32_0 = arith.constant 0 : i32
    %c0_i32_1 = arith.constant 0 : i32
    return %c0_i32, %c0_i32_0 : i32, i32
  }
  func.func @transform_3(%arg0: i32, %arg1: i32) -> (i32, i32) {
    %c0_i32 = arith.constant 0 : i32
    %c0_i32_0 = arith.constant 0 : i32
    %c0_i32_1 = arith.constant 0 : i32
    return %c0_i32, %c0_i32_0 : i32, i32
  }
  func.func @transform_4(%arg0: i32, %arg1: i32) -> (i32, i32) {
    %c0_i32 = arith.constant 0 : i32
    %c0_i32_0 = arith.constant 0 : i32
    %c0_i32_1 = arith.constant 0 : i32
    return %c0_i32, %c0_i32_0 : i32, i32
  }
  func.func @transform_5(%arg0: i32, %arg1: i32) -> (i32, i32) {
    %c0_i32 = arith.constant 0 : i32
    %c0_i32_0 = arith.constant 0 : i32
    %c0_i32_1 = arith.constant 0 : i32
    return %c0_i32, %c0_i32_0 : i32, i32
  }
  func.func @transform_6(%arg0: i32, %arg1: i32) -> (i32, i32) {
    %c0_i32 = arith.constant 0 : i32
    %c0_i32_0 = arith.constant 0 : i32
    %c0_i32_1 = arith.constant 0 : i32
    return %c0_i32, %c0_i32_0 : i32, i32
  }
  func.func @transform_7(%arg0: i32, %arg1: i32) -> (i32, i32) {
    %c0_i32 = arith.constant 0 : i32
    %c0_i32_0 = arith.constant 0 : i32
    %c0_i32_1 = arith.constant 0 : i32
    return %c0_i32, %c0_i32_0 : i32, i32
  }
  func.func @transform_8(%arg0: i32, %arg1: i32) -> (i32, i32) {
    %c0_i32 = arith.constant 0 : i32
    %c0_i32_0 = arith.constant 0 : i32
    %c0_i32_1 = arith.constant 0 : i32
    return %c0_i32, %c0_i32_0 : i32, i32
  }
  func.func @transform_9(%arg0: i32, %arg1: i32) -> (i32, i32) {
    %c0_i32 = arith.constant 0 : i32
    %c0_i32_0 = arith.constant 0 : i32
    %c0_i32_1 = arith.constant 0 : i32
    return %c0_i32, %c0_i32_0 : i32, i32
  }
  func.func @transform_10(%arg0: i32, %arg1: i32) -> (i32, i32) {
    %c0_i32 = arith.constant 0 : i32
    %c0_i32_0 = arith.constant 0 : i32
    %c0_i32_1 = arith.constant 0 : i32
    return %c0_i32, %c0_i32_0 : i32, i32
  }
  func.func @transform_11(%arg0: i32, %arg1: i32) -> (i32, i32) {
    %c0_i32 = arith.constant 0 : i32
    %c0_i32_0 = arith.constant 0 : i32
    %c0_i32_1 = arith.constant 0 : i32
    return %c0_i32, %c0_i32_0 : i32, i32
  }
  func.func @transform_12(%arg0: i32, %arg1: i32) -> (i32, i32) {
    %c0_i32 = arith.constant 0 : i32
    %c0_i32_0 = arith.constant 0 : i32
    %c0_i32_1 = arith.constant 0 : i32
    return %c0_i32, %c0_i32_0 : i32, i32
  }
  func.func @transform_13(%arg0: i32, %arg1: i32) -> (i32, i32) {
    %c0_i32 = arith.constant 0 : i32
    %c0_i32_0 = arith.constant 0 : i32
    %c0_i32_1 = arith.constant 0 : i32
    return %c0_i32, %c0_i32_0 : i32, i32
  }
  func.func @transform_14(%arg0: i32, %arg1: i32) -> (i32, i32) {
    %c0_i32 = arith.constant 0 : i32
    %c0_i32_0 = arith.constant 0 : i32
    %c0_i32_1 = arith.constant 0 : i32
    return %c0_i32, %c0_i32_0 : i32, i32
  }
  func.func @transform_15(%arg0: i32, %arg1: i32) -> (i32, i32, i32) {
    %c0_i32 = arith.constant 0 : i32
    %c0_i32_0 = arith.constant 0 : i32
    return %arg0, %arg1, %c0_i32 : i32, i32, i32
  }
}

</mosaic_0001>

<bundles_post_ra>
// kernel: tpu_custom_call.1
= control target key start
LH: loop header
LB: loop body
LE: loop exit
PB: predicated region body
PF: predicated region fallthrough
CT: control target
= control target key end

     0   :  { %s4745_s0 = inlined_call_operand.hbm [shape: f32[2,16,64], index: 0, kind: input, shape index: {}]   ;;  %s4746_s1 = inlined_call_operand.hbm [shape: f32[1,64], index: 1, kind: input, shape index: {}]   ;;  %s4747_s2 = inlined_call_operand.vmem [shape: f32[1,64], index: 2, kind: input, shape index: {}]   ;;  %s4748_s3 = inlined_call_operand.vmem [shape: f32[64,64], index: 3, kind: input, shape index: {}]   ;;  %s4749_s4 = inlined_call_operand.vmem [shape: f32[1,64], index: 4, kind: input, shape index: {}]   ;;  %s4750_s5 = inlined_call_operand.vmem [shape: f32[64,128], index: 5, kind: input, shape index: {}]   ;;  %s4751_s6 = inlined_call_operand.vmem [shape: f32[1,128], index: 6, kind: input, shape index: {}]   ;;  %s4752_s7 = inlined_call_operand.vmem [shape: f32[64,64], index: 7, kind: input, shape index: {}]   ;;  %s4753_s8 = inlined_call_operand.vmem [shape: f32[1,64], index: 8, kind: input, shape index: {}]   ;;  %s4754_s9 = inlined_call_operand.vmem [shape: f32[1,64], index: 9, kind: input, shape index: {}]   ;;  %s4755_s10 = inlined_call_operand.vmem [shape: f32[1,64], index: 10, kind: input, shape index: {}]   ;;  %s4756_s11 = inlined_call_operand.hbm [shape: f32[64,128], index: 11, kind: input, shape index: {}]   ;;  %s4757_s12 = inlined_call_operand.vmem [shape: f32[1,128], index: 12, kind: input, shape index: {}]   ;;  %s4758_s13 = inlined_call_operand.vmem [shape: f32[128,64], index: 13, kind: input, shape index: {}]   ;;  %s4759_s14 = inlined_call_operand.vmem [shape: f32[1,64], index: 14, kind: input, shape index: {}]   ;;  %s4760_s15 = inlined_call_operand.hbm [shape: f32[2,16,64], index: 15, kind: output, shape index: {}]  }
   0x1   :  { %4775 = sst [smem:[#allocation21_spill]] %s4746_s1 }
   0x2   :  { %4776 = sst [smem:[#allocation22_spill]] %s4753_s8 }
   0x3   :  { %4777 = sst [smem:[#allocation23_spill]] %s4754_s9 }
   0x4   :  { %4778 = sst [smem:[#allocation24_spill]] %s4755_s10 }
   0x5   :  { %4779 = sst [smem:[#allocation25_spill]] %s4757_s12 }
   0x6   :  { %4780 = sst [smem:[#allocation26_spill]] %s4758_s13 }
   0x7   :  { %4781 = sst [smem:[#allocation27_spill]] %s4759_s14 }
   0x8   :  { %4782 = sst [smem:[#allocation28_spill]] %s4760_s15 }
   0x9   :  { %20 = vsyncpa [#allocation7], 0 }
   0xa   :  { %22 = vsyncpa [#allocation7 + $0x1], 0 }
   0xb   :  { %23 = vsyncpa [#allocation10], 0 }
   0xc   :  { %24 = vsyncpa [#allocation8], 0 }
   0xd   :  { %26 = vsyncpa [#allocation8 + $0x1], 0  ;;  %s4054_s18 = smov 0   ;;  %s4056_s19 = smov 0  }
   0xe   :  { %s4058_s20 = smov 0   ;;  %s4060_s21 = smov 0  }
   0xf   :  { %s4062_s22 = smov 0   ;;  %s4064_s23 = smov 0  }
  0x10 LB: > { %4783 = sst [smem:[#allocation16_spill]] %s3935_s18  ;;  %s3302_s24 = sadd.s32 4294967295, %s3955_s23   ;;  %s3955_s23 = sphi %s4064_s23, %s32_s23   ;;  %s3951_s22 = sphi %s4062_s22, %s4822_s22   ;;  %s3947_s21 = sphi %s4060_s21, %s4821_s21   ;;  %s3943_s20 = sphi %s4058_s20, %s4820_s20   ;;  %s3939_s19 = sphi %s4056_s19, %s4819_s19   ;;  %s3935_s18 = sphi %s4054_s18, %s4818_s18  }
  0x11   : > { %4784 = sst [smem:[#allocation17_spill]] %s3947_s21  ;;  %s3303_s25 = sadd.s32 4294967294, %s3955_s23  }
  0x12   : > { %4785 = sst [smem:[#allocation18_spill]] %s3955_s23  ;;  %p58_p0 = scmp.ne.s32.totalorder %s3943_s20, %s3939_s19 }
  0x13   : > { %p59_p1 = scmp.eq.s32.totalorder %s3955_s23, 0  ;;  %p64_p2 = scmp.ne.s32.totalorder %s3939_s19, %s3935_s18 }
  0x14   : > { %p4091_p3 = scmp.eq.s32.totalorder %s3302_s24, 0  ;;  %p384_p4 = scmp.eq.s32.totalorder %s3302_s24, 1 }
  0x15   : > { %p4095_p5 = por %p59_p1, %p58_p0  ;;  %p390_p6 = scmp.eq.s32.totalorder %s3303_s25, 1 }
  0x16   : > { %s4786_s26 = scalar_select %p4091_p3, 1, 0 }
  0x17   : > { %p4101_p7 = por %p4091_p3, %p64_p2  ;;  %p4105_p8 = por %p384_p4, %p58_p0 }
  0x18   : > { %p4109_p9 = por %p390_p6, %p64_p2  ;;  %p3304_p10 = scmp.ge.s32.totalorder %s3955_s23, 1 }
  0x19   : > { %s4788_s28 = scalar_select %p4101_p7, 1, 0 }
  0x1a   : > { %s4789_s29 = scalar_select %p4105_p8, 1, 0 }
  0x1b   : > { %s4791_s30 = scalar_select %p4109_p9, 1, 0 }
  0x1c   : > { %4790 = sst [smem:[#allocation19_spill]] %s4789_s29  ;;  %p397_p11 = scmp.lt.s32.totalorder %s3955_s23, 3 }
  0x1d   : > { %4792 = sst [smem:[#allocation20_spill]] %s4791_s30  ;;  %s3957_s17 = smov [#allocation9]  }
  0x1e   : > { %p4116_p13 = pnand %p3304_p10, %p397_p11  ;;  %s410_s24 = sshll.u32 %s3957_s17, 4  ;;  %s411_s24 = int_to_ptr.vmem [resolvable:$true] %s410_s24 }
  0x1f   : > { %p3670_p1 = scmp.lt.s32.totalorder %s3955_s23, 2  ;;  %s3958_s30 = smov [#allocation11]  }
  0x20   : > { %s4793_s16 = scalar_select %p4116_p13, 1, 0 }
  0x21   : > { %p3653_p0 = pneg %p4116_p13  ;;  %p4125_p4 = pnand %p3670_p1, %p4095_p5 }
  0x22   : > { %s447_s18 = sshll.u32 %s3958_s30, 4  ;;  %s3802_s17 = scalar_lea.vmem %s411_s24, 16  ;;  %s448_s18 = int_to_ptr.vmem [resolvable:$true] %s447_s18 }
  0x23   : > { %s4794_s25 = scalar_select %p4125_p4, 1, 0 }
  0x24   : > { %p4131_p2 = pnand %p3653_p0, %p4091_p3  ;;  %p3803_p10 = scmp.ne.s32.totalorder %s411_s24, %s3802_s17 }
  0x25   : > { %s3809_s27 = scalar_lea.vmem %s411_s24, 32  ;;  %p3810_p1 = scmp.lt.s32.totalorder %s411_s24, %s411_s24 }
  0x26   : > { %p3793_p6 = pneg %p4131_p2  ;;  %p3811_p12 = scmp.lt.s32.totalorder %s3809_s27, %s3802_s17 }
  0x28   : > { %p3805_p5 = pnand %p3803_p10, %p3793_p6  ;;  %p3812_p9 = por %p3811_p12, %p3810_p1 }
  0x2a   : > { %p3806_p11 = pneg %p3805_p5 }
  0x2c   : > { %p3813_p8 = pnand %p3812_p9, %p3806_p11 }
  0x2e   : > { %3816 = shalt.err (!%p3813_p8)
}
  0x2f   : > { %s4796_s1 = sld [smem:[#allocation21_spill]]  ;;  %s3828_s29 = scalar_lea.vmem %s448_s18, 1024 }
  0x30   : > { %p3829_p0 = scmp.ne.s32.totalorder %s448_s18, %s3828_s29  ;;  %p3836_p5 = scmp.lt.s32.totalorder %s448_s18, %s448_s18 }
  0x31   : > { %p3837_p7 = scmp.lt.s32.totalorder %s3828_s29, %s3828_s29 }
  0x32   : > { %p3831_p3 = pnand %p3829_p0, %p3793_p6 }
  0x33   : > { %p3838_p13 = por %p3837_p7, %p3836_p5 }
  0x34   : > { %p3832_p10 = pneg %p3831_p3 }
  0x35   : > { %3656 = dma.hbm_to_vmem [thread:$0]  (!%p4131_p2), %s4796_s1, 16, %s411_s24, [#allocation10]  }
  0x36   : > { %p3839_p4 = pnand %p3838_p13, %p3832_p10 }
  0x38   : > { %3842 = shalt.err (!%p3839_p4)
}
  0x39   : > { %s3959_s17 = smov 128   ;;  %s3960_s23 = smov 8  }
  0x3a   : > { %3659 = dma.hbm_to_vmem [thread:$0]  (!%p4131_p2), %s4756_s11, 1024, %s448_s18, [#allocation10], %s3959_s17, %s3959_s17, %s3960_s23  }
  0x3b   : > { %s470_s29 = sand.u32 1, %s3943_s20   ;;  %s44_s30 = sadd.s32 1, %s3951_s22 }
  0x3c   : > { %s3308_s1 = sshll.u32 %s470_s29, 4  ;;  %p46_p3 = scmp.ge.s32.totalorder %s44_s30, 2 }
  0x3d   : > { %s3382_s14 = sshll.u32 %s3951_s22, 8  ;;  %s474_s21 = scalar_lea.vmem [#allocation6], %s3308_s1 }
  0x3e   : > { %s481_s12 = sshll.u32 %s474_s21, 4  ;;  %s4824_s30 = smov (%p46_p3, %s44_s30), 0  ;;  %s482_s12 = int_to_ptr.vmem [resolvable:$true] %s481_s12 }
  0x3f   : > { %s480_s15 = scalar_lea.hbm %s4745_s0, %s3382_s14  ;;  %s51_s9 = sadd.s32 1, %s3943_s20 }
  0x40   : > { %s48_s8 = ssub.s32 %s3951_s22, %s4824_s30  ;;  %s471_s18 = scalar_lea.sflag [#allocation7], %s470_s29 }
  0x41   : > { %p4167_p7 = scmp.eq.s32.totalorder %s48_s8, 0  ;;  %p4798_p8 = scmp.ne.s32.totalorder %s4794_s25, 0 }
  0x42   : > { %s3856_s27 = scalar_lea.vmem %s482_s12, 256  ;;  %s3961_s1 = smov [#allocation6]  }
  0x43   : > { %p3845_p9 = pneg %p4798_p8  ;;  %p3857_p12 = scmp.ne.s32.totalorder %s482_s12, %s3856_s27 }
  0x44   : > { %s3861_s21 = sshll.u32 %s3961_s1, 4  ;;  %s3862_s21 = int_to_ptr.vmem [resolvable:$false] %s3861_s21 }
  0x45   : > { %p3859_p13 = pnand %p3857_p12, %p3845_p9  ;;  %s3863_s10 = scalar_lea.vmem %s3862_s21, 512 }
  0x46   : > { %p3864_p2 = scmp.lt.s32.totalorder %s482_s12, %s3862_s21  ;;  %p3865_p6 = scmp.lt.s32.totalorder %s3863_s10, %s3856_s27 }
  0x47   : > { %p3860_p4 = pneg %p3859_p13 }
  0x48   : > { %p3866_p11 = por %p3865_p6, %p3864_p2 }
  0x4a   : > { %p3867_p1 = pnand %p3866_p11, %p3860_p4 }
  0x4c   : > { %3870 = shalt.err (!%p3867_p1)
}
  0x4d   : > { %3663 = dma.hbm_to_vmem [thread:$0]  (!%p4798_p8), %s480_s15, 256, %s482_s12, %s471_s18, %s3959_s17, %s3959_s17, %s3960_s23  }
  0x4e   : > { %s4181_s8 = scalar_select %p4167_p7, %s3943_s20, %s51_s9  }
  0x4f   : > { %p4799_p0 = scmp.ne.s32.totalorder %s4793_s16, 0 }
  0x50   : > { %s4186_s13 = sand.u32 (!%p4799_p0), 1, %s3939_s19   ;;  %p4800_p10 = scmp.ne.s32.totalorder (!%p4799_p0), %s4788_s28, 0 }
  0x51   : > { %493 = sbr.rel (%p4799_p0) target bundleno = 2586 (0xa1a), region = 80  ;;  %s3312_s14 = sshll.u32 (!%p4799_p0), %s4186_s13, 4 }
  0x52   : > { %s496_s25 = scalar_lea.sflag (!%p4799_p0), [#allocation7], %s4186_s13  ;;  %s4192_s29 = scalar_lea.vmem (!%p4799_p0), [#allocation6], %s3312_s14 }
  0x56   : > { %3922 = dma.done.wait (%p4800_p10), %s496_s25, 256  }
  0x57   : > { %3924 = vsyncadd (%p4800_p10), %s496_s25, 4294967040  ;;  %p4801_p5 = scmp.ne.s32.totalorder %s4786_s26, 0 }
  0x59   : > { %3926 = dma.done.wait (%p4801_p5), [#allocation10], 1040  }
  0x5a   : > { %3928 = vsyncadd (%p4801_p5), [#allocation10], 4294966256  ;;  %vm561_vm0 = vcmask 523264   ;;  %v559_v0 = vld [vmem:[%s4192_s29] sm:$0xff]  ;;  %v560_v1 = vld [vmem:[%s4192_s29 + $0x8] sm:$0xff]  ;;  %s3962_s23 = smov 96  }
  0x5b   : > { %v562_v2 = vsel %vm561_vm0, %v559_v0, 0.0  ;;  %v565_v3 = vsel %vm561_vm0, %v560_v1, 0.0  ;;  %v614_v24 = vld [vmem:[%s4750_s5 + $0x38] sm:$0xff]  ;;  %v613_v25 = vld [vmem:[%s4750_s5 + $0x30] sm:$0xff]  ;;  %v612_v26 = vld [vmem:[%s4750_s5 + $0x28] sm:$0xff]  ;;  %s3963_s15 = smov 112  }
  0x5c   : > { %563 = vadd.xlane.f32.xlu0 %v562_v2  ;;  %1312 = vadd.xlane.f32.xlu1 %v562_v2  ;;  %v611_v27 = vld [vmem:[%s4750_s5 + $0x20] sm:$0xff]  ;;  %v610_v28 = vld [vmem:[%s4750_s5 + $0x18] sm:$0xff]  ;;  %v609_v29 = vld [vmem:[%s4750_s5 + $0x10] sm:$0xff]  ;;  %s3964_s24 = smov 80   ;;  %vm995_vm1 = vcmask 130048   ;;  %s3967_s1 = smov 64  }
  0x5d   : > { %3474 = vmatprep.subr.mxu1 %v614_v24  ;;  %v608_v30 = vld [vmem:[%s4750_s5 + $0x8] sm:$0xff]  ;;  %v607_v31 = vld [vmem:[%s4750_s5] sm:$0xff]  ;;  %v1363_v32 = vld [vmem:[%s4748_s3 + $0x38] sm:$0xff]  ;;  %s3968_s10 = smov 16   ;;  %s3969_s25 = smov 32   ;;  %vm2824_vm2 = vcmask 392192  }
  0x5e   : > { %3475 = vmatpush3.msra.mxu1 %v614_v24  ;;  %v3316_v46 = vld [vmem:[#allocation9] ss:$0 sm:$0xff]  ;;  %v1362_v58 = vld [vmem:[%s4748_s3 + $0x30] sm:$0xff]  ;;  %v1361_v60 = vld [vmem:[%s4748_s3 + $0x28] sm:$0xff]  ;;  %s3970_s9 = smov 48   ;;  %vm2821_vm3 = vcmask 261120  }
  0x5f   : > { %3476 = vmatprep.subr.mxu1 %v613_v25  ;;  %v3317_v48 = vld [vmem:[%s4747_s2] ss:$0 sm:$0xff]  ;;  %v1359_v63 = vld [vmem:[%s4748_s3 + $0x18] sm:$0xff]  ;;  %v1357_v2 = vld [vmem:[%s4748_s3 + $0x8] sm:$0xff]  ;;  %s4802_s28 = sld [smem:[#allocation22_spill]] }
  0x60   : > { %566 = vadd.xlane.f32.xlu0 %v565_v3  ;;  %1315 = vadd.xlane.f32.xlu1 %v565_v3  ;;  %v1360_v62 = vld [vmem:[%s4748_s3 + $0x20] sm:$0xff]  ;;  %s4803_s17 = sld [smem:[#allocation23_spill]] }
  0x61   : > { %3477 = vmatpush3.msra.mxu1 %v613_v25  ;;  %s4810_s18 = sld [smem:[#allocation28_spill]] }
  0x62   : > { %3478 = vmatprep.subr.mxu1 %v612_v26 }
  0x63   : > { %3479 = vmatpush3.msra.mxu1 %v612_v26 }
  0x64   : > { %3480 = vmatprep.subr.mxu1 %v611_v27 }
  0x65   : > { %3481 = vmatpush3.msra.mxu1 %v611_v27 }
  0x66   : > { %3482 = vmatprep.subr.mxu1 %v610_v28 }
  0x67   : > { %3483 = vmatpush3.msra.mxu1 %v610_v28  ;;  %s4811_s27 = smov %s4810_s18 }
  0x68   : > { %3484 = vmatprep.subr.mxu1 %v609_v29 }
  0x69   : > { %3485 = vmatpush3.msra.mxu1 %v609_v29 }
  0x6a   : > { %3486 = vmatprep.subr.mxu1 %v608_v30 }
  0x6b   : > { %3487 = vmatpush3.msra.mxu1 %v608_v30 }
  0x6c   : > { %3488 = vmatprep.subr.mxu1 %v607_v31 }
  0x6d   : > { %3489 = vmatpush3.msra.mxu1 %v607_v31 }
  0x6e   : > { %3493 = vmatprep.subr.mxu1 %v1363_v32 }
  0xe5   : > { %v564_v4 = vpop.xlane.xlu0 %563  ;;  %v1313_v5 = vpop.xlane.xlu1 %1312 }
  0xe6   : > { %v569_v6 = vmul.f32 0.015625, %v564_v4  ;;  %v1318_v7 = vmul.f32 0.015625, %v1313_v5  ;;  %v1356_v4 = vld [vmem:[%s4748_s3] sm:$0xff] }
  0xe8   : > { %v4206_v8 = vsub.f32 %v559_v0, %v569_v6  ;;  %v4208_v9 = vsub.f32 %v559_v0, %v1318_v7  ;;  %v3318_v6 = vld [vmem:[%s4751_s6] ss:$0 sm:$0xff] }
  0xe9   : > { %v567_v10 = vpop.xlane.xlu0 %566  ;;  %v1316_v11 = vpop.xlane.xlu1 %1315 }
  0xea   : > { %v570_v12 = vmul.f32 0.015625, %v567_v10  ;;  %v1319_v13 = vmul.f32 0.015625, %v1316_v11  ;;  %v573_v14 = vmul.f32 %v4206_v8, %v4206_v8  ;;  %v1322_v15 = vmul.f32 %v4208_v9, %v4208_v9  ;;  %v3331_v11 = vld [vmem:[%s4749_s4] ss:$0 sm:$0xff] }
  0xec   : > { %v572_v16 = vsub.f32 %v560_v1, %v570_v12  ;;  %v4214_v17 = vsub.f32 %v560_v1, %v1319_v13  ;;  %v575_v18 = vsel %vm561_vm0, %v573_v14, 0.0  ;;  %v1324_v19 = vsel %vm561_vm0, %v1322_v15, 0.0  ;;  %v1358_v1 = vld [vmem:[%s4748_s3 + $0x10] sm:$0xff] }
  0xed   : > { %576 = vadd.xlane.f32.xlu0 %v575_v18  ;;  %v3965_v18 = vmov 1983009808  }
  0xee   : > { %v574_v20 = vmul.f32 %v572_v16, %v572_v16  ;;  %v1323_v21 = vmul.f32 %v4214_v17, %v4214_v17 }
  0xf0   : > { %v578_v22 = vsel %vm561_vm0, %v574_v20, 0.0  ;;  %v1327_v23 = vsel %vm561_vm0, %v1323_v21, 0.0  ;;  %v728_v20 = vlaneseq  ;;  %v3966_v21 = vmov 1934713408  }
  0xf1   : > { %1325 = vadd.xlane.f32.xlu0 %v1324_v19  ;;  %579 = vadd.xlane.f32.xlu1 %v578_v22  ;;  %v726_v19 = vunpack.c.l.s4 %v3965_v18  ;;  %v758_v22 = vunpack.c.l.s4 %v3966_v21 }
  0xf2   : > { %v729_v24 = vshrl.u32 %v728_v20, 7 }
  0xf3   : > { %v759_v26 = vunpack.c.0.s8 %v758_v22 }
  0xf5   : > { %1328 = vadd.xlane.f32.xlu1 %v1327_v23  ;;  %v727_v23 = vunpack.c.0.s8 %v726_v19 }
  0xf7   : > { %v4308_v27 = vsub.s32 %v727_v23, %v729_v24 }
 0x176   : > { %v577_v33 = vpop.xlane.xlu0 %576 }
 0x177   : > { %v581_v34 = vmul.f32 0.015625, %v577_v33 }
 0x179   : > { %v583_v35 = vadd.f32 1e-05, %v581_v34  ;;  %v4322_v34 = vsub.s32 %v759_v26, %v729_v24 }
 0x17a   : > { %v580_v36 = vpop.xlane.xlu1 %579  ;;  %v1326_v37 = vpop.xlane.xlu0 %1325 }
 0x17b   : > { %3737 = vrsqrt.f32 %v583_v35  ;;  %v582_v38 = vmul.f32 0.015625, %v580_v36  ;;  %v1330_v39 = vmul.f32 0.015625, %v1326_v37 }
 0x17d   : > { %v584_v40 = vadd.f32 1e-05, %v582_v38  ;;  %v1332_v41 = vadd.f32 1e-05, %v1330_v39 }
 0x17e   : > { %v1329_v42 = vpop.xlane.xlu1 %1328 }
 0x17f   : > { %3739 = vrsqrt.f32 %v584_v40  ;;  %v1331_v43 = vmul.f32 0.015625, %v1329_v42 }
 0x180   : > { %3741 = vrsqrt.f32 %v1332_v41 }
 0x181   : > { %v1333_v44 = vadd.f32 1e-05, %v1331_v43 }
 0x183   : > { %3743 = vrsqrt.f32 %v1333_v44 }
 0x188   : > { %v3738_v45 = vpop.eup %3737 }
 0x189   : > { %v587_v47 = vmul.f32 %v3738_v45, %v4206_v8 }
 0x18b   : > { %v596_v49 = vmul.f32 %v3316_v46, %v587_v47 }
 0x18c   : > { %v3740_v50 = vpop.eup %3739 }
 0x18d   : > { %v3742_v51 = vpop.eup %3741  ;;  %v588_v52 = vmul.f32 %v3740_v50, %v572_v16  ;;  %v605_v53 = vadd.f32 %v3317_v48, %v596_v49 }
 0x18e   : > { %v1336_v54 = vmul.f32 %v3742_v51, %v4208_v9 }
 0x18f   : > { %v597_v55 = vmul.f32 %v3316_v46, %v588_v52  ;;  %3490 = vmatprep.mubr.msk.f32.mxu1 %vm561_vm0, %v605_v53 }
 0x190   : > { %v1345_v56 = vmul.f32 %v3316_v46, %v1336_v54  ;;  %v3744_v61 = vpop.eup %3743 }
 0x191   : > { %v606_v57 = vadd.f32 %v3317_v48, %v597_v55  ;;  %v1337_v0 = vmul.f32 %v3744_v61, %v4214_v17 }
 0x192   : > { %v1354_v59 = vadd.f32 %v3317_v48, %v1345_v56 }
 0x193   : > { %3491 = vmatmul.mubr.msk.f32.vlgmr.msra.gmra.mxu1 %vm561_vm0, %v606_v57  ;;  %v1346_v3 = vmul.f32 %v3316_v46, %v1337_v0 }
 0x194   : > { %3494 = vmatpush3.msra.mxu1 %v1363_v32  ;;  %3509 = vmatprep.mubr.msk.f32.mxu1 %vm561_vm0, %v1354_v59 }
 0x195   : > { %3495 = vmatprep.subr.mxu1 %v1362_v58  ;;  %v1355_v5 = vadd.f32 %v3317_v48, %v1346_v3 }
 0x196   : > { %3496 = vmatpush3.msra.mxu1 %v1362_v58 }
 0x197   : > { %3497 = vmatprep.subr.mxu1 %v1361_v60 }
 0x198   : > { %3498 = vmatpush3.msra.mxu1 %v1361_v60 }
 0x199   : > { %3499 = vmatprep.subr.mxu1 %v1360_v62 }
 0x19a   : > { %3500 = vmatpush3.msra.mxu1 %v1360_v62 }
 0x19b   : > { %3501 = vmatprep.subr.mxu1 %v1359_v63 }
 0x19c   : > { %3502 = vmatpush3.msra.mxu1 %v1359_v63 }
 0x19d   : > { %3503 = vmatprep.subr.mxu1 %v1358_v1 }
 0x19e   : > { %3504 = vmatpush3.msra.mxu1 %v1358_v1 }
 0x19f   : > { %3505 = vmatprep.subr.mxu1 %v1357_v2 }
 0x1a0   : > { %3506 = vmatpush3.msra.mxu1 %v1357_v2 }
 0x1a1   : > { %3507 = vmatprep.subr.mxu1 %v1356_v4 }
 0x1a2   : > { %3508 = vmatpush3.msra.mxu1 %v1356_v4 }
 0x1a3   : > { %3510 = vmatmul.mubr.msk.f32.vlgmr.msra.gmra.mxu1 %vm561_vm0, %v1355_v5 }
 0x253   : > { %v3492_v7 = vpop.f32.mrf.mxu1 }
 0x254   : > { %v4283_v8 = vadd.f32 %v3492_v7, %v3318_v6 }
 0x255   : > { %v694_v9 = vpop.f32.mrf.mxu1 }
 0x256   : > { %713 = vrot.lane.b32.xlu1 %v4283_v8, %s3962_s23  ;;  %707 = vrot.lane.b32.xlu0 %v4283_v8, %s3963_s15  ;;  %v4287_v10 = vadd.f32 %v3318_v6, %v694_v9 }
 0x25a   : > { %719 = vrot.lane.b32.xlu1 %v4283_v8, %s3964_s24  ;;  %711 = vrot.lane.b32.xlu0 %v4287_v10, %s3962_s23 }
 0x25e   : > { %705 = vrot.lane.b32.xlu1 %v4287_v10, %s3963_s15 }
 0x262   : > { %717 = vrot.lane.b32.xlu1 %v4287_v10, %s3964_s24 }
 0x263   : > { %v3511_v12 = vpop.f32.mrf.mxu1 }
 0x264   : > { %v1449_v13 = vadd.f32 %v3511_v12, %v3331_v11 }
 0x265   : > { %v1443_v14 = vpop.f32.mrf.mxu1 }
 0x266   : > { %v4296_v15 = vmul.f32 0.25, %v1449_v13  ;;  %v1444_v16 = vadd.f32 %v3331_v11, %v1443_v14 }
 0x268   : > { %v4298_v17 = vmul.f32 0.25, %v1444_v16  ;;  %1458 = vrot.lane.b32.xlu1 %v4296_v15, %s3963_s15 }
 0x26a   : > { %1456 = vrot.lane.b32.xlu0 %v4298_v17, %s3963_s15 }
 0x26c   : > { %1462 = vrot.lane.b32.xlu1 %v4298_v17, %s3962_s23 }
 0x26e   : > { %1468 = vrot.lane.b32.xlu0 %v4298_v17, %s3964_s24 }
 0x270   : > { %1470 = vrot.lane.b32.xlu1 %v4296_v15, %s3964_s24  ;;  %s4804_s24 = sld [smem:[#allocation24_spill]] }
 0x272   : > { %1464 = vrot.lane.b32.xlu0 %v4296_v15, %s3962_s23 }
 0x2c8   : > { %v4306_v25 = vpop.permute.xlu1 %713  ;;  %v4314_v30 = vpop.permute.xlu0 %707 }
 0x2c9   : > { %v791_v28 = vcombine.low %v4283_v8, %v4306_v25  ;;  %v792_v29 = vcombine.high %v4283_v8, %v4306_v25 }
 0x2cb   : > { %v799_v35 = vrot.slane %v791_v28, %v4308_v27  ;;  %v806_v36 = vrot.slane %v792_v29, %v4308_v27 }
 0x2cc   : > { %v4316_v31 = vpop.permute.xlu1 %719  ;;  %v4330_v44 = vpop.permute.xlu0 %711 }
 0x2cd   : > { %v807_v32 = vcombine.low %v4314_v30, %v4316_v31  ;;  %v808_v33 = vcombine.high %v4314_v30, %v4316_v31  ;;  %v723_v49 = vcombine.low %v4287_v10, %v4330_v44  ;;  %v724_v50 = vcombine.high %v4287_v10, %v4330_v44 }
 0x2cf   : > { %v815_v37 = vrot.slane %v807_v32, %v4308_v27  ;;  %v822_v38 = vrot.slane %v808_v33, %v4308_v27  ;;  %v731_v62 = vrot.slane %v723_v49, %v4308_v27  ;;  %v738_v63 = vrot.slane %v724_v50, %v4308_v27 }
 0x2d0   : > { %v4328_v39 = vpop.permute.xlu1 %705 }
 0x2d1   : > { %v823_v40 = vcombine.low %v799_v35, %v815_v37  ;;  %v824_v41 = vcombine.high %v799_v35, %v815_v37  ;;  %v839_v42 = vcombine.low %v806_v36, %v822_v38  ;;  %v840_v43 = vcombine.high %v806_v36, %v822_v38 }
 0x2d3   : > { %v831_v45 = vrot.slane %v823_v40, %v4322_v34  ;;  %v838_v46 = vrot.slane %v824_v41, %v4322_v34  ;;  %v847_v47 = vrot.slane %v839_v42, %v4322_v34  ;;  %v854_v48 = vrot.slane %v840_v43, %v4322_v34 }
 0x2d4   : > { %v4340_v51 = vpop.permute.xlu1 %717 }
 0x2d5   : > { %v927_v52 = vcombine.low %v831_v45, %v838_v46  ;;  %v3323_v53 = vcombine.high %v831_v45, %v838_v46  ;;  %v943_v54 = vcombine.low %v847_v47, %v854_v48  ;;  %v3324_v55 = vcombine.high %v847_v47, %v854_v48 }
 0x2d6   : > { %v739_v56 = vcombine.low %v4328_v39, %v4340_v51  ;;  %v740_v57 = vcombine.high %v4328_v39, %v4340_v51 }
 0x2d7   : > { %v934_v58 = vrot.slane %v927_v52, %v4308_v27  ;;  %v942_v59 = vrot.slane %v3323_v53, %v4308_v27  ;;  %v950_v60 = vrot.slane %v943_v54, %v4308_v27  ;;  %v958_v61 = vrot.slane %v3324_v55, %v4308_v27 }
 0x2d8   : > { %v747_v0 = vrot.slane %v739_v56, %v4308_v27  ;;  %v754_v1 = vrot.slane %v740_v57, %v4308_v27 }
 0x2d9   : > { %v959_v2 = vcombine.low %v934_v58, %v942_v59  ;;  %v960_v3 = vcombine.high %v934_v58, %v942_v59  ;;  %v975_v4 = vcombine.low %v950_v60, %v958_v61  ;;  %v976_v5 = vcombine.high %v950_v60, %v958_v61 }
 0x2da   : > { %v755_v6 = vcombine.low %v731_v62, %v747_v0  ;;  %v756_v7 = vcombine.high %v731_v62, %v747_v0  ;;  %v771_v9 = vcombine.low %v738_v63, %v754_v1  ;;  %v772_v11 = vcombine.high %v738_v63, %v754_v1  ;;  %v4354_v12 = vpop.permute.xlu1 %1458 }
 0x2db   : > { %v967_v13 = vrot.slane %v959_v2, %v4322_v34  ;;  %v974_v14 = vrot.slane %v960_v3, %v4322_v34  ;;  %v983_v16 = vrot.slane %v975_v4, %v4322_v34  ;;  %v990_v18 = vrot.slane %v976_v5, %v4322_v34 }
 0x2dc   : > { %v763_v19 = vrot.slane %v755_v6, %v4322_v34  ;;  %v770_v20 = vrot.slane %v756_v7, %v4322_v34  ;;  %v779_v21 = vrot.slane %v771_v9, %v4322_v34  ;;  %v786_v22 = vrot.slane %v772_v11, %v4322_v34  ;;  %v1457_v23 = vpop.permute.xlu0 %1456 }
 0x2dd   : > { %v991_v24 = vcombine.low %v967_v13, %v983_v16  ;;  %v992_v26 = vcombine.high %v967_v13, %v983_v16  ;;  %v993_v28 = vcombine.low %v974_v14, %v990_v18  ;;  %v994_v29 = vcombine.high %v974_v14, %v990_v18 }
 0x2de   : > { %v859_v32 = vcombine.low %v763_v19, %v770_v20  ;;  %v3321_v33 = vcombine.high %v763_v19, %v770_v20  ;;  %v875_v35 = vcombine.low %v779_v21, %v786_v22  ;;  %v3322_v36 = vcombine.high %v779_v21, %v786_v22  ;;  %v1463_v37 = vpop.permute.xlu1 %1462 }
 0x2df   : > { %997 = vst.msk [vmem:[#allocation2 + $0x8] sm:$0xff] %vm995_vm1, %v991_v24  ;;  %999 = vst.msk [vmem:[#allocation2 + $0x18] sm:$0xff] %vm995_vm1, %v992_v26  ;;  %v1474_v38 = vcombine.low %v4298_v17, %v1463_v37  ;;  %v1475_v40 = vcombine.high %v4298_v17, %v1463_v37 }
 0x2e0   : > { %1001 = vst.msk [vmem:[#allocation2 + $0x28] sm:$0xff] %vm995_vm1, %v993_v28  ;;  %1003 = vst.msk [vmem:[#allocation2 + $0x38] sm:$0xff] %vm995_vm1, %v994_v29  ;;  %v866_v41 = vrot.slane %v859_v32, %v4308_v27  ;;  %v874_v42 = vrot.slane %v3321_v33, %v4308_v27  ;;  %v882_v43 = vrot.slane %v875_v35, %v4308_v27  ;;  %v1469_v46 = vpop.permute.xlu0 %1468 }
 0x2e1   : > { %v890_v45 = vrot.slane %v3322_v36, %v4308_v27  ;;  %v1482_v47 = vrot.slane %v1474_v38, %v4308_v27  ;;  %v1489_v48 = vrot.slane %v1475_v40, %v4308_v27  ;;  %v1490_v49 = vcombine.low %v1457_v23, %v1469_v46 }
 0x2e2   : > { %v1491_v50 = vcombine.high %v1457_v23, %v1469_v46  ;;  %v891_v52 = vcombine.low %v866_v41, %v874_v42  ;;  %v892_v53 = vcombine.high %v866_v41, %v874_v42  ;;  %v1471_v17 = vpop.permute.xlu1 %1470 }
 0x2e3   : > { %v907_v54 = vcombine.low %v882_v43, %v890_v45  ;;  %v908_v55 = vcombine.high %v882_v43, %v890_v45  ;;  %v1498_v56 = vrot.slane %v1490_v49, %v4308_v27  ;;  %v1558_v58 = vcombine.low %v4354_v12, %v1471_v17 }
 0x2e4   : > { %v1505_v57 = vrot.slane %v1491_v50, %v4308_v27  ;;  %v1559_v59 = vcombine.high %v4354_v12, %v1471_v17  ;;  %v899_v60 = vrot.slane %v891_v52, %v4322_v34  ;;  %v906_v61 = vrot.slane %v892_v53, %v4322_v34  ;;  %v1465_v4 = vpop.permute.xlu0 %1464 }
 0x2e5   : > { %v915_v62 = vrot.slane %v907_v54, %v4322_v34  ;;  %v922_v63 = vrot.slane %v908_v55, %v4322_v34  ;;  %v1506_v0 = vcombine.low %v1482_v47, %v1498_v56  ;;  %v1507_v1 = vcombine.high %v1482_v47, %v1498_v56 }
 0x2e6   : > { %v1522_v2 = vcombine.low %v1489_v48, %v1505_v57  ;;  %v1523_v3 = vcombine.high %v1489_v48, %v1505_v57  ;;  %v1747_v11 = vld [vmem:[#allocation2 + $0x8] sm:$0xff]  ;;  %v1749_v13 = vld [vmem:[#allocation2 + $0x18] sm:$0xff]  ;;  %v1566_v19 = vrot.slane %v1558_v58, %v4308_v27  ;;  %v1542_v20 = vcombine.low %v4296_v15, %v1465_v4 }
 0x2e7   : > { %v923_v5 = vcombine.low %v899_v60, %v915_v62  ;;  %v924_v6 = vcombine.high %v899_v60, %v915_v62  ;;  %v925_v7 = vcombine.low %v906_v61, %v922_v63  ;;  %v926_v9 = vcombine.high %v906_v61, %v922_v63  ;;  %3512 = vmatprep.subr.msk.mxu0 %vm995_vm1, %v1747_v11  ;;  %v1751_v63 = vld [vmem:[#allocation2 + $0x28] sm:$0xff] }
 0x2e8   : > { %v1514_v12 = vrot.slane %v1506_v0, %v4322_v34  ;;  %v1521_v14 = vrot.slane %v1507_v1, %v4322_v34  ;;  %v1530_v16 = vrot.slane %v1522_v2, %v4322_v34  ;;  %v1537_v18 = vrot.slane %v1523_v3, %v4322_v34  ;;  %3519 = vmatprep.subr.msk.mxu1 %vm995_vm1, %v1749_v13  ;;  %v1753_v0 = vld [vmem:[#allocation2 + $0x38] sm:$0xff] }
 0x2e9   : > { %996 = vst.msk [vmem:[#allocation2] sm:$0xff] %vm995_vm1, %v923_v5  ;;  %998 = vst.msk [vmem:[#allocation2 + $0x10] sm:$0xff] %vm995_vm1, %v924_v6  ;;  %v1543_v21 = vcombine.high %v4296_v15, %v1465_v4  ;;  %3513 = vmatpush3.xpose.msk.msra.mxu0 %vm995_vm1, %v1747_v11  ;;  %3520 = vmatpush3.xpose.msk.msra.mxu1 %vm995_vm1, %v1749_v13  ;;  %v1573_v26 = vrot.slane %v1559_v59, %v4308_v27 }
 0x2ea   : > { %1000 = vst.msk [vmem:[#allocation2 + $0x20] sm:$0xff] %vm995_vm1, %v925_v7  ;;  %1002 = vst.msk [vmem:[#allocation2 + $0x30] sm:$0xff] %vm995_vm1, %v926_v9  ;;  %v1610_v22 = vcombine.low %v1514_v12, %v1521_v14  ;;  %v3334_v23 = vcombine.high %v1514_v12, %v1521_v14  ;;  %v1626_v24 = vcombine.low %v1530_v16, %v1537_v18 }
 0x2eb   : > { %v1550_v28 = vrot.slane %v1542_v20, %v4308_v27  ;;  %v1557_v29 = vrot.slane %v1543_v21, %v4308_v27  ;;  %v3335_v32 = vcombine.high %v1530_v16, %v1537_v18 }
 0x2ec   : > { %v1617_v33 = vrot.slane %v1610_v22, %v4308_v27  ;;  %v1625_v15 = vrot.slane %v3334_v23, %v4308_v27  ;;  %v1633_v35 = vrot.slane %v1626_v24, %v4308_v27 }
 0x2ed   : > { %v1574_v36 = vcombine.low %v1550_v28, %v1566_v19  ;;  %v1575_v37 = vcombine.high %v1550_v28, %v1566_v19  ;;  %v1590_v38 = vcombine.low %v1557_v29, %v1573_v26  ;;  %v1591_v40 = vcombine.high %v1557_v29, %v1573_v26 }
 0x2ee   : > { %v1641_v41 = vrot.slane %v3335_v32, %v4308_v27  ;;  %v1642_v42 = vcombine.low %v1617_v33, %v1625_v15  ;;  %v1643_v56 = vcombine.high %v1617_v33, %v1625_v15 }
 0x2ef   : > { %v1582_v43 = vrot.slane %v1574_v36, %v4322_v34  ;;  %v1589_v45 = vrot.slane %v1575_v37, %v4322_v34  ;;  %v1598_v46 = vrot.slane %v1590_v38, %v4322_v34  ;;  %v1605_v47 = vrot.slane %v1591_v40, %v4322_v34 }
 0x2f0   : > { %v1746_v48 = vld [vmem:[#allocation2] sm:$0xff]  ;;  %v1748_v49 = vld [vmem:[#allocation2 + $0x10] sm:$0xff]  ;;  %v1650_v50 = vrot.slane %v1642_v42, %v4322_v34  ;;  %v1658_v52 = vcombine.low %v1633_v35, %v1641_v41  ;;  %v1659_v57 = vcombine.high %v1633_v35, %v1641_v41  ;;  %v1657_v7 = vrot.slane %v1643_v56, %v4322_v34 }
 0x2f1   : > { %v1678_v53 = vcombine.low %v1582_v43, %v1589_v45  ;;  %v3336_v54 = vcombine.high %v1582_v43, %v1589_v45  ;;  %v1694_v55 = vcombine.low %v1598_v46, %v1605_v47  ;;  %v3337_v17 = vcombine.high %v1598_v46, %v1605_v47  ;;  %3514 = vmatprep.subr.msk.mxu0 %vm995_vm1, %v1746_v48  ;;  %v1750_v18 = vld [vmem:[#allocation2 + $0x20] sm:$0xff]  ;;  %v1752_v20 = vld [vmem:[#allocation2 + $0x30] sm:$0xff] }
 0x2f2   : > { %3521 = vmatprep.subr.msk.mxu1 %vm995_vm1, %v1748_v49  ;;  %3515 = vmatpush3.xpose.msk.msra.mxu0 %vm995_vm1, %v1746_v48  ;;  %v1666_v58 = vrot.slane %v1658_v52, %v4322_v34  ;;  %v1673_v9 = vrot.slane %v1659_v57, %v4322_v34 }
 0x2f3   : > { %v1685_v59 = vrot.slane %v1678_v53, %v4308_v27  ;;  %v1693_v60 = vrot.slane %v3336_v54, %v4308_v27  ;;  %v1701_v61 = vrot.slane %v1694_v55, %v4308_v27  ;;  %v1709_v62 = vrot.slane %v3337_v17, %v4308_v27  ;;  %3522 = vmatpush3.xpose.msk.msra.mxu1 %vm995_vm1, %v1748_v49 }
 0x2f4   : > { %3526 = vmatprep.subr.msk.mxu0 %vm995_vm1, %v1751_v63  ;;  %3533 = vmatprep.subr.msk.mxu1 %vm995_vm1, %v1753_v0  ;;  %v1674_v1 = vcombine.low %v1650_v50, %v1666_v58  ;;  %v1675_v2 = vcombine.high %v1650_v50, %v1666_v58  ;;  %v1676_v16 = vcombine.low %v1657_v7, %v1673_v9 }
 0x2f5   : > { %v1710_v3 = vcombine.low %v1685_v59, %v1693_v60  ;;  %v1726_v4 = vcombine.low %v1701_v61, %v1709_v62  ;;  %v1711_v11 = vcombine.high %v1685_v59, %v1693_v60  ;;  %v1727_v13 = vcombine.high %v1701_v61, %v1709_v62 }
 0x2f6   : > { %3516 = vmatprep.mubr.msk.f32.mxu0 %vm995_vm1, %v1674_v1  ;;  %3523 = vmatprep.mubr.msk.f32.mxu1 %vm995_vm1, %v1675_v2  ;;  %v1677_v19 = vcombine.high %v1657_v7, %v1673_v9 }
 0x2f7   : > { %v1718_v5 = vrot.slane %v1710_v3, %v4322_v34  ;;  %v1734_v6 = vrot.slane %v1726_v4, %v4322_v34  ;;  %v1725_v21 = vrot.slane %v1711_v11, %v4322_v34  ;;  %v1741_v22 = vrot.slane %v1727_v13, %v4322_v34 }
 0x2f9   : > { %v1742_v12 = vcombine.low %v1718_v5, %v1734_v6  ;;  %v1743_v14 = vcombine.high %v1718_v5, %v1734_v6  ;;  %v1744_v23 = vcombine.low %v1725_v21, %v1741_v22  ;;  %v1745_v24 = vcombine.high %v1725_v21, %v1741_v22 }
 0x2fb   : > { %3517 = vmatmul.mubr.msk.f32.vlgmr.msra.gmra.mxu0 %vm995_vm1, %v1742_v12  ;;  %3524 = vmatmul.mubr.msk.f32.vlgmr.msra.gmra.mxu1 %vm995_vm1, %v1743_v14 }
 0x2fc   : > { %3527 = vmatpush3.xpose.msk.msra.mxu0 %vm995_vm1, %v1751_v63  ;;  %3534 = vmatpush3.xpose.msk.msra.mxu1 %vm995_vm1, %v1753_v0 }
 0x2fd   : > { %3528 = vmatprep.subr.msk.mxu0 %vm995_vm1, %v1750_v18  ;;  %3530 = vmatprep.mubr.msk.f32.mxu0 %vm995_vm1, %v1676_v16 }
 0x2fe   : > { %3535 = vmatprep.subr.msk.mxu1 %vm995_vm1, %v1752_v20  ;;  %3537 = vmatprep.mubr.msk.f32.mxu1 %vm995_vm1, %v1677_v19 }
 0x300   : > { %3529 = vmatpush3.xpose.msk.msra.mxu0 %vm995_vm1, %v1750_v18  ;;  %3536 = vmatpush3.xpose.msk.msra.mxu1 %vm995_vm1, %v1752_v20 }
 0x303   : > { %3531 = vmatmul.mubr.msk.f32.vlgmr.msra.gmra.mxu0 %vm995_vm1, %v1744_v23  ;;  %3538 = vmatmul.mubr.msk.f32.vlgmr.msra.gmra.mxu1 %vm995_vm1, %v1745_v24 }
 0x3bb   : > { %v3518_v26 = vpop.f32.mrf.mxu0  ;;  %v3525_v28 = vpop.f32.mrf.mxu1 }
 0x3bc   : > { %v2106_v29 = vsel %vm995_vm1, %v3518_v26, -inf  ;;  %v2112_v15 = vsel %vm995_vm1, %v3525_v28, -inf }
 0x3bd   : > { %v1920_v32 = vpop.f32.mrf.mxu1  ;;  %2107 = vmax.xlane.f32.xlu0 %v2106_v29  ;;  %v1833_v35 = vpop.f32.mrf.mxu0 }
 0x3be   : > { %v2109_v33 = vsel %vm995_vm1, %v1920_v32, -inf  ;;  %v2103_v38 = vsel %vm995_vm1, %v1833_v35, -inf }
 0x3bf   : > { %2110 = vmax.xlane.f32.xlu1 %v2109_v33 }
 0x3c1   : > { %2113 = vmax.xlane.f32.xlu0 %v2112_v15 }
 0x3c3   : > { %v3532_v36 = vpop.f32.mrf.mxu0  ;;  %v3539_v37 = vpop.f32.mrf.mxu1 }
 0x3c4   : > { %v2124_v45 = vsel %vm995_vm1, %v3539_v37, -inf  ;;  %v2118_v46 = vsel %vm995_vm1, %v3532_v36, -inf }
 0x3c5   : > { %v2007_v40 = vpop.f32.mrf.mxu0  ;;  %v2094_v41 = vpop.f32.mrf.mxu1  ;;  %2104 = vmax.xlane.f32.xlu0 %v2103_v38 }
 0x3c6   : > { %v2121_v42 = vsel %vm995_vm1, %v2094_v41, -inf  ;;  %v2115_v43 = vsel %vm995_vm1, %v2007_v40, -inf }
 0x3c7   : > { %2122 = vmax.xlane.f32.xlu1 %v2121_v42 }
 0x3c9   : > { %2116 = vmax.xlane.f32.xlu0 %v2115_v43 }
 0x3cb   : > { %2125 = vmax.xlane.f32.xlu1 %v2124_v45 }
 0x3cd   : > { %2119 = vmax.xlane.f32.xlu0 %v2118_v46 }
 0x3dc   : > { %1010 = vrot.lane.b32.xlu1 %v4314_v30, %s3967_s1 }
 0x3e0   : > { %1014 = vrot.lane.b32.xlu1 %v4306_v25, %s3967_s1 }
 0x3e3   : > { %1006 = vrot.lane.b32.xlu0 %v4283_v8, %s3967_s1 }
 0x3e4   : > { %1018 = vrot.lane.b32.xlu1 %v4316_v31, %s3967_s1 }
 0x3e7   : > { %1004 = vrot.lane.b32.xlu0 %v4287_v10, %s3967_s1 }
 0x3e8   : > { %1008 = vrot.lane.b32.xlu1 %v4328_v39, %s3967_s1 }
 0x3eb   : > { %1012 = vrot.lane.b32.xlu0 %v4330_v44, %s3967_s1 }
 0x3ec   : > { %1016 = vrot.lane.b32.xlu1 %v4340_v51, %s3967_s1  ;;  %s4805_s1 = sld [smem:[#allocation26_spill]] }
 0x446   : > { %v2108_v47 = vpop.xlane.xlu0 %2107 }
 0x447   : > { %v2128_v48 = vsub.f32 %v3518_v26, %v2108_v47 }
 0x448   : > { %v2111_v49 = vpop.xlane.xlu1 %2110 }
 0x449   : > { %v2137_v50 = vmul.f32 1.442695, %v2128_v48  ;;  %v2129_v52 = vsub.f32 %v1920_v32, %v2111_v49 }
 0x44a   : > { %v2114_v30 = vpop.xlane.xlu0 %2113 }
 0x44b   : > { %3745 = vpow2.f32 %v2137_v50  ;;  %v2139_v25 = vmul.f32 1.442695, %v2129_v52  ;;  %v2130_v53 = vsub.f32 %v3525_v28, %v2114_v30 }
 0x44d   : > { %3747 = vpow2.f32 %v2139_v25  ;;  %v2141_v8 = vmul.f32 1.442695, %v2130_v53 }
 0x44e   : > { %v2105_v31 = vpop.xlane.xlu0 %2104 }
 0x44f   : > { %3749 = vpow2.f32 %v2141_v8  ;;  %v2127_v10 = vsub.f32 %v1833_v35, %v2105_v31 }
 0x450   : > { %v2123_v54 = vpop.xlane.xlu1 %2122 }
 0x451   : > { %v2135_v39 = vmul.f32 1.442695, %v2127_v10  ;;  %v2133_v55 = vsub.f32 %v2094_v41, %v2123_v54 }
 0x452   : > { %v2117_v44 = vpop.xlane.xlu0 %2116 }
 0x453   : > { %3751 = vpow2.f32 %v2135_v39  ;;  %v2131_v51 = vsub.f32 %v2007_v40, %v2117_v44  ;;  %v2147_v58 = vmul.f32 1.442695, %v2133_v55 }
 0x454   : > { %v2126_v17 = vpop.xlane.xlu1 %2125 }
 0x455   : > { %v2143_v56 = vmul.f32 1.442695, %v2131_v51  ;;  %v2134_v57 = vsub.f32 %v3539_v37, %v2126_v17 }
 0x456   : > { %v2120_v59 = vpop.xlane.xlu0 %2119 }
 0x457   : > { %3753 = vpow2.f32 %v2143_v56  ;;  %v2149_v60 = vmul.f32 1.442695, %v2134_v57  ;;  %v2132_v61 = vsub.f32 %v3532_v36, %v2120_v59 }
 0x458   : > { %v4458_v62 = vpop.eup %3745  ;;  %v1011_v63 = vpop.permute.xlu1 %1010 }
 0x459   : > { %3755 = vpow2.f32 %v2149_v60  ;;  %v2145_v0 = vmul.f32 1.442695, %v2132_v61  ;;  %v2154_v1 = vsel %vm995_vm1, %v4458_v62, 0.0 }
 0x45a   : > { %v4462_v2 = vpop.eup %3747  ;;  %3757 = vpow2.f32 %v2147_v58  ;;  %2155 = vadd.xlane.f32.xlu0 %v2154_v1  ;;  %v1007_v3 = vpop.permute.xlu0 %1006 }
 0x45b   : > { %v2157_v4 = vsel %vm995_vm1, %v4462_v2, 0.0  ;;  %3759 = vpow2.f32 %v2145_v0 }
 0x45c   : > { %v4466_v5 = vpop.eup %3749  ;;  %v1015_v6 = vpop.permute.xlu1 %1014  ;;  %2158 = vadd.xlane.f32.xlu1 %v2157_v4 }
 0x45d   : > { %v1096_v9 = vcombine.low %v1007_v3, %v1015_v6  ;;  %v1097_v11 = vcombine.high %v1007_v3, %v1015_v6  ;;  %v2160_v13 = vsel %vm995_vm1, %v4466_v5, 0.0 }
 0x45e   : > { %v1005_v7 = vpop.permute.xlu0 %1004 }
 0x45f   : > { %v1104_v20 = vrot.slane %v1096_v9, %v4308_v27  ;;  %v1111_v21 = vrot.slane %v1097_v11, %v4308_v27 }
 0x460   : > { %v4470_v12 = vpop.eup %3751  ;;  %v1019_v14 = vpop.permute.xlu1 %1018  ;;  %2161 = vadd.xlane.f32.xlu1 %v2160_v13 }
 0x461   : > { %v1112_v16 = vcombine.low %v1011_v63, %v1019_v14  ;;  %v1113_v18 = vcombine.high %v1011_v63, %v1019_v14  ;;  %v2151_v19 = vsel %vm995_vm1, %v4470_v12, 0.0 }
 0x462   : > { %2152 = vadd.xlane.f32.xlu0 %v2151_v19  ;;  %v1013_v24 = vpop.permute.xlu0 %1012 }
 0x463   : > { %v1120_v22 = vrot.slane %v1112_v16, %v4308_v27  ;;  %v1127_v23 = vrot.slane %v1113_v18, %v4308_v27  ;;  %v1028_v36 = vcombine.low %v1005_v7, %v1013_v24  ;;  %v1029_v45 = vcombine.high %v1005_v7, %v1013_v24 }
 0x464   : > { %v4478_v26 = vpop.eup %3753  ;;  %v1009_v28 = vpop.permute.xlu1 %1008 }
 0x465   : > { %v1128_v29 = vcombine.low %v1104_v20, %v1120_v22  ;;  %v1129_v32 = vcombine.high %v1104_v20, %v1120_v22  ;;  %v1144_v33 = vcombine.low %v1111_v21, %v1127_v23  ;;  %v1145_v15 = vcombine.high %v1111_v21, %v1127_v23 }
 0x466   : > { %v4480_v35 = vpop.eup %3755  ;;  %v2163_v37 = vsel %vm995_vm1, %v4478_v26, 0.0  ;;  %v1036_v25 = vrot.slane %v1028_v36, %v4308_v27  ;;  %v1043_v44 = vrot.slane %v1029_v45, %v4308_v27 }
 0x467   : > { %v4484_v38 = vpop.eup %3757  ;;  %v1136_v40 = vrot.slane %v1128_v29, %v4322_v34  ;;  %v1143_v41 = vrot.slane %v1129_v32, %v4322_v34  ;;  %v1152_v42 = vrot.slane %v1144_v33, %v4322_v34  ;;  %v1159_v43 = vrot.slane %v1145_v15, %v4322_v34  ;;  %2164 = vadd.xlane.f32.xlu0 %v2163_v37 }
 0x468   : > { %v1017_v46 = vpop.permute.xlu1 %1016  ;;  %v2172_v47 = vsel %vm995_vm1, %v4480_v35, 0.0  ;;  %v4492_v48 = vpop.eup %3759  ;;  %v2169_v31 = vsel %vm995_vm1, %v4484_v38, 0.0 }
 0x469   : > { %v1232_v49 = vcombine.low %v1136_v40, %v1143_v41  ;;  %v3327_v50 = vcombine.high %v1136_v40, %v1143_v41  ;;  %v1248_v52 = vcombine.low %v1152_v42, %v1159_v43  ;;  %v3328_v30 = vcombine.high %v1152_v42, %v1159_v43  ;;  %2173 = vadd.xlane.f32.xlu1 %v2172_v47 }
 0x46a   : > { %v1044_v53 = vcombine.low %v1009_v28, %v1017_v46  ;;  %v1045_v8 = vcombine.high %v1009_v28, %v1017_v46  ;;  %v2166_v56 = vsel %vm995_vm1, %v4492_v48, 0.0 }
 0x46b   : > { %v1239_v10 = vrot.slane %v1232_v49, %v4308_v27  ;;  %v1247_v54 = vrot.slane %v3327_v50, %v4308_v27  ;;  %v1255_v39 = vrot.slane %v1248_v52, %v4308_v27  ;;  %v1263_v55 = vrot.slane %v3328_v30, %v4308_v27  ;;  %2170 = vadd.xlane.f32.xlu0 %v2169_v31 }
 0x46c   : > { %v1052_v51 = vrot.slane %v1044_v53, %v4308_v27  ;;  %v1059_v17 = vrot.slane %v1045_v8, %v4308_v27 }
 0x46d   : > { %v1264_v57 = vcombine.low %v1239_v10, %v1247_v54  ;;  %v1265_v58 = vcombine.high %v1239_v10, %v1247_v54  ;;  %v1280_v59 = vcombine.low %v1255_v39, %v1263_v55  ;;  %v1281_v60 = vcombine.high %v1255_v39, %v1263_v55 }
 0x46e   : > { %v1060_v61 = vcombine.low %v1036_v25, %v1052_v51  ;;  %v1061_v63 = vcombine.high %v1036_v25, %v1052_v51  ;;  %v1076_v0 = vcombine.low %v1043_v44, %v1059_v17  ;;  %v1077_v1 = vcombine.high %v1043_v44, %v1059_v17 }
 0x46f   : > { %v1272_v3 = vrot.slane %v1264_v57, %v4322_v34  ;;  %v1279_v4 = vrot.slane %v1265_v58, %v4322_v34  ;;  %v1288_v6 = vrot.slane %v1280_v59, %v4322_v34  ;;  %v1295_v7 = vrot.slane %v1281_v60, %v4322_v34  ;;  %2167 = vadd.xlane.f32.xlu0 %v2166_v56 }
 0x470   : > { %v1068_v9 = vrot.slane %v1060_v61, %v4322_v34  ;;  %v1075_v11 = vrot.slane %v1061_v63, %v4322_v34  ;;  %v1084_v13 = vrot.slane %v1076_v0, %v4322_v34  ;;  %v1091_v14 = vrot.slane %v1077_v1, %v4322_v34 }
 0x471   : > { %v1296_v16 = vcombine.low %v1272_v3, %v1288_v6  ;;  %v1297_v18 = vcombine.high %v1272_v3, %v1288_v6  ;;  %v1298_v19 = vcombine.low %v1279_v4, %v1295_v7  ;;  %v1299_v20 = vcombine.high %v1279_v4, %v1295_v7 }
 0x472   : > { %v1164_v21 = vcombine.low %v1068_v9, %v1075_v11  ;;  %v3325_v22 = vcombine.high %v1068_v9, %v1075_v11  ;;  %v1180_v23 = vcombine.low %v1084_v13, %v1091_v14  ;;  %v3326_v24 = vcombine.high %v1084_v13, %v1091_v14  ;;  %v2833_v13 = vld [vmem:[%s4752_s7 + $0x30] sm:$0xff] }
 0x473   : > { %1301 = vst.msk [vmem:[#allocation3 + $0x8] sm:$0xff] %vm995_vm1, %v1296_v16  ;;  %1303 = vst.msk [vmem:[#allocation3 + $0x18] sm:$0xff] %vm995_vm1, %v1297_v18 }
 0x474   : > { %1305 = vst.msk [vmem:[#allocation3 + $0x28] sm:$0xff] %vm995_vm1, %v1298_v19  ;;  %1307 = vst.msk [vmem:[#allocation3 + $0x38] sm:$0xff] %vm995_vm1, %v1299_v20  ;;  %v1171_v28 = vrot.slane %v1164_v21, %v4308_v27  ;;  %v1179_v29 = vrot.slane %v3325_v22, %v4308_v27  ;;  %v1187_v32 = vrot.slane %v1180_v23, %v4308_v27 }
 0x475   : > { %v1195_v33 = vrot.slane %v3326_v24, %v4308_v27 }
 0x476   : > { %v1196_v15 = vcombine.low %v1171_v28, %v1179_v29  ;;  %v1197_v36 = vcombine.high %v1171_v28, %v1179_v29 }
 0x477   : > { %v1212_v37 = vcombine.low %v1187_v32, %v1195_v33  ;;  %v1213_v40 = vcombine.high %v1187_v32, %v1195_v33 }
 0x478   : > { %v1204_v41 = vrot.slane %v1196_v15, %v4322_v34  ;;  %v1211_v42 = vrot.slane %v1197_v36, %v4322_v34 }
 0x479   : > { %v1220_v43 = vrot.slane %v1212_v37, %v4322_v34  ;;  %v1227_v45 = vrot.slane %v1213_v40, %v4322_v34 }
 0x47a   : > { %v2192_v52 = vld [vmem:[#allocation3 + $0x8] sm:$0xff]  ;;  %v2194_v30 = vld [vmem:[#allocation3 + $0x18] sm:$0xff] }
 0x47b   : > { %v1228_v46 = vcombine.low %v1204_v41, %v1220_v43  ;;  %v1229_v47 = vcombine.high %v1204_v41, %v1220_v43  ;;  %v1230_v49 = vcombine.low %v1211_v42, %v1227_v45  ;;  %v1231_v50 = vcombine.high %v1211_v42, %v1227_v45  ;;  %3540 = vmatprep.subr.mxu0 %v2192_v52  ;;  %v2196_v8 = vld [vmem:[#allocation3 + $0x28] sm:$0xff]  ;;  %v2198_v31 = vld [vmem:[#allocation3 + $0x38] sm:$0xff] }
 0x47c   : > { %3547 = vmatprep.subr.mxu1 %v2194_v30  ;;  %3541 = vmatpush3.msra.mxu0 %v2192_v52  ;;  %v2832_v52 = vld [vmem:[%s4752_s7 + $0x28] sm:$0xff] }
 0x47d   : > { %1300 = vst.msk [vmem:[#allocation3] sm:$0xff] %vm995_vm1, %v1228_v46  ;;  %1302 = vst.msk [vmem:[#allocation3 + $0x10] sm:$0xff] %vm995_vm1, %v1229_v47  ;;  %3548 = vmatpush3.msra.mxu1 %v2194_v30 }
 0x47e   : > { %1304 = vst.msk [vmem:[#allocation3 + $0x20] sm:$0xff] %vm995_vm1, %v1230_v49  ;;  %1306 = vst.msk [vmem:[#allocation3 + $0x30] sm:$0xff] %vm995_vm1, %v1231_v50 }
 0x484   : > { %v2191_v25 = vld [vmem:[#allocation3] sm:$0xff]  ;;  %v2193_v53 = vld [vmem:[#allocation3 + $0x10] sm:$0xff] }
 0x485   : > { %3542 = vmatprep.subr.mxu0 %v2191_v25  ;;  %3549 = vmatprep.subr.mxu1 %v2193_v53  ;;  %v2197_v1 = vld [vmem:[#allocation3 + $0x30] sm:$0xff]  ;;  %v2195_v4 = vld [vmem:[#allocation3 + $0x20] sm:$0xff] }
 0x486   : > { %3543 = vmatpush3.msra.mxu0 %v2191_v25  ;;  %3550 = vmatpush3.msra.mxu1 %v2193_v53 }
 0x487   : > { %3554 = vmatprep.subr.mxu0 %v2196_v8  ;;  %3561 = vmatprep.subr.mxu1 %v2198_v31 }
 0x4e3   : > { %v2156_v54 = vpop.xlane.xlu0 %2155 }
 0x4e5   : > { %v2159_v10 = vpop.xlane.xlu1 %2158 }
 0x4e6   : > { %3761 = vrcp.f32 %v2159_v10 }
 0x4e9   : > { %v2162_v39 = vpop.xlane.xlu1 %2161 }
 0x4ea   : > { %3763 = vrcp.f32 %v2162_v39 }
 0x4eb   : > { %3765 = vrcp.f32 %v2156_v54  ;;  %v2153_v55 = vpop.xlane.xlu0 %2152 }
 0x4ec   : > { %3767 = vrcp.f32 %v2153_v55 }
 0x4f0   : > { %v2165_v44 = vpop.xlane.xlu0 %2164 }
 0x4f1   : > { %3769 = vrcp.f32 %v2165_v44 }
 0x4f2   : > { %v2174_v51 = vpop.xlane.xlu1 %2173 }
 0x4f3   : > { %v3762_v17 = vpop.eup %3761  ;;  %3771 = vrcp.f32 %v2174_v51 }
 0x4f4   : > { %v2171_v56 = vpop.xlane.xlu0 %2170  ;;  %v2185_v57 = vmul.f32 %v3762_v17, %v4462_v2 }
 0x4f5   : > { %3773 = vrcp.f32 %v2171_v56  ;;  %v2831_v56 = vld [vmem:[%s4752_s7 + $0x20] sm:$0xff] }
 0x4f6   : > { %3551 = vmatprep.mubr.msk.f32.mxu1 %vm995_vm1, %v2185_v57 }
 0x4f7   : > { %v3764_v58 = vpop.eup %3763 }
 0x4f8   : > { %v3766_v59 = vpop.eup %3765  ;;  %v2168_v60 = vpop.xlane.xlu0 %2167  ;;  %v2186_v61 = vmul.f32 %v3764_v58, %v4466_v5 }
 0x4f9   : > { %v3768_v63 = vpop.eup %3767  ;;  %3775 = vrcp.f32 %v2168_v60  ;;  %v2184_v3 = vmul.f32 %v3766_v59, %v4458_v62 }
 0x4fa   : > { %3552 = vmatmul.mubr.msk.f32.vlgmr.msra.gmra.mxu1 %vm995_vm1, %v2186_v61  ;;  %v2183_v0 = vmul.f32 %v3768_v63, %v4470_v12  ;;  %v2830_v61 = vld [vmem:[%s4752_s7 + $0x18] sm:$0xff] }
 0x4fb   : > { %3562 = vmatpush3.msra.mxu1 %v2198_v31 }
 0x4fc   : > { %3563 = vmatprep.subr.mxu1 %v2197_v1  ;;  %3544 = vmatprep.mubr.msk.f32.mxu0 %vm995_vm1, %v2183_v0 }
 0x4fd   : > { %3564 = vmatpush3.msra.mxu1 %v2197_v1  ;;  %3545 = vmatmul.mubr.msk.f32.vlgmr.msra.gmra.mxu0 %vm995_vm1, %v2184_v3 }
 0x4fe   : > { %v3770_v2 = vpop.eup %3769  ;;  %3555 = vmatpush3.msra.mxu0 %v2196_v8 }
 0x4ff   : > { %3556 = vmatprep.subr.mxu0 %v2195_v4  ;;  %v2187_v5 = vmul.f32 %v3770_v2, %v4478_v26  ;;  %v2834_v26 = vld [vmem:[%s4752_s7 + $0x38] sm:$0xff] }
 0x500   : > { %3557 = vmatpush3.msra.mxu0 %v2195_v4  ;;  %v3772_v6 = vpop.eup %3771 }
 0x501   : > { %3558 = vmatprep.mubr.msk.f32.mxu0 %vm995_vm1, %v2187_v5  ;;  %v2190_v62 = vmul.f32 %v3772_v6, %v4480_v35  ;;  %3568 = vmatprep.subr.mxu0 %v2834_v26 }
 0x502   : > { %v3774_v12 = vpop.eup %3773 }
 0x503   : > { %v2189_v7 = vmul.f32 %v3774_v12, %v4484_v38  ;;  %v2829_v12 = vld [vmem:[%s4752_s7 + $0x10] sm:$0xff] }
 0x505   : > { %3565 = vmatprep.mubr.msk.f32.mxu1 %vm995_vm1, %v2189_v7 }
 0x506   : > { %v3776_v9 = vpop.eup %3775  ;;  %3566 = vmatmul.mubr.msk.f32.vlgmr.msra.gmra.mxu1 %vm995_vm1, %v2190_v62 }
 0x507   : > { %v2188_v11 = vmul.f32 %v3776_v9, %v4492_v48 }
 0x509   : > { %3559 = vmatmul.mubr.msk.f32.vlgmr.msra.gmra.mxu0 %vm995_vm1, %v2188_v11 }
 0x50a   : > { %3569 = vmatpush3.msra.mxu0 %v2834_v26 }
 0x50b   : > { %3570 = vmatprep.subr.mxu0 %v2833_v13 }
 0x50c   : > { %3571 = vmatpush3.msra.mxu0 %v2833_v13 }
 0x50d   : > { %3572 = vmatprep.subr.mxu0 %v2832_v52 }
 0x50e   : > { %3573 = vmatpush3.msra.mxu0 %v2832_v52 }
 0x50f   : > { %3574 = vmatprep.subr.mxu0 %v2831_v56 }
 0x510   : > { %3575 = vmatpush3.msra.mxu0 %v2831_v56  ;;  %v3790_v56 = vld [vmem:[%s4192_s29] sm:$0xff] }
 0x511   : > { %3576 = vmatprep.subr.mxu0 %v2830_v61 }
 0x512   : > { %3577 = vmatpush3.msra.mxu0 %v2830_v61 }
 0x513   : > { %3578 = vmatprep.subr.mxu0 %v2829_v12 }
 0x514   : > { %3579 = vmatpush3.msra.mxu0 %v2829_v12  ;;  %v2976_v12 = vld [vmem:[#allocation11 + $0x38] sm:$0xff] }
 0x515   : > { %3587 = vmatprep.subr.mxu1 %v2976_v12 }
 0x516   : > { %3588 = vmatpush3.msra.mxu1 %v2976_v12 }
 0x5ba   : > { %v3553_v35 = vpop.f32.mrf.mxu1 }
 0x5bc   : > { %v2352_v14 = vpop.f32.mrf.mxu1 }
 0x5bd   : > { %v3546_v38 = vpop.f32.mrf.mxu0 }
 0x5bf   : > { %v2271_v18 = vpop.f32.mrf.mxu0 }
 0x5c6   : > { %v3567_v16 = vpop.f32.mrf.mxu1 }
 0x5c7   : > { %v2607_v48 = vcombine.low %v3553_v35, %v3567_v16  ;;  %v2608_v19 = vcombine.high %v3553_v35, %v3567_v16 }
 0x5c8   : > { %v2514_v20 = vpop.f32.mrf.mxu1 }
 0x5c9   : > { %v3560_v21 = vpop.f32.mrf.mxu0  ;;  %v2615_v24 = vrot.slane %v2607_v48, %v4308_v27  ;;  %v2622_v28 = vrot.slane %v2608_v19, %v4308_v27  ;;  %v2539_v29 = vcombine.low %v2352_v14, %v2514_v20  ;;  %v2540_v32 = vcombine.high %v2352_v14, %v2514_v20  ;;  %v2828_v14 = vld [vmem:[%s4752_s7 + $0x8] sm:$0xff] }
 0x5ca   : > { %v2591_v22 = vcombine.low %v3546_v38, %v3560_v21  ;;  %v2592_v23 = vcombine.high %v3546_v38, %v3560_v21  ;;  %3580 = vmatprep.subr.mxu0 %v2828_v14 }
 0x5cb   : > { %v2433_v33 = vpop.f32.mrf.mxu0  ;;  %v2547_v46 = vrot.slane %v2539_v29, %v4308_v27  ;;  %v2554_v47 = vrot.slane %v2540_v32, %v4308_v27  ;;  %3581 = vmatpush3.msra.mxu0 %v2828_v14 }
 0x5cc   : > { %v2599_v15 = vrot.slane %v2591_v22, %v4308_v27  ;;  %v2606_v36 = vrot.slane %v2592_v23, %v4308_v27  ;;  %v2523_v37 = vcombine.low %v2271_v18, %v2433_v33  ;;  %v2524_v40 = vcombine.high %v2271_v18, %v2433_v33  ;;  %v2827_v22 = vld [vmem:[%s4752_s7] sm:$0xff] }
 0x5cd   : > { %3582 = vmatprep.subr.mxu0 %v2827_v22 }
 0x5ce   : > { %v2623_v41 = vcombine.low %v2599_v15, %v2615_v24  ;;  %v2624_v42 = vcombine.high %v2599_v15, %v2615_v24  ;;  %v2639_v43 = vcombine.low %v2606_v36, %v2622_v28  ;;  %v2640_v45 = vcombine.high %v2606_v36, %v2622_v28  ;;  %3583 = vmatpush3.msra.mxu0 %v2827_v22 }
 0x5cf   : > { %v2531_v49 = vrot.slane %v2523_v37, %v4308_v27  ;;  %v2538_v50 = vrot.slane %v2524_v40, %v4308_v27 }
 0x5d0   : > { %v2631_v30 = vrot.slane %v2623_v41, %v4322_v34  ;;  %v2638_v25 = vrot.slane %v2624_v42, %v4322_v34  ;;  %v2647_v53 = vrot.slane %v2639_v43, %v4322_v34  ;;  %v2654_v8 = vrot.slane %v2640_v45, %v4322_v34 }
 0x5d1   : > { %v2555_v31 = vcombine.low %v2531_v49, %v2547_v46  ;;  %v2556_v10 = vcombine.high %v2531_v49, %v2547_v46  ;;  %v2571_v54 = vcombine.low %v2538_v50, %v2554_v47  ;;  %v2572_v39 = vcombine.high %v2538_v50, %v2554_v47 }
 0x5d2   : > { %v2727_v55 = vcombine.low %v2631_v30, %v2638_v25  ;;  %v3364_v44 = vcombine.high %v2631_v30, %v2638_v25  ;;  %v2743_v51 = vcombine.low %v2647_v53, %v2654_v8  ;;  %v3365_v17 = vcombine.high %v2647_v53, %v2654_v8 }
 0x5d3   : > { %v2563_v57 = vrot.slane %v2555_v31, %v4322_v34  ;;  %v2570_v58 = vrot.slane %v2556_v10, %v4322_v34  ;;  %v2579_v59 = vrot.slane %v2571_v54, %v4322_v34  ;;  %v2586_v60 = vrot.slane %v2572_v39, %v4322_v34  ;;  %v3366_v10 = vld [vmem:[%s4802_s28] ss:$0 sm:$0xff]  ;;  %s4808_s28 = sld [smem:[#allocation27_spill]] }
 0x5d4   : > { %v2734_v63 = vrot.slane %v2727_v55, %v4308_v27  ;;  %v2742_v0 = vrot.slane %v3364_v44, %v4308_v27  ;;  %v2750_v1 = vrot.slane %v2743_v51, %v4308_v27  ;;  %v2758_v3 = vrot.slane %v3365_v17, %v4308_v27  ;;  %v3789_v44 = vld [vmem:[%s4192_s29 + $0x8] sm:$0xff]  ;;  %s4809_s29 = sld [smem:[#allocation19_spill]] }
 0x5d5   : > { %v2659_v2 = vcombine.low %v2563_v57, %v2570_v58  ;;  %v3362_v4 = vcombine.high %v2563_v57, %v2570_v58  ;;  %v2675_v5 = vcombine.low %v2579_v59, %v2586_v60  ;;  %v3363_v6 = vcombine.high %v2579_v59, %v2586_v60 }
 0x5d6   : > { %v2759_v7 = vcombine.low %v2734_v63, %v2742_v0  ;;  %v2775_v62 = vcombine.low %v2750_v1, %v2758_v3  ;;  %v2760_v9 = vcombine.high %v2734_v63, %v2742_v0  ;;  %v2776_v11 = vcombine.high %v2750_v1, %v2758_v3 }
 0x5d7   : > { %v2666_v26 = vrot.slane %v2659_v2, %v4308_v27  ;;  %v2674_v13 = vrot.slane %v3362_v4, %v4308_v27  ;;  %v2682_v35 = vrot.slane %v2675_v5, %v4308_v27  ;;  %v2690_v38 = vrot.slane %v3363_v6, %v4308_v27 }
 0x5d8   : > { %v2767_v16 = vrot.slane %v2759_v7, %v4322_v34  ;;  %v2783_v18 = vrot.slane %v2775_v62, %v4322_v34  ;;  %v2774_v23 = vrot.slane %v2760_v9, %v4322_v34  ;;  %v2790_v24 = vrot.slane %v2776_v11, %v4322_v34  ;;  %v2975_v7 = vld [vmem:[#allocation11 + $0x30] sm:$0xff]  ;;  %v2974_v62 = vld [vmem:[#allocation11 + $0x28] sm:$0xff]  ;;  %v2973_v9 = vld [vmem:[#allocation11 + $0x20] sm:$0xff] }
 0x5d9   : > { %v2691_v48 = vcombine.low %v2666_v26, %v2674_v13  ;;  %v2707_v19 = vcombine.low %v2682_v35, %v2690_v38  ;;  %v2692_v20 = vcombine.high %v2666_v26, %v2674_v13  ;;  %v2708_v21 = vcombine.high %v2682_v35, %v2690_v38  ;;  %3589 = vmatprep.subr.mxu1 %v2975_v7  ;;  %v2972_v11 = vld [vmem:[#allocation11 + $0x18] sm:$0xff]  ;;  %v2971_v26 = vld [vmem:[#allocation11 + $0x10] sm:$0xff]  ;;  %v2970_v13 = vld [vmem:[#allocation11 + $0x8] sm:$0xff] }
 0x5da   : > { %v2792_v27 = vcombine.high %v2767_v16, %v2783_v18  ;;  %v2791_v28 = vcombine.low %v2767_v16, %v2783_v18  ;;  %v2793_v40 = vcombine.low %v2774_v23, %v2790_v24  ;;  %v2794_v43 = vcombine.high %v2774_v23, %v2790_v24  ;;  %3590 = vmatpush3.msra.mxu1 %v2975_v7  ;;  %v2969_v35 = vld [vmem:[#allocation11] sm:$0xff]  ;;  %p4812_p7 = scmp.ne.s32.totalorder %s4809_s29, 0 }
 0x5db   : > { %v2699_v29 = vrot.slane %v2691_v48, %v4322_v34  ;;  %v2715_v32 = vrot.slane %v2707_v19, %v4322_v34  ;;  %v2706_v15 = vrot.slane %v2692_v20, %v4322_v34  ;;  %v2722_v36 = vrot.slane %v2708_v21, %v4322_v34  ;;  %3591 = vmatprep.subr.mxu1 %v2974_v62  ;;  %v3369_v21 = vld [vmem:[%s4803_s17] ss:$0 sm:$0xff]  ;;  %s553_s17 = scalar_lea.vmem [#allocation12], %s3312_s14  ;;  %s3184_s14 = scalar_lea.sflag [#allocation8], %s4186_s13 }
 0x5dc   : > { %2799 = vrot.lane.b32.xlu1 %v2792_v27, %s3968_s10  ;;  %3592 = vmatpush3.msra.mxu1 %v2974_v62  ;;  %v3370_v27 = vld [vmem:[%s4804_s24] ss:$0 sm:$0xff]  ;;  %s3199_s23 = sshll.u32 %s553_s17, 4  ;;  %s4694_s23 = int_to_ptr.vmem [resolvable:$true] %s3199_s23 }
 0x5dd   : > { %v2724_v33 = vcombine.high %v2699_v29, %v2715_v32  ;;  %v2723_v37 = vcombine.low %v2699_v29, %v2715_v32  ;;  %v2726_v41 = vcombine.high %v2706_v15, %v2722_v36  ;;  %v2725_v42 = vcombine.low %v2706_v15, %v2722_v36  ;;  %3593 = vmatprep.subr.mxu1 %v2973_v9  ;;  %v3096_v15 = vld [vmem:[%s4805_s1 + $0x78] sm:$0xff]  ;;  %v3095_v36 = vld [vmem:[%s4805_s1 + $0x70] sm:$0xff] }
 0x5de   : > { %3594 = vmatpush3.msra.mxu1 %v2973_v9  ;;  %3606 = vmatprep.subr.mxu0 %v3096_v15 }
 0x5df   : > { %2797 = vrot.lane.b32.xlu0 %v2724_v33, %s3968_s10  ;;  %3595 = vmatprep.subr.mxu1 %v2972_v11  ;;  %s3871_s10 = scalar_lea.vmem %s4694_s23, 256 }
 0x5e0   : > { %2807 = vrot.lane.b32.xlu1 %v2793_v40, %s3969_s25  ;;  %3596 = vmatpush3.msra.mxu1 %v2972_v11  ;;  %v3093_v40 = vld [vmem:[%s4805_s1 + $0x60] sm:$0xff]  ;;  %p3872_p3 = scmp.ne.s32.totalorder %s4694_s23, %s3871_s10 }
 0x5e1   : > { %3597 = vmatprep.subr.mxu1 %v2971_v26 }
 0x5e2   : > { %3598 = vmatpush3.msra.mxu1 %v2971_v26  ;;  %p3873_p8 = pnand %p3872_p3, %p4812_p7 }
 0x5e3   : > { %2813 = vrot.lane.b32.xlu0 %v2726_v41, %s3970_s9  ;;  %3599 = vmatprep.subr.mxu1 %v2970_v13  ;;  %v3092_v41 = vld [vmem:[%s4805_s1 + $0x58] sm:$0xff] }
 0x5e4   : > { %2805 = vrot.lane.b32.xlu1 %v2725_v42, %s3969_s25  ;;  %3600 = vmatpush3.msra.mxu1 %v2970_v13  ;;  %v3091_v42 = vld [vmem:[%s4805_s1 + $0x50] sm:$0xff]  ;;  %s4806_s25 = sld [smem:[#allocation25_spill]]  ;;  %p3874_p9 = pneg %p3873_p8 }
 0x5e5   : > { %3601 = vmatprep.subr.mxu1 %v2969_v35 }
 0x5e6   : > { %3602 = vmatpush3.msra.mxu1 %v2969_v35 }
 0x5e8   : > { %2815 = vrot.lane.b32.xlu1 %v2794_v43, %s3970_s9  ;;  %v3090_v43 = vld [vmem:[%s4805_s1 + $0x48] sm:$0xff]  ;;  %s4807_s9 = sld [smem:[#allocation17_spill]] }
 0x5ee   : > { %s3383_s16 = sshll.u32 %s4807_s9, 8 }
 0x5ef   : > { %s4692_s21 = scalar_lea.hbm %s4810_s18, %s3383_s16 }
 0x64e   : > { %v2800_v45 = vpop.permute.xlu1 %2799 }
 0x64f   : > { %v2820_v25 = vsel %vm995_vm1, %v2791_v28, %v2800_v45  ;;  %v3089_v45 = vld [vmem:[%s4805_s1 + $0x40] sm:$0xff] }
 0x651   : > { %v2798_v46 = vpop.permute.xlu0 %2797 }
 0x652   : > { %v2808_v47 = vpop.permute.xlu1 %2807  ;;  %v2819_v49 = vsel %vm995_vm1, %v2723_v37, %v2798_v46  ;;  %v3094_v37 = vld [vmem:[%s4805_s1 + $0x68] sm:$0xff]  ;;  %v3088_v46 = vld [vmem:[%s4805_s1 + $0x38] sm:$0xff] }
 0x653   : > { %v2823_v53 = vsel %vm2821_vm3, %v2820_v25, %v2808_v47  ;;  %v3087_v47 = vld [vmem:[%s4805_s1 + $0x30] sm:$0xff]  ;;  %v3081_v25 = vld [vmem:[%s4805_s1] sm:$0xff] }
 0x655   : > { %v2814_v50 = vpop.permute.xlu0 %2813 }
 0x656   : > { %v2806_v34 = vpop.permute.xlu1 %2805 }
 0x657   : > { %v2822_v52 = vsel %vm2821_vm3, %v2819_v49, %v2806_v34  ;;  %v3086_v49 = vld [vmem:[%s4805_s1 + $0x28] sm:$0xff]  ;;  %v3085_v34 = vld [vmem:[%s4805_s1 + $0x20] sm:$0xff] }
 0x658   : > { %v2825_v30 = vsel %vm2824_vm2, %v2822_v52, %v2814_v50  ;;  %v3084_v50 = vld [vmem:[%s4805_s1 + $0x18] sm:$0xff]  ;;  %v3083_v52 = vld [vmem:[%s4805_s1 + $0x10] sm:$0xff] }
 0x659   : > { %3584 = vmatprep.mubr.msk.f32.mxu0 %vm561_vm0, %v2825_v30  ;;  %v3082_v30 = vld [vmem:[%s4805_s1 + $0x8] sm:$0xff] }
 0x65a   : > { %v2816_v8 = vpop.permute.xlu1 %2815 }
 0x65b   : > { %v2826_v31 = vsel %vm2824_vm2, %v2823_v53, %v2816_v8  ;;  %v3371_v53 = vld [vmem:[%s4806_s25] ss:$0 sm:$0xff]  ;;  %s3971_s25 = smov [#allocation12]  }
 0x65c   : > { %3585 = vmatmul.mubr.msk.f32.vlgmr.msra.gmra.mxu0 %vm561_vm0, %v2826_v31  ;;  %s3875_s9 = sshll.u32 %s3971_s25, 4  ;;  %s3876_s9 = int_to_ptr.vmem [resolvable:$false] %s3875_s9 }
 0x65d   : > { %3607 = vmatpush3.msra.mxu0 %v3096_v15  ;;  %s3877_s12 = scalar_lea.vmem %s3876_s9, 512  ;;  %p3878_p12 = scmp.lt.s32.totalorder %s4694_s23, %s3876_s9 }
 0x65e   : > { %3608 = vmatprep.subr.mxu0 %v3095_v36  ;;  %p3879_p13 = scmp.lt.s32.totalorder %s3877_s12, %s3871_s10 }
 0x65f   : > { %3609 = vmatpush3.msra.mxu0 %v3095_v36 }
 0x660   : > { %3610 = vmatprep.subr.mxu0 %v3094_v37  ;;  %p3880_p4 = por %p3879_p13, %p3878_p12 }
 0x661   : > { %3611 = vmatpush3.msra.mxu0 %v3094_v37 }
 0x662   : > { %3612 = vmatprep.subr.mxu0 %v3093_v40  ;;  %p3881_p2 = pnand %p3880_p4, %p3874_p9 }
 0x663   : > { %3613 = vmatpush3.msra.mxu0 %v3093_v40 }
 0x664   : > { %3614 = vmatprep.subr.mxu0 %v3092_v41 }
 0x665   : > { %3615 = vmatpush3.msra.mxu0 %v3092_v41 }
 0x666   : > { %3616 = vmatprep.subr.mxu0 %v3091_v42 }
 0x667   : > { %3617 = vmatpush3.msra.mxu0 %v3091_v42 }
 0x668   : > { %3618 = vmatprep.subr.mxu0 %v3090_v43 }
 0x669   : > { %3619 = vmatpush3.msra.mxu0 %v3090_v43 }
 0x66a   : > { %3620 = vmatprep.subr.mxu0 %v3089_v45 }
 0x66b   : > { %3621 = vmatpush3.msra.mxu0 %v3089_v45 }
 0x66c   : > { %3622 = vmatprep.subr.mxu0 %v3088_v46 }
 0x66d   : > { %3623 = vmatpush3.msra.mxu0 %v3088_v46 }
 0x66e   : > { %3624 = vmatprep.subr.mxu0 %v3087_v47 }
 0x66f   : > { %3625 = vmatpush3.msra.mxu0 %v3087_v47 }
 0x670   : > { %3626 = vmatprep.subr.mxu0 %v3086_v49 }
 0x671   : > { %3627 = vmatpush3.msra.mxu0 %v3086_v49 }
 0x672   : > { %3628 = vmatprep.subr.mxu0 %v3085_v34 }
 0x673   : > { %3629 = vmatpush3.msra.mxu0 %v3085_v34 }
 0x674   : > { %3630 = vmatprep.subr.mxu0 %v3084_v50 }
 0x675   : > { %3631 = vmatpush3.msra.mxu0 %v3084_v50 }
 0x676   : > { %3632 = vmatprep.subr.mxu0 %v3083_v52 }
 0x677   : > { %3633 = vmatpush3.msra.mxu0 %v3083_v52 }
 0x678   : > { %3634 = vmatprep.subr.mxu0 %v3082_v30 }
 0x679   : > { %3635 = vmatpush3.msra.mxu0 %v3082_v30 }
 0x67a   : > { %3636 = vmatprep.subr.mxu0 %v3081_v25 }
 0x67b   : > { %3637 = vmatpush3.msra.mxu0 %v3081_v25 }
 0x71c   : > { %v3586_v54 = vpop.f32.mrf.mxu0 }
 0x71d   : > { %v2920_v39 = vadd.f32 %v3586_v54, %v3366_v10 }
 0x71e   : > { %v2914_v55 = vpop.f32.mrf.mxu0 }
 0x71f   : > { %v4610_v51 = vadd.f32 %v3789_v44, %v2920_v39  ;;  %v2915_v17 = vadd.f32 %v3366_v10, %v2914_v55 }
 0x721   : > { %v4613_v57 = vadd.f32 %v3790_v56, %v2915_v17  ;;  %v2928_v58 = vsel %vm561_vm0, %v4610_v51, 0.0 }
 0x722   : > { %2929 = vadd.xlane.f32.xlu1 %v2928_v58 }
 0x723   : > { %v2925_v59 = vsel %vm561_vm0, %v4613_v57, 0.0 }
 0x724   : > { %2926 = vadd.xlane.f32.xlu0 %v2925_v59 }
 0x7ab   : > { %v2930_v60 = vpop.xlane.xlu1 %2929 }
 0x7ac   : > { %v2932_v61 = vmul.f32 0.015625, %v2930_v60 }
 0x7ad   : > { %v2927_v63 = vpop.xlane.xlu0 %2926 }
 0x7ae   : > { %v2931_v0 = vmul.f32 0.015625, %v2927_v63  ;;  %v2934_v1 = vsub.f32 %v4610_v51, %v2932_v61 }
 0x7b0   : > { %v2933_v3 = vsub.f32 %v4613_v57, %v2931_v0  ;;  %v2936_v5 = vmul.f32 %v2934_v1, %v2934_v1 }
 0x7b2   : > { %v2935_v2 = vmul.f32 %v2933_v3, %v2933_v3  ;;  %v2940_v6 = vsel %vm561_vm0, %v2936_v5, 0.0 }
 0x7b4   : > { %v2937_v4 = vsel %vm561_vm0, %v2935_v2, 0.0 }
 0x7b5   : > { %2938 = vadd.xlane.f32.xlu0 %v2937_v4 }
 0x7b9   : > { %2941 = vadd.xlane.f32.xlu0 %v2940_v6 }
 0x83e   : > { %v2939_v38 = vpop.xlane.xlu0 %2938 }
 0x83f   : > { %v2943_v14 = vmul.f32 0.015625, %v2939_v38 }
 0x841   : > { %v2945_v16 = vadd.f32 1e-05, %v2943_v14 }
 0x842   : > { %v2942_v18 = vpop.xlane.xlu0 %2941 }
 0x843   : > { %3777 = vrsqrt.f32 %v2945_v16  ;;  %v2944_v48 = vmul.f32 0.015625, %v2942_v18 }
 0x845   : > { %v2946_v19 = vadd.f32 1e-05, %v2944_v48 }
 0x847   : > { %3779 = vrsqrt.f32 %v2946_v19 }
 0x850   : > { %v3778_v20 = vpop.eup %3777 }
 0x851   : > { %v2949_v22 = vmul.f32 %v3778_v20, %v2933_v3  ;;  %v3376_v3 = vld [vmem:[%s4808_s28] ss:$0 sm:$0xff] }
 0x853   : > { %v2958_v23 = vmul.f32 %v3369_v21, %v2949_v22 }
 0x854   : > { %v3780_v24 = vpop.eup %3779 }
 0x855   : > { %v2950_v28 = vmul.f32 %v3780_v24, %v2934_v1  ;;  %v2967_v29 = vadd.f32 %v3370_v27, %v2958_v23 }
 0x857   : > { %v2959_v32 = vmul.f32 %v3369_v21, %v2950_v28  ;;  %3603 = vmatprep.mubr.msk.f32.mxu1 %vm561_vm0, %v2967_v29 }
 0x859   : > { %v2968_v33 = vadd.f32 %v3370_v27, %v2959_v32 }
 0x85b   : > { %3604 = vmatmul.mubr.msk.f32.vlgmr.msra.gmra.mxu1 %vm561_vm0, %v2968_v33 }
 0x91b   : > { %v3605_v8 = vpop.f32.mrf.mxu1 }
 0x91c   : > { %v3062_v31 = vadd.f32 %v3605_v8, %v3371_v53 }
 0x91d   : > { %v3056_v10 = vpop.f32.mrf.mxu1 }
 0x91e   : > { %v3375_v54 = vmul.f32 -1.702, %v3062_v31  ;;  %v3057_v39 = vadd.f32 %v3371_v53, %v3056_v10 }
 0x920   : > { %v3071_v55 = vmul.f32 1.442695, %v3375_v54  ;;  %v3374_v44 = vmul.f32 -1.702, %v3057_v39 }
 0x922   : > { %3781 = vpow2.f32 %v3071_v55  ;;  %v3069_v17 = vmul.f32 1.442695, %v3374_v44 }
 0x924   : > { %3783 = vpow2.f32 %v3069_v17 }
 0x92f   : > { %v3782_v56 = vpop.eup %3781 }
 0x930   : > { %v3074_v58 = vadd.f32 1.0, %v3782_v56 }
 0x931   : > { %v3784_v59 = vpop.eup %3783 }
 0x932   : > { %v3073_v60 = vadd.f32 1.0, %v3784_v59  ;;  %3785 = vrcp.f32 %v3074_v58 }
 0x934   : > { %3787 = vrcp.f32 %v3073_v60 }
 0x93f   : > { %v3786_v61 = vpop.eup %3785 }
 0x940   : > { %v3080_v1 = vmul.f32 %v3786_v61, %v3062_v31 }
 0x941   : > { %v3788_v63 = vpop.eup %3787 }
 0x942   : > { %v3079_v0 = vmul.f32 %v3788_v63, %v3057_v39 }
 0x944   : > { %3638 = vmatprep.mubr.f32.mxu0 %v3079_v0 }
 0x945   : > { %3639 = vmatmul.mubr.f32.vlgmr.msra.gmra.mxu0 %v3080_v1 }
 0xa05   : > { %v3640_v2 = vpop.f32.mrf.mxu0 }
 0xa06   : > { %v3176_v4 = vadd.f32 %v3640_v2, %v3376_v3 }
 0xa07   : > { %v3170_v5 = vpop.f32.mrf.mxu0 }
 0xa08   : > { %v3180_v6 = vadd.f32 %v3176_v4, %v4610_v51  ;;  %v3171_v12 = vadd.f32 %v3376_v3, %v3170_v5 }
 0xa0a   : > { %3182 = vst.msk [vmem:[%s553_s17 + $0x8] sm:$0xff] %vm561_vm0, %v3180_v6  ;;  %v3179_v7 = vadd.f32 %v3171_v12, %v4613_v57 }
 0xa0c   : > { %3181 = vst.msk [vmem:[%s553_s17] sm:$0xff] %vm561_vm0, %v3179_v7 }
 0xa0d   : > { %3884 = shalt.err (!%p3881_p2)
}
 0xa0e   : > { %s3885_s26 = scalar_lea.hbm %s4692_s21, 256  ;;  %s3889_s17 = scalar_lea.hbm %s4811_s27, 512 }
 0xa0f   : > { %p3886_p6 = scmp.ne.s32.totalorder %s4692_s21, %s3885_s26  ;;  %p3890_p0 = scmp.lt.s32.totalorder %s4692_s21, %s4811_s27 }
 0xa10   : > { %p3891_p10 = scmp.lt.s32.totalorder %s3889_s17, %s3885_s26 }
 0xa11   : > { %p3887_p11 = pnand %p3886_p6, %p4812_p7 }
 0xa12   : > { %p3892_p5 = por %p3891_p10, %p3890_p0 }
 0xa13   : > { %p3888_p1 = pneg %p3887_p11 }
 0xa15   : > { %p3893_p3 = pnand %p3892_p5, %p3888_p1 }
 0xa17   : > { %3896 = shalt.err (!%p3893_p3)
}
 0xa18   : > { %s3972_s18 = smov 128   ;;  %s3973_s10 = smov 8  }
 0xa19   : > { %3651 = dma.vmem_to_hbm [thread:$0]  (%p4812_p7), %s4694_s23, 256, %s4692_s21, %s3184_s14, %s3972_s18, %s3972_s18, %s3973_s10  }
 0xa1a PF: > { %s4813_s25 = sld [smem:[#allocation16_spill]] }
 0xa1b   : > { %s4814_s9 = sld [smem:[#allocation20_spill]] }
 0xa1c   : > { %s4815_s12 = sld [smem:[#allocation18_spill]] }
 0xa20   : > { %s3214_s28 = sand.u32 1, %s4813_s25  }
 0xa21   : > { %p4816_p8 = scmp.ne.s32.totalorder %s4814_s9, 0  ;;  %s3215_s26 = scalar_lea.sflag [#allocation8], %s3214_s28 }
 0xa22   : > { %p4817_p9 = scmp.ge.s32.totalorder %s4815_s12, 2 }
 0xa24   : > { %p3665_p12 = pnand %p4817_p9, %p4816_p8 }
 0xa26   : > { %p3666_p13 = pneg %p3665_p12 }
 0xa28   : > { %3930 = dma.done.wait (%p3666_p13), %s3215_s26, 256  }
 0xa29   : > { %3932 = vsyncadd (%p3666_p13), %s3215_s26, 4294967040  ;;  %s32_s23 = sadd.s32 1, %s4815_s12   ;;  %s4818_s18 = smov %s3939_s19 }
 0xa2a   : > { %p29_p4 = scmp.ge.s32.totalorder %s32_s23, 4   ;;  %s4819_s19 = smov %s3943_s20 }
 0xa2b   : > { %s4820_s20 = smov %s4181_s8  ;;  %s4821_s21 = smov %s3951_s22 }
 0xa2c   : > { %s4822_s22 = smov %s4824_s30  ;;  %31 = sbr.rel (!%p29_p4) target bundleno = 16 (0x10), region = 137 }
 0xa31   :  { %3220 = vsyncpa [#allocation7], 1 }
 0xa32   :  { %3222 = vsyncpa [#allocation7 + $0x1], 1 }
 0xa33   :  { %3223 = vsyncpa [#allocation10], 1 }
 0xa34   :  { %3224 = vsyncpa [#allocation8], 1 }
 0xa35   :  { %3226 = vsyncpa [#allocation8 + $0x1], 1 }

// kernel: tpu_custom_call.1
= control target key start
LH: loop header
LB: loop body
LE: loop exit
PB: predicated region body
PF: predicated region fallthrough
CT: control target
= control target key end

     0   :  { %s4745_s0 = inlined_call_operand.hbm [shape: f32[2,16,64], index: 0, kind: input, shape index: {}]   ;;  %s4746_s1 = inlined_call_operand.hbm [shape: f32[1,64], index: 1, kind: input, shape index: {}]   ;;  %s4747_s2 = inlined_call_operand.vmem [shape: f32[1,64], index: 2, kind: input, shape index: {}]   ;;  %s4748_s3 = inlined_call_operand.vmem [shape: f32[64,64], index: 3, kind: input, shape index: {}]   ;;  %s4749_s4 = inlined_call_operand.vmem [shape: f32[1,64], index: 4, kind: input, shape index: {}]   ;;  %s4750_s5 = inlined_call_operand.vmem [shape: f32[64,128], index: 5, kind: input, shape index: {}]   ;;  %s4751_s6 = inlined_call_operand.vmem [shape: f32[1,128], index: 6, kind: input, shape index: {}]   ;;  %s4752_s7 = inlined_call_operand.vmem [shape: f32[64,64], index: 7, kind: input, shape index: {}]   ;;  %s4753_s8 = inlined_call_operand.vmem [shape: f32[1,64], index: 8, kind: input, shape index: {}]   ;;  %s4754_s9 = inlined_call_operand.vmem [shape: f32[1,64], index: 9, kind: input, shape index: {}]   ;;  %s4755_s10 = inlined_call_operand.vmem [shape: f32[1,64], index: 10, kind: input, shape index: {}]   ;;  %s4756_s11 = inlined_call_operand.hbm [shape: f32[64,128], index: 11, kind: input, shape index: {}]   ;;  %s4757_s12 = inlined_call_operand.vmem [shape: f32[1,128], index: 12, kind: input, shape index: {}]   ;;  %s4758_s13 = inlined_call_operand.vmem [shape: f32[128,64], index: 13, kind: input, shape index: {}]   ;;  %s4759_s14 = inlined_call_operand.vmem [shape: f32[1,64], index: 14, kind: input, shape index: {}]   ;;  %s4760_s15 = inlined_call_operand.hbm [shape: f32[2,16,64], index: 15, kind: output, shape index: {}]  }
   0x1   :  { %4775 = sst [smem:[#allocation21_spill]] %s4746_s1 }
   0x2   :  { %4776 = sst [smem:[#allocation22_spill]] %s4753_s8 }
   0x3   :  { %4777 = sst [smem:[#allocation23_spill]] %s4754_s9 }
   0x4   :  { %4778 = sst [smem:[#allocation24_spill]] %s4755_s10 }
   0x5   :  { %4779 = sst [smem:[#allocation25_spill]] %s4757_s12 }
   0x6   :  { %4780 = sst [smem:[#allocation26_spill]] %s4758_s13 }
   0x7   :  { %4781 = sst [smem:[#allocation27_spill]] %s4759_s14 }
   0x8   :  { %4782 = sst [smem:[#allocation28_spill]] %s4760_s15 }
   0x9   :  { %20 = vsyncpa [#allocation7], 0 }
   0xa   :  { %22 = vsyncpa [#allocation7 + $0x1], 0 }
   0xb   :  { %23 = vsyncpa [#allocation10], 0 }
   0xc   :  { %24 = vsyncpa [#allocation8], 0 }
   0xd   :  { %26 = vsyncpa [#allocation8 + $0x1], 0  ;;  %s4054_s18 = smov 0   ;;  %s4056_s19 = smov 0  }
   0xe   :  { %s4058_s20 = smov 0   ;;  %s4060_s21 = smov 0  }
   0xf   :  { %s4062_s22 = smov 0   ;;  %s4064_s23 = smov 0  }
  0x10 LB: > { %4783 = sst [smem:[#allocation16_spill]] %s3935_s18  ;;  %s3302_s24 = sadd.s32 4294967295, %s3955_s23   ;;  %s3955_s23 = sphi %s4064_s23, %s32_s23   ;;  %s3951_s22 = sphi %s4062_s22, %s4822_s22   ;;  %s3947_s21 = sphi %s4060_s21, %s4821_s21   ;;  %s3943_s20 = sphi %s4058_s20, %s4820_s20   ;;  %s3939_s19 = sphi %s4056_s19, %s4819_s19   ;;  %s3935_s18 = sphi %s4054_s18, %s4818_s18  }
  0x11   : > { %4784 = sst [smem:[#allocation17_spill]] %s3947_s21  ;;  %s3303_s25 = sadd.s32 4294967294, %s3955_s23  }
  0x12   : > { %4785 = sst [smem:[#allocation18_spill]] %s3955_s23  ;;  %p58_p0 = scmp.ne.s32.totalorder %s3943_s20, %s3939_s19 }
  0x13   : > { %p59_p1 = scmp.eq.s32.totalorder %s3955_s23, 0  ;;  %p64_p2 = scmp.ne.s32.totalorder %s3939_s19, %s3935_s18 }
  0x14   : > { %p4091_p3 = scmp.eq.s32.totalorder %s3302_s24, 0  ;;  %p384_p4 = scmp.eq.s32.totalorder %s3302_s24, 1 }
  0x15   : > { %p4095_p5 = por %p59_p1, %p58_p0  ;;  %p390_p6 = scmp.eq.s32.totalorder %s3303_s25, 1 }
  0x16   : > { %s4786_s26 = scalar_select %p4091_p3, 1, 0 }
  0x17   : > { %p4101_p7 = por %p4091_p3, %p64_p2  ;;  %p4105_p8 = por %p384_p4, %p58_p0 }
  0x18   : > { %p4109_p9 = por %p390_p6, %p64_p2  ;;  %p3304_p10 = scmp.ge.s32.totalorder %s3955_s23, 1 }
  0x19   : > { %s4788_s28 = scalar_select %p4101_p7, 1, 0 }
  0x1a   : > { %s4789_s29 = scalar_select %p4105_p8, 1, 0 }
  0x1b   : > { %s4791_s30 = scalar_select %p4109_p9, 1, 0 }
  0x1c   : > { %4790 = sst [smem:[#allocation19_spill]] %s4789_s29  ;;  %p397_p11 = scmp.lt.s32.totalorder %s3955_s23, 3 }
  0x1d   : > { %4792 = sst [smem:[#allocation20_spill]] %s4791_s30  ;;  %s3957_s17 = smov [#allocation9]  }
  0x1e   : > { %p4116_p13 = pnand %p3304_p10, %p397_p11  ;;  %s410_s24 = sshll.u32 %s3957_s17, 4  ;;  %s411_s24 = int_to_ptr.vmem [resolvable:$true] %s410_s24 }
  0x1f   : > { %p3670_p1 = scmp.lt.s32.totalorder %s3955_s23, 2  ;;  %s3958_s30 = smov [#allocation11]  }
  0x20   : > { %s4793_s16 = scalar_select %p4116_p13, 1, 0 }
  0x21   : > { %p3653_p0 = pneg %p4116_p13  ;;  %p4125_p4 = pnand %p3670_p1, %p4095_p5 }
  0x22   : > { %s447_s18 = sshll.u32 %s3958_s30, 4  ;;  %s3802_s17 = scalar_lea.vmem %s411_s24, 16  ;;  %s448_s18 = int_to_ptr.vmem [resolvable:$true] %s447_s18 }
  0x23   : > { %s4794_s25 = scalar_select %p4125_p4, 1, 0 }
  0x24   : > { %p4131_p2 = pnand %p3653_p0, %p4091_p3  ;;  %p3803_p10 = scmp.ne.s32.totalorder %s411_s24, %s3802_s17 }
  0x25   : > { %s3809_s27 = scalar_lea.vmem %s411_s24, 32  ;;  %p3810_p1 = scmp.lt.s32.totalorder %s411_s24, %s411_s24 }
  0x26   : > { %p3793_p6 = pneg %p4131_p2  ;;  %p3811_p12 = scmp.lt.s32.totalorder %s3809_s27, %s3802_s17 }
  0x28   : > { %p3805_p5 = pnand %p3803_p10, %p3793_p6  ;;  %p3812_p9 = por %p3811_p12, %p3810_p1 }
  0x2a   : > { %p3806_p11 = pneg %p3805_p5 }
  0x2c   : > { %p3813_p8 = pnand %p3812_p9, %p3806_p11 }
  0x2e   : > { %3816 = shalt.err (!%p3813_p8)
}
  0x2f   : > { %s4796_s1 = sld [smem:[#allocation21_spill]]  ;;  %s3828_s29 = scalar_lea.vmem %s448_s18, 1024 }
  0x30   : > { %p3829_p0 = scmp.ne.s32.totalorder %s448_s18, %s3828_s29  ;;  %p3836_p5 = scmp.lt.s32.totalorder %s448_s18, %s448_s18 }
  0x31   : > { %p3837_p7 = scmp.lt.s32.totalorder %s3828_s29, %s3828_s29 }
  0x32   : > { %p3831_p3 = pnand %p3829_p0, %p3793_p6 }
  0x33   : > { %p3838_p13 = por %p3837_p7, %p3836_p5 }
  0x34   : > { %p3832_p10 = pneg %p3831_p3 }
  0x35   : > { %3656 = dma.hbm_to_vmem [thread:$0]  (!%p4131_p2), %s4796_s1, 16, %s411_s24, [#allocation10]  }
  0x36   : > { %p3839_p4 = pnand %p3838_p13, %p3832_p10 }
  0x38   : > { %3842 = shalt.err (!%p3839_p4)
}
  0x39   : > { %s3959_s17 = smov 128   ;;  %s3960_s23 = smov 8  }
  0x3a   : > { %3659 = dma.hbm_to_vmem [thread:$0]  (!%p4131_p2), %s4756_s11, 1024, %s448_s18, [#allocation10], %s3959_s17, %s3959_s17, %s3960_s23  }
  0x3b   : > { %s470_s29 = sand.u32 1, %s3943_s20   ;;  %s44_s30 = sadd.s32 1, %s3951_s22 }
  0x3c   : > { %s3308_s1 = sshll.u32 %s470_s29, 4  ;;  %p46_p3 = scmp.ge.s32.totalorder %s44_s30, 2 }
  0x3d   : > { %s3382_s14 = sshll.u32 %s3951_s22, 8  ;;  %s474_s21 = scalar_lea.vmem [#allocation6], %s3308_s1 }
  0x3e   : > { %s481_s12 = sshll.u32 %s474_s21, 4  ;;  %s4824_s30 = smov (%p46_p3, %s44_s30), 0  ;;  %s482_s12 = int_to_ptr.vmem [resolvable:$true] %s481_s12 }
  0x3f   : > { %s480_s15 = scalar_lea.hbm %s4745_s0, %s3382_s14  ;;  %s51_s9 = sadd.s32 1, %s3943_s20 }
  0x40   : > { %s48_s8 = ssub.s32 %s3951_s22, %s4824_s30  ;;  %s471_s18 = scalar_lea.sflag [#allocation7], %s470_s29 }
  0x41   : > { %p4167_p7 = scmp.eq.s32.totalorder %s48_s8, 0  ;;  %p4798_p8 = scmp.ne.s32.totalorder %s4794_s25, 0 }
  0x42   : > { %s3856_s27 = scalar_lea.vmem %s482_s12, 256  ;;  %s3961_s1 = smov [#allocation6]  }
  0x43   : > { %p3845_p9 = pneg %p4798_p8  ;;  %p3857_p12 = scmp.ne.s32.totalorder %s482_s12, %s3856_s27 }
  0x44   : > { %s3861_s21 = sshll.u32 %s3961_s1, 4  ;;  %s3862_s21 = int_to_ptr.vmem [resolvable:$false] %s3861_s21 }
  0x45   : > { %p3859_p13 = pnand %p3857_p12, %p3845_p9  ;;  %s3863_s10 = scalar_lea.vmem %s3862_s21, 512 }
  0x46   : > { %p3864_p2 = scmp.lt.s32.totalorder %s482_s12, %s3862_s21  ;;  %p3865_p6 = scmp.lt.s32.totalorder %s3863_s10, %s3856_s27 }
  0x47   : > { %p3860_p4 = pneg %p3859_p13 }
  0x48   : > { %p3866_p11 = por %p3865_p6, %p3864_p2 }
  0x4a   : > { %p3867_p1 = pnand %p3866_p11, %p3860_p4 }
  0x4c   : > { %3870 = shalt.err (!%p3867_p1)
}
  0x4d   : > { %3663 = dma.hbm_to_vmem [thread:$0]  (!%p4798_p8), %s480_s15, 256, %s482_s12, %s471_s18, %s3959_s17, %s3959_s17, %s3960_s23  }
  0x4e   : > { %s4181_s8 = scalar_select %p4167_p7, %s3943_s20, %s51_s9  }
  0x4f   : > { %p4799_p0 = scmp.ne.s32.totalorder %s4793_s16, 0 }
  0x50   : > { %s4186_s13 = sand.u32 (!%p4799_p0), 1, %s3939_s19   ;;  %p4800_p10 = scmp.ne.s32.totalorder (!%p4799_p0), %s4788_s28, 0 }
  0x51   : > { %493 = sbr.rel (%p4799_p0) target bundleno = 2586 (0xa1a), region = 80  ;;  %s3312_s14 = sshll.u32 (!%p4799_p0), %s4186_s13, 4 }
  0x52   : > { %s496_s25 = scalar_lea.sflag (!%p4799_p0), [#allocation7], %s4186_s13  ;;  %s4192_s29 = scalar_lea.vmem (!%p4799_p0), [#allocation6], %s3312_s14 }
  0x56   : > { %3922 = dma.done.wait (%p4800_p10), %s496_s25, 256  }
  0x57   : > { %3924 = vsyncadd (%p4800_p10), %s496_s25, 4294967040  ;;  %p4801_p5 = scmp.ne.s32.totalorder %s4786_s26, 0 }
  0x59   : > { %3926 = dma.done.wait (%p4801_p5), [#allocation10], 1040  }
  0x5a   : > { %3928 = vsyncadd (%p4801_p5), [#allocation10], 4294966256  ;;  %vm561_vm0 = vcmask 523264   ;;  %v559_v0 = vld [vmem:[%s4192_s29] sm:$0xff]  ;;  %v560_v1 = vld [vmem:[%s4192_s29 + $0x8] sm:$0xff]  ;;  %s3962_s23 = smov 96  }
  0x5b   : > { %v562_v2 = vsel %vm561_vm0, %v559_v0, 0.0  ;;  %v565_v3 = vsel %vm561_vm0, %v560_v1, 0.0  ;;  %v614_v24 = vld [vmem:[%s4750_s5 + $0x38] sm:$0xff]  ;;  %v613_v25 = vld [vmem:[%s4750_s5 + $0x30] sm:$0xff]  ;;  %v612_v26 = vld [vmem:[%s4750_s5 + $0x28] sm:$0xff]  ;;  %s3963_s15 = smov 112  }
  0x5c   : > { %563 = vadd.xlane.f32.xlu0 %v562_v2  ;;  %1312 = vadd.xlane.f32.xlu1 %v562_v2  ;;  %v611_v27 = vld [vmem:[%s4750_s5 + $0x20] sm:$0xff]  ;;  %v610_v28 = vld [vmem:[%s4750_s5 + $0x18] sm:$0xff]  ;;  %v609_v29 = vld [vmem:[%s4750_s5 + $0x10] sm:$0xff]  ;;  %s3964_s24 = smov 80   ;;  %vm995_vm1 = vcmask 130048   ;;  %s3967_s1 = smov 64  }
  0x5d   : > { %3474 = vmatprep.subr.mxu1 %v614_v24  ;;  %v608_v30 = vld [vmem:[%s4750_s5 + $0x8] sm:$0xff]  ;;  %v607_v31 = vld [vmem:[%s4750_s5] sm:$0xff]  ;;  %v1363_v32 = vld [vmem:[%s4748_s3 + $0x38] sm:$0xff]  ;;  %s3968_s10 = smov 16   ;;  %s3969_s25 = smov 32   ;;  %vm2824_vm2 = vcmask 392192  }
  0x5e   : > { %3475 = vmatpush3.msra.mxu1 %v614_v24  ;;  %v3316_v46 = vld [vmem:[#allocation9] ss:$0 sm:$0xff]  ;;  %v1362_v58 = vld [vmem:[%s4748_s3 + $0x30] sm:$0xff]  ;;  %v1361_v60 = vld [vmem:[%s4748_s3 + $0x28] sm:$0xff]  ;;  %s3970_s9 = smov 48   ;;  %vm2821_vm3 = vcmask 261120  }
  0x5f   : > { %3476 = vmatprep.subr.mxu1 %v613_v25  ;;  %v3317_v48 = vld [vmem:[%s4747_s2] ss:$0 sm:$0xff]  ;;  %v1359_v63 = vld [vmem:[%s4748_s3 + $0x18] sm:$0xff]  ;;  %v1357_v2 = vld [vmem:[%s4748_s3 + $0x8] sm:$0xff]  ;;  %s4802_s28 = sld [smem:[#allocation22_spill]] }
  0x60   : > { %566 = vadd.xlane.f32.xlu0 %v565_v3  ;;  %1315 = vadd.xlane.f32.xlu1 %v565_v3  ;;  %v1360_v62 = vld [vmem:[%s4748_s3 + $0x20] sm:$0xff]  ;;  %s4803_s17 = sld [smem:[#allocation23_spill]] }
  0x61   : > { %3477 = vmatpush3.msra.mxu1 %v613_v25  ;;  %s4810_s18 = sld [smem:[#allocation28_spill]] }
  0x62   : > { %3478 = vmatprep.subr.mxu1 %v612_v26 }
  0x63   : > { %3479 = vmatpush3.msra.mxu1 %v612_v26 }
  0x64   : > { %3480 = vmatprep.subr.mxu1 %v611_v27 }
  0x65   : > { %3481 = vmatpush3.msra.mxu1 %v611_v27 }
  0x66   : > { %3482 = vmatprep.subr.mxu1 %v610_v28 }
  0x67   : > { %3483 = vmatpush3.msra.mxu1 %v610_v28  ;;  %s4811_s27 = smov %s4810_s18 }
  0x68   : > { %3484 = vmatprep.subr.mxu1 %v609_v29 }
  0x69   : > { %3485 = vmatpush3.msra.mxu1 %v609_v29 }
  0x6a   : > { %3486 = vmatprep.subr.mxu1 %v608_v30 }
  0x6b   : > { %3487 = vmatpush3.msra.mxu1 %v608_v30 }
  0x6c   : > { %3488 = vmatprep.subr.mxu1 %v607_v31 }
  0x6d   : > { %3489 = vmatpush3.msra.mxu1 %v607_v31 }
  0x6e   : > { %3493 = vmatprep.subr.mxu1 %v1363_v32 }
  0xe5   : > { %v564_v4 = vpop.xlane.xlu0 %563  ;;  %v1313_v5 = vpop.xlane.xlu1 %1312 }
  0xe6   : > { %v569_v6 = vmul.f32 0.015625, %v564_v4  ;;  %v1318_v7 = vmul.f32 0.015625, %v1313_v5  ;;  %v1356_v4 = vld [vmem:[%s4748_s3] sm:$0xff] }
  0xe8   : > { %v4206_v8 = vsub.f32 %v559_v0, %v569_v6  ;;  %v4208_v9 = vsub.f32 %v559_v0, %v1318_v7  ;;  %v3318_v6 = vld [vmem:[%s4751_s6] ss:$0 sm:$0xff] }
  0xe9   : > { %v567_v10 = vpop.xlane.xlu0 %566  ;;  %v1316_v11 = vpop.xlane.xlu1 %1315 }
  0xea   : > { %v570_v12 = vmul.f32 0.015625, %v567_v10  ;;  %v1319_v13 = vmul.f32 0.015625, %v1316_v11  ;;  %v573_v14 = vmul.f32 %v4206_v8, %v4206_v8  ;;  %v1322_v15 = vmul.f32 %v4208_v9, %v4208_v9  ;;  %v3331_v11 = vld [vmem:[%s4749_s4] ss:$0 sm:$0xff] }
  0xec   : > { %v572_v16 = vsub.f32 %v560_v1, %v570_v12  ;;  %v4214_v17 = vsub.f32 %v560_v1, %v1319_v13  ;;  %v575_v18 = vsel %vm561_vm0, %v573_v14, 0.0  ;;  %v1324_v19 = vsel %vm561_vm0, %v1322_v15, 0.0  ;;  %v1358_v1 = vld [vmem:[%s4748_s3 + $0x10] sm:$0xff] }
  0xed   : > { %576 = vadd.xlane.f32.xlu0 %v575_v18  ;;  %v3965_v18 = vmov 1983009808  }
  0xee   : > { %v574_v20 = vmul.f32 %v572_v16, %v572_v16  ;;  %v1323_v21 = vmul.f32 %v4214_v17, %v4214_v17 }
  0xf0   : > { %v578_v22 = vsel %vm561_vm0, %v574_v20, 0.0  ;;  %v1327_v23 = vsel %vm561_vm0, %v1323_v21, 0.0  ;;  %v728_v20 = vlaneseq  ;;  %v3966_v21 = vmov 1934713408  }
  0xf1   : > { %1325 = vadd.xlane.f32.xlu0 %v1324_v19  ;;  %579 = vadd.xlane.f32.xlu1 %v578_v22  ;;  %v726_v19 = vunpack.c.l.s4 %v3965_v18  ;;  %v758_v22 = vunpack.c.l.s4 %v3966_v21 }
  0xf2   : > { %v729_v24 = vshrl.u32 %v728_v20, 7 }
  0xf3   : > { %v759_v26 = vunpack.c.0.s8 %v758_v22 }
  0xf5   : > { %1328 = vadd.xlane.f32.xlu1 %v1327_v23  ;;  %v727_v23 = vunpack.c.0.s8 %v726_v19 }
  0xf7   : > { %v4308_v27 = vsub.s32 %v727_v23, %v729_v24 }
 0x176   : > { %v577_v33 = vpop.xlane.xlu0 %576 }
 0x177   : > { %v581_v34 = vmul.f32 0.015625, %v577_v33 }
 0x179   : > { %v583_v35 = vadd.f32 1e-05, %v581_v34  ;;  %v4322_v34 = vsub.s32 %v759_v26, %v729_v24 }
 0x17a   : > { %v580_v36 = vpop.xlane.xlu1 %579  ;;  %v1326_v37 = vpop.xlane.xlu0 %1325 }
 0x17b   : > { %3737 = vrsqrt.f32 %v583_v35  ;;  %v582_v38 = vmul.f32 0.015625, %v580_v36  ;;  %v1330_v39 = vmul.f32 0.015625, %v1326_v37 }
 0x17d   : > { %v584_v40 = vadd.f32 1e-05, %v582_v38  ;;  %v1332_v41 = vadd.f32 1e-05, %v1330_v39 }
 0x17e   : > { %v1329_v42 = vpop.xlane.xlu1 %1328 }
 0x17f   : > { %3739 = vrsqrt.f32 %v584_v40  ;;  %v1331_v43 = vmul.f32 0.015625, %v1329_v42 }
 0x180   : > { %3741 = vrsqrt.f32 %v1332_v41 }
 0x181   : > { %v1333_v44 = vadd.f32 1e-05, %v1331_v43 }
 0x183   : > { %3743 = vrsqrt.f32 %v1333_v44 }
 0x188   : > { %v3738_v45 = vpop.eup %3737 }
 0x189   : > { %v587_v47 = vmul.f32 %v3738_v45, %v4206_v8 }
 0x18b   : > { %v596_v49 = vmul.f32 %v3316_v46, %v587_v47 }
 0x18c   : > { %v3740_v50 = vpop.eup %3739 }
 0x18d   : > { %v3742_v51 = vpop.eup %3741  ;;  %v588_v52 = vmul.f32 %v3740_v50, %v572_v16  ;;  %v605_v53 = vadd.f32 %v3317_v48, %v596_v49 }
 0x18e   : > { %v1336_v54 = vmul.f32 %v3742_v51, %v4208_v9 }
 0x18f   : > { %v597_v55 = vmul.f32 %v3316_v46, %v588_v52  ;;  %3490 = vmatprep.mubr.msk.f32.mxu1 %vm561_vm0, %v605_v53 }
 0x190   : > { %v1345_v56 = vmul.f32 %v3316_v46, %v1336_v54  ;;  %v3744_v61 = vpop.eup %3743 }
 0x191   : > { %v606_v57 = vadd.f32 %v3317_v48, %v597_v55  ;;  %v1337_v0 = vmul.f32 %v3744_v61, %v4214_v17 }
 0x192   : > { %v1354_v59 = vadd.f32 %v3317_v48, %v1345_v56 }
 0x193   : > { %3491 = vmatmul.mubr.msk.f32.vlgmr.msra.gmra.mxu1 %vm561_vm0, %v606_v57  ;;  %v1346_v3 = vmul.f32 %v3316_v46, %v1337_v0 }
 0x194   : > { %3494 = vmatpush3.msra.mxu1 %v1363_v32  ;;  %3509 = vmatprep.mubr.msk.f32.mxu1 %vm561_vm0, %v1354_v59 }
 0x195   : > { %3495 = vmatprep.subr.mxu1 %v1362_v58  ;;  %v1355_v5 = vadd.f32 %v3317_v48, %v1346_v3 }
 0x196   : > { %3496 = vmatpush3.msra.mxu1 %v1362_v58 }
 0x197   : > { %3497 = vmatprep.subr.mxu1 %v1361_v60 }
 0x198   : > { %3498 = vmatpush3.msra.mxu1 %v1361_v60 }
 0x199   : > { %3499 = vmatprep.subr.mxu1 %v1360_v62 }
 0x19a   : > { %3500 = vmatpush3.msra.mxu1 %v1360_v62 }
 0x19b   : > { %3501 = vmatprep.subr.mxu1 %v1359_v63 }
 0x19c   : > { %3502 = vmatpush3.msra.mxu1 %v1359_v63 }
 0x19d   : > { %3503 = vmatprep.subr.mxu1 %v1358_v1 }
 0x19e   : > { %3504 = vmatpush3.msra.mxu1 %v1358_v1 }
 0x19f   : > { %3505 = vmatprep.subr.mxu1 %v1357_v2 }
 0x1a0   : > { %3506 = vmatpush3.msra.mxu1 %v1357_v2 }
 0x1a1   : > { %3507 = vmatprep.subr.mxu1 %v1356_v4 }
 0x1a2   : > { %3508 = vmatpush3.msra.mxu1 %v1356_v4 }
 0x1a3   : > { %3510 = vmatmul.mubr.msk.f32.vlgmr.msra.gmra.mxu1 %vm561_vm0, %v1355_v5 }
 0x253   : > { %v3492_v7 = vpop.f32.mrf.mxu1 }
 0x254   : > { %v4283_v8 = vadd.f32 %v3492_v7, %v3318_v6 }
 0x255   : > { %v694_v9 = vpop.f32.mrf.mxu1 }
 0x256   : > { %713 = vrot.lane.b32.xlu1 %v4283_v8, %s3962_s23  ;;  %707 = vrot.lane.b32.xlu0 %v4283_v8, %s3963_s15  ;;  %v4287_v10 = vadd.f32 %v3318_v6, %v694_v9 }
 0x25a   : > { %719 = vrot.lane.b32.xlu1 %v4283_v8, %s3964_s24  ;;  %711 = vrot.lane.b32.xlu0 %v4287_v10, %s3962_s23 }
 0x25e   : > { %705 = vrot.lane.b32.xlu1 %v4287_v10, %s3963_s15 }
 0x262   : > { %717 = vrot.lane.b32.xlu1 %v4287_v10, %s3964_s24 }
 0x263   : > { %v3511_v12 = vpop.f32.mrf.mxu1 }
 0x264   : > { %v1449_v13 = vadd.f32 %v3511_v12, %v3331_v11 }
 0x265   : > { %v1443_v14 = vpop.f32.mrf.mxu1 }
 0x266   : > { %v4296_v15 = vmul.f32 0.25, %v1449_v13  ;;  %v1444_v16 = vadd.f32 %v3331_v11, %v1443_v14 }
 0x268   : > { %v4298_v17 = vmul.f32 0.25, %v1444_v16  ;;  %1458 = vrot.lane.b32.xlu1 %v4296_v15, %s3963_s15 }
 0x26a   : > { %1456 = vrot.lane.b32.xlu0 %v4298_v17, %s3963_s15 }
 0x26c   : > { %1462 = vrot.lane.b32.xlu1 %v4298_v17, %s3962_s23 }
 0x26e   : > { %1468 = vrot.lane.b32.xlu0 %v4298_v17, %s3964_s24 }
 0x270   : > { %1470 = vrot.lane.b32.xlu1 %v4296_v15, %s3964_s24  ;;  %s4804_s24 = sld [smem:[#allocation24_spill]] }
 0x272   : > { %1464 = vrot.lane.b32.xlu0 %v4296_v15, %s3962_s23 }
 0x2c8   : > { %v4306_v25 = vpop.permute.xlu1 %713  ;;  %v4314_v30 = vpop.permute.xlu0 %707 }
 0x2c9   : > { %v791_v28 = vcombine.low %v4283_v8, %v4306_v25  ;;  %v792_v29 = vcombine.high %v4283_v8, %v4306_v25 }
 0x2cb   : > { %v799_v35 = vrot.slane %v791_v28, %v4308_v27  ;;  %v806_v36 = vrot.slane %v792_v29, %v4308_v27 }
 0x2cc   : > { %v4316_v31 = vpop.permute.xlu1 %719  ;;  %v4330_v44 = vpop.permute.xlu0 %711 }
 0x2cd   : > { %v807_v32 = vcombine.low %v4314_v30, %v4316_v31  ;;  %v808_v33 = vcombine.high %v4314_v30, %v4316_v31  ;;  %v723_v49 = vcombine.low %v4287_v10, %v4330_v44  ;;  %v724_v50 = vcombine.high %v4287_v10, %v4330_v44 }
 0x2cf   : > { %v815_v37 = vrot.slane %v807_v32, %v4308_v27  ;;  %v822_v38 = vrot.slane %v808_v33, %v4308_v27  ;;  %v731_v62 = vrot.slane %v723_v49, %v4308_v27  ;;  %v738_v63 = vrot.slane %v724_v50, %v4308_v27 }
 0x2d0   : > { %v4328_v39 = vpop.permute.xlu1 %705 }
 0x2d1   : > { %v823_v40 = vcombine.low %v799_v35, %v815_v37  ;;  %v824_v41 = vcombine.high %v799_v35, %v815_v37  ;;  %v839_v42 = vcombine.low %v806_v36, %v822_v38  ;;  %v840_v43 = vcombine.high %v806_v36, %v822_v38 }
 0x2d3   : > { %v831_v45 = vrot.slane %v823_v40, %v4322_v34  ;;  %v838_v46 = vrot.slane %v824_v41, %v4322_v34  ;;  %v847_v47 = vrot.slane %v839_v42, %v4322_v34  ;;  %v854_v48 = vrot.slane %v840_v43, %v4322_v34 }
 0x2d4   : > { %v4340_v51 = vpop.permute.xlu1 %717 }
 0x2d5   : > { %v927_v52 = vcombine.low %v831_v45, %v838_v46  ;;  %v3323_v53 = vcombine.high %v831_v45, %v838_v46  ;;  %v943_v54 = vcombine.low %v847_v47, %v854_v48  ;;  %v3324_v55 = vcombine.high %v847_v47, %v854_v48 }
 0x2d6   : > { %v739_v56 = vcombine.low %v4328_v39, %v4340_v51  ;;  %v740_v57 = vcombine.high %v4328_v39, %v4340_v51 }
 0x2d7   : > { %v934_v58 = vrot.slane %v927_v52, %v4308_v27  ;;  %v942_v59 = vrot.slane %v3323_v53, %v4308_v27  ;;  %v950_v60 = vrot.slane %v943_v54, %v4308_v27  ;;  %v958_v61 = vrot.slane %v3324_v55, %v4308_v27 }
 0x2d8   : > { %v747_v0 = vrot.slane %v739_v56, %v4308_v27  ;;  %v754_v1 = vrot.slane %v740_v57, %v4308_v27 }
 0x2d9   : > { %v959_v2 = vcombine.low %v934_v58, %v942_v59  ;;  %v960_v3 = vcombine.high %v934_v58, %v942_v59  ;;  %v975_v4 = vcombine.low %v950_v60, %v958_v61  ;;  %v976_v5 = vcombine.high %v950_v60, %v958_v61 }
 0x2da   : > { %v755_v6 = vcombine.low %v731_v62, %v747_v0  ;;  %v756_v7 = vcombine.high %v731_v62, %v747_v0  ;;  %v771_v9 = vcombine.low %v738_v63, %v754_v1  ;;  %v772_v11 = vcombine.high %v738_v63, %v754_v1  ;;  %v4354_v12 = vpop.permute.xlu1 %1458 }
 0x2db   : > { %v967_v13 = vrot.slane %v959_v2, %v4322_v34  ;;  %v974_v14 = vrot.slane %v960_v3, %v4322_v34  ;;  %v983_v16 = vrot.slane %v975_v4, %v4322_v34  ;;  %v990_v18 = vrot.slane %v976_v5, %v4322_v34 }
 0x2dc   : > { %v763_v19 = vrot.slane %v755_v6, %v4322_v34  ;;  %v770_v20 = vrot.slane %v756_v7, %v4322_v34  ;;  %v779_v21 = vrot.slane %v771_v9, %v4322_v34  ;;  %v786_v22 = vrot.slane %v772_v11, %v4322_v34  ;;  %v1457_v23 = vpop.permute.xlu0 %1456 }
 0x2dd   : > { %v991_v24 = vcombine.low %v967_v13, %v983_v16  ;;  %v992_v26 = vcombine.high %v967_v13, %v983_v16  ;;  %v993_v28 = vcombine.low %v974_v14, %v990_v18  ;;  %v994_v29 = vcombine.high %v974_v14, %v990_v18 }
 0x2de   : > { %v859_v32 = vcombine.low %v763_v19, %v770_v20  ;;  %v3321_v33 = vcombine.high %v763_v19, %v770_v20  ;;  %v875_v35 = vcombine.low %v779_v21, %v786_v22  ;;  %v3322_v36 = vcombine.high %v779_v21, %v786_v22  ;;  %v1463_v37 = vpop.permute.xlu1 %1462 }
 0x2df   : > { %997 = vst.msk [vmem:[#allocation2 + $0x8] sm:$0xff] %vm995_vm1, %v991_v24  ;;  %999 = vst.msk [vmem:[#allocation2 + $0x18] sm:$0xff] %vm995_vm1, %v992_v26  ;;  %v1474_v38 = vcombine.low %v4298_v17, %v1463_v37  ;;  %v1475_v40 = vcombine.high %v4298_v17, %v1463_v37 }
 0x2e0   : > { %1001 = vst.msk [vmem:[#allocation2 + $0x28] sm:$0xff] %vm995_vm1, %v993_v28  ;;  %1003 = vst.msk [vmem:[#allocation2 + $0x38] sm:$0xff] %vm995_vm1, %v994_v29  ;;  %v866_v41 = vrot.slane %v859_v32, %v4308_v27  ;;  %v874_v42 = vrot.slane %v3321_v33, %v4308_v27  ;;  %v882_v43 = vrot.slane %v875_v35, %v4308_v27  ;;  %v1469_v46 = vpop.permute.xlu0 %1468 }
 0x2e1   : > { %v890_v45 = vrot.slane %v3322_v36, %v4308_v27  ;;  %v1482_v47 = vrot.slane %v1474_v38, %v4308_v27  ;;  %v1489_v48 = vrot.slane %v1475_v40, %v4308_v27  ;;  %v1490_v49 = vcombine.low %v1457_v23, %v1469_v46 }
 0x2e2   : > { %v1491_v50 = vcombine.high %v1457_v23, %v1469_v46  ;;  %v891_v52 = vcombine.low %v866_v41, %v874_v42  ;;  %v892_v53 = vcombine.high %v866_v41, %v874_v42  ;;  %v1471_v17 = vpop.permute.xlu1 %1470 }
 0x2e3   : > { %v907_v54 = vcombine.low %v882_v43, %v890_v45  ;;  %v908_v55 = vcombine.high %v882_v43, %v890_v45  ;;  %v1498_v56 = vrot.slane %v1490_v49, %v4308_v27  ;;  %v1558_v58 = vcombine.low %v4354_v12, %v1471_v17 }
 0x2e4   : > { %v1505_v57 = vrot.slane %v1491_v50, %v4308_v27  ;;  %v1559_v59 = vcombine.high %v4354_v12, %v1471_v17  ;;  %v899_v60 = vrot.slane %v891_v52, %v4322_v34  ;;  %v906_v61 = vrot.slane %v892_v53, %v4322_v34  ;;  %v1465_v4 = vpop.permute.xlu0 %1464 }
 0x2e5   : > { %v915_v62 = vrot.slane %v907_v54, %v4322_v34  ;;  %v922_v63 = vrot.slane %v908_v55, %v4322_v34  ;;  %v1506_v0 = vcombine.low %v1482_v47, %v1498_v56  ;;  %v1507_v1 = vcombine.high %v1482_v47, %v1498_v56 }
 0x2e6   : > { %v1522_v2 = vcombine.low %v1489_v48, %v1505_v57  ;;  %v1523_v3 = vcombine.high %v1489_v48, %v1505_v57  ;;  %v1747_v11 = vld [vmem:[#allocation2 + $0x8] sm:$0xff]  ;;  %v1749_v13 = vld [vmem:[#allocation2 + $0x18] sm:$0xff]  ;;  %v1566_v19 = vrot.slane %v1558_v58, %v4308_v27  ;;  %v1542_v20 = vcombine.low %v4296_v15, %v1465_v4 }
 0x2e7   : > { %v923_v5 = vcombine.low %v899_v60, %v915_v62  ;;  %v924_v6 = vcombine.high %v899_v60, %v915_v62  ;;  %v925_v7 = vcombine.low %v906_v61, %v922_v63  ;;  %v926_v9 = vcombine.high %v906_v61, %v922_v63  ;;  %3512 = vmatprep.subr.msk.mxu0 %vm995_vm1, %v1747_v11  ;;  %v1751_v63 = vld [vmem:[#allocation2 + $0x28] sm:$0xff] }
 0x2e8   : > { %v1514_v12 = vrot.slane %v1506_v0, %v4322_v34  ;;  %v1521_v14 = vrot.slane %v1507_v1, %v4322_v34  ;;  %v1530_v16 = vrot.slane %v1522_v2, %v4322_v34  ;;  %v1537_v18 = vrot.slane %v1523_v3, %v4322_v34  ;;  %3519 = vmatprep.subr.msk.mxu1 %vm995_vm1, %v1749_v13  ;;  %v1753_v0 = vld [vmem:[#allocation2 + $0x38] sm:$0xff] }
 0x2e9   : > { %996 = vst.msk [vmem:[#allocation2] sm:$0xff] %vm995_vm1, %v923_v5  ;;  %998 = vst.msk [vmem:[#allocation2 + $0x10] sm:$0xff] %vm995_vm1, %v924_v6  ;;  %v1543_v21 = vcombine.high %v4296_v15, %v1465_v4  ;;  %3513 = vmatpush3.xpose.msk.msra.mxu0 %vm995_vm1, %v1747_v11  ;;  %3520 = vmatpush3.xpose.msk.msra.mxu1 %vm995_vm1, %v1749_v13  ;;  %v1573_v26 = vrot.slane %v1559_v59, %v4308_v27 }
 0x2ea   : > { %1000 = vst.msk [vmem:[#allocation2 + $0x20] sm:$0xff] %vm995_vm1, %v925_v7  ;;  %1002 = vst.msk [vmem:[#allocation2 + $0x30] sm:$0xff] %vm995_vm1, %v926_v9  ;;  %v1610_v22 = vcombine.low %v1514_v12, %v1521_v14  ;;  %v3334_v23 = vcombine.high %v1514_v12, %v1521_v14  ;;  %v1626_v24 = vcombine.low %v1530_v16, %v1537_v18 }
 0x2eb   : > { %v1550_v28 = vrot.slane %v1542_v20, %v4308_v27  ;;  %v1557_v29 = vrot.slane %v1543_v21, %v4308_v27  ;;  %v3335_v32 = vcombine.high %v1530_v16, %v1537_v18 }
 0x2ec   : > { %v1617_v33 = vrot.slane %v1610_v22, %v4308_v27  ;;  %v1625_v15 = vrot.slane %v3334_v23, %v4308_v27  ;;  %v1633_v35 = vrot.slane %v1626_v24, %v4308_v27 }
 0x2ed   : > { %v1574_v36 = vcombine.low %v1550_v28, %v1566_v19  ;;  %v1575_v37 = vcombine.high %v1550_v28, %v1566_v19  ;;  %v1590_v38 = vcombine.low %v1557_v29, %v1573_v26  ;;  %v1591_v40 = vcombine.high %v1557_v29, %v1573_v26 }
 0x2ee   : > { %v1641_v41 = vrot.slane %v3335_v32, %v4308_v27  ;;  %v1642_v42 = vcombine.low %v1617_v33, %v1625_v15  ;;  %v1643_v56 = vcombine.high %v1617_v33, %v1625_v15 }
 0x2ef   : > { %v1582_v43 = vrot.slane %v1574_v36, %v4322_v34  ;;  %v1589_v45 = vrot.slane %v1575_v37, %v4322_v34  ;;  %v1598_v46 = vrot.slane %v1590_v38, %v4322_v34  ;;  %v1605_v47 = vrot.slane %v1591_v40, %v4322_v34 }
 0x2f0   : > { %v1746_v48 = vld [vmem:[#allocation2] sm:$0xff]  ;;  %v1748_v49 = vld [vmem:[#allocation2 + $0x10] sm:$0xff]  ;;  %v1650_v50 = vrot.slane %v1642_v42, %v4322_v34  ;;  %v1658_v52 = vcombine.low %v1633_v35, %v1641_v41  ;;  %v1659_v57 = vcombine.high %v1633_v35, %v1641_v41  ;;  %v1657_v7 = vrot.slane %v1643_v56, %v4322_v34 }
 0x2f1   : > { %v1678_v53 = vcombine.low %v1582_v43, %v1589_v45  ;;  %v3336_v54 = vcombine.high %v1582_v43, %v1589_v45  ;;  %v1694_v55 = vcombine.low %v1598_v46, %v1605_v47  ;;  %v3337_v17 = vcombine.high %v1598_v46, %v1605_v47  ;;  %3514 = vmatprep.subr.msk.mxu0 %vm995_vm1, %v1746_v48  ;;  %v1750_v18 = vld [vmem:[#allocation2 + $0x20] sm:$0xff]  ;;  %v1752_v20 = vld [vmem:[#allocation2 + $0x30] sm:$0xff] }
 0x2f2   : > { %3521 = vmatprep.subr.msk.mxu1 %vm995_vm1, %v1748_v49  ;;  %3515 = vmatpush3.xpose.msk.msra.mxu0 %vm995_vm1, %v1746_v48  ;;  %v1666_v58 = vrot.slane %v1658_v52, %v4322_v34  ;;  %v1673_v9 = vrot.slane %v1659_v57, %v4322_v34 }
 0x2f3   : > { %v1685_v59 = vrot.slane %v1678_v53, %v4308_v27  ;;  %v1693_v60 = vrot.slane %v3336_v54, %v4308_v27  ;;  %v1701_v61 = vrot.slane %v1694_v55, %v4308_v27  ;;  %v1709_v62 = vrot.slane %v3337_v17, %v4308_v27  ;;  %3522 = vmatpush3.xpose.msk.msra.mxu1 %vm995_vm1, %v1748_v49 }
 0x2f4   : > { %3526 = vmatprep.subr.msk.mxu0 %vm995_vm1, %v1751_v63  ;;  %3533 = vmatprep.subr.msk.mxu1 %vm995_vm1, %v1753_v0  ;;  %v1674_v1 = vcombine.low %v1650_v50, %v1666_v58  ;;  %v1675_v2 = vcombine.high %v1650_v50, %v1666_v58  ;;  %v1676_v16 = vcombine.low %v1657_v7, %v1673_v9 }
 0x2f5   : > { %v1710_v3 = vcombine.low %v1685_v59, %v1693_v60  ;;  %v1726_v4 = vcombine.low %v1701_v61, %v1709_v62  ;;  %v1711_v11 = vcombine.high %v1685_v59, %v1693_v60  ;;  %v1727_v13 = vcombine.high %v1701_v61, %v1709_v62 }
 0x2f6   : > { %3516 = vmatprep.mubr.msk.f32.mxu0 %vm995_vm1, %v1674_v1  ;;  %3523 = vmatprep.mubr.msk.f32.mxu1 %vm995_vm1, %v1675_v2  ;;  %v1677_v19 = vcombine.high %v1657_v7, %v1673_v9 }
 0x2f7   : > { %v1718_v5 = vrot.slane %v1710_v3, %v4322_v34  ;;  %v1734_v6 = vrot.slane %v1726_v4, %v4322_v34  ;;  %v1725_v21 = vrot.slane %v1711_v11, %v4322_v34  ;;  %v1741_v22 = vrot.slane %v1727_v13, %v4322_v34 }
 0x2f9   : > { %v1742_v12 = vcombine.low %v1718_v5, %v1734_v6  ;;  %v1743_v14 = vcombine.high %v1718_v5, %v1734_v6  ;;  %v1744_v23 = vcombine.low %v1725_v21, %v1741_v22  ;;  %v1745_v24 = vcombine.high %v1725_v21, %v1741_v22 }
 0x2fb   : > { %3517 = vmatmul.mubr.msk.f32.vlgmr.msra.gmra.mxu0 %vm995_vm1, %v1742_v12  ;;  %3524 = vmatmul.mubr.msk.f32.vlgmr.msra.gmra.mxu1 %vm995_vm1, %v1743_v14 }
 0x2fc   : > { %3527 = vmatpush3.xpose.msk.msra.mxu0 %vm995_vm1, %v1751_v63  ;;  %3534 = vmatpush3.xpose.msk.msra.mxu1 %vm995_vm1, %v1753_v0 }
 0x2fd   : > { %3528 = vmatprep.subr.msk.mxu0 %vm995_vm1, %v1750_v18  ;;  %3530 = vmatprep.mubr.msk.f32.mxu0 %vm995_vm1, %v1676_v16 }
 0x2fe   : > { %3535 = vmatprep.subr.msk.mxu1 %vm995_vm1, %v1752_v20  ;;  %3537 = vmatprep.mubr.msk.f32.mxu1 %vm995_vm1, %v1677_v19 }
 0x300   : > { %3529 = vmatpush3.xpose.msk.msra.mxu0 %vm995_vm1, %v1750_v18  ;;  %3536 = vmatpush3.xpose.msk.msra.mxu1 %vm995_vm1, %v1752_v20 }
 0x303   : > { %3531 = vmatmul.mubr.msk.f32.vlgmr.msra.gmra.mxu0 %vm995_vm1, %v1744_v23  ;;  %3538 = vmatmul.mubr.msk.f32.vlgmr.msra.gmra.mxu1 %vm995_vm1, %v1745_v24 }
 0x3bb   : > { %v3518_v26 = vpop.f32.mrf.mxu0  ;;  %v3525_v28 = vpop.f32.mrf.mxu1 }
 0x3bc   : > { %v2106_v29 = vsel %vm995_vm1, %v3518_v26, -inf  ;;  %v2112_v15 = vsel %vm995_vm1, %v3525_v28, -inf }
 0x3bd   : > { %v1920_v32 = vpop.f32.mrf.mxu1  ;;  %2107 = vmax.xlane.f32.xlu0 %v2106_v29  ;;  %v1833_v35 = vpop.f32.mrf.mxu0 }
 0x3be   : > { %v2109_v33 = vsel %vm995_vm1, %v1920_v32, -inf  ;;  %v2103_v38 = vsel %vm995_vm1, %v1833_v35, -inf }
 0x3bf   : > { %2110 = vmax.xlane.f32.xlu1 %v2109_v33 }
 0x3c1   : > { %2113 = vmax.xlane.f32.xlu0 %v2112_v15 }
 0x3c3   : > { %v3532_v36 = vpop.f32.mrf.mxu0  ;;  %v3539_v37 = vpop.f32.mrf.mxu1 }
 0x3c4   : > { %v2124_v45 = vsel %vm995_vm1, %v3539_v37, -inf  ;;  %v2118_v46 = vsel %vm995_vm1, %v3532_v36, -inf }
 0x3c5   : > { %v2007_v40 = vpop.f32.mrf.mxu0  ;;  %v2094_v41 = vpop.f32.mrf.mxu1  ;;  %2104 = vmax.xlane.f32.xlu0 %v2103_v38 }
 0x3c6   : > { %v2121_v42 = vsel %vm995_vm1, %v2094_v41, -inf  ;;  %v2115_v43 = vsel %vm995_vm1, %v2007_v40, -inf }
 0x3c7   : > { %2122 = vmax.xlane.f32.xlu1 %v2121_v42 }
 0x3c9   : > { %2116 = vmax.xlane.f32.xlu0 %v2115_v43 }
 0x3cb   : > { %2125 = vmax.xlane.f32.xlu1 %v2124_v45 }
 0x3cd   : > { %2119 = vmax.xlane.f32.xlu0 %v2118_v46 }
 0x3dc   : > { %1010 = vrot.lane.b32.xlu1 %v4314_v30, %s3967_s1 }
 0x3e0   : > { %1014 = vrot.lane.b32.xlu1 %v4306_v25, %s3967_s1 }
 0x3e3   : > { %1006 = vrot.lane.b32.xlu0 %v4283_v8, %s3967_s1 }
 0x3e4   : > { %1018 = vrot.lane.b32.xlu1 %v4316_v31, %s3967_s1 }
 0x3e7   : > { %1004 = vrot.lane.b32.xlu0 %v4287_v10, %s3967_s1 }
 0x3e8   : > { %1008 = vrot.lane.b32.xlu1 %v4328_v39, %s3967_s1 }
 0x3eb   : > { %1012 = vrot.lane.b32.xlu0 %v4330_v44, %s3967_s1 }
 0x3ec   : > { %1016 = vrot.lane.b32.xlu1 %v4340_v51, %s3967_s1  ;;  %s4805_s1 = sld [smem:[#allocation26_spill]] }
 0x446   : > { %v2108_v47 = vpop.xlane.xlu0 %2107 }
 0x447   : > { %v2128_v48 = vsub.f32 %v3518_v26, %v2108_v47 }
 0x448   : > { %v2111_v49 = vpop.xlane.xlu1 %2110 }
 0x449   : > { %v2137_v50 = vmul.f32 1.442695, %v2128_v48  ;;  %v2129_v52 = vsub.f32 %v1920_v32, %v2111_v49 }
 0x44a   : > { %v2114_v30 = vpop.xlane.xlu0 %2113 }
 0x44b   : > { %3745 = vpow2.f32 %v2137_v50  ;;  %v2139_v25 = vmul.f32 1.442695, %v2129_v52  ;;  %v2130_v53 = vsub.f32 %v3525_v28, %v2114_v30 }
 0x44d   : > { %3747 = vpow2.f32 %v2139_v25  ;;  %v2141_v8 = vmul.f32 1.442695, %v2130_v53 }
 0x44e   : > { %v2105_v31 = vpop.xlane.xlu0 %2104 }
 0x44f   : > { %3749 = vpow2.f32 %v2141_v8  ;;  %v2127_v10 = vsub.f32 %v1833_v35, %v2105_v31 }
 0x450   : > { %v2123_v54 = vpop.xlane.xlu1 %2122 }
 0x451   : > { %v2135_v39 = vmul.f32 1.442695, %v2127_v10  ;;  %v2133_v55 = vsub.f32 %v2094_v41, %v2123_v54 }
 0x452   : > { %v2117_v44 = vpop.xlane.xlu0 %2116 }
 0x453   : > { %3751 = vpow2.f32 %v2135_v39  ;;  %v2131_v51 = vsub.f32 %v2007_v40, %v2117_v44  ;;  %v2147_v58 = vmul.f32 1.442695, %v2133_v55 }
 0x454   : > { %v2126_v17 = vpop.xlane.xlu1 %2125 }
 0x455   : > { %v2143_v56 = vmul.f32 1.442695, %v2131_v51  ;;  %v2134_v57 = vsub.f32 %v3539_v37, %v2126_v17 }
 0x456   : > { %v2120_v59 = vpop.xlane.xlu0 %2119 }
 0x457   : > { %3753 = vpow2.f32 %v2143_v56  ;;  %v2149_v60 = vmul.f32 1.442695, %v2134_v57  ;;  %v2132_v61 = vsub.f32 %v3532_v36, %v2120_v59 }
 0x458   : > { %v4458_v62 = vpop.eup %3745  ;;  %v1011_v63 = vpop.permute.xlu1 %1010 }
 0x459   : > { %3755 = vpow2.f32 %v2149_v60  ;;  %v2145_v0 = vmul.f32 1.442695, %v2132_v61  ;;  %v2154_v1 = vsel %vm995_vm1, %v4458_v62, 0.0 }
 0x45a   : > { %v4462_v2 = vpop.eup %3747  ;;  %3757 = vpow2.f32 %v2147_v58  ;;  %2155 = vadd.xlane.f32.xlu0 %v2154_v1  ;;  %v1007_v3 = vpop.permute.xlu0 %1006 }
 0x45b   : > { %v2157_v4 = vsel %vm995_vm1, %v4462_v2, 0.0  ;;  %3759 = vpow2.f32 %v2145_v0 }
 0x45c   : > { %v4466_v5 = vpop.eup %3749  ;;  %v1015_v6 = vpop.permute.xlu1 %1014  ;;  %2158 = vadd.xlane.f32.xlu1 %v2157_v4 }
 0x45d   : > { %v1096_v9 = vcombine.low %v1007_v3, %v1015_v6  ;;  %v1097_v11 = vcombine.high %v1007_v3, %v1015_v6  ;;  %v2160_v13 = vsel %vm995_vm1, %v4466_v5, 0.0 }
 0x45e   : > { %v1005_v7 = vpop.permute.xlu0 %1004 }
 0x45f   : > { %v1104_v20 = vrot.slane %v1096_v9, %v4308_v27  ;;  %v1111_v21 = vrot.slane %v1097_v11, %v4308_v27 }
 0x460   : > { %v4470_v12 = vpop.eup %3751  ;;  %v1019_v14 = vpop.permute.xlu1 %1018  ;;  %2161 = vadd.xlane.f32.xlu1 %v2160_v13 }
 0x461   : > { %v1112_v16 = vcombine.low %v1011_v63, %v1019_v14  ;;  %v1113_v18 = vcombine.high %v1011_v63, %v1019_v14  ;;  %v2151_v19 = vsel %vm995_vm1, %v4470_v12, 0.0 }
 0x462   : > { %2152 = vadd.xlane.f32.xlu0 %v2151_v19  ;;  %v1013_v24 = vpop.permute.xlu0 %1012 }
 0x463   : > { %v1120_v22 = vrot.slane %v1112_v16, %v4308_v27  ;;  %v1127_v23 = vrot.slane %v1113_v18, %v4308_v27  ;;  %v1028_v36 = vcombine.low %v1005_v7, %v1013_v24  ;;  %v1029_v45 = vcombine.high %v1005_v7, %v1013_v24 }
 0x464   : > { %v4478_v26 = vpop.eup %3753  ;;  %v1009_v28 = vpop.permute.xlu1 %1008 }
 0x465   : > { %v1128_v29 = vcombine.low %v1104_v20, %v1120_v22  ;;  %v1129_v32 = vcombine.high %v1104_v20, %v1120_v22  ;;  %v1144_v33 = vcombine.low %v1111_v21, %v1127_v23  ;;  %v1145_v15 = vcombine.high %v1111_v21, %v1127_v23 }
 0x466   : > { %v4480_v35 = vpop.eup %3755  ;;  %v2163_v37 = vsel %vm995_vm1, %v4478_v26, 0.0  ;;  %v1036_v25 = vrot.slane %v1028_v36, %v4308_v27  ;;  %v1043_v44 = vrot.slane %v1029_v45, %v4308_v27 }
 0x467   : > { %v4484_v38 = vpop.eup %3757  ;;  %v1136_v40 = vrot.slane %v1128_v29, %v4322_v34  ;;  %v1143_v41 = vrot.slane %v1129_v32, %v4322_v34  ;;  %v1152_v42 = vrot.slane %v1144_v33, %v4322_v34  ;;  %v1159_v43 = vrot.slane %v1145_v15, %v4322_v34  ;;  %2164 = vadd.xlane.f32.xlu0 %v2163_v37 }
 0x468   : > { %v1017_v46 = vpop.permute.xlu1 %1016  ;;  %v2172_v47 = vsel %vm995_vm1, %v4480_v35, 0.0  ;;  %v4492_v48 = vpop.eup %3759  ;;  %v2169_v31 = vsel %vm995_vm1, %v4484_v38, 0.0 }
 0x469   : > { %v1232_v49 = vcombine.low %v1136_v40, %v1143_v41  ;;  %v3327_v50 = vcombine.high %v1136_v40, %v1143_v41  ;;  %v1248_v52 = vcombine.low %v1152_v42, %v1159_v43  ;;  %v3328_v30 = vcombine.high %v1152_v42, %v1159_v43  ;;  %2173 = vadd.xlane.f32.xlu1 %v2172_v47 }
 0x46a   : > { %v1044_v53 = vcombine.low %v1009_v28, %v1017_v46  ;;  %v1045_v8 = vcombine.high %v1009_v28, %v1017_v46  ;;  %v2166_v56 = vsel %vm995_vm1, %v4492_v48, 0.0 }
 0x46b   : > { %v1239_v10 = vrot.slane %v1232_v49, %v4308_v27  ;;  %v1247_v54 = vrot.slane %v3327_v50, %v4308_v27  ;;  %v1255_v39 = vrot.slane %v1248_v52, %v4308_v27  ;;  %v1263_v55 = vrot.slane %v3328_v30, %v4308_v27  ;;  %2170 = vadd.xlane.f32.xlu0 %v2169_v31 }
 0x46c   : > { %v1052_v51 = vrot.slane %v1044_v53, %v4308_v27  ;;  %v1059_v17 = vrot.slane %v1045_v8, %v4308_v27 }
 0x46d   : > { %v1264_v57 = vcombine.low %v1239_v10, %v1247_v54  ;;  %v1265_v58 = vcombine.high %v1239_v10, %v1247_v54  ;;  %v1280_v59 = vcombine.low %v1255_v39, %v1263_v55  ;;  %v1281_v60 = vcombine.high %v1255_v39, %v1263_v55 }
 0x46e   : > { %v1060_v61 = vcombine.low %v1036_v25, %v1052_v51  ;;  %v1061_v63 = vcombine.high %v1036_v25, %v1052_v51  ;;  %v1076_v0 = vcombine.low %v1043_v44, %v1059_v17  ;;  %v1077_v1 = vcombine.high %v1043_v44, %v1059_v17 }
 0x46f   : > { %v1272_v3 = vrot.slane %v1264_v57, %v4322_v34  ;;  %v1279_v4 = vrot.slane %v1265_v58, %v4322_v34  ;;  %v1288_v6 = vrot.slane %v1280_v59, %v4322_v34  ;;  %v1295_v7 = vrot.slane %v1281_v60, %v4322_v34  ;;  %2167 = vadd.xlane.f32.xlu0 %v2166_v56 }
 0x470   : > { %v1068_v9 = vrot.slane %v1060_v61, %v4322_v34  ;;  %v1075_v11 = vrot.slane %v1061_v63, %v4322_v34  ;;  %v1084_v13 = vrot.slane %v1076_v0, %v4322_v34  ;;  %v1091_v14 = vrot.slane %v1077_v1, %v4322_v34 }
 0x471   : > { %v1296_v16 = vcombine.low %v1272_v3, %v1288_v6  ;;  %v1297_v18 = vcombine.high %v1272_v3, %v1288_v6  ;;  %v1298_v19 = vcombine.low %v1279_v4, %v1295_v7  ;;  %v1299_v20 = vcombine.high %v1279_v4, %v1295_v7 }
 0x472   : > { %v1164_v21 = vcombine.low %v1068_v9, %v1075_v11  ;;  %v3325_v22 = vcombine.high %v1068_v9, %v1075_v11  ;;  %v1180_v23 = vcombine.low %v1084_v13, %v1091_v14  ;;  %v3326_v24 = vcombine.high %v1084_v13, %v1091_v14  ;;  %v2833_v13 = vld [vmem:[%s4752_s7 + $0x30] sm:$0xff] }
 0x473   : > { %1301 = vst.msk [vmem:[#allocation3 + $0x8] sm:$0xff] %vm995_vm1, %v1296_v16  ;;  %1303 = vst.msk [vmem:[#allocation3 + $0x18] sm:$0xff] %vm995_vm1, %v1297_v18 }
 0x474   : > { %1305 = vst.msk [vmem:[#allocation3 + $0x28] sm:$0xff] %vm995_vm1, %v1298_v19  ;;  %1307 = vst.msk [vmem:[#allocation3 + $0x38] sm:$0xff] %vm995_vm1, %v1299_v20  ;;  %v1171_v28 = vrot.slane %v1164_v21, %v4308_v27  ;;  %v1179_v29 = vrot.slane %v3325_v22, %v4308_v27  ;;  %v1187_v32 = vrot.slane %v1180_v23, %v4308_v27 }
 0x475   : > { %v1195_v33 = vrot.slane %v3326_v24, %v4308_v27 }
 0x476   : > { %v1196_v15 = vcombine.low %v1171_v28, %v1179_v29  ;;  %v1197_v36 = vcombine.high %v1171_v28, %v1179_v29 }
 0x477   : > { %v1212_v37 = vcombine.low %v1187_v32, %v1195_v33  ;;  %v1213_v40 = vcombine.high %v1187_v32, %v1195_v33 }
 0x478   : > { %v1204_v41 = vrot.slane %v1196_v15, %v4322_v34  ;;  %v1211_v42 = vrot.slane %v1197_v36, %v4322_v34 }
 0x479   : > { %v1220_v43 = vrot.slane %v1212_v37, %v4322_v34  ;;  %v1227_v45 = vrot.slane %v1213_v40, %v4322_v34 }
 0x47a   : > { %v2192_v52 = vld [vmem:[#allocation3 + $0x8] sm:$0xff]  ;;  %v2194_v30 = vld [vmem:[#allocation3 + $0x18] sm:$0xff] }
 0x47b   : > { %v1228_v46 = vcombine.low %v1204_v41, %v1220_v43  ;;  %v1229_v47 = vcombine.high %v1204_v41, %v1220_v43  ;;  %v1230_v49 = vcombine.low %v1211_v42, %v1227_v45  ;;  %v1231_v50 = vcombine.high %v1211_v42, %v1227_v45  ;;  %3540 = vmatprep.subr.mxu0 %v2192_v52  ;;  %v2196_v8 = vld [vmem:[#allocation3 + $0x28] sm:$0xff]  ;;  %v2198_v31 = vld [vmem:[#allocation3 + $0x38] sm:$0xff] }
 0x47c   : > { %3547 = vmatprep.subr.mxu1 %v2194_v30  ;;  %3541 = vmatpush3.msra.mxu0 %v2192_v52  ;;  %v2832_v52 = vld [vmem:[%s4752_s7 + $0x28] sm:$0xff] }
 0x47d   : > { %1300 = vst.msk [vmem:[#allocation3] sm:$0xff] %vm995_vm1, %v1228_v46  ;;  %1302 = vst.msk [vmem:[#allocation3 + $0x10] sm:$0xff] %vm995_vm1, %v1229_v47  ;;  %3548 = vmatpush3.msra.mxu1 %v2194_v30 }
 0x47e   : > { %1304 = vst.msk [vmem:[#allocation3 + $0x20] sm:$0xff] %vm995_vm1, %v1230_v49  ;;  %1306 = vst.msk [vmem:[#allocation3 + $0x30] sm:$0xff] %vm995_vm1, %v1231_v50 }
 0x484   : > { %v2191_v25 = vld [vmem:[#allocation3] sm:$0xff]  ;;  %v2193_v53 = vld [vmem:[#allocation3 + $0x10] sm:$0xff] }
 0x485   : > { %3542 = vmatprep.subr.mxu0 %v2191_v25  ;;  %3549 = vmatprep.subr.mxu1 %v2193_v53  ;;  %v2197_v1 = vld [vmem:[#allocation3 + $0x30] sm:$0xff]  ;;  %v2195_v4 = vld [vmem:[#allocation3 + $0x20] sm:$0xff] }
 0x486   : > { %3543 = vmatpush3.msra.mxu0 %v2191_v25  ;;  %3550 = vmatpush3.msra.mxu1 %v2193_v53 }
 0x487   : > { %3554 = vmatprep.subr.mxu0 %v2196_v8  ;;  %3561 = vmatprep.subr.mxu1 %v2198_v31 }
 0x4e3   : > { %v2156_v54 = vpop.xlane.xlu0 %2155 }
 0x4e5   : > { %v2159_v10 = vpop.xlane.xlu1 %2158 }
 0x4e6   : > { %3761 = vrcp.f32 %v2159_v10 }
 0x4e9   : > { %v2162_v39 = vpop.xlane.xlu1 %2161 }
 0x4ea   : > { %3763 = vrcp.f32 %v2162_v39 }
 0x4eb   : > { %3765 = vrcp.f32 %v2156_v54  ;;  %v2153_v55 = vpop.xlane.xlu0 %2152 }
 0x4ec   : > { %3767 = vrcp.f32 %v2153_v55 }
 0x4f0   : > { %v2165_v44 = vpop.xlane.xlu0 %2164 }
 0x4f1   : > { %3769 = vrcp.f32 %v2165_v44 }
 0x4f2   : > { %v2174_v51 = vpop.xlane.xlu1 %2173 }
 0x4f3   : > { %v3762_v17 = vpop.eup %3761  ;;  %3771 = vrcp.f32 %v2174_v51 }
 0x4f4   : > { %v2171_v56 = vpop.xlane.xlu0 %2170  ;;  %v2185_v57 = vmul.f32 %v3762_v17, %v4462_v2 }
 0x4f5   : > { %3773 = vrcp.f32 %v2171_v56  ;;  %v2831_v56 = vld [vmem:[%s4752_s7 + $0x20] sm:$0xff] }
 0x4f6   : > { %3551 = vmatprep.mubr.msk.f32.mxu1 %vm995_vm1, %v2185_v57 }
 0x4f7   : > { %v3764_v58 = vpop.eup %3763 }
 0x4f8   : > { %v3766_v59 = vpop.eup %3765  ;;  %v2168_v60 = vpop.xlane.xlu0 %2167  ;;  %v2186_v61 = vmul.f32 %v3764_v58, %v4466_v5 }
 0x4f9   : > { %v3768_v63 = vpop.eup %3767  ;;  %3775 = vrcp.f32 %v2168_v60  ;;  %v2184_v3 = vmul.f32 %v3766_v59, %v4458_v62 }
 0x4fa   : > { %3552 = vmatmul.mubr.msk.f32.vlgmr.msra.gmra.mxu1 %vm995_vm1, %v2186_v61  ;;  %v2183_v0 = vmul.f32 %v3768_v63, %v4470_v12  ;;  %v2830_v61 = vld [vmem:[%s4752_s7 + $0x18] sm:$0xff] }
 0x4fb   : > { %3562 = vmatpush3.msra.mxu1 %v2198_v31 }
 0x4fc   : > { %3563 = vmatprep.subr.mxu1 %v2197_v1  ;;  %3544 = vmatprep.mubr.msk.f32.mxu0 %vm995_vm1, %v2183_v0 }
 0x4fd   : > { %3564 = vmatpush3.msra.mxu1 %v2197_v1  ;;  %3545 = vmatmul.mubr.msk.f32.vlgmr.msra.gmra.mxu0 %vm995_vm1, %v2184_v3 }
 0x4fe   : > { %v3770_v2 = vpop.eup %3769  ;;  %3555 = vmatpush3.msra.mxu0 %v2196_v8 }
 0x4ff   : > { %3556 = vmatprep.subr.mxu0 %v2195_v4  ;;  %v2187_v5 = vmul.f32 %v3770_v2, %v4478_v26  ;;  %v2834_v26 = vld [vmem:[%s4752_s7 + $0x38] sm:$0xff] }
 0x500   : > { %3557 = vmatpush3.msra.mxu0 %v2195_v4  ;;  %v3772_v6 = vpop.eup %3771 }
 0x501   : > { %3558 = vmatprep.mubr.msk.f32.mxu0 %vm995_vm1, %v2187_v5  ;;  %v2190_v62 = vmul.f32 %v3772_v6, %v4480_v35  ;;  %3568 = vmatprep.subr.mxu0 %v2834_v26 }
 0x502   : > { %v3774_v12 = vpop.eup %3773 }
 0x503   : > { %v2189_v7 = vmul.f32 %v3774_v12, %v4484_v38  ;;  %v2829_v12 = vld [vmem:[%s4752_s7 + $0x10] sm:$0xff] }
 0x505   : > { %3565 = vmatprep.mubr.msk.f32.mxu1 %vm995_vm1, %v2189_v7 }
 0x506   : > { %v3776_v9 = vpop.eup %3775  ;;  %3566 = vmatmul.mubr.msk.f32.vlgmr.msra.gmra.mxu1 %vm995_vm1, %v2190_v62 }
 0x507   : > { %v2188_v11 = vmul.f32 %v3776_v9, %v4492_v48 }
 0x509   : > { %3559 = vmatmul.mubr.msk.f32.vlgmr.msra.gmra.mxu0 %vm995_vm1, %v2188_v11 }
 0x50a   : > { %3569 = vmatpush3.msra.mxu0 %v2834_v26 }
 0x50b   : > { %3570 = vmatprep.subr.mxu0 %v2833_v13 }
 0x50c   : > { %3571 = vmatpush3.msra.mxu0 %v2833_v13 }
 0x50d   : > { %3572 = vmatprep.subr.mxu0 %v2832_v52 }
 0x50e   : > { %3573 = vmatpush3.msra.mxu0 %v2832_v52 }
 0x50f   : > { %3574 = vmatprep.subr.mxu0 %v2831_v56 }
 0x510   : > { %3575 = vmatpush3.msra.mxu0 %v2831_v56  ;;  %v3790_v56 = vld [vmem:[%s4192_s29] sm:$0xff] }
 0x511   : > { %3576 = vmatprep.subr.mxu0 %v2830_v61 }
 0x512   : > { %3577 = vmatpush3.msra.mxu0 %v2830_v61 }
 0x513   : > { %3578 = vmatprep.subr.mxu0 %v2829_v12 }
 0x514   : > { %3579 = vmatpush3.msra.mxu0 %v2829_v12  ;;  %v2976_v12 = vld [vmem:[#allocation11 + $0x38] sm:$0xff] }
 0x515   : > { %3587 = vmatprep.subr.mxu1 %v2976_v12 }
 0x516   : > { %3588 = vmatpush3.msra.mxu1 %v2976_v12 }
 0x5ba   : > { %v3553_v35 = vpop.f32.mrf.mxu1 }
 0x5bc   : > { %v2352_v14 = vpop.f32.mrf.mxu1 }
 0x5bd   : > { %v3546_v38 = vpop.f32.mrf.mxu0 }
 0x5bf   : > { %v2271_v18 = vpop.f32.mrf.mxu0 }
 0x5c6   : > { %v3567_v16 = vpop.f32.mrf.mxu1 }
 0x5c7   : > { %v2607_v48 = vcombine.low %v3553_v35, %v3567_v16  ;;  %v2608_v19 = vcombine.high %v3553_v35, %v3567_v16 }
 0x5c8   : > { %v2514_v20 = vpop.f32.mrf.mxu1 }
 0x5c9   : > { %v3560_v21 = vpop.f32.mrf.mxu0  ;;  %v2615_v24 = vrot.slane %v2607_v48, %v4308_v27  ;;  %v2622_v28 = vrot.slane %v2608_v19, %v4308_v27  ;;  %v2539_v29 = vcombine.low %v2352_v14, %v2514_v20  ;;  %v2540_v32 = vcombine.high %v2352_v14, %v2514_v20  ;;  %v2828_v14 = vld [vmem:[%s4752_s7 + $0x8] sm:$0xff] }
 0x5ca   : > { %v2591_v22 = vcombine.low %v3546_v38, %v3560_v21  ;;  %v2592_v23 = vcombine.high %v3546_v38, %v3560_v21  ;;  %3580 = vmatprep.subr.mxu0 %v2828_v14 }
 0x5cb   : > { %v2433_v33 = vpop.f32.mrf.mxu0  ;;  %v2547_v46 = vrot.slane %v2539_v29, %v4308_v27  ;;  %v2554_v47 = vrot.slane %v2540_v32, %v4308_v27  ;;  %3581 = vmatpush3.msra.mxu0 %v2828_v14 }
 0x5cc   : > { %v2599_v15 = vrot.slane %v2591_v22, %v4308_v27  ;;  %v2606_v36 = vrot.slane %v2592_v23, %v4308_v27  ;;  %v2523_v37 = vcombine.low %v2271_v18, %v2433_v33  ;;  %v2524_v40 = vcombine.high %v2271_v18, %v2433_v33  ;;  %v2827_v22 = vld [vmem:[%s4752_s7] sm:$0xff] }
 0x5cd   : > { %3582 = vmatprep.subr.mxu0 %v2827_v22 }
 0x5ce   : > { %v2623_v41 = vcombine.low %v2599_v15, %v2615_v24  ;;  %v2624_v42 = vcombine.high %v2599_v15, %v2615_v24  ;;  %v2639_v43 = vcombine.low %v2606_v36, %v2622_v28  ;;  %v2640_v45 = vcombine.high %v2606_v36, %v2622_v28  ;;  %3583 = vmatpush3.msra.mxu0 %v2827_v22 }
 0x5cf   : > { %v2531_v49 = vrot.slane %v2523_v37, %v4308_v27  ;;  %v2538_v50 = vrot.slane %v2524_v40, %v4308_v27 }
 0x5d0   : > { %v2631_v30 = vrot.slane %v2623_v41, %v4322_v34  ;;  %v2638_v25 = vrot.slane %v2624_v42, %v4322_v34  ;;  %v2647_v53 = vrot.slane %v2639_v43, %v4322_v34  ;;  %v2654_v8 = vrot.slane %v2640_v45, %v4322_v34 }
 0x5d1   : > { %v2555_v31 = vcombine.low %v2531_v49, %v2547_v46  ;;  %v2556_v10 = vcombine.high %v2531_v49, %v2547_v46  ;;  %v2571_v54 = vcombine.low %v2538_v50, %v2554_v47  ;;  %v2572_v39 = vcombine.high %v2538_v50, %v2554_v47 }
 0x5d2   : > { %v2727_v55 = vcombine.low %v2631_v30, %v2638_v25  ;;  %v3364_v44 = vcombine.high %v2631_v30, %v2638_v25  ;;  %v2743_v51 = vcombine.low %v2647_v53, %v2654_v8  ;;  %v3365_v17 = vcombine.high %v2647_v53, %v2654_v8 }
 0x5d3   : > { %v2563_v57 = vrot.slane %v2555_v31, %v4322_v34  ;;  %v2570_v58 = vrot.slane %v2556_v10, %v4322_v34  ;;  %v2579_v59 = vrot.slane %v2571_v54, %v4322_v34  ;;  %v2586_v60 = vrot.slane %v2572_v39, %v4322_v34  ;;  %v3366_v10 = vld [vmem:[%s4802_s28] ss:$0 sm:$0xff]  ;;  %s4808_s28 = sld [smem:[#allocation27_spill]] }
 0x5d4   : > { %v2734_v63 = vrot.slane %v2727_v55, %v4308_v27  ;;  %v2742_v0 = vrot.slane %v3364_v44, %v4308_v27  ;;  %v2750_v1 = vrot.slane %v2743_v51, %v4308_v27  ;;  %v2758_v3 = vrot.slane %v3365_v17, %v4308_v27  ;;  %v3789_v44 = vld [vmem:[%s4192_s29 + $0x8] sm:$0xff]  ;;  %s4809_s29 = sld [smem:[#allocation19_spill]] }
 0x5d5   : > { %v2659_v2 = vcombine.low %v2563_v57, %v2570_v58  ;;  %v3362_v4 = vcombine.high %v2563_v57, %v2570_v58  ;;  %v2675_v5 = vcombine.low %v2579_v59, %v2586_v60  ;;  %v3363_v6 = vcombine.high %v2579_v59, %v2586_v60 }
 0x5d6   : > { %v2759_v7 = vcombine.low %v2734_v63, %v2742_v0  ;;  %v2775_v62 = vcombine.low %v2750_v1, %v2758_v3  ;;  %v2760_v9 = vcombine.high %v2734_v63, %v2742_v0  ;;  %v2776_v11 = vcombine.high %v2750_v1, %v2758_v3 }
 0x5d7   : > { %v2666_v26 = vrot.slane %v2659_v2, %v4308_v27  ;;  %v2674_v13 = vrot.slane %v3362_v4, %v4308_v27  ;;  %v2682_v35 = vrot.slane %v2675_v5, %v4308_v27  ;;  %v2690_v38 = vrot.slane %v3363_v6, %v4308_v27 }
 0x5d8   : > { %v2767_v16 = vrot.slane %v2759_v7, %v4322_v34  ;;  %v2783_v18 = vrot.slane %v2775_v62, %v4322_v34  ;;  %v2774_v23 = vrot.slane %v2760_v9, %v4322_v34  ;;  %v2790_v24 = vrot.slane %v2776_v11, %v4322_v34  ;;  %v2975_v7 = vld [vmem:[#allocation11 + $0x30] sm:$0xff]  ;;  %v2974_v62 = vld [vmem:[#allocation11 + $0x28] sm:$0xff]  ;;  %v2973_v9 = vld [vmem:[#allocation11 + $0x20] sm:$0xff] }
 0x5d9   : > { %v2691_v48 = vcombine.low %v2666_v26, %v2674_v13  ;;  %v2707_v19 = vcombine.low %v2682_v35, %v2690_v38  ;;  %v2692_v20 = vcombine.high %v2666_v26, %v2674_v13  ;;  %v2708_v21 = vcombine.high %v2682_v35, %v2690_v38  ;;  %3589 = vmatprep.subr.mxu1 %v2975_v7  ;;  %v2972_v11 = vld [vmem:[#allocation11 + $0x18] sm:$0xff]  ;;  %v2971_v26 = vld [vmem:[#allocation11 + $0x10] sm:$0xff]  ;;  %v2970_v13 = vld [vmem:[#allocation11 + $0x8] sm:$0xff] }
 0x5da   : > { %v2792_v27 = vcombine.high %v2767_v16, %v2783_v18  ;;  %v2791_v28 = vcombine.low %v2767_v16, %v2783_v18  ;;  %v2793_v40 = vcombine.low %v2774_v23, %v2790_v24  ;;  %v2794_v43 = vcombine.high %v2774_v23, %v2790_v24  ;;  %3590 = vmatpush3.msra.mxu1 %v2975_v7  ;;  %v2969_v35 = vld [vmem:[#allocation11] sm:$0xff]  ;;  %p4812_p7 = scmp.ne.s32.totalorder %s4809_s29, 0 }
 0x5db   : > { %v2699_v29 = vrot.slane %v2691_v48, %v4322_v34  ;;  %v2715_v32 = vrot.slane %v2707_v19, %v4322_v34  ;;  %v2706_v15 = vrot.slane %v2692_v20, %v4322_v34  ;;  %v2722_v36 = vrot.slane %v2708_v21, %v4322_v34  ;;  %3591 = vmatprep.subr.mxu1 %v2974_v62  ;;  %v3369_v21 = vld [vmem:[%s4803_s17] ss:$0 sm:$0xff]  ;;  %s553_s17 = scalar_lea.vmem [#allocation12], %s3312_s14  ;;  %s3184_s14 = scalar_lea.sflag [#allocation8], %s4186_s13 }
 0x5dc   : > { %2799 = vrot.lane.b32.xlu1 %v2792_v27, %s3968_s10  ;;  %3592 = vmatpush3.msra.mxu1 %v2974_v62  ;;  %v3370_v27 = vld [vmem:[%s4804_s24] ss:$0 sm:$0xff]  ;;  %s3199_s23 = sshll.u32 %s553_s17, 4  ;;  %s4694_s23 = int_to_ptr.vmem [resolvable:$true] %s3199_s23 }
 0x5dd   : > { %v2724_v33 = vcombine.high %v2699_v29, %v2715_v32  ;;  %v2723_v37 = vcombine.low %v2699_v29, %v2715_v32  ;;  %v2726_v41 = vcombine.high %v2706_v15, %v2722_v36  ;;  %v2725_v42 = vcombine.low %v2706_v15, %v2722_v36  ;;  %3593 = vmatprep.subr.mxu1 %v2973_v9  ;;  %v3096_v15 = vld [vmem:[%s4805_s1 + $0x78] sm:$0xff]  ;;  %v3095_v36 = vld [vmem:[%s4805_s1 + $0x70] sm:$0xff] }
 0x5de   : > { %3594 = vmatpush3.msra.mxu1 %v2973_v9  ;;  %3606 = vmatprep.subr.mxu0 %v3096_v15 }
 0x5df   : > { %2797 = vrot.lane.b32.xlu0 %v2724_v33, %s3968_s10  ;;  %3595 = vmatprep.subr.mxu1 %v2972_v11  ;;  %s3871_s10 = scalar_lea.vmem %s4694_s23, 256 }
 0x5e0   : > { %2807 = vrot.lane.b32.xlu1 %v2793_v40, %s3969_s25  ;;  %3596 = vmatpush3.msra.mxu1 %v2972_v11  ;;  %v3093_v40 = vld [vmem:[%s4805_s1 + $0x60] sm:$0xff]  ;;  %p3872_p3 = scmp.ne.s32.totalorder %s4694_s23, %s3871_s10 }
 0x5e1   : > { %3597 = vmatprep.subr.mxu1 %v2971_v26 }
 0x5e2   : > { %3598 = vmatpush3.msra.mxu1 %v2971_v26  ;;  %p3873_p8 = pnand %p3872_p3, %p4812_p7 }
 0x5e3   : > { %2813 = vrot.lane.b32.xlu0 %v2726_v41, %s3970_s9  ;;  %3599 = vmatprep.subr.mxu1 %v2970_v13  ;;  %v3092_v41 = vld [vmem:[%s4805_s1 + $0x58] sm:$0xff] }
 0x5e4   : > { %2805 = vrot.lane.b32.xlu1 %v2725_v42, %s3969_s25  ;;  %3600 = vmatpush3.msra.mxu1 %v2970_v13  ;;  %v3091_v42 = vld [vmem:[%s4805_s1 + $0x50] sm:$0xff]  ;;  %s4806_s25 = sld [smem:[#allocation25_spill]]  ;;  %p3874_p9 = pneg %p3873_p8 }
 0x5e5   : > { %3601 = vmatprep.subr.mxu1 %v2969_v35 }
 0x5e6   : > { %3602 = vmatpush3.msra.mxu1 %v2969_v35 }
 0x5e8   : > { %2815 = vrot.lane.b32.xlu1 %v2794_v43, %s3970_s9  ;;  %v3090_v43 = vld [vmem:[%s4805_s1 + $0x48] sm:$0xff]  ;;  %s4807_s9 = sld [smem:[#allocation17_spill]] }
 0x5ee   : > { %s3383_s16 = sshll.u32 %s4807_s9, 8 }
 0x5ef   : > { %s4692_s21 = scalar_lea.hbm %s4810_s18, %s3383_s16 }
 0x64e   : > { %v2800_v45 = vpop.permute.xlu1 %2799 }
 0x64f   : > { %v2820_v25 = vsel %vm995_vm1, %v2791_v28, %v2800_v45  ;;  %v3089_v45 = vld [vmem:[%s4805_s1 + $0x40] sm:$0xff] }
 0x651   : > { %v2798_v46 = vpop.permute.xlu0 %2797 }
 0x652   : > { %v2808_v47 = vpop.permute.xlu1 %2807  ;;  %v2819_v49 = vsel %vm995_vm1, %v2723_v37, %v2798_v46  ;;  %v3094_v37 = vld [vmem:[%s4805_s1 + $0x68] sm:$0xff]  ;;  %v3088_v46 = vld [vmem:[%s4805_s1 + $0x38] sm:$0xff] }
 0x653   : > { %v2823_v53 = vsel %vm2821_vm3, %v2820_v25, %v2808_v47  ;;  %v3087_v47 = vld [vmem:[%s4805_s1 + $0x30] sm:$0xff]  ;;  %v3081_v25 = vld [vmem:[%s4805_s1] sm:$0xff] }
 0x655   : > { %v2814_v50 = vpop.permute.xlu0 %2813 }
 0x656   : > { %v2806_v34 = vpop.permute.xlu1 %2805 }
 0x657   : > { %v2822_v52 = vsel %vm2821_vm3, %v2819_v49, %v2806_v34  ;;  %v3086_v49 = vld [vmem:[%s4805_s1 + $0x28] sm:$0xff]  ;;  %v3085_v34 = vld [vmem:[%s4805_s1 + $0x20] sm:$0xff] }
 0x658   : > { %v2825_v30 = vsel %vm2824_vm2, %v2822_v52, %v2814_v50  ;;  %v3084_v50 = vld [vmem:[%s4805_s1 + $0x18] sm:$0xff]  ;;  %v3083_v52 = vld [vmem:[%s4805_s1 + $0x10] sm:$0xff] }
 0x659   : > { %3584 = vmatprep.mubr.msk.f32.mxu0 %vm561_vm0, %v2825_v30  ;;  %v3082_v30 = vld [vmem:[%s4805_s1 + $0x8] sm:$0xff] }
 0x65a   : > { %v2816_v8 = vpop.permute.xlu1 %2815 }
 0x65b   : > { %v2826_v31 = vsel %vm2824_vm2, %v2823_v53, %v2816_v8  ;;  %v3371_v53 = vld [vmem:[%s4806_s25] ss:$0 sm:$0xff]  ;;  %s3971_s25 = smov [#allocation12]  }
 0x65c   : > { %3585 = vmatmul.mubr.msk.f32.vlgmr.msra.gmra.mxu0 %vm561_vm0, %v2826_v31  ;;  %s3875_s9 = sshll.u32 %s3971_s25, 4  ;;  %s3876_s9 = int_to_ptr.vmem [resolvable:$false] %s3875_s9 }
 0x65d   : > { %3607 = vmatpush3.msra.mxu0 %v3096_v15  ;;  %s3877_s12 = scalar_lea.vmem %s3876_s9, 512  ;;  %p3878_p12 = scmp.lt.s32.totalorder %s4694_s23, %s3876_s9 }
 0x65e   : > { %3608 = vmatprep.subr.mxu0 %v3095_v36  ;;  %p3879_p13 = scmp.lt.s32.totalorder %s3877_s12, %s3871_s10 }
 0x65f   : > { %3609 = vmatpush3.msra.mxu0 %v3095_v36 }
 0x660   : > { %3610 = vmatprep.subr.mxu0 %v3094_v37  ;;  %p3880_p4 = por %p3879_p13, %p3878_p12 }
 0x661   : > { %3611 = vmatpush3.msra.mxu0 %v3094_v37 }
 0x662   : > { %3612 = vmatprep.subr.mxu0 %v3093_v40  ;;  %p3881_p2 = pnand %p3880_p4, %p3874_p9 }
 0x663   : > { %3613 = vmatpush3.msra.mxu0 %v3093_v40 }
 0x664   : > { %3614 = vmatprep.subr.mxu0 %v3092_v41 }
 0x665   : > { %3615 = vmatpush3.msra.mxu0 %v3092_v41 }
 0x666   : > { %3616 = vmatprep.subr.mxu0 %v3091_v42 }
 0x667   : > { %3617 = vmatpush3.msra.mxu0 %v3091_v42 }
 0x668   : > { %3618 = vmatprep.subr.mxu0 %v3090_v43 }
 0x669   : > { %3619 = vmatpush3.msra.mxu0 %v3090_v43 }
 0x66a   : > { %3620 = vmatprep.subr.mxu0 %v3089_v45 }
 0x66b   : > { %3621 = vmatpush3.msra.mxu0 %v3089_v45 }
 0x66c   : > { %3622 = vmatprep.subr.mxu0 %v3088_v46 }
 0x66d   : > { %3623 = vmatpush3.msra.mxu0 %v3088_v46 }
 0x66e   : > { %3624 = vmatprep.subr.mxu0 %v3087_v47 }
 0x66f   : > { %3625 = vmatpush3.msra.mxu0 %v3087_v47 }
 0x670   : > { %3626 = vmatprep.subr.mxu0 %v3086_v49 }
 0x671   : > { %3627 = vmatpush3.msra.mxu0 %v3086_v49 }
 0x672   : > { %3628 = vmatprep.subr.mxu0 %v3085_v34 }
 0x673   : > { %3629 = vmatpush3.msra.mxu0 %v3085_v34 }
 0x674   : > { %3630 = vmatprep.subr.mxu0 %v3084_v50 }
 0x675   : > { %3631 = vmatpush3.msra.mxu0 %v3084_v50 }
 0x676   : > { %3632 = vmatprep.subr.mxu0 %v3083_v52 }
 0x677   : > { %3633 = vmatpush3.msra.mxu0 %v3083_v52 }
 0x678   : > { %3634 = vmatprep.subr.mxu0 %v3082_v30 }
 0x679   : > { %3635 = vmatpush3.msra.mxu0 %v3082_v30 }
 0x67a   : > { %3636 = vmatprep.subr.mxu0 %v3081_v25 }
 0x67b   : > { %3637 = vmatpush3.msra.mxu0 %v3081_v25 }
 0x71c   : > { %v3586_v54 = vpop.f32.mrf.mxu0 }
 0x71d   : > { %v2920_v39 = vadd.f32 %v3586_v54, %v3366_v10 }
 0x71e   : > { %v2914_v55 = vpop.f32.mrf.mxu0 }
 0x71f   : > { %v4610_v51 = vadd.f32 %v3789_v44, %v2920_v39  ;;  %v2915_v17 = vadd.f32 %v3366_v10, %v2914_v55 }
 0x721   : > { %v4613_v57 = vadd.f32 %v3790_v56, %v2915_v17  ;;  %v2928_v58 = vsel %vm561_vm0, %v4610_v51, 0.0 }
 0x722   : > { %2929 = vadd.xlane.f32.xlu1 %v2928_v58 }
 0x723   : > { %v2925_v59 = vsel %vm561_vm0, %v4613_v57, 0.0 }
 0x724   : > { %2926 = vadd.xlane.f32.xlu0 %v2925_v59 }
 0x7ab   : > { %v2930_v60 = vpop.xlane.xlu1 %2929 }
 0x7ac   : > { %v2932_v61 = vmul.f32 0.015625, %v2930_v60 }
 0x7ad   : > { %v2927_v63 = vpop.xlane.xlu0 %2926 }
 0x7ae   : > { %v2931_v0 = vmul.f32 0.015625, %v2927_v63  ;;  %v2934_v1 = vsub.f32 %v4610_v51, %v2932_v61 }
 0x7b0   : > { %v2933_v3 = vsub.f32 %v4613_v57, %v2931_v0  ;;  %v2936_v5 = vmul.f32 %v2934_v1, %v2934_v1 }
 0x7b2   : > { %v2935_v2 = vmul.f32 %v2933_v3, %v2933_v3  ;;  %v2940_v6 = vsel %vm561_vm0, %v2936_v5, 0.0 }
 0x7b4   : > { %v2937_v4 = vsel %vm561_vm0, %v2935_v2, 0.0 }
 0x7b5   : > { %2938 = vadd.xlane.f32.xlu0 %v2937_v4 }
 0x7b9   : > { %2941 = vadd.xlane.f32.xlu0 %v2940_v6 }
 0x83e   : > { %v2939_v38 = vpop.xlane.xlu0 %2938 }
 0x83f   : > { %v2943_v14 = vmul.f32 0.015625, %v2939_v38 }
 0x841   : > { %v2945_v16 = vadd.f32 1e-05, %v2943_v14 }
 0x842   : > { %v2942_v18 = vpop.xlane.xlu0 %2941 }
 0x843   : > { %3777 = vrsqrt.f32 %v2945_v16  ;;  %v2944_v48 = vmul.f32 0.015625, %v2942_v18 }
 0x845   : > { %v2946_v19 = vadd.f32 1e-05, %v2944_v48 }
 0x847   : > { %3779 = vrsqrt.f32 %v2946_v19 }
 0x850   : > { %v3778_v20 = vpop.eup %3777 }
 0x851   : > { %v2949_v22 = vmul.f32 %v3778_v20, %v2933_v3  ;;  %v3376_v3 = vld [vmem:[%s4808_s28] ss:$0 sm:$0xff] }
 0x853   : > { %v2958_v23 = vmul.f32 %v3369_v21, %v2949_v22 }
 0x854   : > { %v3780_v24 = vpop.eup %3779 }
 0x855   : > { %v2950_v28 = vmul.f32 %v3780_v24, %v2934_v1  ;;  %v2967_v29 = vadd.f32 %v3370_v27, %v2958_v23 }
 0x857   : > { %v2959_v32 = vmul.f32 %v3369_v21, %v2950_v28  ;;  %3603 = vmatprep.mubr.msk.f32.mxu1 %vm561_vm0, %v2967_v29 }
 0x859   : > { %v2968_v33 = vadd.f32 %v3370_v27, %v2959_v32 }
 0x85b   : > { %3604 = vmatmul.mubr.msk.f32.vlgmr.msra.gmra.mxu1 %vm561_vm0, %v2968_v33 }
 0x91b   : > { %v3605_v8 = vpop.f32.mrf.mxu1 }
 0x91c   : > { %v3062_v31 = vadd.f32 %v3605_v8, %v3371_v53 }
 0x91d   : > { %v3056_v10 = vpop.f32.mrf.mxu1 }
 0x91e   : > { %v3375_v54 = vmul.f32 -1.702, %v3062_v31  ;;  %v3057_v39 = vadd.f32 %v3371_v53, %v3056_v10 }
 0x920   : > { %v3071_v55 = vmul.f32 1.442695, %v3375_v54  ;;  %v3374_v44 = vmul.f32 -1.702, %v3057_v39 }
 0x922   : > { %3781 = vpow2.f32 %v3071_v55  ;;  %v3069_v17 = vmul.f32 1.442695, %v3374_v44 }
 0x924   : > { %3783 = vpow2.f32 %v3069_v17 }
 0x92f   : > { %v3782_v56 = vpop.eup %3781 }
 0x930   : > { %v3074_v58 = vadd.f32 1.0, %v3782_v56 }
 0x931   : > { %v3784_v59 = vpop.eup %3783 }
 0x932   : > { %v3073_v60 = vadd.f32 1.0, %v3784_v59  ;;  %3785 = vrcp.f32 %v3074_v58 }
 0x934   : > { %3787 = vrcp.f32 %v3073_v60 }
 0x93f   : > { %v3786_v61 = vpop.eup %3785 }
 0x940   : > { %v3080_v1 = vmul.f32 %v3786_v61, %v3062_v31 }
 0x941   : > { %v3788_v63 = vpop.eup %3787 }
 0x942   : > { %v3079_v0 = vmul.f32 %v3788_v63, %v3057_v39 }
 0x944   : > { %3638 = vmatprep.mubr.f32.mxu0 %v3079_v0 }
 0x945   : > { %3639 = vmatmul.mubr.f32.vlgmr.msra.gmra.mxu0 %v3080_v1 }
 0xa05   : > { %v3640_v2 = vpop.f32.mrf.mxu0 }
 0xa06   : > { %v3176_v4 = vadd.f32 %v3640_v2, %v3376_v3 }
 0xa07   : > { %v3170_v5 = vpop.f32.mrf.mxu0 }
 0xa08   : > { %v3180_v6 = vadd.f32 %v3176_v4, %v4610_v51  ;;  %v3171_v12 = vadd.f32 %v3376_v3, %v3170_v5 }
 0xa0a   : > { %3182 = vst.msk [vmem:[%s553_s17 + $0x8] sm:$0xff] %vm561_vm0, %v3180_v6  ;;  %v3179_v7 = vadd.f32 %v3171_v12, %v4613_v57 }
 0xa0c   : > { %3181 = vst.msk [vmem:[%s553_s17] sm:$0xff] %vm561_vm0, %v3179_v7 }
 0xa0d   : > { %3884 = shalt.err (!%p3881_p2)
}
 0xa0e   : > { %s3885_s26 = scalar_lea.hbm %s4692_s21, 256  ;;  %s3889_s17 = scalar_lea.hbm %s4811_s27, 512 }
 0xa0f   : > { %p3886_p6 = scmp.ne.s32.totalorder %s4692_s21, %s3885_s26  ;;  %p3890_p0 = scmp.lt.s32.totalorder %s4692_s21, %s4811_s27 }
 0xa10   : > { %p3891_p10 = scmp.lt.s32.totalorder %s3889_s17, %s3885_s26 }
 0xa11   : > { %p3887_p11 = pnand %p3886_p6, %p4812_p7 }
 0xa12   : > { %p3892_p5 = por %p3891_p10, %p3890_p0 }
 0xa13   : > { %p3888_p1 = pneg %p3887_p11 }
 0xa15   : > { %p3893_p3 = pnand %p3892_p5, %p3888_p1 }
 0xa17   : > { %3896 = shalt.err (!%p3893_p3)
}
 0xa18   : > { %s3972_s18 = smov 128   ;;  %s3973_s10 = smov 8  }
 0xa19   : > { %3651 = dma.vmem_to_hbm [thread:$0]  (%p4812_p7), %s4694_s23, 256, %s4692_s21, %s3184_s14, %s3972_s18, %s3972_s18, %s3973_s10  }
 0xa1a PF: > { %s4813_s25 = sld [smem:[#allocation16_spill]] }
 0xa1b   : > { %s4814_s9 = sld [smem:[#allocation20_spill]] }
 0xa1c   : > { %s4815_s12 = sld [smem:[#allocation18_spill]] }
 0xa20   : > { %s3214_s28 = sand.u32 1, %s4813_s25  }
 0xa21   : > { %p4816_p8 = scmp.ne.s32.totalorder %s4814_s9, 0  ;;  %s3215_s26 = scalar_lea.sflag [#allocation8], %s3214_s28 }
 0xa22   : > { %p4817_p9 = scmp.ge.s32.totalorder %s4815_s12, 2 }
 0xa24   : > { %p3665_p12 = pnand %p4817_p9, %p4816_p8 }
 0xa26   : > { %p3666_p13 = pneg %p3665_p12 }
 0xa28   : > { %3930 = dma.done.wait (%p3666_p13), %s3215_s26, 256  }
 0xa29   : > { %3932 = vsyncadd (%p3666_p13), %s3215_s26, 4294967040  ;;  %s32_s23 = sadd.s32 1, %s4815_s12   ;;  %s4818_s18 = smov %s3939_s19 }
 0xa2a   : > { %p29_p4 = scmp.ge.s32.totalorder %s32_s23, 4   ;;  %s4819_s19 = smov %s3943_s20 }
 0xa2b   : > { %s4820_s20 = smov %s4181_s8  ;;  %s4821_s21 = smov %s3951_s22 }
 0xa2c   : > { %s4822_s22 = smov %s4824_s30  ;;  %31 = sbr.rel (!%p29_p4) target bundleno = 16 (0x10), region = 137 }
 0xa31   :  { %3220 = vsyncpa [#allocation7], 1 }
 0xa32   :  { %3222 = vsyncpa [#allocation7 + $0x1], 1 }
 0xa33   :  { %3223 = vsyncpa [#allocation10], 1 }
 0xa34   :  { %3224 = vsyncpa [#allocation8], 1 }
 0xa35   :  { %3226 = vsyncpa [#allocation8 + $0x1], 1 }

// kernel: tpu_custom_call.1
= control target key start
LH: loop header
LB: loop body
LE: loop exit
PB: predicated region body
PF: predicated region fallthrough
CT: control target
= control target key end

     0   :  { %s3463_s0 = inlined_call_operand.hbm [shape: f32[2,16,64], index: 0, kind: input, shape index: {}]   ;;  %s3464_s1 = inlined_call_operand.hbm [shape: f32[1,64], index: 1, kind: input, shape index: {}]   ;;  %s3465_s2 = inlined_call_operand.vmem [shape: f32[1,64], index: 2, kind: input, shape index: {}]   ;;  %s3466_s3 = inlined_call_operand.vmem [shape: f32[64,64], index: 3, kind: input, shape index: {}]   ;;  %s3467_s4 = inlined_call_operand.vmem [shape: f32[1,64], index: 4, kind: input, shape index: {}]   ;;  %s3468_s5 = inlined_call_operand.vmem [shape: f32[64,128], index: 5, kind: input, shape index: {}]   ;;  %s3469_s6 = inlined_call_operand.vmem [shape: f32[1,128], index: 6, kind: input, shape index: {}]   ;;  %s3470_s7 = inlined_call_operand.vmem [shape: f32[64,64], index: 7, kind: input, shape index: {}]   ;;  %s3471_s8 = inlined_call_operand.vmem [shape: f32[1,64], index: 8, kind: input, shape index: {}]   ;;  %s3472_s9 = inlined_call_operand.vmem [shape: f32[1,64], index: 9, kind: input, shape index: {}]   ;;  %s3473_s10 = inlined_call_operand.vmem [shape: f32[1,64], index: 10, kind: input, shape index: {}]   ;;  %s3474_s11 = inlined_call_operand.hbm [shape: f32[64,128], index: 11, kind: input, shape index: {}]   ;;  %s3475_s12 = inlined_call_operand.vmem [shape: f32[1,128], index: 12, kind: input, shape index: {}]   ;;  %s3476_s13 = inlined_call_operand.vmem [shape: f32[128,64], index: 13, kind: input, shape index: {}]   ;;  %s3477_s14 = inlined_call_operand.vmem [shape: f32[1,64], index: 14, kind: input, shape index: {}]   ;;  %s3478_s15 = inlined_call_operand.hbm [shape: f32[2,16,64], index: 15, kind: output, shape index: {}]  }
   0x1   :  { %3493 = sst [smem:[#allocation21_spill]] %s3464_s1 }
   0x2   :  { %3494 = sst [smem:[#allocation22_spill]] %s3471_s8 }
   0x3   :  { %3495 = sst [smem:[#allocation23_spill]] %s3472_s9 }
   0x4   :  { %3496 = sst [smem:[#allocation24_spill]] %s3473_s10 }
   0x5   :  { %3497 = sst [smem:[#allocation25_spill]] %s3475_s12 }
   0x6   :  { %3498 = sst [smem:[#allocation26_spill]] %s3476_s13 }
   0x7   :  { %3499 = sst [smem:[#allocation27_spill]] %s3477_s14 }
   0x8   :  { %3500 = sst [smem:[#allocation28_spill]] %s3478_s15 }
   0x9   :  { %20 = vsyncpa [#allocation7], 0 }
   0xa   :  { %22 = vsyncpa [#allocation7 + $0x1], 0 }
   0xb   :  { %23 = vsyncpa [#allocation10], 0 }
   0xc   :  { %24 = vsyncpa [#allocation8], 0 }
   0xd   :  { %26 = vsyncpa [#allocation8 + $0x1], 0  ;;  %s2942_s18 = smov 0   ;;  %s2944_s19 = smov 0  }
   0xe   :  { %s2946_s20 = smov 0   ;;  %s2948_s21 = smov 0  }
   0xf   :  { %s2950_s22 = smov 0   ;;  %s2952_s23 = smov 0  }
  0x10 LB: > { %3501 = sst [smem:[#allocation16_spill]] %s2825_s18  ;;  %s2212_s24 = sadd.s32 4294967295, %s2845_s23   ;;  %s2845_s23 = sphi %s2952_s23, %s32_s23   ;;  %s2841_s22 = sphi %s2950_s22, %s3540_s22   ;;  %s2837_s21 = sphi %s2948_s21, %s3539_s21   ;;  %s2833_s20 = sphi %s2946_s20, %s3538_s20   ;;  %s2829_s19 = sphi %s2944_s19, %s3537_s19   ;;  %s2825_s18 = sphi %s2942_s18, %s3536_s18  }
  0x11   : > { %3502 = sst [smem:[#allocation17_spill]] %s2837_s21  ;;  %s2213_s25 = sadd.s32 4294967294, %s2845_s23  }
  0x12   : > { %3503 = sst [smem:[#allocation18_spill]] %s2845_s23  ;;  %p58_p0 = scmp.ne.s32.totalorder %s2833_s20, %s2829_s19 }
  0x13   : > { %p59_p1 = scmp.eq.s32.totalorder %s2845_s23, 0  ;;  %p64_p2 = scmp.ne.s32.totalorder %s2829_s19, %s2825_s18 }
  0x14   : > { %p2979_p3 = scmp.eq.s32.totalorder %s2212_s24, 0  ;;  %p384_p4 = scmp.eq.s32.totalorder %s2212_s24, 1 }
  0x15   : > { %p2983_p5 = por %p59_p1, %p58_p0  ;;  %p390_p6 = scmp.eq.s32.totalorder %s2213_s25, 1 }
  0x16   : > { %s3504_s26 = scalar_select %p2979_p3, 1, 0 }
  0x17   : > { %p2989_p7 = por %p2979_p3, %p64_p2  ;;  %p2993_p8 = por %p384_p4, %p58_p0 }
  0x18   : > { %p2997_p9 = por %p390_p6, %p64_p2  ;;  %p2214_p10 = scmp.ge.s32.totalorder %s2845_s23, 1 }
  0x19   : > { %s3506_s28 = scalar_select %p2989_p7, 1, 0 }
  0x1a   : > { %s3507_s29 = scalar_select %p2993_p8, 1, 0 }
  0x1b   : > { %s3509_s30 = scalar_select %p2997_p9, 1, 0 }
  0x1c   : > { %3508 = sst [smem:[#allocation19_spill]] %s3507_s29  ;;  %p397_p11 = scmp.lt.s32.totalorder %s2845_s23, 3 }
  0x1d   : > { %3510 = sst [smem:[#allocation20_spill]] %s3509_s30  ;;  %s2847_s17 = smov [#allocation9]  }
  0x1e   : > { %p3004_p13 = pnand %p2214_p10, %p397_p11  ;;  %s410_s24 = sshll.u32 %s2847_s17, 4  ;;  %s411_s24 = int_to_ptr.vmem [resolvable:$true] %s410_s24 }
  0x1f   : > { %p2564_p1 = scmp.lt.s32.totalorder %s2845_s23, 2  ;;  %s2848_s30 = smov [#allocation11]  }
  0x20   : > { %s3511_s16 = scalar_select %p3004_p13, 1, 0 }
  0x21   : > { %p2547_p0 = pneg %p3004_p13  ;;  %p3013_p4 = pnand %p2564_p1, %p2983_p5 }
  0x22   : > { %s447_s18 = sshll.u32 %s2848_s30, 4  ;;  %s2692_s17 = scalar_lea.vmem %s411_s24, 16  ;;  %s448_s18 = int_to_ptr.vmem [resolvable:$true] %s447_s18 }
  0x23   : > { %s3512_s25 = scalar_select %p3013_p4, 1, 0 }
  0x24   : > { %p3019_p2 = pnand %p2547_p0, %p2979_p3  ;;  %p2693_p10 = scmp.ne.s32.totalorder %s411_s24, %s2692_s17 }
  0x25   : > { %s2699_s27 = scalar_lea.vmem %s411_s24, 32  ;;  %p2700_p1 = scmp.lt.s32.totalorder %s411_s24, %s411_s24 }
  0x26   : > { %p2683_p6 = pneg %p3019_p2  ;;  %p2701_p12 = scmp.lt.s32.totalorder %s2699_s27, %s2692_s17 }
  0x28   : > { %p2695_p5 = pnand %p2693_p10, %p2683_p6  ;;  %p2702_p9 = por %p2701_p12, %p2700_p1 }
  0x2a   : > { %p2696_p11 = pneg %p2695_p5 }
  0x2c   : > { %p2703_p8 = pnand %p2702_p9, %p2696_p11 }
  0x2e   : > { %2706 = shalt.err (!%p2703_p8)
}
  0x2f   : > { %s3514_s1 = sld [smem:[#allocation21_spill]]  ;;  %s2718_s29 = scalar_lea.vmem %s448_s18, 1024 }
  0x30   : > { %p2719_p0 = scmp.ne.s32.totalorder %s448_s18, %s2718_s29  ;;  %p2726_p5 = scmp.lt.s32.totalorder %s448_s18, %s448_s18 }
  0x31   : > { %p2727_p7 = scmp.lt.s32.totalorder %s2718_s29, %s2718_s29 }
  0x32   : > { %p2721_p3 = pnand %p2719_p0, %p2683_p6 }
  0x33   : > { %p2728_p13 = por %p2727_p7, %p2726_p5 }
  0x34   : > { %p2722_p10 = pneg %p2721_p3 }
  0x35   : > { %2550 = dma.hbm_to_vmem [thread:$0]  (!%p3019_p2), %s3514_s1, 16, %s411_s24, [#allocation10]  }
  0x36   : > { %p2729_p4 = pnand %p2728_p13, %p2722_p10 }
  0x38   : > { %2732 = shalt.err (!%p2729_p4)
}
  0x39   : > { %s2849_s17 = smov 128   ;;  %s2850_s23 = smov 8  }
  0x3a   : > { %2553 = dma.hbm_to_vmem [thread:$0]  (!%p3019_p2), %s3474_s11, 1024, %s448_s18, [#allocation10], %s2849_s17, %s2849_s17, %s2850_s23  }
  0x3b   : > { %s470_s29 = sand.u32 1, %s2833_s20   ;;  %s44_s30 = sadd.s32 1, %s2841_s22 }
  0x3c   : > { %s2218_s1 = sshll.u32 %s470_s29, 4  ;;  %p46_p3 = scmp.ge.s32.totalorder %s44_s30, 2 }
  0x3d   : > { %s2276_s14 = sshll.u32 %s2841_s22, 8  ;;  %s474_s21 = scalar_lea.vmem [#allocation6], %s2218_s1 }
  0x3e   : > { %s481_s12 = sshll.u32 %s474_s21, 4  ;;  %s3542_s30 = smov (%p46_p3, %s44_s30), 0  ;;  %s482_s12 = int_to_ptr.vmem [resolvable:$true] %s481_s12 }
  0x3f   : > { %s480_s15 = scalar_lea.hbm %s3463_s0, %s2276_s14  ;;  %s51_s9 = sadd.s32 1, %s2833_s20 }
  0x40   : > { %s48_s8 = ssub.s32 %s2841_s22, %s3542_s30  ;;  %s471_s18 = scalar_lea.sflag [#allocation7], %s470_s29 }
  0x41   : > { %p3055_p7 = scmp.eq.s32.totalorder %s48_s8, 0  ;;  %p3516_p8 = scmp.ne.s32.totalorder %s3512_s25, 0 }
  0x42   : > { %s2746_s27 = scalar_lea.vmem %s482_s12, 256  ;;  %s2851_s1 = smov [#allocation6]  }
  0x43   : > { %p2735_p9 = pneg %p3516_p8  ;;  %p2747_p12 = scmp.ne.s32.totalorder %s482_s12, %s2746_s27 }
  0x44   : > { %s2751_s21 = sshll.u32 %s2851_s1, 4  ;;  %s2752_s21 = int_to_ptr.vmem [resolvable:$false] %s2751_s21 }
  0x45   : > { %p2749_p13 = pnand %p2747_p12, %p2735_p9  ;;  %s2753_s10 = scalar_lea.vmem %s2752_s21, 512 }
  0x46   : > { %p2754_p2 = scmp.lt.s32.totalorder %s482_s12, %s2752_s21  ;;  %p2755_p6 = scmp.lt.s32.totalorder %s2753_s10, %s2746_s27 }
  0x47   : > { %p2750_p4 = pneg %p2749_p13 }
  0x48   : > { %p2756_p11 = por %p2755_p6, %p2754_p2 }
  0x4a   : > { %p2757_p1 = pnand %p2756_p11, %p2750_p4 }
  0x4c   : > { %2760 = shalt.err (!%p2757_p1)
}
  0x4d   : > { %2557 = dma.hbm_to_vmem [thread:$0]  (!%p3516_p8), %s480_s15, 256, %s482_s12, %s471_s18, %s2849_s17, %s2849_s17, %s2850_s23  }
  0x4e   : > { %s3069_s8 = scalar_select %p3055_p7, %s2833_s20, %s51_s9  }
  0x4f   : > { %p3517_p0 = scmp.ne.s32.totalorder %s3511_s16, 0 }
  0x50   : > { %s3074_s13 = sand.u32 (!%p3517_p0), 1, %s2829_s19   ;;  %p3518_p10 = scmp.ne.s32.totalorder (!%p3517_p0), %s3506_s28, 0 }
  0x51   : > { %493 = sbr.rel (%p3517_p0) target bundleno = 3951 (0xf6f), region = 80  ;;  %s2222_s14 = sshll.u32 (!%p3517_p0), %s3074_s13, 4 }
  0x52   : > { %s496_s25 = scalar_lea.sflag (!%p3517_p0), [#allocation7], %s3074_s13  ;;  %s499_s29 = scalar_lea.vmem (!%p3517_p0), [#allocation6], %s2222_s14 }
  0x56   : > { %2812 = dma.done.wait (%p3518_p10), %s496_s25, 256  }
  0x57   : > { %2814 = vsyncadd (%p3518_p10), %s496_s25, 4294967040  ;;  %p3519_p5 = scmp.ne.s32.totalorder %s3504_s26, 0 }
  0x59   : > { %2816 = dma.done.wait (%p3519_p5), [#allocation10], 1040  }
  0x5a   : > { %2818 = vsyncadd (%p3519_p5), [#allocation10], 4294966256  ;;  %vm561_vm0 = vcmask 523264   ;;  %v3088_v0 = vld [vmem:[%s499_s29] sm:$0xff]  ;;  %v3090_v1 = vld [vmem:[%s499_s29 + $0x8] sm:$0xff]  ;;  %vm703_vm1 = vcmask 130048  }
  0x5b   : > { %v562_v2 = vsel %vm561_vm0, %v3088_v0, 0.0  ;;  %v565_v3 = vsel %vm561_vm0, %v3090_v1, 0.0  ;;  %v614_v24 = vld [vmem:[%s3468_s5 + $0x38] sm:$0xff]  ;;  %v613_v25 = vld [vmem:[%s3468_s5 + $0x30] sm:$0xff]  ;;  %v612_v26 = vld [vmem:[%s3468_s5 + $0x28] sm:$0xff]  ;;  %s2852_s23 = smov 64  }
  0x5c   : > { %563 = vadd.xlane.f32.xlu0 %v562_v2  ;;  %774 = vadd.xlane.f32.xlu1 %v562_v2  ;;  %v611_v27 = vld [vmem:[%s3468_s5 + $0x20] sm:$0xff]  ;;  %v610_v28 = vld [vmem:[%s3468_s5 + $0x18] sm:$0xff]  ;;  %v609_v29 = vld [vmem:[%s3468_s5 + $0x10] sm:$0xff]  ;;  %s2853_s15 = smov 112   ;;  %s2854_s24 = smov 48   ;;  %vm1731_vm2 = vcmask 261120  }
  0x5d   : > { %2368 = vmatprep.subr.mxu1 %v614_v24  ;;  %v608_v30 = vld [vmem:[%s3468_s5 + $0x8] sm:$0xff]  ;;  %v607_v31 = vld [vmem:[%s3468_s5] sm:$0xff]  ;;  %v825_v32 = vld [vmem:[%s3466_s3 + $0x38] sm:$0xff]  ;;  %s2855_s18 = smov 96   ;;  %s2856_s27 = smov 32   ;;  %vm1734_vm3 = vcmask 392192  }
  0x5e   : > { %2369 = vmatpush3.msra.mxu1 %v614_v24  ;;  %v2226_v46 = vld [vmem:[#allocation9] ss:$0 sm:$0xff]  ;;  %v824_v58 = vld [vmem:[%s3466_s3 + $0x30] sm:$0xff]  ;;  %v823_v60 = vld [vmem:[%s3466_s3 + $0x28] sm:$0xff]  ;;  %s2857_s1 = smov 80   ;;  %s2858_s21 = smov 16  }
  0x5f   : > { %2370 = vmatprep.subr.mxu1 %v613_v25  ;;  %v2227_v48 = vld [vmem:[%s3465_s2] ss:$0 sm:$0xff]  ;;  %v821_v63 = vld [vmem:[%s3466_s3 + $0x18] sm:$0xff]  ;;  %s3520_s29 = sld [smem:[#allocation22_spill]]  ;;  %s553_s28 = scalar_lea.vmem [#allocation12], %s2222_s14 }
  0x60   : > { %566 = vadd.xlane.f32.xlu0 %v565_v3  ;;  %777 = vadd.xlane.f32.xlu1 %v565_v3  ;;  %v822_v62 = vld [vmem:[%s3466_s3 + $0x20] sm:$0xff]  ;;  %v820_v3 = vld [vmem:[%s3466_s3 + $0x10] sm:$0xff]  ;;  %s3521_s26 = sld [smem:[#allocation23_spill]]  ;;  %s2109_s16 = sshll.u32 %s553_s28, 4  ;;  %s3412_s16 = int_to_ptr.vmem [resolvable:$true] %s2109_s16 }
  0x61   : > { %2371 = vmatpush3.msra.mxu1 %v613_v25  ;;  %s3522_s17 = sld [smem:[#allocation24_spill]]  ;;  %s2094_s14 = scalar_lea.sflag [#allocation8], %s3074_s13 }
  0x62   : > { %2372 = vmatprep.subr.mxu1 %v612_v26  ;;  %s3525_s10 = sld [smem:[#allocation25_spill]] }
  0x63   : > { %2373 = vmatpush3.msra.mxu1 %v612_v26  ;;  %s3527_s9 = sld [smem:[#allocation27_spill]] }
  0x64   : > { %2374 = vmatprep.subr.mxu1 %v611_v27  ;;  %s3528_s12 = sld [smem:[#allocation19_spill]] }
  0x65   : > { %2375 = vmatpush3.msra.mxu1 %v611_v27 }
  0x66   : > { %2376 = vmatprep.subr.mxu1 %v610_v28 }
  0x67   : > { %2377 = vmatpush3.msra.mxu1 %v610_v28 }
  0x68   : > { %2378 = vmatprep.subr.mxu1 %v609_v29 }
  0x69   : > { %2379 = vmatpush3.msra.mxu1 %v609_v29 }
  0x6a   : > { %2380 = vmatprep.subr.mxu1 %v608_v30  ;;  %p3530_p7 = scmp.ne.s32.totalorder %s3528_s12, 0 }
  0x6b   : > { %2381 = vmatpush3.msra.mxu1 %v608_v30 }
  0x6c   : > { %2382 = vmatprep.subr.mxu1 %v607_v31 }
  0x6d   : > { %2383 = vmatpush3.msra.mxu1 %v607_v31 }
  0x6e   : > { %2387 = vmatprep.subr.mxu1 %v825_v32 }
  0xe5   : > { %v564_v4 = vpop.xlane.xlu0 %563  ;;  %v775_v5 = vpop.xlane.xlu1 %774 }
  0xe6   : > { %v569_v6 = vmul.f32 0.015625, %v564_v4  ;;  %v780_v7 = vmul.f32 0.015625, %v775_v5  ;;  %v819_v4 = vld [vmem:[%s3466_s3 + $0x8] sm:$0xff] }
  0xe8   : > { %v3097_v8 = vsub.f32 %v3088_v0, %v569_v6  ;;  %v3100_v9 = vsub.f32 %v3088_v0, %v780_v7  ;;  %v818_v6 = vld [vmem:[%s3466_s3] sm:$0xff] }
  0xe9   : > { %v567_v10 = vpop.xlane.xlu0 %566  ;;  %v778_v11 = vpop.xlane.xlu1 %777 }
  0xea   : > { %v570_v12 = vmul.f32 0.015625, %v567_v10  ;;  %v781_v13 = vmul.f32 0.015625, %v778_v11  ;;  %v573_v14 = vmul.f32 %v3097_v8, %v3097_v8  ;;  %v784_v15 = vmul.f32 %v3100_v9, %v3100_v9 }
  0xec   : > { %v572_v16 = vsub.f32 %v3090_v1, %v570_v12  ;;  %v3108_v17 = vsub.f32 %v3090_v1, %v781_v13  ;;  %v575_v18 = vsel %vm561_vm0, %v573_v14, 0.0  ;;  %v786_v19 = vsel %vm561_vm0, %v784_v15, 0.0  ;;  %v2233_v15 = vld [vmem:[%s3467_s4] ss:$0 sm:$0xff] }
  0xed   : > { %576 = vadd.xlane.f32.xlu0 %v575_v18 }
  0xee   : > { %v574_v20 = vmul.f32 %v572_v16, %v572_v16  ;;  %v785_v21 = vmul.f32 %v3108_v17, %v3108_v17 }
  0xf0   : > { %v578_v22 = vsel %vm561_vm0, %v574_v20, 0.0  ;;  %v789_v23 = vsel %vm561_vm0, %v785_v21, 0.0 }
  0xf1   : > { %787 = vadd.xlane.f32.xlu0 %v786_v19  ;;  %579 = vadd.xlane.f32.xlu1 %v578_v22 }
  0xf5   : > { %790 = vadd.xlane.f32.xlu1 %v789_v23 }
 0x176   : > { %v577_v33 = vpop.xlane.xlu0 %576 }
 0x177   : > { %v581_v34 = vmul.f32 0.015625, %v577_v33 }
 0x179   : > { %v583_v35 = vadd.f32 1e-05, %v581_v34 }
 0x17a   : > { %v580_v36 = vpop.xlane.xlu1 %579  ;;  %v788_v37 = vpop.xlane.xlu0 %787 }
 0x17b   : > { %2629 = vrsqrt.f32 %v583_v35  ;;  %v582_v38 = vmul.f32 0.015625, %v580_v36  ;;  %v792_v39 = vmul.f32 0.015625, %v788_v37 }
 0x17d   : > { %v584_v40 = vadd.f32 1e-05, %v582_v38  ;;  %v794_v41 = vadd.f32 1e-05, %v792_v39 }
 0x17e   : > { %v791_v42 = vpop.xlane.xlu1 %790 }
 0x17f   : > { %2631 = vrsqrt.f32 %v584_v40  ;;  %v793_v43 = vmul.f32 0.015625, %v791_v42 }
 0x180   : > { %2633 = vrsqrt.f32 %v794_v41 }
 0x181   : > { %v795_v44 = vadd.f32 1e-05, %v793_v43 }
 0x183   : > { %2635 = vrsqrt.f32 %v795_v44 }
 0x188   : > { %v2630_v45 = vpop.eup %2629 }
 0x189   : > { %v587_v47 = vmul.f32 %v2630_v45, %v3097_v8  ;;  %v2228_v8 = vld [vmem:[%s3469_s6] ss:$0 sm:$0xff] }
 0x18b   : > { %v596_v49 = vmul.f32 %v2226_v46, %v587_v47 }
 0x18c   : > { %v2632_v50 = vpop.eup %2631 }
 0x18d   : > { %v2634_v51 = vpop.eup %2633  ;;  %v588_v52 = vmul.f32 %v2632_v50, %v572_v16  ;;  %v605_v53 = vadd.f32 %v2227_v48, %v596_v49 }
 0x18e   : > { %v798_v54 = vmul.f32 %v2634_v51, %v3100_v9 }
 0x18f   : > { %v597_v55 = vmul.f32 %v2226_v46, %v588_v52  ;;  %2384 = vmatprep.mubr.msk.f32.mxu1 %vm561_vm0, %v605_v53 }
 0x190   : > { %v807_v56 = vmul.f32 %v2226_v46, %v798_v54  ;;  %v2636_v61 = vpop.eup %2635 }
 0x191   : > { %v606_v57 = vadd.f32 %v2227_v48, %v597_v55  ;;  %v799_v2 = vmul.f32 %v2636_v61, %v3108_v17 }
 0x192   : > { %v816_v59 = vadd.f32 %v2227_v48, %v807_v56 }
 0x193   : > { %2385 = vmatmul.mubr.msk.f32.vlgmr.msra.gmra.mxu1 %vm561_vm0, %v606_v57  ;;  %v808_v5 = vmul.f32 %v2226_v46, %v799_v2 }
 0x194   : > { %2388 = vmatpush3.msra.mxu1 %v825_v32  ;;  %2403 = vmatprep.mubr.msk.f32.mxu1 %vm561_vm0, %v816_v59 }
 0x195   : > { %2389 = vmatprep.subr.mxu1 %v824_v58  ;;  %v817_v7 = vadd.f32 %v2227_v48, %v808_v5 }
 0x196   : > { %2390 = vmatpush3.msra.mxu1 %v824_v58 }
 0x197   : > { %2391 = vmatprep.subr.mxu1 %v823_v60 }
 0x198   : > { %2392 = vmatpush3.msra.mxu1 %v823_v60 }
 0x199   : > { %2393 = vmatprep.subr.mxu1 %v822_v62 }
 0x19a   : > { %2394 = vmatpush3.msra.mxu1 %v822_v62 }
 0x19b   : > { %2395 = vmatprep.subr.mxu1 %v821_v63 }
 0x19c   : > { %2396 = vmatpush3.msra.mxu1 %v821_v63 }
 0x19d   : > { %2397 = vmatprep.subr.mxu1 %v820_v3 }
 0x19e   : > { %2398 = vmatpush3.msra.mxu1 %v820_v3 }
 0x19f   : > { %2399 = vmatprep.subr.mxu1 %v819_v4 }
 0x1a0   : > { %2400 = vmatpush3.msra.mxu1 %v819_v4 }
 0x1a1   : > { %2401 = vmatprep.subr.mxu1 %v818_v6 }
 0x1a2   : > { %2402 = vmatpush3.msra.mxu1 %v818_v6 }
 0x1a3   : > { %2404 = vmatmul.mubr.msk.f32.vlgmr.msra.gmra.mxu1 %vm561_vm0, %v817_v7 }
 0x253   : > { %v2386_v9 = vpop.f32.mrf.mxu1 }
 0x254   : > { %v3177_v10 = vadd.f32 %v2386_v9, %v2228_v8 }
 0x255   : > { %v694_v11 = vpop.f32.mrf.mxu1 }
 0x256   : > { %v3179_v12 = vadd.f32 %v2228_v8, %v694_v11  ;;  %705 = vst.msk [vmem:[#allocation2 + $0x8] sm:$0xff] %vm703_vm1, %v3177_v10 }
 0x258   : > { %704 = vst.msk [vmem:[#allocation2] sm:$0xff] %vm703_vm1, %v3179_v12 }
 0x25d   : > { %v917_v13 = vld [vmem:[#allocation2 + $0x8] sm:$0xff] }
 0x25e   : > { %2406 = vmatprep.subr.msk.mxu0 %vm703_vm1, %v917_v13 }
 0x25f   : > { %2407 = vmatpush3.xpose.msk.msra.mxu0 %vm703_vm1, %v917_v13  ;;  %v916_v14 = vld [vmem:[#allocation2] sm:$0xff] }
 0x260   : > { %2408 = vmatprep.subr.msk.mxu0 %vm703_vm1, %v916_v14 }
 0x263   : > { %v2405_v16 = vpop.f32.mrf.mxu1  ;;  %2409 = vmatpush3.xpose.msk.msra.mxu0 %vm703_vm1, %v916_v14 }
 0x264   : > { %v911_v17 = vadd.f32 %v2405_v16, %v2233_v15 }
 0x265   : > { %v905_v18 = vpop.f32.mrf.mxu1 }
 0x266   : > { %v906_v19 = vadd.f32 %v2233_v15, %v905_v18  ;;  %v3194_v21 = vmul.f32 0.25, %v911_v17 }
 0x268   : > { %v3192_v20 = vmul.f32 0.25, %v906_v19 }
 0x26a   : > { %2410 = vmatprep.mubr.msk.f32.mxu0 %vm703_vm1, %v3192_v20 }
 0x26b   : > { %2411 = vmatmul.mubr.msk.f32.vlgmr.msra.gmra.mxu0 %vm703_vm1, %v3194_v21 }
 0x32b   : > { %v2412_v22 = vpop.f32.mrf.mxu0 }
 0x32c   : > { %v1011_v23 = vsel %vm703_vm1, %v2412_v22, -inf }
 0x32d   : > { %1012 = vmax.xlane.f32.xlu1 %v1011_v23  ;;  %v999_v24 = vpop.f32.mrf.mxu0 }
 0x32e   : > { %v1008_v25 = vsel %vm703_vm1, %v999_v24, -inf }
 0x32f   : > { %1009 = vmax.xlane.f32.xlu0 %v1008_v25 }
 0x3b6   : > { %v1013_v26 = vpop.xlane.xlu1 %1012 }
 0x3b7   : > { %v1015_v27 = vsub.f32 %v2412_v22, %v1013_v26 }
 0x3b8   : > { %v1010_v28 = vpop.xlane.xlu0 %1009 }
 0x3b9   : > { %v1018_v29 = vmul.f32 1.442695, %v1015_v27  ;;  %v1014_v30 = vsub.f32 %v999_v24, %v1010_v28 }
 0x3bb   : > { %2637 = vpow2.f32 %v1018_v29  ;;  %v1016_v31 = vmul.f32 1.442695, %v1014_v30 }
 0x3bd   : > { %2639 = vpow2.f32 %v1016_v31 }
 0x3c8   : > { %v2638_v32 = vpop.eup %2637 }
 0x3c9   : > { %v1023_v33 = vsel %vm703_vm1, %v2638_v32, 0.0 }
 0x3ca   : > { %v2640_v34 = vpop.eup %2639  ;;  %1024 = vadd.xlane.f32.xlu1 %v1023_v33 }
 0x3cb   : > { %v1020_v35 = vsel %vm703_vm1, %v2640_v34, 0.0 }
 0x3cc   : > { %1021 = vadd.xlane.f32.xlu0 %v1020_v35 }
 0x3db   : > { %708 = vrot.lane.b32.xlu1 %v3179_v12, %s2852_s23 }
 0x3df   : > { %718 = vrot.lane.b32.xlu1 %v3177_v10, %s2853_s15 }
 0x3e2   : > { %710 = vrot.lane.b32.xlu0 %v3177_v10, %s2852_s23 }
 0x3e3   : > { %716 = vrot.lane.b32.xlu1 %v3179_v12, %s2853_s15 }
 0x3e6   : > { %1117 = vrot.lane.b32.xlu0 %v3192_v20, %s2853_s15 }
 0x3e7   : > { %1119 = vrot.lane.b32.xlu1 %v3194_v21, %s2853_s15  ;;  %s3529_s15 = sld [smem:[#allocation28_spill]] }
 0x453   : > { %v1025_v36 = vpop.xlane.xlu1 %1024 }
 0x454   : > { %2641 = vrcp.f32 %v1025_v36 }
 0x455   : > { %v1022_v37 = vpop.xlane.xlu0 %1021 }
 0x456   : > { %2643 = vrcp.f32 %v1022_v37 }
 0x457   : > { %v709_v38 = vpop.permute.xlu1 %708 }
 0x458   : > { %714 = vst.msk [vmem:[#allocation3] sm:$0xff] %vm703_vm1, %v709_v38 }
 0x459   : > { %v711_v39 = vpop.permute.xlu0 %710 }
 0x45a   : > { %715 = vst.msk [vmem:[#allocation3 + $0x8] sm:$0xff] %vm703_vm1, %v711_v39 }
 0x45b   : > { %v719_v40 = vpop.permute.xlu1 %718 }
 0x45c   : > { %724 = vst.msk [vmem:[#allocation2 + $0x18] sm:$0xff] %vm703_vm1, %v719_v40 }
 0x45d   : > { %v1118_v49 = vpop.permute.xlu0 %1117 }
 0x45f   : > { %v717_v41 = vpop.permute.xlu1 %716  ;;  %v918_v45 = vld [vmem:[#allocation3] sm:$0xff] }
 0x460   : > { %723 = vst.msk [vmem:[#allocation2 + $0x10] sm:$0xff] %vm703_vm1, %v717_v41 }
 0x461   : > { %v919_v42 = vld [vmem:[#allocation3 + $0x8] sm:$0xff]  ;;  %v2642_v43 = vpop.eup %2641 }
 0x462   : > { %2413 = vmatprep.subr.mxu1 %v919_v42  ;;  %v1029_v48 = vmul.f32 %v2642_v43, %v2638_v32 }
 0x463   : > { %v2644_v44 = vpop.eup %2643  ;;  %2414 = vmatpush3.msra.mxu1 %v919_v42  ;;  %v1113_v47 = vld [vmem:[#allocation2 + $0x18] sm:$0xff]  ;;  %v1120_v51 = vpop.permute.xlu1 %1119 }
 0x464   : > { %2415 = vmatprep.subr.mxu1 %v918_v45  ;;  %v1028_v46 = vmul.f32 %v2644_v44, %v2640_v34 }
 0x465   : > { %2416 = vmatpush3.msra.mxu1 %v918_v45 }
 0x466   : > { %2417 = vmatprep.mubr.msk.f32.mxu1 %vm703_vm1, %v1028_v46  ;;  %2420 = vmatprep.subr.msk.mxu1 %vm703_vm1, %v1113_v47 }
 0x467   : > { %2418 = vmatmul.mubr.msk.f32.vlgmr.msra.gmra.mxu1 %vm703_vm1, %v1029_v48  ;;  %v1112_v50 = vld [vmem:[#allocation2 + $0x10] sm:$0xff] }
 0x468   : > { %2421 = vmatpush3.xpose.msk.msra.mxu1 %vm703_vm1, %v1113_v47  ;;  %2424 = vmatprep.mubr.msk.f32.mxu1 %vm703_vm1, %v1118_v49 }
 0x469   : > { %2422 = vmatprep.subr.msk.mxu1 %vm703_vm1, %v1112_v50 }
 0x46c   : > { %2423 = vmatpush3.xpose.msk.msra.mxu1 %vm703_vm1, %v1112_v50 }
 0x46f   : > { %2425 = vmatmul.mubr.msk.f32.vlgmr.msra.gmra.mxu1 %vm703_vm1, %v1120_v51 }
 0x527   : > { %v3222_v52 = vpop.f32.mrf.mxu1 }
 0x529   : > { %v3224_v53 = vpop.f32.mrf.mxu1 }
 0x52f   : > { %v2426_v54 = vpop.f32.mrf.mxu1 }
 0x530   : > { %v1209_v55 = vsel %vm703_vm1, %v2426_v54, -inf }
 0x531   : > { %1210 = vmax.xlane.f32.xlu1 %v1209_v55  ;;  %v1197_v56 = vpop.f32.mrf.mxu1 }
 0x532   : > { %v1206_v57 = vsel %vm703_vm1, %v1197_v56, -inf }
 0x533   : > { %1207 = vmax.xlane.f32.xlu0 %v1206_v57 }
 0x542   : > { %725 = vrot.lane.b32.xlu1 %v3179_v12, %s2854_s24 }
 0x546   : > { %736 = vrot.lane.b32.xlu1 %v3177_v10, %s2855_s18 }
 0x54a   : > { %734 = vrot.lane.b32.xlu1 %v3179_v12, %s2855_s18 }
 0x54e   : > { %1317 = vrot.lane.b32.xlu1 %v3194_v21, %s2855_s18 }
 0x5ba   : > { %v1211_v58 = vpop.xlane.xlu1 %1210 }
 0x5bb   : > { %v1213_v59 = vsub.f32 %v2426_v54, %v1211_v58 }
 0x5bc   : > { %v1208_v60 = vpop.xlane.xlu0 %1207 }
 0x5bd   : > { %v1216_v61 = vmul.f32 1.442695, %v1213_v59  ;;  %v1212_v62 = vsub.f32 %v1197_v56, %v1208_v60 }
 0x5be   : > { %v726_v63 = vpop.permute.xlu1 %725 }
 0x5bf   : > { %2645 = vpow2.f32 %v1216_v61  ;;  %v1214_v2 = vmul.f32 1.442695, %v1212_v62  ;;  %732 = vst.msk [vmem:[#allocation3 + $0x10] sm:$0xff] %vm703_vm1, %v726_v63 }
 0x5c1   : > { %2647 = vpow2.f32 %v1214_v2 }
 0x5c2   : > { %v737_v3 = vpop.permute.xlu1 %736 }
 0x5c3   : > { %742 = vst.msk [vmem:[#allocation2 + $0x28] sm:$0xff] %vm703_vm1, %v737_v3 }
 0x5c6   : > { %v735_v4 = vpop.permute.xlu1 %734  ;;  %v1115_v17 = vld [vmem:[#allocation3 + $0x10] sm:$0xff] }
 0x5c7   : > { %741 = vst.msk [vmem:[#allocation2 + $0x20] sm:$0xff] %vm703_vm1, %v735_v4 }
 0x5ca   : > { %v1311_v19 = vld [vmem:[#allocation2 + $0x28] sm:$0xff]  ;;  %v1318_v25 = vpop.permute.xlu1 %1317 }
 0x5cc   : > { %v2646_v5 = vpop.eup %2645 }
 0x5cd   : > { %v1221_v6 = vsel %vm703_vm1, %v2646_v5, 0.0 }
 0x5ce   : > { %v2648_v7 = vpop.eup %2647  ;;  %1222 = vadd.xlane.f32.xlu0 %v1221_v6  ;;  %v1310_v24 = vld [vmem:[#allocation2 + $0x20] sm:$0xff] }
 0x5cf   : > { %v1218_v8 = vsel %vm703_vm1, %v2648_v7, 0.0 }
 0x5d2   : > { %1219 = vadd.xlane.f32.xlu0 %v1218_v8 }
 0x5e8   : > { %727 = vrot.lane.b32.xlu0 %v3177_v10, %s2854_s24 }
 0x5ec   : > { %1315 = vrot.lane.b32.xlu0 %v3192_v20, %s2855_s18  ;;  %s3523_s18 = sld [smem:[#allocation26_spill]] }
 0x657   : > { %v1223_v9 = vpop.xlane.xlu0 %1222 }
 0x658   : > { %2649 = vrcp.f32 %v1223_v9 }
 0x65b   : > { %v1220_v11 = vpop.xlane.xlu0 %1219 }
 0x65c   : > { %2651 = vrcp.f32 %v1220_v11 }
 0x65f   : > { %v728_v13 = vpop.permute.xlu0 %727 }
 0x660   : > { %733 = vst.msk [vmem:[#allocation3 + $0x18] sm:$0xff] %vm703_vm1, %v728_v13 }
 0x663   : > { %v1316_v23 = vpop.permute.xlu0 %1315 }
 0x665   : > { %v2650_v15 = vpop.eup %2649 }
 0x666   : > { %v1227_v22 = vmul.f32 %v2650_v15, %v2646_v5 }
 0x667   : > { %v1116_v14 = vld [vmem:[#allocation3 + $0x18] sm:$0xff] }
 0x668   : > { %2427 = vmatprep.subr.mxu0 %v1116_v14 }
 0x669   : > { %v2652_v16 = vpop.eup %2651  ;;  %2428 = vmatpush3.msra.mxu0 %v1116_v14 }
 0x66a   : > { %2429 = vmatprep.subr.mxu0 %v1115_v17  ;;  %v1226_v18 = vmul.f32 %v2652_v16, %v2648_v7 }
 0x66b   : > { %2430 = vmatpush3.msra.mxu0 %v1115_v17 }
 0x66c   : > { %2431 = vmatprep.mubr.msk.f32.mxu0 %vm703_vm1, %v1226_v18  ;;  %2434 = vmatprep.subr.msk.mxu0 %vm703_vm1, %v1311_v19 }
 0x66d   : > { %2432 = vmatmul.mubr.msk.f32.vlgmr.msra.gmra.mxu0 %vm703_vm1, %v1227_v22 }
 0x66e   : > { %2435 = vmatpush3.xpose.msk.msra.mxu0 %vm703_vm1, %v1311_v19  ;;  %2438 = vmatprep.mubr.msk.f32.mxu0 %vm703_vm1, %v1316_v23 }
 0x66f   : > { %2436 = vmatprep.subr.msk.mxu0 %vm703_vm1, %v1310_v24 }
 0x672   : > { %2437 = vmatpush3.xpose.msk.msra.mxu0 %vm703_vm1, %v1310_v24 }
 0x675   : > { %2439 = vmatmul.mubr.msk.f32.vlgmr.msra.gmra.mxu0 %vm703_vm1, %v1318_v25  ;;  %v1743_v25 = vld [vmem:[%s3470_s7 + $0x30] sm:$0xff] }
 0x72d   : > { %v3250_v26 = vpop.f32.mrf.mxu0 }
 0x72f   : > { %v3252_v27 = vpop.f32.mrf.mxu0 }
 0x735   : > { %v2440_v28 = vpop.f32.mrf.mxu0 }
 0x736   : > { %v1407_v29 = vsel %vm703_vm1, %v2440_v28, -inf }
 0x737   : > { %1408 = vmax.xlane.f32.xlu1 %v1407_v29  ;;  %v1395_v30 = vpop.f32.mrf.mxu0  ;;  %v1739_v29 = vld [vmem:[%s3470_s7 + $0x10] sm:$0xff] }
 0x738   : > { %v1404_v31 = vsel %vm703_vm1, %v1395_v30, -inf }
 0x739   : > { %1405 = vmax.xlane.f32.xlu0 %v1404_v31  ;;  %v1737_v31 = vld [vmem:[%s3470_s7] sm:$0xff] }
 0x748   : > { %743 = vrot.lane.b32.xlu1 %v3179_v12, %s2856_s27 }
 0x74c   : > { %754 = vrot.lane.b32.xlu1 %v3177_v10, %s2857_s1 }
 0x750   : > { %752 = vrot.lane.b32.xlu1 %v3179_v12, %s2857_s1 }
 0x754   : > { %1515 = vrot.lane.b32.xlu1 %v3194_v21, %s2857_s1 }
 0x7c0   : > { %v1409_v32 = vpop.xlane.xlu1 %1408 }
 0x7c1   : > { %v1411_v33 = vsub.f32 %v2440_v28, %v1409_v32  ;;  %v1740_v28 = vld [vmem:[%s3470_s7 + $0x18] sm:$0xff] }
 0x7c2   : > { %v1406_v34 = vpop.xlane.xlu0 %1405 }
 0x7c3   : > { %v1414_v35 = vmul.f32 1.442695, %v1411_v33  ;;  %v1410_v36 = vsub.f32 %v1395_v30, %v1406_v34  ;;  %v1738_v30 = vld [vmem:[%s3470_s7 + $0x8] sm:$0xff] }
 0x7c4   : > { %v744_v37 = vpop.permute.xlu1 %743 }
 0x7c5   : > { %2653 = vpow2.f32 %v1414_v35  ;;  %v1412_v38 = vmul.f32 1.442695, %v1410_v36  ;;  %750 = vst.msk [vmem:[#allocation3 + $0x20] sm:$0xff] %vm703_vm1, %v744_v37 }
 0x7c7   : > { %2655 = vpow2.f32 %v1412_v38 }
 0x7c8   : > { %v755_v39 = vpop.permute.xlu1 %754 }
 0x7c9   : > { %760 = vst.msk [vmem:[#allocation2 + $0x38] sm:$0xff] %vm703_vm1, %v755_v39 }
 0x7cc   : > { %v753_v40 = vpop.permute.xlu1 %752  ;;  %v1313_v50 = vld [vmem:[#allocation3 + $0x20] sm:$0xff] }
 0x7cd   : > { %759 = vst.msk [vmem:[#allocation2 + $0x30] sm:$0xff] %vm703_vm1, %v753_v40 }
 0x7d0   : > { %v1509_v54 = vld [vmem:[#allocation2 + $0x38] sm:$0xff]  ;;  %v1516_v57 = vpop.permute.xlu1 %1515 }
 0x7d2   : > { %v2654_v41 = vpop.eup %2653 }
 0x7d3   : > { %v1419_v21 = vsel %vm703_vm1, %v2654_v41, 0.0 }
 0x7d4   : > { %v2656_v42 = vpop.eup %2655  ;;  %1420 = vadd.xlane.f32.xlu0 %v1419_v21  ;;  %v1508_v56 = vld [vmem:[#allocation2 + $0x30] sm:$0xff] }
 0x7d5   : > { %v1416_v43 = vsel %vm703_vm1, %v2656_v42, 0.0 }
 0x7d8   : > { %1417 = vadd.xlane.f32.xlu0 %v1416_v43 }
 0x7ee   : > { %745 = vrot.lane.b32.xlu0 %v3177_v10, %s2856_s27 }
 0x7f2   : > { %1513 = vrot.lane.b32.xlu0 %v3192_v20, %s2857_s1  ;;  %s2761_s1 = scalar_lea.vmem %s3412_s16, 256 }
 0x7f3   : > { %p2762_p3 = scmp.ne.s32.totalorder %s3412_s16, %s2761_s1 }
 0x7f5   : > { %p2763_p8 = pnand %p2762_p3, %p3530_p7 }
 0x7f7   : > { %p2764_p9 = pneg %p2763_p8 }
 0x85d   : > { %v1421_v44 = vpop.xlane.xlu0 %1420 }
 0x85e   : > { %2657 = vrcp.f32 %v1421_v44 }
 0x861   : > { %v1418_v45 = vpop.xlane.xlu0 %1417 }
 0x862   : > { %2659 = vrcp.f32 %v1418_v45  ;;  %v2260_v45 = vld [vmem:[%s3520_s29] ss:$0 sm:$0xff] }
 0x865   : > { %v746_v46 = vpop.permute.xlu0 %745 }
 0x866   : > { %751 = vst.msk [vmem:[#allocation3 + $0x28] sm:$0xff] %vm703_vm1, %v746_v46 }
 0x869   : > { %v1514_v20 = vpop.permute.xlu0 %1513 }
 0x86b   : > { %v2658_v48 = vpop.eup %2657 }
 0x86c   : > { %v1425_v55 = vmul.f32 %v2658_v48, %v2654_v41 }
 0x86d   : > { %v1314_v47 = vld [vmem:[#allocation3 + $0x28] sm:$0xff] }
 0x86e   : > { %2441 = vmatprep.subr.mxu1 %v1314_v47 }
 0x86f   : > { %v2660_v49 = vpop.eup %2659  ;;  %2442 = vmatpush3.msra.mxu1 %v1314_v47 }
 0x870   : > { %2443 = vmatprep.subr.mxu1 %v1313_v50  ;;  %v1424_v51 = vmul.f32 %v2660_v49, %v2656_v42 }
 0x871   : > { %2444 = vmatpush3.msra.mxu1 %v1313_v50 }
 0x872   : > { %2445 = vmatprep.mubr.msk.f32.mxu1 %vm703_vm1, %v1424_v51  ;;  %2448 = vmatprep.subr.msk.mxu1 %vm703_vm1, %v1509_v54 }
 0x873   : > { %2446 = vmatmul.mubr.msk.f32.vlgmr.msra.gmra.mxu1 %vm703_vm1, %v1425_v55 }
 0x874   : > { %2449 = vmatpush3.xpose.msk.msra.mxu1 %vm703_vm1, %v1509_v54  ;;  %2452 = vmatprep.mubr.msk.f32.mxu1 %vm703_vm1, %v1514_v20 }
 0x875   : > { %2450 = vmatprep.subr.msk.mxu1 %vm703_vm1, %v1508_v56 }
 0x878   : > { %2451 = vmatpush3.xpose.msk.msra.mxu1 %vm703_vm1, %v1508_v56 }
 0x87b   : > { %2453 = vmatmul.mubr.msk.f32.vlgmr.msra.gmra.mxu1 %vm703_vm1, %v1516_v57 }
 0x933   : > { %v2447_v58 = vpop.f32.mrf.mxu1 }
 0x935   : > { %v1498_v59 = vpop.f32.mrf.mxu1 }
 0x93b   : > { %v2454_v60 = vpop.f32.mrf.mxu1 }
 0x93c   : > { %v1605_v61 = vsel %vm703_vm1, %v2454_v60, -inf }
 0x93d   : > { %1606 = vmax.xlane.f32.xlu1 %v1605_v61  ;;  %v1593_v62 = vpop.f32.mrf.mxu1  ;;  %v1886_v61 = vld [vmem:[#allocation11 + $0x38] sm:$0xff] }
 0x93e   : > { %v1602_v63 = vsel %vm703_vm1, %v1593_v62, -inf  ;;  %2481 = vmatprep.subr.mxu1 %v1886_v61 }
 0x93f   : > { %1603 = vmax.xlane.f32.xlu0 %v1602_v63  ;;  %2482 = vmatpush3.msra.mxu1 %v1886_v61  ;;  %v1884_v63 = vld [vmem:[#allocation11 + $0x28] sm:$0xff] }
 0x94e   : > { %761 = vrot.lane.b32.xlu1 %v3179_v12, %s2858_s21 }
 0x952   : > { %1707 = vrot.lane.b32.xlu1 %v3252_v27, %s2858_s21  ;;  %v1741_v27 = vld [vmem:[%s3470_s7 + $0x20] sm:$0xff] }
 0x956   : > { %1709 = vrot.lane.b32.xlu1 %v3250_v26, %s2858_s21  ;;  %v1742_v26 = vld [vmem:[%s3470_s7 + $0x28] sm:$0xff] }
 0x95a   : > { %1717 = vrot.lane.b32.xlu1 %v2447_v58, %s2856_s27 }
 0x9c6   : > { %v1607_v2 = vpop.xlane.xlu1 %1606 }
 0x9c7   : > { %v1609_v3 = vsub.f32 %v2454_v60, %v1607_v2  ;;  %v1883_v2 = vld [vmem:[#allocation11 + $0x20] sm:$0xff] }
 0x9c8   : > { %v1604_v4 = vpop.xlane.xlu0 %1603 }
 0x9c9   : > { %v1612_v5 = vmul.f32 1.442695, %v1609_v3  ;;  %v1608_v6 = vsub.f32 %v1593_v62, %v1604_v4  ;;  %v1885_v62 = vld [vmem:[#allocation11 + $0x30] sm:$0xff]  ;;  %v1882_v3 = vld [vmem:[#allocation11 + $0x18] sm:$0xff] }
 0x9ca   : > { %v762_v7 = vpop.permute.xlu1 %761  ;;  %2483 = vmatprep.subr.mxu1 %v1885_v62  ;;  %v1881_v4 = vld [vmem:[#allocation11 + $0x10] sm:$0xff] }
 0x9cb   : > { %2661 = vpow2.f32 %v1612_v5  ;;  %v1610_v8 = vmul.f32 1.442695, %v1608_v6  ;;  %768 = vst.msk [vmem:[#allocation3 + $0x30] sm:$0xff] %vm703_vm1, %v762_v7  ;;  %2484 = vmatpush3.msra.mxu1 %v1885_v62  ;;  %v1880_v5 = vld [vmem:[#allocation11 + $0x8] sm:$0xff]  ;;  %v1879_v6 = vld [vmem:[#allocation11] sm:$0xff] }
 0x9cc   : > { %2485 = vmatprep.subr.mxu1 %v1884_v63 }
 0x9cd   : > { %2663 = vpow2.f32 %v1610_v8  ;;  %2486 = vmatpush3.msra.mxu1 %v1884_v63 }
 0x9ce   : > { %v1708_v34 = vpop.permute.xlu1 %1707  ;;  %2487 = vmatprep.subr.mxu1 %v1883_v2 }
 0x9cf   : > { %v1729_v38 = vsel %vm703_vm1, %v3224_v53, %v1708_v34  ;;  %2488 = vmatpush3.msra.mxu1 %v1883_v2 }
 0x9d0   : > { %2489 = vmatprep.subr.mxu1 %v1882_v3 }
 0x9d1   : > { %2490 = vmatpush3.msra.mxu1 %v1882_v3 }
 0x9d2   : > { %v1511_v22 = vld [vmem:[#allocation3 + $0x30] sm:$0xff]  ;;  %v1710_v35 = vpop.permute.xlu1 %1709  ;;  %2491 = vmatprep.subr.mxu1 %v1881_v4 }
 0x9d3   : > { %v1730_v40 = vsel %vm703_vm1, %v3222_v52, %v1710_v35  ;;  %2492 = vmatpush3.msra.mxu1 %v1881_v4 }
 0x9d4   : > { %2493 = vmatprep.subr.mxu1 %v1880_v5 }
 0x9d5   : > { %2494 = vmatpush3.msra.mxu1 %v1880_v5 }
 0x9d6   : > { %v1718_v36 = vpop.permute.xlu1 %1717  ;;  %2495 = vmatprep.subr.mxu1 %v1879_v6 }
 0x9d7   : > { %v1733_v42 = vsel %vm1731_vm2, %v1730_v40, %v1718_v36  ;;  %2496 = vmatpush3.msra.mxu1 %v1879_v6 }
 0x9d8   : > { %v2662_v9 = vpop.eup %2661 }
 0x9d9   : > { %v1617_v12 = vsel %vm703_vm1, %v2662_v9, 0.0 }
 0x9da   : > { %v2664_v11 = vpop.eup %2663  ;;  %1618 = vadd.xlane.f32.xlu0 %v1617_v12 }
 0x9db   : > { %v1614_v13 = vsel %vm703_vm1, %v2664_v11, 0.0 }
 0x9de   : > { %1615 = vadd.xlane.f32.xlu0 %v1614_v13 }
 0x9f4   : > { %763 = vrot.lane.b32.xlu0 %v3177_v10, %s2858_s21  ;;  %v1744_v10 = vld [vmem:[%s3470_s7 + $0x38] sm:$0xff]  ;;  %s2859_s21 = smov [#allocation12]  }
 0x9f8   : > { %1715 = vrot.lane.b32.xlu0 %v1498_v59, %s2856_s27  ;;  %s3524_s27 = smov %s3523_s18 }
 0x9f9   : > { %v1997_v34 = vld [vmem:[%s3524_s27 + $0x30] sm:$0xff]  ;;  %v1996_v35 = vld [vmem:[%s3524_s27 + $0x28] sm:$0xff]  ;;  %v1995_v36 = vld [vmem:[%s3524_s27 + $0x20] sm:$0xff] }
 0x9fa   : > { %v1991_v40 = vld [vmem:[%s3524_s27] sm:$0xff] }
 0xa63   : > { %v1619_v14 = vpop.xlane.xlu0 %1618 }
 0xa64   : > { %2665 = vrcp.f32 %v1619_v14 }
 0xa67   : > { %v1616_v15 = vpop.xlane.xlu0 %1615 }
 0xa68   : > { %2667 = vrcp.f32 %v1616_v15  ;;  %v2263_v15 = vld [vmem:[%s3521_s26] ss:$0 sm:$0xff] }
 0xa6b   : > { %v764_v16 = vpop.permute.xlu0 %763 }
 0xa6c   : > { %769 = vst.msk [vmem:[#allocation3 + $0x38] sm:$0xff] %vm703_vm1, %v764_v16 }
 0xa6f   : > { %v1716_v37 = vpop.permute.xlu0 %1715 }
 0xa70   : > { %v1732_v41 = vsel %vm1731_vm2, %v1729_v38, %v1716_v37  ;;  %v1994_v37 = vld [vmem:[%s3524_s27 + $0x18] sm:$0xff]  ;;  %v1993_v38 = vld [vmem:[%s3524_s27 + $0x10] sm:$0xff] }
 0xa71   : > { %v2666_v18 = vpop.eup %2665 }
 0xa72   : > { %v1623_v24 = vmul.f32 %v2666_v18, %v2662_v9 }
 0xa73   : > { %v1512_v17 = vld [vmem:[#allocation3 + $0x38] sm:$0xff] }
 0xa74   : > { %2455 = vmatprep.subr.mxu0 %v1512_v17 }
 0xa75   : > { %v2668_v19 = vpop.eup %2667  ;;  %2456 = vmatpush3.msra.mxu0 %v1512_v17  ;;  %v2264_v17 = vld [vmem:[%s3522_s17] ss:$0 sm:$0xff] }
 0xa76   : > { %2457 = vmatprep.subr.mxu0 %v1511_v22  ;;  %v1622_v23 = vmul.f32 %v2668_v19, %v2664_v11 }
 0xa77   : > { %2458 = vmatpush3.msra.mxu0 %v1511_v22 }
 0xa78   : > { %2459 = vmatprep.mubr.msk.f32.mxu0 %vm703_vm1, %v1622_v23  ;;  %2462 = vmatprep.subr.mxu0 %v1744_v10 }
 0xa79   : > { %2460 = vmatmul.mubr.msk.f32.vlgmr.msra.gmra.mxu0 %vm703_vm1, %v1623_v24 }
 0xa7a   : > { %2463 = vmatpush3.msra.mxu0 %v1744_v10 }
 0xa7b   : > { %2464 = vmatprep.subr.mxu0 %v1743_v25 }
 0xa7c   : > { %2465 = vmatpush3.msra.mxu0 %v1743_v25  ;;  %v2006_v25 = vld [vmem:[%s3523_s18 + $0x78] sm:$0xff] }
 0xa7d   : > { %2466 = vmatprep.subr.mxu0 %v1742_v26 }
 0xa7e   : > { %2467 = vmatpush3.msra.mxu0 %v1742_v26  ;;  %v2005_v26 = vld [vmem:[%s3524_s27 + $0x70] sm:$0xff] }
 0xa7f   : > { %2468 = vmatprep.subr.mxu0 %v1741_v27 }
 0xa80   : > { %2469 = vmatpush3.msra.mxu0 %v1741_v27  ;;  %v2004_v27 = vld [vmem:[%s3524_s27 + $0x68] sm:$0xff] }
 0xa81   : > { %2470 = vmatprep.subr.mxu0 %v1740_v28 }
 0xa82   : > { %2471 = vmatpush3.msra.mxu0 %v1740_v28  ;;  %v2003_v28 = vld [vmem:[%s3524_s27 + $0x60] sm:$0xff] }
 0xa83   : > { %2472 = vmatprep.subr.mxu0 %v1739_v29 }
 0xa84   : > { %2473 = vmatpush3.msra.mxu0 %v1739_v29  ;;  %v2002_v29 = vld [vmem:[%s3524_s27 + $0x58] sm:$0xff] }
 0xa85   : > { %2474 = vmatprep.subr.mxu0 %v1738_v30 }
 0xa86   : > { %2475 = vmatpush3.msra.mxu0 %v1738_v30  ;;  %v2001_v30 = vld [vmem:[%s3524_s27 + $0x50] sm:$0xff] }
 0xa87   : > { %2476 = vmatprep.subr.mxu0 %v1737_v31 }
 0xa88   : > { %2477 = vmatpush3.msra.mxu0 %v1737_v31  ;;  %v2000_v31 = vld [vmem:[%s3524_s27 + $0x48] sm:$0xff] }
 0xa89   : > { %2500 = vmatprep.subr.mxu0 %v2006_v25 }
 0xb39   : > { %v2461_v32 = vpop.f32.mrf.mxu0 }
 0xb3a   : > { %1725 = vrot.lane.b32.xlu1 %v2461_v32, %s2854_s24  ;;  %v1999_v32 = vld [vmem:[%s3524_s27 + $0x40] sm:$0xff] }
 0xb3b   : > { %v1696_v33 = vpop.f32.mrf.mxu0 }
 0xb3c   : > { %1723 = vrot.lane.b32.xlu0 %v1696_v33, %s2854_s24  ;;  %v1998_v33 = vld [vmem:[%s3524_s27 + $0x38] sm:$0xff]  ;;  %s3526_s24 = sld [smem:[#allocation17_spill]] }
 0xb42   : > { %s2277_s26 = sshll.u32 %s3526_s24, 8 }
 0xb43   : > { %s3410_s18 = scalar_lea.hbm %s3529_s15, %s2277_s26 }
 0xbac   : > { %v1726_v39 = vpop.permute.xlu1 %1725 }
 0xbad   : > { %v1736_v44 = vsel %vm1734_vm3, %v1733_v42, %v1726_v39  ;;  %v1992_v39 = vld [vmem:[%s3524_s27 + $0x8] sm:$0xff] }
 0xbae   : > { %v1724_v21 = vpop.permute.xlu0 %1723 }
 0xbaf   : > { %v1735_v43 = vsel %vm1734_vm3, %v1732_v41, %v1724_v21  ;;  %v2265_v41 = vld [vmem:[%s3525_s10] ss:$0 sm:$0xff]  ;;  %s2765_s10 = sshll.u32 %s2859_s21, 4  ;;  %s2766_s10 = int_to_ptr.vmem [resolvable:$false] %s2765_s10 }
 0xbb0   : > { %2478 = vmatprep.mubr.msk.f32.mxu0 %vm561_vm0, %v1735_v43  ;;  %s2767_s24 = scalar_lea.vmem %s2766_s10, 512  ;;  %p2768_p12 = scmp.lt.s32.totalorder %s3412_s16, %s2766_s10 }
 0xbb1   : > { %2479 = vmatmul.mubr.msk.f32.vlgmr.msra.gmra.mxu0 %vm561_vm0, %v1736_v44  ;;  %p2769_p13 = scmp.lt.s32.totalorder %s2767_s24, %s2761_s1 }
 0xbb2   : > { %2501 = vmatpush3.msra.mxu0 %v2006_v25 }
 0xbb3   : > { %2502 = vmatprep.subr.mxu0 %v2005_v26  ;;  %p2770_p4 = por %p2769_p13, %p2768_p12 }
 0xbb4   : > { %2503 = vmatpush3.msra.mxu0 %v2005_v26 }
 0xbb5   : > { %2504 = vmatprep.subr.mxu0 %v2004_v27  ;;  %p2771_p2 = pnand %p2770_p4, %p2764_p9 }
 0xbb6   : > { %2505 = vmatpush3.msra.mxu0 %v2004_v27 }
 0xbb7   : > { %2506 = vmatprep.subr.mxu0 %v2003_v28 }
 0xbb8   : > { %2507 = vmatpush3.msra.mxu0 %v2003_v28 }
 0xbb9   : > { %2508 = vmatprep.subr.mxu0 %v2002_v29 }
 0xbba   : > { %2509 = vmatpush3.msra.mxu0 %v2002_v29 }
 0xbbb   : > { %2510 = vmatprep.subr.mxu0 %v2001_v30 }
 0xbbc   : > { %2511 = vmatpush3.msra.mxu0 %v2001_v30 }
 0xbbd   : > { %2512 = vmatprep.subr.mxu0 %v2000_v31 }
 0xbbe   : > { %2513 = vmatpush3.msra.mxu0 %v2000_v31 }
 0xbbf   : > { %2514 = vmatprep.subr.mxu0 %v1999_v32 }
 0xbc0   : > { %2515 = vmatpush3.msra.mxu0 %v1999_v32 }
 0xbc1   : > { %2516 = vmatprep.subr.mxu0 %v1998_v33 }
 0xbc2   : > { %2517 = vmatpush3.msra.mxu0 %v1998_v33 }
 0xbc3   : > { %2518 = vmatprep.subr.mxu0 %v1997_v34 }
 0xbc4   : > { %2519 = vmatpush3.msra.mxu0 %v1997_v34 }
 0xbc5   : > { %2520 = vmatprep.subr.mxu0 %v1996_v35 }
 0xbc6   : > { %2521 = vmatpush3.msra.mxu0 %v1996_v35 }
 0xbc7   : > { %2522 = vmatprep.subr.mxu0 %v1995_v36 }
 0xbc8   : > { %2523 = vmatpush3.msra.mxu0 %v1995_v36 }
 0xbc9   : > { %2524 = vmatprep.subr.mxu0 %v1994_v37 }
 0xbca   : > { %2525 = vmatpush3.msra.mxu0 %v1994_v37 }
 0xbcb   : > { %2526 = vmatprep.subr.mxu0 %v1993_v38 }
 0xbcc   : > { %2527 = vmatpush3.msra.mxu0 %v1993_v38 }
 0xbcd   : > { %2528 = vmatprep.subr.mxu0 %v1992_v39 }
 0xbce   : > { %2529 = vmatpush3.msra.mxu0 %v1992_v39 }
 0xbcf   : > { %2530 = vmatprep.subr.mxu0 %v1991_v40 }
 0xbd0   : > { %2531 = vmatpush3.msra.mxu0 %v1991_v40 }
 0xc71   : > { %v2480_v46 = vpop.f32.mrf.mxu0 }
 0xc72   : > { %v1830_v53 = vadd.f32 %v2480_v46, %v2260_v45 }
 0xc73   : > { %v1824_v47 = vpop.f32.mrf.mxu0 }
 0xc74   : > { %v3328_v48 = vadd.f32 %v1830_v53, %v3090_v1  ;;  %v1825_v52 = vadd.f32 %v2260_v45, %v1824_v47 }
 0xc76   : > { %v3331_v49 = vadd.f32 %v1825_v52, %v3088_v0  ;;  %v1838_v50 = vsel %vm561_vm0, %v3328_v48, 0.0 }
 0xc77   : > { %1839 = vadd.xlane.f32.xlu1 %v1838_v50 }
 0xc78   : > { %v1835_v51 = vsel %vm561_vm0, %v3331_v49, 0.0 }
 0xc79   : > { %1836 = vadd.xlane.f32.xlu0 %v1835_v51 }
 0xd00   : > { %v1840_v54 = vpop.xlane.xlu1 %1839 }
 0xd01   : > { %v1842_v55 = vmul.f32 0.015625, %v1840_v54 }
 0xd02   : > { %v1837_v20 = vpop.xlane.xlu0 %1836 }
 0xd03   : > { %v1841_v56 = vmul.f32 0.015625, %v1837_v20  ;;  %v1844_v57 = vsub.f32 %v3328_v48, %v1842_v55 }
 0xd05   : > { %v1843_v1 = vsub.f32 %v3331_v49, %v1841_v56  ;;  %v1846_v59 = vmul.f32 %v1844_v57, %v1844_v57 }
 0xd07   : > { %v1845_v58 = vmul.f32 %v1843_v1, %v1843_v1  ;;  %v1850_v60 = vsel %vm561_vm0, %v1846_v59, 0.0 }
 0xd09   : > { %v1847_v0 = vsel %vm561_vm0, %v1845_v58, 0.0 }
 0xd0a   : > { %1848 = vadd.xlane.f32.xlu0 %v1847_v0 }
 0xd0e   : > { %1851 = vadd.xlane.f32.xlu0 %v1850_v60 }
 0xd93   : > { %v1849_v7 = vpop.xlane.xlu0 %1848 }
 0xd94   : > { %v1853_v8 = vmul.f32 0.015625, %v1849_v7 }
 0xd96   : > { %v1855_v9 = vadd.f32 1e-05, %v1853_v8 }
 0xd97   : > { %v1852_v12 = vpop.xlane.xlu0 %1851 }
 0xd98   : > { %2669 = vrsqrt.f32 %v1855_v9  ;;  %v1854_v11 = vmul.f32 0.015625, %v1852_v12 }
 0xd9a   : > { %v1856_v13 = vadd.f32 1e-05, %v1854_v11 }
 0xd9c   : > { %2671 = vrsqrt.f32 %v1856_v13 }
 0xda5   : > { %v2670_v14 = vpop.eup %2669 }
 0xda6   : > { %v1859_v16 = vmul.f32 %v2670_v14, %v1843_v1  ;;  %v2270_v1 = vld [vmem:[%s3527_s9] ss:$0 sm:$0xff] }
 0xda8   : > { %v1868_v18 = vmul.f32 %v2263_v15, %v1859_v16 }
 0xda9   : > { %v2672_v19 = vpop.eup %2671 }
 0xdaa   : > { %v1860_v22 = vmul.f32 %v2672_v19, %v1844_v57  ;;  %v1877_v23 = vadd.f32 %v2264_v17, %v1868_v18 }
 0xdac   : > { %v1869_v24 = vmul.f32 %v2263_v15, %v1860_v22  ;;  %2497 = vmatprep.mubr.msk.f32.mxu1 %vm561_vm0, %v1877_v23 }
 0xdae   : > { %v1878_v10 = vadd.f32 %v2264_v17, %v1869_v24 }
 0xdb0   : > { %2498 = vmatmul.mubr.msk.f32.vlgmr.msra.gmra.mxu1 %vm561_vm0, %v1878_v10 }
 0xe70   : > { %v2499_v21 = vpop.f32.mrf.mxu1 }
 0xe71   : > { %v1972_v42 = vadd.f32 %v2499_v21, %v2265_v41 }
 0xe72   : > { %v1966_v43 = vpop.f32.mrf.mxu1 }
 0xe73   : > { %v2269_v44 = vmul.f32 -1.702, %v1972_v42  ;;  %v1967_v45 = vadd.f32 %v2265_v41, %v1966_v43 }
 0xe75   : > { %v1981_v46 = vmul.f32 1.442695, %v2269_v44  ;;  %v2268_v53 = vmul.f32 -1.702, %v1967_v45 }
 0xe77   : > { %2673 = vpow2.f32 %v1981_v46  ;;  %v1979_v47 = vmul.f32 1.442695, %v2268_v53 }
 0xe79   : > { %2675 = vpow2.f32 %v1979_v47 }
 0xe84   : > { %v2674_v52 = vpop.eup %2673 }
 0xe85   : > { %v1984_v50 = vadd.f32 1.0, %v2674_v52 }
 0xe86   : > { %v2676_v51 = vpop.eup %2675 }
 0xe87   : > { %v1983_v54 = vadd.f32 1.0, %v2676_v51  ;;  %2677 = vrcp.f32 %v1984_v50 }
 0xe89   : > { %2679 = vrcp.f32 %v1983_v54 }
 0xe94   : > { %v2678_v55 = vpop.eup %2677 }
 0xe95   : > { %v1990_v57 = vmul.f32 %v2678_v55, %v1972_v42 }
 0xe96   : > { %v2680_v20 = vpop.eup %2679 }
 0xe97   : > { %v1989_v56 = vmul.f32 %v2680_v20, %v1967_v45 }
 0xe99   : > { %2532 = vmatprep.mubr.f32.mxu0 %v1989_v56 }
 0xe9a   : > { %2533 = vmatmul.mubr.f32.vlgmr.msra.gmra.mxu0 %v1990_v57 }
 0xf5a   : > { %v2534_v58 = vpop.f32.mrf.mxu0 }
 0xf5b   : > { %v2086_v0 = vadd.f32 %v2534_v58, %v2270_v1 }
 0xf5c   : > { %v2080_v59 = vpop.f32.mrf.mxu0 }
 0xf5d   : > { %v2090_v60 = vadd.f32 %v2086_v0, %v3328_v48  ;;  %v2081_v61 = vadd.f32 %v2270_v1, %v2080_v59 }
 0xf5f   : > { %2092 = vst.msk [vmem:[%s553_s28 + $0x8] sm:$0xff] %vm561_vm0, %v2090_v60  ;;  %v2089_v62 = vadd.f32 %v2081_v61, %v3331_v49 }
 0xf61   : > { %2091 = vst.msk [vmem:[%s553_s28] sm:$0xff] %vm561_vm0, %v2089_v62 }
 0xf62   : > { %2774 = shalt.err (!%p2771_p2)
}
 0xf63   : > { %s2775_s25 = scalar_lea.hbm %s3410_s18, 256  ;;  %s2779_s26 = scalar_lea.hbm %s3529_s15, 512 }
 0xf64   : > { %p2776_p6 = scmp.ne.s32.totalorder %s3410_s18, %s2775_s25  ;;  %p2780_p0 = scmp.lt.s32.totalorder %s3410_s18, %s3529_s15 }
 0xf65   : > { %p2781_p10 = scmp.lt.s32.totalorder %s2779_s26, %s2775_s25 }
 0xf66   : > { %p2777_p11 = pnand %p2776_p6, %p3530_p7 }
 0xf67   : > { %p2782_p5 = por %p2781_p10, %p2780_p0 }
 0xf68   : > { %p2778_p1 = pneg %p2777_p11 }
 0xf6a   : > { %p2783_p3 = pnand %p2782_p5, %p2778_p1 }
 0xf6c   : > { %2786 = shalt.err (!%p2783_p3)
}
 0xf6d   : > { %s2860_s23 = smov 128   ;;  %s2861_s1 = smov 8  }
 0xf6e   : > { %2545 = dma.vmem_to_hbm [thread:$0]  (%p3530_p7), %s3412_s16, 256, %s3410_s18, %s2094_s14, %s2860_s23, %s2860_s23, %s2861_s1  }
 0xf6f PF: > { %s3531_s21 = sld [smem:[#allocation16_spill]] }
 0xf70   : > { %s3532_s10 = sld [smem:[#allocation20_spill]] }
 0xf71   : > { %s3533_s24 = sld [smem:[#allocation18_spill]] }
 0xf75   : > { %s2124_s29 = sand.u32 1, %s3531_s21  }
 0xf76   : > { %p3534_p8 = scmp.ne.s32.totalorder %s3532_s10, 0  ;;  %s2125_s25 = scalar_lea.sflag [#allocation8], %s2124_s29 }
 0xf77   : > { %p3535_p9 = scmp.ge.s32.totalorder %s3533_s24, 2 }
 0xf79   : > { %p2559_p12 = pnand %p3535_p9, %p3534_p8 }
 0xf7b   : > { %p2560_p13 = pneg %p2559_p12 }
 0xf7d   : > { %2820 = dma.done.wait (%p2560_p13), %s2125_s25, 256  }
 0xf7e   : > { %2822 = vsyncadd (%p2560_p13), %s2125_s25, 4294967040  ;;  %s32_s23 = sadd.s32 1, %s3533_s24   ;;  %s3536_s18 = smov %s2829_s19 }
 0xf7f   : > { %p29_p4 = scmp.ge.s32.totalorder %s32_s23, 4   ;;  %s3537_s19 = smov %s2833_s20 }
 0xf80   : > { %s3538_s20 = smov %s3069_s8  ;;  %s3539_s21 = smov %s2841_s22 }
 0xf81   : > { %s3540_s22 = smov %s3542_s30  ;;  %31 = sbr.rel (!%p29_p4) target bundleno = 16 (0x10), region = 149 }
 0xf86   :  { %2130 = vsyncpa [#allocation7], 1 }
 0xf87   :  { %2132 = vsyncpa [#allocation7 + $0x1], 1 }
 0xf88   :  { %2133 = vsyncpa [#allocation10], 1 }
 0xf89   :  { %2134 = vsyncpa [#allocation8], 1 }
 0xf8a   :  { %2136 = vsyncpa [#allocation8 + $0x1], 1 }

// kernel: tpu_custom_call.1
= control target key start
LH: loop header
LB: loop body
LE: loop exit
PB: predicated region body
PF: predicated region fallthrough
CT: control target
= control target key end

     0   :  { %s3463_s0 = inlined_call_operand.hbm [shape: f32[2,16,64], index: 0, kind: input, shape index: {}]   ;;  %s3464_s1 = inlined_call_operand.hbm [shape: f32[1,64], index: 1, kind: input, shape index: {}]   ;;  %s3465_s2 = inlined_call_operand.vmem [shape: f32[1,64], index: 2, kind: input, shape index: {}]   ;;  %s3466_s3 = inlined_call_operand.vmem [shape: f32[64,64], index: 3, kind: input, shape index: {}]   ;;  %s3467_s4 = inlined_call_operand.vmem [shape: f32[1,64], index: 4, kind: input, shape index: {}]   ;;  %s3468_s5 = inlined_call_operand.vmem [shape: f32[64,128], index: 5, kind: input, shape index: {}]   ;;  %s3469_s6 = inlined_call_operand.vmem [shape: f32[1,128], index: 6, kind: input, shape index: {}]   ;;  %s3470_s7 = inlined_call_operand.vmem [shape: f32[64,64], index: 7, kind: input, shape index: {}]   ;;  %s3471_s8 = inlined_call_operand.vmem [shape: f32[1,64], index: 8, kind: input, shape index: {}]   ;;  %s3472_s9 = inlined_call_operand.vmem [shape: f32[1,64], index: 9, kind: input, shape index: {}]   ;;  %s3473_s10 = inlined_call_operand.vmem [shape: f32[1,64], index: 10, kind: input, shape index: {}]   ;;  %s3474_s11 = inlined_call_operand.hbm [shape: f32[64,128], index: 11, kind: input, shape index: {}]   ;;  %s3475_s12 = inlined_call_operand.vmem [shape: f32[1,128], index: 12, kind: input, shape index: {}]   ;;  %s3476_s13 = inlined_call_operand.vmem [shape: f32[128,64], index: 13, kind: input, shape index: {}]   ;;  %s3477_s14 = inlined_call_operand.vmem [shape: f32[1,64], index: 14, kind: input, shape index: {}]   ;;  %s3478_s15 = inlined_call_operand.hbm [shape: f32[2,16,64], index: 15, kind: output, shape index: {}]  }
   0x1   :  { %3493 = sst [smem:[#allocation21_spill]] %s3464_s1 }
   0x2   :  { %3494 = sst [smem:[#allocation22_spill]] %s3471_s8 }
   0x3   :  { %3495 = sst [smem:[#allocation23_spill]] %s3472_s9 }
   0x4   :  { %3496 = sst [smem:[#allocation24_spill]] %s3473_s10 }
   0x5   :  { %3497 = sst [smem:[#allocation25_spill]] %s3475_s12 }
   0x6   :  { %3498 = sst [smem:[#allocation26_spill]] %s3476_s13 }
   0x7   :  { %3499 = sst [smem:[#allocation27_spill]] %s3477_s14 }
   0x8   :  { %3500 = sst [smem:[#allocation28_spill]] %s3478_s15 }
   0x9   :  { %20 = vsyncpa [#allocation7], 0 }
   0xa   :  { %22 = vsyncpa [#allocation7 + $0x1], 0 }
   0xb   :  { %23 = vsyncpa [#allocation10], 0 }
   0xc   :  { %24 = vsyncpa [#allocation8], 0 }
   0xd   :  { %26 = vsyncpa [#allocation8 + $0x1], 0  ;;  %s2942_s18 = smov 0   ;;  %s2944_s19 = smov 0  }
   0xe   :  { %s2946_s20 = smov 0   ;;  %s2948_s21 = smov 0  }
   0xf   :  { %s2950_s22 = smov 0   ;;  %s2952_s23 = smov 0  }
  0x10 LB: > { %3501 = sst [smem:[#allocation16_spill]] %s2825_s18  ;;  %s2212_s24 = sadd.s32 4294967295, %s2845_s23   ;;  %s2845_s23 = sphi %s2952_s23, %s32_s23   ;;  %s2841_s22 = sphi %s2950_s22, %s3540_s22   ;;  %s2837_s21 = sphi %s2948_s21, %s3539_s21   ;;  %s2833_s20 = sphi %s2946_s20, %s3538_s20   ;;  %s2829_s19 = sphi %s2944_s19, %s3537_s19   ;;  %s2825_s18 = sphi %s2942_s18, %s3536_s18  }
  0x11   : > { %3502 = sst [smem:[#allocation17_spill]] %s2837_s21  ;;  %s2213_s25 = sadd.s32 4294967294, %s2845_s23  }
  0x12   : > { %3503 = sst [smem:[#allocation18_spill]] %s2845_s23  ;;  %p58_p0 = scmp.ne.s32.totalorder %s2833_s20, %s2829_s19 }
  0x13   : > { %p59_p1 = scmp.eq.s32.totalorder %s2845_s23, 0  ;;  %p64_p2 = scmp.ne.s32.totalorder %s2829_s19, %s2825_s18 }
  0x14   : > { %p2979_p3 = scmp.eq.s32.totalorder %s2212_s24, 0  ;;  %p384_p4 = scmp.eq.s32.totalorder %s2212_s24, 1 }
  0x15   : > { %p2983_p5 = por %p59_p1, %p58_p0  ;;  %p390_p6 = scmp.eq.s32.totalorder %s2213_s25, 1 }
  0x16   : > { %s3504_s26 = scalar_select %p2979_p3, 1, 0 }
  0x17   : > { %p2989_p7 = por %p2979_p3, %p64_p2  ;;  %p2993_p8 = por %p384_p4, %p58_p0 }
  0x18   : > { %p2997_p9 = por %p390_p6, %p64_p2  ;;  %p2214_p10 = scmp.ge.s32.totalorder %s2845_s23, 1 }
  0x19   : > { %s3506_s28 = scalar_select %p2989_p7, 1, 0 }
  0x1a   : > { %s3507_s29 = scalar_select %p2993_p8, 1, 0 }
  0x1b   : > { %s3509_s30 = scalar_select %p2997_p9, 1, 0 }
  0x1c   : > { %3508 = sst [smem:[#allocation19_spill]] %s3507_s29  ;;  %p397_p11 = scmp.lt.s32.totalorder %s2845_s23, 3 }
  0x1d   : > { %3510 = sst [smem:[#allocation20_spill]] %s3509_s30  ;;  %s2847_s17 = smov [#allocation9]  }
  0x1e   : > { %p3004_p13 = pnand %p2214_p10, %p397_p11  ;;  %s410_s24 = sshll.u32 %s2847_s17, 4  ;;  %s411_s24 = int_to_ptr.vmem [resolvable:$true] %s410_s24 }
  0x1f   : > { %p2564_p1 = scmp.lt.s32.totalorder %s2845_s23, 2  ;;  %s2848_s30 = smov [#allocation11]  }
  0x20   : > { %s3511_s16 = scalar_select %p3004_p13, 1, 0 }
  0x21   : > { %p2547_p0 = pneg %p3004_p13  ;;  %p3013_p4 = pnand %p2564_p1, %p2983_p5 }
  0x22   : > { %s447_s18 = sshll.u32 %s2848_s30, 4  ;;  %s2692_s17 = scalar_lea.vmem %s411_s24, 16  ;;  %s448_s18 = int_to_ptr.vmem [resolvable:$true] %s447_s18 }
  0x23   : > { %s3512_s25 = scalar_select %p3013_p4, 1, 0 }
  0x24   : > { %p3019_p2 = pnand %p2547_p0, %p2979_p3  ;;  %p2693_p10 = scmp.ne.s32.totalorder %s411_s24, %s2692_s17 }
  0x25   : > { %s2699_s27 = scalar_lea.vmem %s411_s24, 32  ;;  %p2700_p1 = scmp.lt.s32.totalorder %s411_s24, %s411_s24 }
  0x26   : > { %p2683_p6 = pneg %p3019_p2  ;;  %p2701_p12 = scmp.lt.s32.totalorder %s2699_s27, %s2692_s17 }
  0x28   : > { %p2695_p5 = pnand %p2693_p10, %p2683_p6  ;;  %p2702_p9 = por %p2701_p12, %p2700_p1 }
  0x2a   : > { %p2696_p11 = pneg %p2695_p5 }
  0x2c   : > { %p2703_p8 = pnand %p2702_p9, %p2696_p11 }
  0x2e   : > { %2706 = shalt.err (!%p2703_p8)
}
  0x2f   : > { %s3514_s1 = sld [smem:[#allocation21_spill]]  ;;  %s2718_s29 = scalar_lea.vmem %s448_s18, 1024 }
  0x30   : > { %p2719_p0 = scmp.ne.s32.totalorder %s448_s18, %s2718_s29  ;;  %p2726_p5 = scmp.lt.s32.totalorder %s448_s18, %s448_s18 }
  0x31   : > { %p2727_p7 = scmp.lt.s32.totalorder %s2718_s29, %s2718_s29 }
  0x32   : > { %p2721_p3 = pnand %p2719_p0, %p2683_p6 }
  0x33   : > { %p2728_p13 = por %p2727_p7, %p2726_p5 }
  0x34   : > { %p2722_p10 = pneg %p2721_p3 }
  0x35   : > { %2550 = dma.hbm_to_vmem [thread:$0]  (!%p3019_p2), %s3514_s1, 16, %s411_s24, [#allocation10]  }
  0x36   : > { %p2729_p4 = pnand %p2728_p13, %p2722_p10 }
  0x38   : > { %2732 = shalt.err (!%p2729_p4)
}
  0x39   : > { %s2849_s17 = smov 128   ;;  %s2850_s23 = smov 8  }
  0x3a   : > { %2553 = dma.hbm_to_vmem [thread:$0]  (!%p3019_p2), %s3474_s11, 1024, %s448_s18, [#allocation10], %s2849_s17, %s2849_s17, %s2850_s23  }
  0x3b   : > { %s470_s29 = sand.u32 1, %s2833_s20   ;;  %s44_s30 = sadd.s32 1, %s2841_s22 }
  0x3c   : > { %s2218_s1 = sshll.u32 %s470_s29, 4  ;;  %p46_p3 = scmp.ge.s32.totalorder %s44_s30, 2 }
  0x3d   : > { %s2276_s14 = sshll.u32 %s2841_s22, 8  ;;  %s474_s21 = scalar_lea.vmem [#allocation6], %s2218_s1 }
  0x3e   : > { %s481_s12 = sshll.u32 %s474_s21, 4  ;;  %s3542_s30 = smov (%p46_p3, %s44_s30), 0  ;;  %s482_s12 = int_to_ptr.vmem [resolvable:$true] %s481_s12 }
  0x3f   : > { %s480_s15 = scalar_lea.hbm %s3463_s0, %s2276_s14  ;;  %s51_s9 = sadd.s32 1, %s2833_s20 }
  0x40   : > { %s48_s8 = ssub.s32 %s2841_s22, %s3542_s30  ;;  %s471_s18 = scalar_lea.sflag [#allocation7], %s470_s29 }
  0x41   : > { %p3055_p7 = scmp.eq.s32.totalorder %s48_s8, 0  ;;  %p3516_p8 = scmp.ne.s32.totalorder %s3512_s25, 0 }
  0x42   : > { %s2746_s27 = scalar_lea.vmem %s482_s12, 256  ;;  %s2851_s1 = smov [#allocation6]  }
  0x43   : > { %p2735_p9 = pneg %p3516_p8  ;;  %p2747_p12 = scmp.ne.s32.totalorder %s482_s12, %s2746_s27 }
  0x44   : > { %s2751_s21 = sshll.u32 %s2851_s1, 4  ;;  %s2752_s21 = int_to_ptr.vmem [resolvable:$false] %s2751_s21 }
  0x45   : > { %p2749_p13 = pnand %p2747_p12, %p2735_p9  ;;  %s2753_s10 = scalar_lea.vmem %s2752_s21, 512 }
  0x46   : > { %p2754_p2 = scmp.lt.s32.totalorder %s482_s12, %s2752_s21  ;;  %p2755_p6 = scmp.lt.s32.totalorder %s2753_s10, %s2746_s27 }
  0x47   : > { %p2750_p4 = pneg %p2749_p13 }
  0x48   : > { %p2756_p11 = por %p2755_p6, %p2754_p2 }
  0x4a   : > { %p2757_p1 = pnand %p2756_p11, %p2750_p4 }
  0x4c   : > { %2760 = shalt.err (!%p2757_p1)
}
  0x4d   : > { %2557 = dma.hbm_to_vmem [thread:$0]  (!%p3516_p8), %s480_s15, 256, %s482_s12, %s471_s18, %s2849_s17, %s2849_s17, %s2850_s23  }
  0x4e   : > { %s3069_s8 = scalar_select %p3055_p7, %s2833_s20, %s51_s9  }
  0x4f   : > { %p3517_p0 = scmp.ne.s32.totalorder %s3511_s16, 0 }
  0x50   : > { %s3074_s13 = sand.u32 (!%p3517_p0), 1, %s2829_s19   ;;  %p3518_p10 = scmp.ne.s32.totalorder (!%p3517_p0), %s3506_s28, 0 }
  0x51   : > { %493 = sbr.rel (%p3517_p0) target bundleno = 3951 (0xf6f), region = 80  ;;  %s2222_s14 = sshll.u32 (!%p3517_p0), %s3074_s13, 4 }
  0x52   : > { %s496_s25 = scalar_lea.sflag (!%p3517_p0), [#allocation7], %s3074_s13  ;;  %s499_s29 = scalar_lea.vmem (!%p3517_p0), [#allocation6], %s2222_s14 }
  0x56   : > { %2812 = dma.done.wait (%p3518_p10), %s496_s25, 256  }
  0x57   : > { %2814 = vsyncadd (%p3518_p10), %s496_s25, 4294967040  ;;  %p3519_p5 = scmp.ne.s32.totalorder %s3504_s26, 0 }
  0x59   : > { %2816 = dma.done.wait (%p3519_p5), [#allocation10], 1040  }
  0x5a   : > { %2818 = vsyncadd (%p3519_p5), [#allocation10], 4294966256  ;;  %vm561_vm0 = vcmask 523264   ;;  %v3088_v0 = vld [vmem:[%s499_s29] sm:$0xff]  ;;  %v3090_v1 = vld [vmem:[%s499_s29 + $0x8] sm:$0xff]  ;;  %vm703_vm1 = vcmask 130048  }
  0x5b   : > { %v562_v2 = vsel %vm561_vm0, %v3088_v0, 0.0  ;;  %v565_v3 = vsel %vm561_vm0, %v3090_v1, 0.0  ;;  %v614_v24 = vld [vmem:[%s3468_s5 + $0x38] sm:$0xff]  ;;  %v613_v25 = vld [vmem:[%s3468_s5 + $0x30] sm:$0xff]  ;;  %v612_v26 = vld [vmem:[%s3468_s5 + $0x28] sm:$0xff]  ;;  %s2852_s23 = smov 64  }
  0x5c   : > { %563 = vadd.xlane.f32.xlu0 %v562_v2  ;;  %774 = vadd.xlane.f32.xlu1 %v562_v2  ;;  %v611_v27 = vld [vmem:[%s3468_s5 + $0x20] sm:$0xff]  ;;  %v610_v28 = vld [vmem:[%s3468_s5 + $0x18] sm:$0xff]  ;;  %v609_v29 = vld [vmem:[%s3468_s5 + $0x10] sm:$0xff]  ;;  %s2853_s15 = smov 112   ;;  %s2854_s24 = smov 48   ;;  %vm1731_vm2 = vcmask 261120  }
  0x5d   : > { %2368 = vmatprep.subr.mxu1 %v614_v24  ;;  %v608_v30 = vld [vmem:[%s3468_s5 + $0x8] sm:$0xff]  ;;  %v607_v31 = vld [vmem:[%s3468_s5] sm:$0xff]  ;;  %v825_v32 = vld [vmem:[%s3466_s3 + $0x38] sm:$0xff]  ;;  %s2855_s18 = smov 96   ;;  %s2856_s27 = smov 32   ;;  %vm1734_vm3 = vcmask 392192  }
  0x5e   : > { %2369 = vmatpush3.msra.mxu1 %v614_v24  ;;  %v2226_v46 = vld [vmem:[#allocation9] ss:$0 sm:$0xff]  ;;  %v824_v58 = vld [vmem:[%s3466_s3 + $0x30] sm:$0xff]  ;;  %v823_v60 = vld [vmem:[%s3466_s3 + $0x28] sm:$0xff]  ;;  %s2857_s1 = smov 80   ;;  %s2858_s21 = smov 16  }
  0x5f   : > { %2370 = vmatprep.subr.mxu1 %v613_v25  ;;  %v2227_v48 = vld [vmem:[%s3465_s2] ss:$0 sm:$0xff]  ;;  %v821_v63 = vld [vmem:[%s3466_s3 + $0x18] sm:$0xff]  ;;  %s3520_s29 = sld [smem:[#allocation22_spill]]  ;;  %s553_s28 = scalar_lea.vmem [#allocation12], %s2222_s14 }
  0x60   : > { %566 = vadd.xlane.f32.xlu0 %v565_v3  ;;  %777 = vadd.xlane.f32.xlu1 %v565_v3  ;;  %v822_v62 = vld [vmem:[%s3466_s3 + $0x20] sm:$0xff]  ;;  %v820_v3 = vld [vmem:[%s3466_s3 + $0x10] sm:$0xff]  ;;  %s3521_s26 = sld [smem:[#allocation23_spill]]  ;;  %s2109_s16 = sshll.u32 %s553_s28, 4  ;;  %s3412_s16 = int_to_ptr.vmem [resolvable:$true] %s2109_s16 }
  0x61   : > { %2371 = vmatpush3.msra.mxu1 %v613_v25  ;;  %s3522_s17 = sld [smem:[#allocation24_spill]]  ;;  %s2094_s14 = scalar_lea.sflag [#allocation8], %s3074_s13 }
  0x62   : > { %2372 = vmatprep.subr.mxu1 %v612_v26  ;;  %s3525_s10 = sld [smem:[#allocation25_spill]] }
  0x63   : > { %2373 = vmatpush3.msra.mxu1 %v612_v26  ;;  %s3527_s9 = sld [smem:[#allocation27_spill]] }
  0x64   : > { %2374 = vmatprep.subr.mxu1 %v611_v27  ;;  %s3528_s12 = sld [smem:[#allocation19_spill]] }
  0x65   : > { %2375 = vmatpush3.msra.mxu1 %v611_v27 }
  0x66   : > { %2376 = vmatprep.subr.mxu1 %v610_v28 }
  0x67   : > { %2377 = vmatpush3.msra.mxu1 %v610_v28 }
  0x68   : > { %2378 = vmatprep.subr.mxu1 %v609_v29 }
  0x69   : > { %2379 = vmatpush3.msra.mxu1 %v609_v29 }
  0x6a   : > { %2380 = vmatprep.subr.mxu1 %v608_v30  ;;  %p3530_p7 = scmp.ne.s32.totalorder %s3528_s12, 0 }
  0x6b   : > { %2381 = vmatpush3.msra.mxu1 %v608_v30 }
  0x6c   : > { %2382 = vmatprep.subr.mxu1 %v607_v31 }
  0x6d   : > { %2383 = vmatpush3.msra.mxu1 %v607_v31 }
  0x6e   : > { %2387 = vmatprep.subr.mxu1 %v825_v32 }
  0xe5   : > { %v564_v4 = vpop.xlane.xlu0 %563  ;;  %v775_v5 = vpop.xlane.xlu1 %774 }
  0xe6   : > { %v569_v6 = vmul.f32 0.015625, %v564_v4  ;;  %v780_v7 = vmul.f32 0.015625, %v775_v5  ;;  %v819_v4 = vld [vmem:[%s3466_s3 + $0x8] sm:$0xff] }
  0xe8   : > { %v3097_v8 = vsub.f32 %v3088_v0, %v569_v6  ;;  %v3100_v9 = vsub.f32 %v3088_v0, %v780_v7  ;;  %v818_v6 = vld [vmem:[%s3466_s3] sm:$0xff] }
  0xe9   : > { %v567_v10 = vpop.xlane.xlu0 %566  ;;  %v778_v11 = vpop.xlane.xlu1 %777 }
  0xea   : > { %v570_v12 = vmul.f32 0.015625, %v567_v10  ;;  %v781_v13 = vmul.f32 0.015625, %v778_v11  ;;  %v573_v14 = vmul.f32 %v3097_v8, %v3097_v8  ;;  %v784_v15 = vmul.f32 %v3100_v9, %v3100_v9 }
  0xec   : > { %v572_v16 = vsub.f32 %v3090_v1, %v570_v12  ;;  %v3108_v17 = vsub.f32 %v3090_v1, %v781_v13  ;;  %v575_v18 = vsel %vm561_vm0, %v573_v14, 0.0  ;;  %v786_v19 = vsel %vm561_vm0, %v784_v15, 0.0  ;;  %v2233_v15 = vld [vmem:[%s3467_s4] ss:$0 sm:$0xff] }
  0xed   : > { %576 = vadd.xlane.f32.xlu0 %v575_v18 }
  0xee   : > { %v574_v20 = vmul.f32 %v572_v16, %v572_v16  ;;  %v785_v21 = vmul.f32 %v3108_v17, %v3108_v17 }
  0xf0   : > { %v578_v22 = vsel %vm561_vm0, %v574_v20, 0.0  ;;  %v789_v23 = vsel %vm561_vm0, %v785_v21, 0.0 }
  0xf1   : > { %787 = vadd.xlane.f32.xlu0 %v786_v19  ;;  %579 = vadd.xlane.f32.xlu1 %v578_v22 }
  0xf5   : > { %790 = vadd.xlane.f32.xlu1 %v789_v23 }
 0x176   : > { %v577_v33 = vpop.xlane.xlu0 %576 }
 0x177   : > { %v581_v34 = vmul.f32 0.015625, %v577_v33 }
 0x179   : > { %v583_v35 = vadd.f32 1e-05, %v581_v34 }
 0x17a   : > { %v580_v36 = vpop.xlane.xlu1 %579  ;;  %v788_v37 = vpop.xlane.xlu0 %787 }
 0x17b   : > { %2629 = vrsqrt.f32 %v583_v35  ;;  %v582_v38 = vmul.f32 0.015625, %v580_v36  ;;  %v792_v39 = vmul.f32 0.015625, %v788_v37 }
 0x17d   : > { %v584_v40 = vadd.f32 1e-05, %v582_v38  ;;  %v794_v41 = vadd.f32 1e-05, %v792_v39 }
 0x17e   : > { %v791_v42 = vpop.xlane.xlu1 %790 }
 0x17f   : > { %2631 = vrsqrt.f32 %v584_v40  ;;  %v793_v43 = vmul.f32 0.015625, %v791_v42 }
 0x180   : > { %2633 = vrsqrt.f32 %v794_v41 }
 0x181   : > { %v795_v44 = vadd.f32 1e-05, %v793_v43 }
 0x183   : > { %2635 = vrsqrt.f32 %v795_v44 }
 0x188   : > { %v2630_v45 = vpop.eup %2629 }
 0x189   : > { %v587_v47 = vmul.f32 %v2630_v45, %v3097_v8  ;;  %v2228_v8 = vld [vmem:[%s3469_s6] ss:$0 sm:$0xff] }
 0x18b   : > { %v596_v49 = vmul.f32 %v2226_v46, %v587_v47 }
 0x18c   : > { %v2632_v50 = vpop.eup %2631 }
 0x18d   : > { %v2634_v51 = vpop.eup %2633  ;;  %v588_v52 = vmul.f32 %v2632_v50, %v572_v16  ;;  %v605_v53 = vadd.f32 %v2227_v48, %v596_v49 }
 0x18e   : > { %v798_v54 = vmul.f32 %v2634_v51, %v3100_v9 }
 0x18f   : > { %v597_v55 = vmul.f32 %v2226_v46, %v588_v52  ;;  %2384 = vmatprep.mubr.msk.f32.mxu1 %vm561_vm0, %v605_v53 }
 0x190   : > { %v807_v56 = vmul.f32 %v2226_v46, %v798_v54  ;;  %v2636_v61 = vpop.eup %2635 }
 0x191   : > { %v606_v57 = vadd.f32 %v2227_v48, %v597_v55  ;;  %v799_v2 = vmul.f32 %v2636_v61, %v3108_v17 }
 0x192   : > { %v816_v59 = vadd.f32 %v2227_v48, %v807_v56 }
 0x193   : > { %2385 = vmatmul.mubr.msk.f32.vlgmr.msra.gmra.mxu1 %vm561_vm0, %v606_v57  ;;  %v808_v5 = vmul.f32 %v2226_v46, %v799_v2 }
 0x194   : > { %2388 = vmatpush3.msra.mxu1 %v825_v32  ;;  %2403 = vmatprep.mubr.msk.f32.mxu1 %vm561_vm0, %v816_v59 }
 0x195   : > { %2389 = vmatprep.subr.mxu1 %v824_v58  ;;  %v817_v7 = vadd.f32 %v2227_v48, %v808_v5 }
 0x196   : > { %2390 = vmatpush3.msra.mxu1 %v824_v58 }
 0x197   : > { %2391 = vmatprep.subr.mxu1 %v823_v60 }
 0x198   : > { %2392 = vmatpush3.msra.mxu1 %v823_v60 }
 0x199   : > { %2393 = vmatprep.subr.mxu1 %v822_v62 }
 0x19a   : > { %2394 = vmatpush3.msra.mxu1 %v822_v62 }
 0x19b   : > { %2395 = vmatprep.subr.mxu1 %v821_v63 }
 0x19c   : > { %2396 = vmatpush3.msra.mxu1 %v821_v63 }
 0x19d   : > { %2397 = vmatprep.subr.mxu1 %v820_v3 }
 0x19e   : > { %2398 = vmatpush3.msra.mxu1 %v820_v3 }
 0x19f   : > { %2399 = vmatprep.subr.mxu1 %v819_v4 }
 0x1a0   : > { %2400 = vmatpush3.msra.mxu1 %v819_v4 }
 0x1a1   : > { %2401 = vmatprep.subr.mxu1 %v818_v6 }
 0x1a2   : > { %2402 = vmatpush3.msra.mxu1 %v818_v6 }
 0x1a3   : > { %2404 = vmatmul.mubr.msk.f32.vlgmr.msra.gmra.mxu1 %vm561_vm0, %v817_v7 }
 0x253   : > { %v2386_v9 = vpop.f32.mrf.mxu1 }
 0x254   : > { %v3177_v10 = vadd.f32 %v2386_v9, %v2228_v8 }
 0x255   : > { %v694_v11 = vpop.f32.mrf.mxu1 }
 0x256   : > { %v3179_v12 = vadd.f32 %v2228_v8, %v694_v11  ;;  %705 = vst.msk [vmem:[#allocation2 + $0x8] sm:$0xff] %vm703_vm1, %v3177_v10 }
 0x258   : > { %704 = vst.msk [vmem:[#allocation2] sm:$0xff] %vm703_vm1, %v3179_v12 }
 0x25d   : > { %v917_v13 = vld [vmem:[#allocation2 + $0x8] sm:$0xff] }
 0x25e   : > { %2406 = vmatprep.subr.msk.mxu0 %vm703_vm1, %v917_v13 }
 0x25f   : > { %2407 = vmatpush3.xpose.msk.msra.mxu0 %vm703_vm1, %v917_v13  ;;  %v916_v14 = vld [vmem:[#allocation2] sm:$0xff] }
 0x260   : > { %2408 = vmatprep.subr.msk.mxu0 %vm703_vm1, %v916_v14 }
 0x263   : > { %v2405_v16 = vpop.f32.mrf.mxu1  ;;  %2409 = vmatpush3.xpose.msk.msra.mxu0 %vm703_vm1, %v916_v14 }
 0x264   : > { %v911_v17 = vadd.f32 %v2405_v16, %v2233_v15 }
 0x265   : > { %v905_v18 = vpop.f32.mrf.mxu1 }
 0x266   : > { %v906_v19 = vadd.f32 %v2233_v15, %v905_v18  ;;  %v3194_v21 = vmul.f32 0.25, %v911_v17 }
 0x268   : > { %v3192_v20 = vmul.f32 0.25, %v906_v19 }
 0x26a   : > { %2410 = vmatprep.mubr.msk.f32.mxu0 %vm703_vm1, %v3192_v20 }
 0x26b   : > { %2411 = vmatmul.mubr.msk.f32.vlgmr.msra.gmra.mxu0 %vm703_vm1, %v3194_v21 }
 0x32b   : > { %v2412_v22 = vpop.f32.mrf.mxu0 }
 0x32c   : > { %v1011_v23 = vsel %vm703_vm1, %v2412_v22, -inf }
 0x32d   : > { %1012 = vmax.xlane.f32.xlu1 %v1011_v23  ;;  %v999_v24 = vpop.f32.mrf.mxu0 }
 0x32e   : > { %v1008_v25 = vsel %vm703_vm1, %v999_v24, -inf }
 0x32f   : > { %1009 = vmax.xlane.f32.xlu0 %v1008_v25 }
 0x3b6   : > { %v1013_v26 = vpop.xlane.xlu1 %1012 }
 0x3b7   : > { %v1015_v27 = vsub.f32 %v2412_v22, %v1013_v26 }
 0x3b8   : > { %v1010_v28 = vpop.xlane.xlu0 %1009 }
 0x3b9   : > { %v1018_v29 = vmul.f32 1.442695, %v1015_v27  ;;  %v1014_v30 = vsub.f32 %v999_v24, %v1010_v28 }
 0x3bb   : > { %2637 = vpow2.f32 %v1018_v29  ;;  %v1016_v31 = vmul.f32 1.442695, %v1014_v30 }
 0x3bd   : > { %2639 = vpow2.f32 %v1016_v31 }
 0x3c8   : > { %v2638_v32 = vpop.eup %2637 }
 0x3c9   : > { %v1023_v33 = vsel %vm703_vm1, %v2638_v32, 0.0 }
 0x3ca   : > { %v2640_v34 = vpop.eup %2639  ;;  %1024 = vadd.xlane.f32.xlu1 %v1023_v33 }
 0x3cb   : > { %v1020_v35 = vsel %vm703_vm1, %v2640_v34, 0.0 }
 0x3cc   : > { %1021 = vadd.xlane.f32.xlu0 %v1020_v35 }
 0x3db   : > { %708 = vrot.lane.b32.xlu1 %v3179_v12, %s2852_s23 }
 0x3df   : > { %718 = vrot.lane.b32.xlu1 %v3177_v10, %s2853_s15 }
 0x3e2   : > { %710 = vrot.lane.b32.xlu0 %v3177_v10, %s2852_s23 }
 0x3e3   : > { %716 = vrot.lane.b32.xlu1 %v3179_v12, %s2853_s15 }
 0x3e6   : > { %1117 = vrot.lane.b32.xlu0 %v3192_v20, %s2853_s15 }
 0x3e7   : > { %1119 = vrot.lane.b32.xlu1 %v3194_v21, %s2853_s15  ;;  %s3529_s15 = sld [smem:[#allocation28_spill]] }
 0x453   : > { %v1025_v36 = vpop.xlane.xlu1 %1024 }
 0x454   : > { %2641 = vrcp.f32 %v1025_v36 }
 0x455   : > { %v1022_v37 = vpop.xlane.xlu0 %1021 }
 0x456   : > { %2643 = vrcp.f32 %v1022_v37 }
 0x457   : > { %v709_v38 = vpop.permute.xlu1 %708 }
 0x458   : > { %714 = vst.msk [vmem:[#allocation3] sm:$0xff] %vm703_vm1, %v709_v38 }
 0x459   : > { %v711_v39 = vpop.permute.xlu0 %710 }
 0x45a   : > { %715 = vst.msk [vmem:[#allocation3 + $0x8] sm:$0xff] %vm703_vm1, %v711_v39 }
 0x45b   : > { %v719_v40 = vpop.permute.xlu1 %718 }
 0x45c   : > { %724 = vst.msk [vmem:[#allocation2 + $0x18] sm:$0xff] %vm703_vm1, %v719_v40 }
 0x45d   : > { %v1118_v49 = vpop.permute.xlu0 %1117 }
 0x45f   : > { %v717_v41 = vpop.permute.xlu1 %716  ;;  %v918_v45 = vld [vmem:[#allocation3] sm:$0xff] }
 0x460   : > { %723 = vst.msk [vmem:[#allocation2 + $0x10] sm:$0xff] %vm703_vm1, %v717_v41 }
 0x461   : > { %v919_v42 = vld [vmem:[#allocation3 + $0x8] sm:$0xff]  ;;  %v2642_v43 = vpop.eup %2641 }
 0x462   : > { %2413 = vmatprep.subr.mxu1 %v919_v42  ;;  %v1029_v48 = vmul.f32 %v2642_v43, %v2638_v32 }
 0x463   : > { %v2644_v44 = vpop.eup %2643  ;;  %2414 = vmatpush3.msra.mxu1 %v919_v42  ;;  %v1113_v47 = vld [vmem:[#allocation2 + $0x18] sm:$0xff]  ;;  %v1120_v51 = vpop.permute.xlu1 %1119 }
 0x464   : > { %2415 = vmatprep.subr.mxu1 %v918_v45  ;;  %v1028_v46 = vmul.f32 %v2644_v44, %v2640_v34 }
 0x465   : > { %2416 = vmatpush3.msra.mxu1 %v918_v45 }
 0x466   : > { %2417 = vmatprep.mubr.msk.f32.mxu1 %vm703_vm1, %v1028_v46  ;;  %2420 = vmatprep.subr.msk.mxu1 %vm703_vm1, %v1113_v47 }
 0x467   : > { %2418 = vmatmul.mubr.msk.f32.vlgmr.msra.gmra.mxu1 %vm703_vm1, %v1029_v48  ;;  %v1112_v50 = vld [vmem:[#allocation2 + $0x10] sm:$0xff] }
 0x468   : > { %2421 = vmatpush3.xpose.msk.msra.mxu1 %vm703_vm1, %v1113_v47  ;;  %2424 = vmatprep.mubr.msk.f32.mxu1 %vm703_vm1, %v1118_v49 }
 0x469   : > { %2422 = vmatprep.subr.msk.mxu1 %vm703_vm1, %v1112_v50 }
 0x46c   : > { %2423 = vmatpush3.xpose.msk.msra.mxu1 %vm703_vm1, %v1112_v50 }
 0x46f   : > { %2425 = vmatmul.mubr.msk.f32.vlgmr.msra.gmra.mxu1 %vm703_vm1, %v1120_v51 }
 0x527   : > { %v3222_v52 = vpop.f32.mrf.mxu1 }
 0x529   : > { %v3224_v53 = vpop.f32.mrf.mxu1 }
 0x52f   : > { %v2426_v54 = vpop.f32.mrf.mxu1 }
 0x530   : > { %v1209_v55 = vsel %vm703_vm1, %v2426_v54, -inf }
 0x531   : > { %1210 = vmax.xlane.f32.xlu1 %v1209_v55  ;;  %v1197_v56 = vpop.f32.mrf.mxu1 }
 0x532   : > { %v1206_v57 = vsel %vm703_vm1, %v1197_v56, -inf }
 0x533   : > { %1207 = vmax.xlane.f32.xlu0 %v1206_v57 }
 0x542   : > { %725 = vrot.lane.b32.xlu1 %v3179_v12, %s2854_s24 }
 0x546   : > { %736 = vrot.lane.b32.xlu1 %v3177_v10, %s2855_s18 }
 0x54a   : > { %734 = vrot.lane.b32.xlu1 %v3179_v12, %s2855_s18 }
 0x54e   : > { %1317 = vrot.lane.b32.xlu1 %v3194_v21, %s2855_s18 }
 0x5ba   : > { %v1211_v58 = vpop.xlane.xlu1 %1210 }
 0x5bb   : > { %v1213_v59 = vsub.f32 %v2426_v54, %v1211_v58 }
 0x5bc   : > { %v1208_v60 = vpop.xlane.xlu0 %1207 }
 0x5bd   : > { %v1216_v61 = vmul.f32 1.442695, %v1213_v59  ;;  %v1212_v62 = vsub.f32 %v1197_v56, %v1208_v60 }
 0x5be   : > { %v726_v63 = vpop.permute.xlu1 %725 }
 0x5bf   : > { %2645 = vpow2.f32 %v1216_v61  ;;  %v1214_v2 = vmul.f32 1.442695, %v1212_v62  ;;  %732 = vst.msk [vmem:[#allocation3 + $0x10] sm:$0xff] %vm703_vm1, %v726_v63 }
 0x5c1   : > { %2647 = vpow2.f32 %v1214_v2 }
 0x5c2   : > { %v737_v3 = vpop.permute.xlu1 %736 }
 0x5c3   : > { %742 = vst.msk [vmem:[#allocation2 + $0x28] sm:$0xff] %vm703_vm1, %v737_v3 }
 0x5c6   : > { %v735_v4 = vpop.permute.xlu1 %734  ;;  %v1115_v17 = vld [vmem:[#allocation3 + $0x10] sm:$0xff] }
 0x5c7   : > { %741 = vst.msk [vmem:[#allocation2 + $0x20] sm:$0xff] %vm703_vm1, %v735_v4 }
 0x5ca   : > { %v1311_v19 = vld [vmem:[#allocation2 + $0x28] sm:$0xff]  ;;  %v1318_v25 = vpop.permute.xlu1 %1317 }
 0x5cc   : > { %v2646_v5 = vpop.eup %2645 }
 0x5cd   : > { %v1221_v6 = vsel %vm703_vm1, %v2646_v5, 0.0 }
 0x5ce   : > { %v2648_v7 = vpop.eup %2647  ;;  %1222 = vadd.xlane.f32.xlu0 %v1221_v6  ;;  %v1310_v24 = vld [vmem:[#allocation2 + $0x20] sm:$0xff] }
 0x5cf   : > { %v1218_v8 = vsel %vm703_vm1, %v2648_v7, 0.0 }
 0x5d2   : > { %1219 = vadd.xlane.f32.xlu0 %v1218_v8 }
 0x5e8   : > { %727 = vrot.lane.b32.xlu0 %v3177_v10, %s2854_s24 }
 0x5ec   : > { %1315 = vrot.lane.b32.xlu0 %v3192_v20, %s2855_s18  ;;  %s3523_s18 = sld [smem:[#allocation26_spill]] }
 0x657   : > { %v1223_v9 = vpop.xlane.xlu0 %1222 }
 0x658   : > { %2649 = vrcp.f32 %v1223_v9 }
 0x65b   : > { %v1220_v11 = vpop.xlane.xlu0 %1219 }
 0x65c   : > { %2651 = vrcp.f32 %v1220_v11 }
 0x65f   : > { %v728_v13 = vpop.permute.xlu0 %727 }
 0x660   : > { %733 = vst.msk [vmem:[#allocation3 + $0x18] sm:$0xff] %vm703_vm1, %v728_v13 }
 0x663   : > { %v1316_v23 = vpop.permute.xlu0 %1315 }
 0x665   : > { %v2650_v15 = vpop.eup %2649 }
 0x666   : > { %v1227_v22 = vmul.f32 %v2650_v15, %v2646_v5 }
 0x667   : > { %v1116_v14 = vld [vmem:[#allocation3 + $0x18] sm:$0xff] }
 0x668   : > { %2427 = vmatprep.subr.mxu0 %v1116_v14 }
 0x669   : > { %v2652_v16 = vpop.eup %2651  ;;  %2428 = vmatpush3.msra.mxu0 %v1116_v14 }
 0x66a   : > { %2429 = vmatprep.subr.mxu0 %v1115_v17  ;;  %v1226_v18 = vmul.f32 %v2652_v16, %v2648_v7 }
 0x66b   : > { %2430 = vmatpush3.msra.mxu0 %v1115_v17 }
 0x66c   : > { %2431 = vmatprep.mubr.msk.f32.mxu0 %vm703_vm1, %v1226_v18  ;;  %2434 = vmatprep.subr.msk.mxu0 %vm703_vm1, %v1311_v19 }
 0x66d   : > { %2432 = vmatmul.mubr.msk.f32.vlgmr.msra.gmra.mxu0 %vm703_vm1, %v1227_v22 }
 0x66e   : > { %2435 = vmatpush3.xpose.msk.msra.mxu0 %vm703_vm1, %v1311_v19  ;;  %2438 = vmatprep.mubr.msk.f32.mxu0 %vm703_vm1, %v1316_v23 }
 0x66f   : > { %2436 = vmatprep.subr.msk.mxu0 %vm703_vm1, %v1310_v24 }
 0x672   : > { %2437 = vmatpush3.xpose.msk.msra.mxu0 %vm703_vm1, %v1310_v24 }
 0x675   : > { %2439 = vmatmul.mubr.msk.f32.vlgmr.msra.gmra.mxu0 %vm703_vm1, %v1318_v25  ;;  %v1743_v25 = vld [vmem:[%s3470_s7 + $0x30] sm:$0xff] }
 0x72d   : > { %v3250_v26 = vpop.f32.mrf.mxu0 }
 0x72f   : > { %v3252_v27 = vpop.f32.mrf.mxu0 }
 0x735   : > { %v2440_v28 = vpop.f32.mrf.mxu0 }
 0x736   : > { %v1407_v29 = vsel %vm703_vm1, %v2440_v28, -inf }
 0x737   : > { %1408 = vmax.xlane.f32.xlu1 %v1407_v29  ;;  %v1395_v30 = vpop.f32.mrf.mxu0  ;;  %v1739_v29 = vld [vmem:[%s3470_s7 + $0x10] sm:$0xff] }
 0x738   : > { %v1404_v31 = vsel %vm703_vm1, %v1395_v30, -inf }
 0x739   : > { %1405 = vmax.xlane.f32.xlu0 %v1404_v31  ;;  %v1737_v31 = vld [vmem:[%s3470_s7] sm:$0xff] }
 0x748   : > { %743 = vrot.lane.b32.xlu1 %v3179_v12, %s2856_s27 }
 0x74c   : > { %754 = vrot.lane.b32.xlu1 %v3177_v10, %s2857_s1 }
 0x750   : > { %752 = vrot.lane.b32.xlu1 %v3179_v12, %s2857_s1 }
 0x754   : > { %1515 = vrot.lane.b32.xlu1 %v3194_v21, %s2857_s1 }
 0x7c0   : > { %v1409_v32 = vpop.xlane.xlu1 %1408 }
 0x7c1   : > { %v1411_v33 = vsub.f32 %v2440_v28, %v1409_v32  ;;  %v1740_v28 = vld [vmem:[%s3470_s7 + $0x18] sm:$0xff] }
 0x7c2   : > { %v1406_v34 = vpop.xlane.xlu0 %1405 }
 0x7c3   : > { %v1414_v35 = vmul.f32 1.442695, %v1411_v33  ;;  %v1410_v36 = vsub.f32 %v1395_v30, %v1406_v34  ;;  %v1738_v30 = vld [vmem:[%s3470_s7 + $0x8] sm:$0xff] }
 0x7c4   : > { %v744_v37 = vpop.permute.xlu1 %743 }
 0x7c5   : > { %2653 = vpow2.f32 %v1414_v35  ;;  %v1412_v38 = vmul.f32 1.442695, %v1410_v36  ;;  %750 = vst.msk [vmem:[#allocation3 + $0x20] sm:$0xff] %vm703_vm1, %v744_v37 }
 0x7c7   : > { %2655 = vpow2.f32 %v1412_v38 }
 0x7c8   : > { %v755_v39 = vpop.permute.xlu1 %754 }
 0x7c9   : > { %760 = vst.msk [vmem:[#allocation2 + $0x38] sm:$0xff] %vm703_vm1, %v755_v39 }
 0x7cc   : > { %v753_v40 = vpop.permute.xlu1 %752  ;;  %v1313_v50 = vld [vmem:[#allocation3 + $0x20] sm:$0xff] }
 0x7cd   : > { %759 = vst.msk [vmem:[#allocation2 + $0x30] sm:$0xff] %vm703_vm1, %v753_v40 }
 0x7d0   : > { %v1509_v54 = vld [vmem:[#allocation2 + $0x38] sm:$0xff]  ;;  %v1516_v57 = vpop.permute.xlu1 %1515 }
 0x7d2   : > { %v2654_v41 = vpop.eup %2653 }
 0x7d3   : > { %v1419_v21 = vsel %vm703_vm1, %v2654_v41, 0.0 }
 0x7d4   : > { %v2656_v42 = vpop.eup %2655  ;;  %1420 = vadd.xlane.f32.xlu0 %v1419_v21  ;;  %v1508_v56 = vld [vmem:[#allocation2 + $0x30] sm:$0xff] }
 0x7d5   : > { %v1416_v43 = vsel %vm703_vm1, %v2656_v42, 0.0 }
 0x7d8   : > { %1417 = vadd.xlane.f32.xlu0 %v1416_v43 }
 0x7ee   : > { %745 = vrot.lane.b32.xlu0 %v3177_v10, %s2856_s27 }
 0x7f2   : > { %1513 = vrot.lane.b32.xlu0 %v3192_v20, %s2857_s1  ;;  %s2761_s1 = scalar_lea.vmem %s3412_s16, 256 }
 0x7f3   : > { %p2762_p3 = scmp.ne.s32.totalorder %s3412_s16, %s2761_s1 }
 0x7f5   : > { %p2763_p8 = pnand %p2762_p3, %p3530_p7 }
 0x7f7   : > { %p2764_p9 = pneg %p2763_p8 }
 0x85d   : > { %v1421_v44 = vpop.xlane.xlu0 %1420 }
 0x85e   : > { %2657 = vrcp.f32 %v1421_v44 }
 0x861   : > { %v1418_v45 = vpop.xlane.xlu0 %1417 }
 0x862   : > { %2659 = vrcp.f32 %v1418_v45  ;;  %v2260_v45 = vld [vmem:[%s3520_s29] ss:$0 sm:$0xff] }
 0x865   : > { %v746_v46 = vpop.permute.xlu0 %745 }
 0x866   : > { %751 = vst.msk [vmem:[#allocation3 + $0x28] sm:$0xff] %vm703_vm1, %v746_v46 }
 0x869   : > { %v1514_v20 = vpop.permute.xlu0 %1513 }
 0x86b   : > { %v2658_v48 = vpop.eup %2657 }
 0x86c   : > { %v1425_v55 = vmul.f32 %v2658_v48, %v2654_v41 }
 0x86d   : > { %v1314_v47 = vld [vmem:[#allocation3 + $0x28] sm:$0xff] }
 0x86e   : > { %2441 = vmatprep.subr.mxu1 %v1314_v47 }
 0x86f   : > { %v2660_v49 = vpop.eup %2659  ;;  %2442 = vmatpush3.msra.mxu1 %v1314_v47 }
 0x870   : > { %2443 = vmatprep.subr.mxu1 %v1313_v50  ;;  %v1424_v51 = vmul.f32 %v2660_v49, %v2656_v42 }
 0x871   : > { %2444 = vmatpush3.msra.mxu1 %v1313_v50 }
 0x872   : > { %2445 = vmatprep.mubr.msk.f32.mxu1 %vm703_vm1, %v1424_v51  ;;  %2448 = vmatprep.subr.msk.mxu1 %vm703_vm1, %v1509_v54 }
 0x873   : > { %2446 = vmatmul.mubr.msk.f32.vlgmr.msra.gmra.mxu1 %vm703_vm1, %v1425_v55 }
 0x874   : > { %2449 = vmatpush3.xpose.msk.msra.mxu1 %vm703_vm1, %v1509_v54  ;;  %2452 = vmatprep.mubr.msk.f32.mxu1 %vm703_vm1, %v1514_v20 }
 0x875   : > { %2450 = vmatprep.subr.msk.mxu1 %vm703_vm1, %v1508_v56 }
 0x878   : > { %2451 = vmatpush3.xpose.msk.msra.mxu1 %vm703_vm1, %v1508_v56 }
 0x87b   : > { %2453 = vmatmul.mubr.msk.f32.vlgmr.msra.gmra.mxu1 %vm703_vm1, %v1516_v57 }
 0x933   : > { %v2447_v58 = vpop.f32.mrf.mxu1 }
 0x935   : > { %v1498_v59 = vpop.f32.mrf.mxu1 }
 0x93b   : > { %v2454_v60 = vpop.f32.mrf.mxu1 }
 0x93c   : > { %v1605_v61 = vsel %vm703_vm1, %v2454_v60, -inf }
 0x93d   : > { %1606 = vmax.xlane.f32.xlu1 %v1605_v61  ;;  %v1593_v62 = vpop.f32.mrf.mxu1  ;;  %v1886_v61 = vld [vmem:[#allocation11 + $0x38] sm:$0xff] }
 0x93e   : > { %v1602_v63 = vsel %vm703_vm1, %v1593_v62, -inf  ;;  %2481 = vmatprep.subr.mxu1 %v1886_v61 }
 0x93f   : > { %1603 = vmax.xlane.f32.xlu0 %v1602_v63  ;;  %2482 = vmatpush3.msra.mxu1 %v1886_v61  ;;  %v1884_v63 = vld [vmem:[#allocation11 + $0x28] sm:$0xff] }
 0x94e   : > { %761 = vrot.lane.b32.xlu1 %v3179_v12, %s2858_s21 }
 0x952   : > { %1707 = vrot.lane.b32.xlu1 %v3252_v27, %s2858_s21  ;;  %v1741_v27 = vld [vmem:[%s3470_s7 + $0x20] sm:$0xff] }
 0x956   : > { %1709 = vrot.lane.b32.xlu1 %v3250_v26, %s2858_s21  ;;  %v1742_v26 = vld [vmem:[%s3470_s7 + $0x28] sm:$0xff] }
 0x95a   : > { %1717 = vrot.lane.b32.xlu1 %v2447_v58, %s2856_s27 }
 0x9c6   : > { %v1607_v2 = vpop.xlane.xlu1 %1606 }
 0x9c7   : > { %v1609_v3 = vsub.f32 %v2454_v60, %v1607_v2  ;;  %v1883_v2 = vld [vmem:[#allocation11 + $0x20] sm:$0xff] }
 0x9c8   : > { %v1604_v4 = vpop.xlane.xlu0 %1603 }
 0x9c9   : > { %v1612_v5 = vmul.f32 1.442695, %v1609_v3  ;;  %v1608_v6 = vsub.f32 %v1593_v62, %v1604_v4  ;;  %v1885_v62 = vld [vmem:[#allocation11 + $0x30] sm:$0xff]  ;;  %v1882_v3 = vld [vmem:[#allocation11 + $0x18] sm:$0xff] }
 0x9ca   : > { %v762_v7 = vpop.permute.xlu1 %761  ;;  %2483 = vmatprep.subr.mxu1 %v1885_v62  ;;  %v1881_v4 = vld [vmem:[#allocation11 + $0x10] sm:$0xff] }
 0x9cb   : > { %2661 = vpow2.f32 %v1612_v5  ;;  %v1610_v8 = vmul.f32 1.442695, %v1608_v6  ;;  %768 = vst.msk [vmem:[#allocation3 + $0x30] sm:$0xff] %vm703_vm1, %v762_v7  ;;  %2484 = vmatpush3.msra.mxu1 %v1885_v62  ;;  %v1880_v5 = vld [vmem:[#allocation11 + $0x8] sm:$0xff]  ;;  %v1879_v6 = vld [vmem:[#allocation11] sm:$0xff] }
 0x9cc   : > { %2485 = vmatprep.subr.mxu1 %v1884_v63 }
 0x9cd   : > { %2663 = vpow2.f32 %v1610_v8  ;;  %2486 = vmatpush3.msra.mxu1 %v1884_v63 }
 0x9ce   : > { %v1708_v34 = vpop.permute.xlu1 %1707  ;;  %2487 = vmatprep.subr.mxu1 %v1883_v2 }
 0x9cf   : > { %v1729_v38 = vsel %vm703_vm1, %v3224_v53, %v1708_v34  ;;  %2488 = vmatpush3.msra.mxu1 %v1883_v2 }
 0x9d0   : > { %2489 = vmatprep.subr.mxu1 %v1882_v3 }
 0x9d1   : > { %2490 = vmatpush3.msra.mxu1 %v1882_v3 }
 0x9d2   : > { %v1511_v22 = vld [vmem:[#allocation3 + $0x30] sm:$0xff]  ;;  %v1710_v35 = vpop.permute.xlu1 %1709  ;;  %2491 = vmatprep.subr.mxu1 %v1881_v4 }
 0x9d3   : > { %v1730_v40 = vsel %vm703_vm1, %v3222_v52, %v1710_v35  ;;  %2492 = vmatpush3.msra.mxu1 %v1881_v4 }
 0x9d4   : > { %2493 = vmatprep.subr.mxu1 %v1880_v5 }
 0x9d5   : > { %2494 = vmatpush3.msra.mxu1 %v1880_v5 }
 0x9d6   : > { %v1718_v36 = vpop.permute.xlu1 %1717  ;;  %2495 = vmatprep.subr.mxu1 %v1879_v6 }
 0x9d7   : > { %v1733_v42 = vsel %vm1731_vm2, %v1730_v40, %v1718_v36  ;;  %2496 = vmatpush3.msra.mxu1 %v1879_v6 }
 0x9d8   : > { %v2662_v9 = vpop.eup %2661 }
 0x9d9   : > { %v1617_v12 = vsel %vm703_vm1, %v2662_v9, 0.0 }
 0x9da   : > { %v2664_v11 = vpop.eup %2663  ;;  %1618 = vadd.xlane.f32.xlu0 %v1617_v12 }
 0x9db   : > { %v1614_v13 = vsel %vm703_vm1, %v2664_v11, 0.0 }
 0x9de   : > { %1615 = vadd.xlane.f32.xlu0 %v1614_v13 }
 0x9f4   : > { %763 = vrot.lane.b32.xlu0 %v3177_v10, %s2858_s21  ;;  %v1744_v10 = vld [vmem:[%s3470_s7 + $0x38] sm:$0xff]  ;;  %s2859_s21 = smov [#allocation12]  }
 0x9f8   : > { %1715 = vrot.lane.b32.xlu0 %v1498_v59, %s2856_s27  ;;  %s3524_s27 = smov %s3523_s18 }
 0x9f9   : > { %v1997_v34 = vld [vmem:[%s3524_s27 + $0x30] sm:$0xff]  ;;  %v1996_v35 = vld [vmem:[%s3524_s27 + $0x28] sm:$0xff]  ;;  %v1995_v36 = vld [vmem:[%s3524_s27 + $0x20] sm:$0xff] }
 0x9fa   : > { %v1991_v40 = vld [vmem:[%s3524_s27] sm:$0xff] }
 0xa63   : > { %v1619_v14 = vpop.xlane.xlu0 %1618 }
 0xa64   : > { %2665 = vrcp.f32 %v1619_v14 }
 0xa67   : > { %v1616_v15 = vpop.xlane.xlu0 %1615 }
 0xa68   : > { %2667 = vrcp.f32 %v1616_v15  ;;  %v2263_v15 = vld [vmem:[%s3521_s26] ss:$0 sm:$0xff] }
 0xa6b   : > { %v764_v16 = vpop.permute.xlu0 %763 }
 0xa6c   : > { %769 = vst.msk [vmem:[#allocation3 + $0x38] sm:$0xff] %vm703_vm1, %v764_v16 }
 0xa6f   : > { %v1716_v37 = vpop.permute.xlu0 %1715 }
 0xa70   : > { %v1732_v41 = vsel %vm1731_vm2, %v1729_v38, %v1716_v37  ;;  %v1994_v37 = vld [vmem:[%s3524_s27 + $0x18] sm:$0xff]  ;;  %v1993_v38 = vld [vmem:[%s3524_s27 + $0x10] sm:$0xff] }
 0xa71   : > { %v2666_v18 = vpop.eup %2665 }
 0xa72   : > { %v1623_v24 = vmul.f32 %v2666_v18, %v2662_v9 }
 0xa73   : > { %v1512_v17 = vld [vmem:[#allocation3 + $0x38] sm:$0xff] }
 0xa74   : > { %2455 = vmatprep.subr.mxu0 %v1512_v17 }
 0xa75   : > { %v2668_v19 = vpop.eup %2667  ;;  %2456 = vmatpush3.msra.mxu0 %v1512_v17  ;;  %v2264_v17 = vld [vmem:[%s3522_s17] ss:$0 sm:$0xff] }
 0xa76   : > { %2457 = vmatprep.subr.mxu0 %v1511_v22  ;;  %v1622_v23 = vmul.f32 %v2668_v19, %v2664_v11 }
 0xa77   : > { %2458 = vmatpush3.msra.mxu0 %v1511_v22 }
 0xa78   : > { %2459 = vmatprep.mubr.msk.f32.mxu0 %vm703_vm1, %v1622_v23  ;;  %2462 = vmatprep.subr.mxu0 %v1744_v10 }
 0xa79   : > { %2460 = vmatmul.mubr.msk.f32.vlgmr.msra.gmra.mxu0 %vm703_vm1, %v1623_v24 }
 0xa7a   : > { %2463 = vmatpush3.msra.mxu0 %v1744_v10 }
 0xa7b   : > { %2464 = vmatprep.subr.mxu0 %v1743_v25 }
 0xa7c   : > { %2465 = vmatpush3.msra.mxu0 %v1743_v25  ;;  %v2006_v25 = vld [vmem:[%s3523_s18 + $0x78] sm:$0xff] }
 0xa7d   : > { %2466 = vmatprep.subr.mxu0 %v1742_v26 }
 0xa7e   : > { %2467 = vmatpush3.msra.mxu0 %v1742_v26  ;;  %v2005_v26 = vld [vmem:[%s3524_s27 + $0x70] sm:$0xff] }
 0xa7f   : > { %2468 = vmatprep.subr.mxu0 %v1741_v27 }
 0xa80   : > { %2469 = vmatpush3.msra.mxu0 %v1741_v27  ;;  %v2004_v27 = vld [vmem:[%s3524_s27 + $0x68] sm:$0xff] }
 0xa81   : > { %2470 = vmatprep.subr.mxu0 %v1740_v28 }
 0xa82   : > { %2471 = vmatpush3.msra.mxu0 %v1740_v28  ;;  %v2003_v28 = vld [vmem:[%s3524_s27 + $0x60] sm:$0xff] }
 0xa83   : > { %2472 = vmatprep.subr.mxu0 %v1739_v29 }
 0xa84   : > { %2473 = vmatpush3.msra.mxu0 %v1739_v29  ;;  %v2002_v29 = vld [vmem:[%s3524_s27 + $0x58] sm:$0xff] }
 0xa85   : > { %2474 = vmatprep.subr.mxu0 %v1738_v30 }
 0xa86   : > { %2475 = vmatpush3.msra.mxu0 %v1738_v30  ;;  %v2001_v30 = vld [vmem:[%s3524_s27 + $0x50] sm:$0xff] }
 0xa87   : > { %2476 = vmatprep.subr.mxu0 %v1737_v31 }
 0xa88   : > { %2477 = vmatpush3.msra.mxu0 %v1737_v31  ;;  %v2000_v31 = vld [vmem:[%s3524_s27 + $0x48] sm:$0xff] }
 0xa89   : > { %2500 = vmatprep.subr.mxu0 %v2006_v25 }
 0xb39   : > { %v2461_v32 = vpop.f32.mrf.mxu0 }
 0xb3a   : > { %1725 = vrot.lane.b32.xlu1 %v2461_v32, %s2854_s24  ;;  %v1999_v32 = vld [vmem:[%s3524_s27 + $0x40] sm:$0xff] }
 0xb3b   : > { %v1696_v33 = vpop.f32.mrf.mxu0 }
 0xb3c   : > { %1723 = vrot.lane.b32.xlu0 %v1696_v33, %s2854_s24  ;;  %v1998_v33 = vld [vmem:[%s3524_s27 + $0x38] sm:$0xff]  ;;  %s3526_s24 = sld [smem:[#allocation17_spill]] }
 0xb42   : > { %s2277_s26 = sshll.u32 %s3526_s24, 8 }
 0xb43   : > { %s3410_s18 = scalar_lea.hbm %s3529_s15, %s2277_s26 }
 0xbac   : > { %v1726_v39 = vpop.permute.xlu1 %1725 }
 0xbad   : > { %v1736_v44 = vsel %vm1734_vm3, %v1733_v42, %v1726_v39  ;;  %v1992_v39 = vld [vmem:[%s3524_s27 + $0x8] sm:$0xff] }
 0xbae   : > { %v1724_v21 = vpop.permute.xlu0 %1723 }
 0xbaf   : > { %v1735_v43 = vsel %vm1734_vm3, %v1732_v41, %v1724_v21  ;;  %v2265_v41 = vld [vmem:[%s3525_s10] ss:$0 sm:$0xff]  ;;  %s2765_s10 = sshll.u32 %s2859_s21, 4  ;;  %s2766_s10 = int_to_ptr.vmem [resolvable:$false] %s2765_s10 }
 0xbb0   : > { %2478 = vmatprep.mubr.msk.f32.mxu0 %vm561_vm0, %v1735_v43  ;;  %s2767_s24 = scalar_lea.vmem %s2766_s10, 512  ;;  %p2768_p12 = scmp.lt.s32.totalorder %s3412_s16, %s2766_s10 }
 0xbb1   : > { %2479 = vmatmul.mubr.msk.f32.vlgmr.msra.gmra.mxu0 %vm561_vm0, %v1736_v44  ;;  %p2769_p13 = scmp.lt.s32.totalorder %s2767_s24, %s2761_s1 }
 0xbb2   : > { %2501 = vmatpush3.msra.mxu0 %v2006_v25 }
 0xbb3   : > { %2502 = vmatprep.subr.mxu0 %v2005_v26  ;;  %p2770_p4 = por %p2769_p13, %p2768_p12 }
 0xbb4   : > { %2503 = vmatpush3.msra.mxu0 %v2005_v26 }
 0xbb5   : > { %2504 = vmatprep.subr.mxu0 %v2004_v27  ;;  %p2771_p2 = pnand %p2770_p4, %p2764_p9 }
 0xbb6   : > { %2505 = vmatpush3.msra.mxu0 %v2004_v27 }
 0xbb7   : > { %2506 = vmatprep.subr.mxu0 %v2003_v28 }
 0xbb8   : > { %2507 = vmatpush3.msra.mxu0 %v2003_v28 }
 0xbb9   : > { %2508 = vmatprep.subr.mxu0 %v2002_v29 }
 0xbba   : > { %2509 = vmatpush3.msra.mxu0 %v2002_v29 }
 0xbbb   : > { %2510 = vmatprep.subr.mxu0 %v2001_v30 }
 0xbbc   : > { %2511 = vmatpush3.msra.mxu0 %v2001_v30 }
 0xbbd   : > { %2512 = vmatprep.subr.mxu0 %v2000_v31 }
 0xbbe   : > { %2513 = vmatpush3.msra.mxu0 %v2000_v31 }
 0xbbf   : > { %2514 = vmatprep.subr.mxu0 %v1999_v32 }
 0xbc0   : > { %2515 = vmatpush3.msra.mxu0 %v1999_v32 }
 0xbc1   : > { %2516 = vmatprep.subr.mxu0 %v1998_v33 }
 0xbc2   : > { %2517 = vmatpush3.msra.mxu0 %v1998_v33 }
 0xbc3   : > { %2518 = vmatprep.subr.mxu0 %v1997_v34 }
 0xbc4   : > { %2519 = vmatpush3.msra.mxu0 %v1997_v34 }
 0xbc5   : > { %2520 = vmatprep.subr.mxu0 %v1996_v35 }
 0xbc6   : > { %2521 = vmatpush3.msra.mxu0 %v1996_v35 }
 0xbc7   : > { %2522 = vmatprep.subr.mxu0 %v1995_v36 }
 0xbc8   : > { %2523 = vmatpush3.msra.mxu0 %v1995_v36 }
 0xbc9   : > { %2524 = vmatprep.subr.mxu0 %v1994_v37 }
 0xbca   : > { %2525 = vmatpush3.msra.mxu0 %v1994_v37 }
 0xbcb   : > { %2526 = vmatprep.subr.mxu0 %v1993_v38 }
 0xbcc   : > { %2527 = vmatpush3.msra.mxu0 %v1993_v38 }
 0xbcd   : > { %2528 = vmatprep.subr.mxu0 %v1992_v39 }
 0xbce   : > { %2529 = vmatpush3.msra.mxu0 %v1992_v39 }
 0xbcf   : > { %2530 = vmatprep.subr.mxu0 %v1991_v40 }
 0xbd0   : > { %2531 = vmatpush3.msra.mxu0 %v1991_v40 }
 0xc71   : > { %v2480_v46 = vpop.f32.mrf.mxu0 }
 0xc72   : > { %v1830_v53 = vadd.f32 %v2480_v46, %v2260_v45 }
 0xc73   : > { %v1824_v47 = vpop.f32.mrf.mxu0 }
 0xc74   : > { %v3328_v48 = vadd.f32 %v1830_v53, %v3090_v1  ;;  %v1825_v52 = vadd.f32 %v2260_v45, %v1824_v47 }
 0xc76   : > { %v3331_v49 = vadd.f32 %v1825_v52, %v3088_v0  ;;  %v1838_v50 = vsel %vm561_vm0, %v3328_v48, 0.0 }
 0xc77   : > { %1839 = vadd.xlane.f32.xlu1 %v1838_v50 }
 0xc78   : > { %v1835_v51 = vsel %vm561_vm0, %v3331_v49, 0.0 }
 0xc79   : > { %1836 = vadd.xlane.f32.xlu0 %v1835_v51 }
 0xd00   : > { %v1840_v54 = vpop.xlane.xlu1 %1839 }
 0xd01   : > { %v1842_v55 = vmul.f32 0.015625, %v1840_v54 }
 0xd02   : > { %v1837_v20 = vpop.xlane.xlu0 %1836 }
 0xd03   : > { %v1841_v56 = vmul.f32 0.015625, %v1837_v20  ;;  %v1844_v57 = vsub.f32 %v3328_v48, %v1842_v55 }
 0xd05   : > { %v1843_v1 = vsub.f32 %v3331_v49, %v1841_v56  ;;  %v1846_v59 = vmul.f32 %v1844_v57, %v1844_v57 }
 0xd07   : > { %v1845_v58 = vmul.f32 %v1843_v1, %v1843_v1  ;;  %v1850_v60 = vsel %vm561_vm0, %v1846_v59, 0.0 }
 0xd09   : > { %v1847_v0 = vsel %vm561_vm0, %v1845_v58, 0.0 }
 0xd0a   : > { %1848 = vadd.xlane.f32.xlu0 %v1847_v0 }
 0xd0e   : > { %1851 = vadd.xlane.f32.xlu0 %v1850_v60 }
 0xd93   : > { %v1849_v7 = vpop.xlane.xlu0 %1848 }
 0xd94   : > { %v1853_v8 = vmul.f32 0.015625, %v1849_v7 }
 0xd96   : > { %v1855_v9 = vadd.f32 1e-05, %v1853_v8 }
 0xd97   : > { %v1852_v12 = vpop.xlane.xlu0 %1851 }
 0xd98   : > { %2669 = vrsqrt.f32 %v1855_v9  ;;  %v1854_v11 = vmul.f32 0.015625, %v1852_v12 }
 0xd9a   : > { %v1856_v13 = vadd.f32 1e-05, %v1854_v11 }
 0xd9c   : > { %2671 = vrsqrt.f32 %v1856_v13 }
 0xda5   : > { %v2670_v14 = vpop.eup %2669 }
 0xda6   : > { %v1859_v16 = vmul.f32 %v2670_v14, %v1843_v1  ;;  %v2270_v1 = vld [vmem:[%s3527_s9] ss:$0 sm:$0xff] }
 0xda8   : > { %v1868_v18 = vmul.f32 %v2263_v15, %v1859_v16 }
 0xda9   : > { %v2672_v19 = vpop.eup %2671 }
 0xdaa   : > { %v1860_v22 = vmul.f32 %v2672_v19, %v1844_v57  ;;  %v1877_v23 = vadd.f32 %v2264_v17, %v1868_v18 }
 0xdac   : > { %v1869_v24 = vmul.f32 %v2263_v15, %v1860_v22  ;;  %2497 = vmatprep.mubr.msk.f32.mxu1 %vm561_vm0, %v1877_v23 }
 0xdae   : > { %v1878_v10 = vadd.f32 %v2264_v17, %v1869_v24 }
 0xdb0   : > { %2498 = vmatmul.mubr.msk.f32.vlgmr.msra.gmra.mxu1 %vm561_vm0, %v1878_v10 }
 0xe70   : > { %v2499_v21 = vpop.f32.mrf.mxu1 }
 0xe71   : > { %v1972_v42 = vadd.f32 %v2499_v21, %v2265_v41 }
 0xe72   : > { %v1966_v43 = vpop.f32.mrf.mxu1 }
 0xe73   : > { %v2269_v44 = vmul.f32 -1.702, %v1972_v42  ;;  %v1967_v45 = vadd.f32 %v2265_v41, %v1966_v43 }
 0xe75   : > { %v1981_v46 = vmul.f32 1.442695, %v2269_v44  ;;  %v2268_v53 = vmul.f32 -1.702, %v1967_v45 }
 0xe77   : > { %2673 = vpow2.f32 %v1981_v46  ;;  %v1979_v47 = vmul.f32 1.442695, %v2268_v53 }
 0xe79   : > { %2675 = vpow2.f32 %v1979_v47 }
 0xe84   : > { %v2674_v52 = vpop.eup %2673 }
 0xe85   : > { %v1984_v50 = vadd.f32 1.0, %v2674_v52 }
 0xe86   : > { %v2676_v51 = vpop.eup %2675 }
 0xe87   : > { %v1983_v54 = vadd.f32 1.0, %v2676_v51  ;;  %2677 = vrcp.f32 %v1984_v50 }
 0xe89   : > { %2679 = vrcp.f32 %v1983_v54 }
 0xe94   : > { %v2678_v55 = vpop.eup %2677 }
 0xe95   : > { %v1990_v57 = vmul.f32 %v2678_v55, %v1972_v42 }
 0xe96   : > { %v2680_v20 = vpop.eup %2679 }
 0xe97   : > { %v1989_v56 = vmul.f32 %v2680_v20, %v1967_v45 }
 0xe99   : > { %2532 = vmatprep.mubr.f32.mxu0 %v1989_v56 }
 0xe9a   : > { %2533 = vmatmul.mubr.f32.vlgmr.msra.gmra.mxu0 %v1990_v57 }
 0xf5a   : > { %v2534_v58 = vpop.f32.mrf.mxu0 }
 0xf5b   : > { %v2086_v0 = vadd.f32 %v2534_v58, %v2270_v1 }
 0xf5c   : > { %v2080_v59 = vpop.f32.mrf.mxu0 }
 0xf5d   : > { %v2090_v60 = vadd.f32 %v2086_v0, %v3328_v48  ;;  %v2081_v61 = vadd.f32 %v2270_v1, %v2080_v59 }
 0xf5f   : > { %2092 = vst.msk [vmem:[%s553_s28 + $0x8] sm:$0xff] %vm561_vm0, %v2090_v60  ;;  %v2089_v62 = vadd.f32 %v2081_v61, %v3331_v49 }
 0xf61   : > { %2091 = vst.msk [vmem:[%s553_s28] sm:$0xff] %vm561_vm0, %v2089_v62 }
 0xf62   : > { %2774 = shalt.err (!%p2771_p2)
}
 0xf63   : > { %s2775_s25 = scalar_lea.hbm %s3410_s18, 256  ;;  %s2779_s26 = scalar_lea.hbm %s3529_s15, 512 }
 0xf64   : > { %p2776_p6 = scmp.ne.s32.totalorder %s3410_s18, %s2775_s25  ;;  %p2780_p0 = scmp.lt.s32.totalorder %s3410_s18, %s3529_s15 }
 0xf65   : > { %p2781_p10 = scmp.lt.s32.totalorder %s2779_s26, %s2775_s25 }
 0xf66   : > { %p2777_p11 = pnand %p2776_p6, %p3530_p7 }
 0xf67   : > { %p2782_p5 = por %p2781_p10, %p2780_p0 }
 0xf68   : > { %p2778_p1 = pneg %p2777_p11 }
 0xf6a   : > { %p2783_p3 = pnand %p2782_p5, %p2778_p1 }
 0xf6c   : > { %2786 = shalt.err (!%p2783_p3)
}
 0xf6d   : > { %s2860_s23 = smov 128   ;;  %s2861_s1 = smov 8  }
 0xf6e   : > { %2545 = dma.vmem_to_hbm [thread:$0]  (%p3530_p7), %s3412_s16, 256, %s3410_s18, %s2094_s14, %s2860_s23, %s2860_s23, %s2861_s1  }
 0xf6f PF: > { %s3531_s21 = sld [smem:[#allocation16_spill]] }
 0xf70   : > { %s3532_s10 = sld [smem:[#allocation20_spill]] }
 0xf71   : > { %s3533_s24 = sld [smem:[#allocation18_spill]] }
 0xf75   : > { %s2124_s29 = sand.u32 1, %s3531_s21  }
 0xf76   : > { %p3534_p8 = scmp.ne.s32.totalorder %s3532_s10, 0  ;;  %s2125_s25 = scalar_lea.sflag [#allocation8], %s2124_s29 }
 0xf77   : > { %p3535_p9 = scmp.ge.s32.totalorder %s3533_s24, 2 }
 0xf79   : > { %p2559_p12 = pnand %p3535_p9, %p3534_p8 }
 0xf7b   : > { %p2560_p13 = pneg %p2559_p12 }
 0xf7d   : > { %2820 = dma.done.wait (%p2560_p13), %s2125_s25, 256  }
 0xf7e   : > { %2822 = vsyncadd (%p2560_p13), %s2125_s25, 4294967040  ;;  %s32_s23 = sadd.s32 1, %s3533_s24   ;;  %s3536_s18 = smov %s2829_s19 }
 0xf7f   : > { %p29_p4 = scmp.ge.s32.totalorder %s32_s23, 4   ;;  %s3537_s19 = smov %s2833_s20 }
 0xf80   : > { %s3538_s20 = smov %s3069_s8  ;;  %s3539_s21 = smov %s2841_s22 }
 0xf81   : > { %s3540_s22 = smov %s3542_s30  ;;  %31 = sbr.rel (!%p29_p4) target bundleno = 16 (0x10), region = 149 }
 0xf86   :  { %2130 = vsyncpa [#allocation7], 1 }
 0xf87   :  { %2132 = vsyncpa [#allocation7 + $0x1], 1 }
 0xf88   :  { %2133 = vsyncpa [#allocation10], 1 }
 0xf89   :  { %2134 = vsyncpa [#allocation8], 1 }
 0xf8a   :  { %2136 = vsyncpa [#allocation8 + $0x1], 1 }

</bundles_post_ra>
